<compile_context>
chip_gen: v6e
topology: v6e:2x2x1
jax: 0.10.0
libtpu: 0.0.40
codegen_flags: <defaults>
</compile_context>

<pallas_src>
import functools
import math
import numpy as np

import jax
import jax.numpy as jnp
from jax.experimental import pallas as pl
from jax.experimental.pallas import tpu as pltpu

_TWO_PI = 2.0 * math.pi
_LANE = 128


def _round_up(x, m):
    return -(-x // m) * m


# ---------------------------------------------------------------------------
# Pallas kernels
# ---------------------------------------------------------------------------

def _matmul_kernel(a_ref, b_ref, o_ref):
    o_ref[...] = jnp.dot(a_ref[...], b_ref[...],
                         preferred_element_type=jnp.float32)


def _pv_kernel(ph_ref, mag_ref, p0_ref, tri_ref, re_ref, im_ref, acc_ref, *, chunk):
    """Phase-vocoder accumulate + synthesize for one (freq-block, batch, chunk) tile.

    Grid = (F//128, B, n_chunks); the chunk axis is innermost/"arbitrary" so the
    per-(freq-block, batch) running phase carried in acc_ref is valid; it is
    re-seeded from the initial phase at c == 0.
    """
    c = pl.program_id(2)

    @pl.when(c == 0)
    def _():
        acc_ref[...] = p0_ref[0]                       # (1, 128) initial phase

    ph = ph_ref[0]                                     # (chunk, 128) increments
    # Exclusive prefix-sum along the frame (sublane) axis as a strictly-lower-
    # triangular matmul (MXU slot).  The 0/1 matrix is a hoisted constant input;
    # f32 matmul keeps phase precision (values can reach ~pi*hop per frame).
    prefix = jnp.dot(tri_ref[...], ph, preferred_element_type=jnp.float32)
    cur = acc_ref[...]                                 # (1, 128) carry-in
    phase = cur + prefix                               # (chunk, 128) accum. phase
    mag = mag_ref[0]
    re_ref[0] = (mag * jnp.cos(phase)).astype(re_ref.dtype)
    im_ref[0] = (mag * jnp.sin(phase)).astype(im_ref.dtype)
    # carry-out = carry-in + sum of all increments (last exclusive prefix + last ph)
    acc_ref[...] = cur + prefix[chunk - 1:chunk, :] + ph[chunk - 1:chunk, :]


def _istft_kernel(re_ref, im_ref, nyq_ref, bc_ref, bs_ref, wn_ref, o_ref):
    # ywin = Re @ basis_cos + Im @ basis_sin + nyq * w_nyq   (no concatenate pass)
    acc = jnp.dot(re_ref[...], bc_ref[...], preferred_element_type=jnp.float32)
    acc = acc + jnp.dot(im_ref[...], bs_ref[...], preferred_element_type=jnp.float32)
    o_ref[...] = acc + nyq_ref[...] * wn_ref[...]


# ---------------------------------------------------------------------------
# Pallas wrappers
# ---------------------------------------------------------------------------

def _pad2(x, m0, m1):
    p0 = (-x.shape[0]) % m0
    p1 = (-x.shape[1]) % m1
    if p0 or p1:
        x = jnp.pad(x, ((0, p0), (0, p1)))
    return x


def pallas_matmul(a, b, tile_m=512, tile_n=1024):
    """(M,K)@(K,N): operands cast to bf16, f32 accumulation on the MXU.

    Tiles keep per-step VMEM (double-buffered bf16 tiles + f32 out tile) well
    inside v5e's 16 MiB default scoped limit and v7x's 64 MiB physical VMEM.
    NOTE: bf16 operands trade ~0.4% relative precision for MXU throughput; the
    reference torch path is f32.
    """
    M, K = a.shape
    K2, N = b.shape
    assert K == K2
    a_p = _pad2(a.astype(jnp.bfloat16), 16, 128)
    b_p = _pad2(b.astype(jnp.bfloat16), 128, 128)
    Mp, Kp = a_p.shape
    _, Np = b_p.shape
    tm = min(tile_m, Mp)
    tn = min(tile_n, Np)
    if Mp % tm:
        a_p = jnp.pad(a_p, ((0, tm - Mp % tm), (0, 0)))
        Mp = a_p.shape[0]
    if Np % tn:
        b_p = jnp.pad(b_p, ((0, 0), (0, tn - Np % tn)))
        Np = b_p.shape[1]
    out = pl.pallas_call(
        _matmul_kernel,
        grid=(Mp // tm, Np // tn),
        in_specs=[pl.BlockSpec((tm, Kp), lambda i, j: (i, 0)),
                  pl.BlockSpec((Kp, tn), lambda i, j: (0, j))],
        out_specs=pl.BlockSpec((tm, tn), lambda i, j: (i, j)),
        out_shape=jax.ShapeDtypeStruct((Mp, Np), jnp.float32),
        compiler_params=pltpu.CompilerParams(
            dimension_semantics=("parallel", "parallel")),
    )(a_p, b_p)
    return out[:M, :N]


# ---------------------------------------------------------------------------
# Pitch-shift pipeline (glue in plain JAX / numpy, hot paths in Pallas)
# ---------------------------------------------------------------------------

def _hann_window(win_length):
    n = np.arange(win_length)
    return (0.5 - 0.5 * np.cos(2.0 * np.pi * n / win_length)).astype(np.float32)


def _full_window(win_length, n_fft):
    w = _hann_window(win_length)
    if win_length < n_fft:
        lp = (n_fft - win_length) // 2
        w = np.pad(w, (lp, n_fft - win_length - lp))
    return w.astype(np.float32)


def _stft(x, n_fft, hop, window):
    """torch.stft(center=True, pad_mode='reflect', onesided=True).

    Returns (real, imag) for bins 0..n_fft//2-1 as (B, T, F) f32 plus the purely
    real Nyquist bin as (B, T), keeping the hot path at a lane-dense F = n_fft//2.
    """
    B, _ = x.shape
    pad = n_fft // 2
    xpad = jnp.pad(x, ((0, 0), (pad, pad)), mode="reflect")
    n_frames = 1 + (xpad.shape[1] - n_fft) // hop
    # TODO(synk): hop-strided frame extraction left as an XLA gather (a Pallas
    # Element-indexed DMA would avoid materializing the expanded copy); the
    # expanded copy is at least kept in bf16.
    fidx = (np.arange(n_frames)[:, None] * hop
            + np.arange(n_fft)[None, :]).astype(np.int32)
    frames = xpad.astype(jnp.bfloat16)[:, fidx]            # (B, T, n_fft) bf16
    F = n_fft // 2                                         # Nyquist handled apart
    nn = np.arange(n_fft)[:, None].astype(np.float64)
    ff = np.arange(F)[None, :].astype(np.float64)
    ang = -2.0 * np.pi * nn * ff / n_fft
    basis = np.concatenate([np.cos(ang), np.sin(ang)], axis=1) * window[:, None]
    spec = pallas_matmul(frames.reshape(B * n_frames, n_fft),
                         jnp.asarray(basis, jnp.float32))
    spec = spec.reshape(B, n_frames, 2 * F)
    nyq_vec = jnp.asarray(window * ((-1.0) ** np.arange(n_fft)), jnp.float32)
    nyq = jnp.einsum("btn,n->bt", frames, nyq_vec)         # promotes to f32
    return spec[..., :F], spec[..., F:], nyq


def _phase_vocoder(real, imag, nyq, rate, hop, chunk=128):
    """torchaudio phase_vocoder. real/imag: (B, T, F=n_fft//2), nyq: (B, T).

    Returns stretched bf16 (real, imag) of shape (B, Tout, F) and the stretched
    (purely real) Nyquist bin (B, Tout) f32.
    """
    B, T, F = real.shape
    re_p = jnp.pad(real, ((0, 0), (0, 2), (0, 0)))
    im_p = jnp.pad(imag, ((0, 0), (0, 2), (0, 0)))
    ny_p = jnp.pad(nyq, ((0, 0), (0, 2)))

    time_steps = np.arange(0, T, rate)
    Tout = time_steps.shape[0]
    idx0 = np.floor(time_steps).astype(np.int32)
    al = jnp.asarray((time_steps % 1.0).astype(np.float32))          # (Tout,)
    pa_full = np.linspace(0.0, np.pi * hop, F + 1).astype(np.float32)
    pa = jnp.asarray(pa_full[:F])[None, None, :]                     # (1,1,F)

    # Wrap / interpolation math stays in XLA so it fuses with the frame gather and
    # only two (B,Tout,F) f32 streams (ph, mag) are materialized for the kernel.
    re0, im0 = re_p[:, idx0], im_p[:, idx0]
    re1, im1 = re_p[:, idx0 + 1], im_p[:, idx0 + 1]
    # TODO(synk): atan2/sqrt kept in plain JAX (Mosaic atan2 lowering unverified);
    # XLA fuses them with the gather above.
    ang0 = jnp.arctan2(im0, re0)
    ang1 = jnp.arctan2(im1, re1)
    n0 = jnp.sqrt(re0 * re0 + im0 * im0)
    n1 = jnp.sqrt(re1 * re1 + im1 * im1)
    ph = ang1 - ang0 - pa
    ph = ph - _TWO_PI * jnp.round(ph / _TWO_PI)        # round = ties-to-even (torch)
    ph = ph + pa
    mag = al[None, :, None] * n1 + (1.0 - al[None, :, None]) * n0
    phase0 = ang0[:, 0:1, :]                                         # (B,1,F)

    # Pad frame axis to a chunk multiple and freq axis to a lane multiple.
    Tp = _round_up(Tout, chunk)
    Fp = _round_up(F, _LANE)
    ph = jnp.pad(ph, ((0, 0), (0, Tp - Tout), (0, Fp - F)))
    mag = jnp.pad(mag, ((0, 0), (0, Tp - Tout), (0, Fp - F)))
    phase0 = jnp.pad(phase0, ((0, 0), (0, 0), (0, Fp - F)))
    tri = jnp.asarray(np.tril(np.ones((chunk, chunk), np.float32), k=-1))

    n_chunks = Tp // chunk
    n_fblk = Fp // _LANE
    main_spec = pl.BlockSpec((1, chunk, _LANE), lambda f, b, c: (b, c, f))
    real_s, imag_s = pl.pallas_call(
        functools.partial(_pv_kernel, chunk=chunk),
        grid=(n_fblk, B, n_chunks),
        in_specs=[main_spec, main_spec,
                  pl.BlockSpec((1, 1, _LANE), lambda f, b, c: (b, 0, f)),
                  pl.BlockSpec((chunk, chunk), lambda f, b, c: (0, 0))],
        out_specs=[main_spec, main_spec],
        out_shape=[jax.ShapeDtypeStruct((B, Tp, Fp), jnp.bfloat16)] * 2,
        scratch_shapes=[pltpu.VMEM((1, _LANE), jnp.float32)],
        compiler_params=pltpu.CompilerParams(
            dimension_semantics=("parallel", "parallel", "arbitrary")),
    )(ph, mag, phase0, tri)
    real_s = real_s[:, :Tout, :F]
    imag_s = imag_s[:, :Tout, :F]

    # Nyquist bin (purely real; only its real part survives the ISTFT) in plain JAX.
    r0, r1 = ny_p[:, idx0], ny_p[:, idx0 + 1]
    a0 = jnp.arctan2(jnp.zeros_like(r0), r0)
    a1 = jnp.arctan2(jnp.zeros_like(r1), r1)
    pan = float(np.pi * hop)
    pn = a1 - a0 - pan
    pn = pn - _TWO_PI * jnp.round(pn / _TWO_PI)
    pn = pn + pan
    acc = jnp.cumsum(jnp.concatenate([a0[:, 0:1], pn[:, :-1]], axis=1), axis=1)
    magn = al[None, :] * jnp.abs(r1) + (1.0 - al[None, :]) * jnp.abs(r0)
    nyq_s = magn * jnp.cos(acc)
    return real_s, imag_s, nyq_s


def _istft(real_bt, imag_bt, nyq_bt, n_fft, hop, window, length):
    """torch.istft(center=True, onesided=True, length=length); the Nyquist bin is
    folded into the Pallas kernel as a rank-1 term."""
    B, T, F = real_bt.shape                          # F = n_fft//2
    nn = np.arange(n_fft)[None, :].astype(np.float64)
    ff = np.arange(F)[:, None].astype(np.float64)
    ang = 2.0 * np.pi * ff * nn / n_fft
    c_re = np.where(ff == 0, 1.0, 2.0) / n_fft
    c_im = np.where(ff == 0, 0.0, -2.0) / n_fft
    basis_cos = (c_re * np.cos(ang) * window[None, :]).astype(np.float32)
    basis_sin = (c_im * np.sin(ang) * window[None, :]).astype(np.float32)
    w_nyq = (((-1.0) ** np.arange(n_fft)) * window / n_fft).astype(np.float32)

    M = B * T
    tm = min(512, _round_up(M, 16))
    Mp = _round_up(M, tm)
    re2 = jnp.pad(real_bt.reshape(M, F), ((0, Mp - M), (0, 0)))
    im2 = jnp.pad(imag_bt.reshape(M, F), ((0, Mp - M), (0, 0)))
    ny2 = jnp.pad(nyq_bt.reshape(M, 1).astype(jnp.float32), ((0, Mp - M), (0, 0)))
    ywin = pl.pallas_call(
        _istft_kernel,
        grid=(Mp // tm,),
        in_specs=[pl.BlockSpec((tm, F), lambda i: (i, 0)),
                  pl.BlockSpec((tm, F), lambda i: (i, 0)),
                  pl.BlockSpec((tm, 1), lambda i: (i, 0)),
                  pl.BlockSpec((F, n_fft), lambda i: (0, 0)),
                  pl.BlockSpec((F, n_fft), lambda i: (0, 0)),
                  pl.BlockSpec((1, n_fft), lambda i: (0, 0))],
        out_specs=pl.BlockSpec((tm, n_fft), lambda i: (i, 0)),
        out_shape=jax.ShapeDtypeStruct((Mp, n_fft), jnp.float32),
        compiler_params=pltpu.CompilerParams(dimension_semantics=("parallel",)),
    )(re2, im2, ny2,
      jnp.asarray(basis_cos, jnp.bfloat16), jnp.asarray(basis_sin, jnp.bfloat16),
      jnp.asarray(w_nyq[None, :], jnp.float32))
    ywin = ywin[:M].reshape(B, T, n_fft)

    ola_len = (T - 1) * hop + n_fft
    oidx = (np.arange(T)[:, None] * hop + np.arange(n_fft)[None, :]).astype(np.int32)
    # TODO(synk): overlap-add scatter kept as an XLA .at[].add; a dedicated Pallas
    # OLA kernel (hop-offset index-mapped DMA) is a further optimization.
    y = jnp.zeros((B, ola_len), jnp.float32).at[:, oidx].add(ywin)
    env = jnp.zeros((ola_len,), jnp.float32).at[oidx].add(
        jnp.broadcast_to(jnp.asarray(window ** 2, jnp.float32), (T, n_fft)))
    start = n_fft // 2
    y = y[:, start:start + length]
    env = env[start:start + length]
    return y / jnp.where(env > 1e-11, env, 1.0)


def _resample(x, orig_freq, new_freq, lowpass_filter_width=6, rolloff=0.99):
    # torchaudio sinc_interp_hann resample as a framed Pallas matmul.
    g = math.gcd(int(orig_freq), int(new_freq))
    orig = int(orig_freq) // g
    new = int(new_freq) // g
    if orig == new:
        return x
    base = min(orig, new) * rolloff
    width = int(math.ceil(lowpass_filter_width * orig / base))
    idx = np.arange(-width, width + orig, dtype=np.float64) / orig
    t = np.arange(0, -new, -1, dtype=np.float64)[:, None] / new + idx[None, :]
    t = np.clip(t * base, -lowpass_filter_width, lowpass_filter_width)
    win = np.cos(t * np.pi / lowpass_filter_width / 2.0) ** 2
    tpi = t * np.pi
    kern = np.where(tpi == 0.0, 1.0, np.sin(tpi) / np.where(tpi == 0.0, 1.0, tpi))
    kern = (kern * win * (base / orig)).astype(np.float32)       # (new, ksz)
    ksz = kern.shape[1]

    B, L = x.shape
    xpad = jnp.pad(x, ((0, 0), (width, width + orig))).astype(jnp.bfloat16)
    S = (xpad.shape[1] - ksz) // orig + 1
    target = int(math.ceil(new * L / orig))
    if new < 128:
        # Lane-dense output: gather frames directly in (ksz, B*S) layout (no XLA
        # transpose of the expanded copy); the matmul output (new, B*S) stores
        # wide unmasked lanes.
        tidx = (np.arange(ksz)[:, None]
                + (np.tile(np.arange(S), B) * orig)[None, :]).astype(np.int32)
        bidx = np.repeat(np.arange(B), S)[None, :].astype(np.int32)
        frames_t = xpad[bidx, tidx]                              # (ksz, B*S) bf16
        out = pallas_matmul(jnp.asarray(kern), frames_t)         # (new, B*S)
        out = out.T.reshape(B, S * new)
    else:
        fidx = (np.arange(S)[:, None] * orig
                + np.arange(ksz)[None, :]).astype(np.int32)
        frames = xpad[:, fidx].reshape(B * S, ksz)
        out = pallas_matmul(frames, jnp.asarray(kern.T))         # (B*S, new)
        out = out.reshape(B, S * new)
    return out[:, :target]


def pitch_shift(waveform, sample_rate, n_steps, bins_per_octave=12,
                n_fft=512, win_length=None, hop_length=None):
    if hop_length is None:
        hop_length = n_fft // 4
    if win_length is None:
        win_length = n_fft
    window = _full_window(win_length, n_fft)

    shape = waveform.shape
    wav = waveform.reshape(-1, shape[-1]).astype(jnp.float32)
    ori_len = shape[-1]
    rate = 2.0 ** (-float(n_steps) / bins_per_octave)

    real, imag, nyq = _stft(wav, n_fft, hop_length, window)            # (B, T, F)
    real_s, imag_s, nyq_s = _phase_vocoder(real, imag, nyq, rate, hop_length)
    len_stretch = int(round(ori_len / rate))
    wav_stretch = _istft(real_s, imag_s, nyq_s, n_fft, hop_length, window,
                         len_stretch)
    wav_shift = _resample(wav_stretch, int(sample_rate / rate), sample_rate)

    shift_len = wav_shift.shape[-1]
    if shift_len > ori_len:
        wav_shift = wav_shift[:, :ori_len]
    else:
        wav_shift = jnp.pad(wav_shift, ((0, 0), (0, ori_len - shift_len)))
    return wav_shift.reshape(shape[:-1] + (ori_len,))


class PitchShift:
    """JAX/Pallas equivalent of the torch PitchShift module."""

    def __init__(self, sample_rate, n_steps, bins_per_octave=12, **kwargs):
        self.sample_rate = sample_rate
        self.n_steps = n_steps
        self.bins_per_octave = bins_per_octave
        self.kwargs = kwargs
        self._fn = jax.jit(functools.partial(
            pitch_shift, sample_rate=sample_rate, n_steps=n_steps,
            bins_per_octave=bins_per_octave, **kwargs))

    def __call__(self, waveform):
        return self._fn(waveform)


if __name__ == "__main__":
    key = jax.random.PRNGKey(0)
    B, L = 2, 4096
    sample_rate = 16000
    n_steps = 12          # one octave up -> rate = 0.5 (exercises interpolation)

    waveform = jax.random.normal(key, (B, L), dtype=jnp.float32)

    module = PitchShift(sample_rate, n_steps, bins_per_octave=12)
    out = module(waveform)
    out = jax.block_until_ready(out)

    assert out.shape == (B, L), out.shape
    assert out.dtype == jnp.float32
    assert bool(jnp.all(jnp.isfinite(out)))
    print("KERNEL_OK")
</pallas_src>

<mosaic_0001>
module attributes {stable_mosaic.version = 11 : i64} {
  func.func @_matmul_kernel(%arg0: i32, %arg1: i32, %arg2: memref<80x512xbf16, #tpu.memory_space<vmem>>, %arg3: memref<512x512xbf16, #tpu.memory_space<vmem>>, %arg4: memref<80x512xf32, #tpu.memory_space<vmem>>) attributes {dimension_semantics = [#tpu.dimension_semantics<parallel>, #tpu.dimension_semantics<parallel>], iteration_bounds = array<i64: 1, 1>, scalar_prefetch = 0 : i64, scratch_operands = 0 : i64, tpu.core_type = #tpu.core_type<tc>, window_params = [{transform_indices = @transform_0, window_bounds = array<i64: 80, 512>}, {transform_indices = @transform_1, window_bounds = array<i64: 512, 512>}, {transform_indices = @transform_2, window_bounds = array<i64: 80, 512>}]} {
    %c0 = arith.constant 0 : index
    %c0_0 = arith.constant 0 : index
    %0 = vector.load %arg2[%c0, %c0_0] : memref<80x512xbf16, #tpu.memory_space<vmem>>, vector<80x512xbf16>
    %c0_1 = arith.constant 0 : index
    %c0_2 = arith.constant 0 : index
    %1 = vector.load %arg3[%c0_1, %c0_2] : memref<512x512xbf16, #tpu.memory_space<vmem>>, vector<512x512xbf16>
    %cst = arith.constant dense<0.000000e+00> : vector<80x512xf32>
    %2 = tpu.matmul %0, %1, %cst {dimension_numbers = #tpu.dot_dimension_numbers<[1], [0], [0], [1], [0, 0, 1, 1], [], []>} : vector<80x512xbf16>, vector<512x512xbf16>, vector<80x512xf32> -> vector<80x512xf32>
    %c0_3 = arith.constant 0 : index
    %c0_4 = arith.constant 0 : index
    %3 = vector.load %arg4[%c0_3, %c0_4] : memref<80x512xf32, #tpu.memory_space<vmem>>, vector<80x512xf32>
    tpu.vector_store %arg4[%c0_3, %c0_4], %2 {strides = array<i32>} : memref<80x512xf32, #tpu.memory_space<vmem>>, vector<80x512xf32>,
    return
  }
  func.func @transform_0(%arg0: i32, %arg1: i32) -> (i32, i32) {
    %c0_i32 = arith.constant 0 : i32
    %c0_i32_0 = arith.constant 0 : i32
    return %arg0, %c0_i32 : i32, i32
  }
  func.func @transform_1(%arg0: i32, %arg1: i32) -> (i32, i32) {
    %c0_i32 = arith.constant 0 : i32
    %c0_i32_0 = arith.constant 0 : i32
    return %c0_i32, %arg1 : i32, i32
  }
  func.func @transform_2(%arg0: i32, %arg1: i32) -> (i32, i32) {
    %c0_i32 = arith.constant 0 : i32
    return %arg0, %arg1 : i32, i32
  }
}

module attributes {stable_mosaic.version = 11 : i64} {
  func.func @_pv_kernel(%arg0: i32, %arg1: i32, %arg2: i32, %arg3: memref<1x128x128xf32, #tpu.memory_space<vmem>>, %arg4: memref<1x128x128xf32, #tpu.memory_space<vmem>>, %arg5: memref<1x1x128xf32, #tpu.memory_space<vmem>>, %arg6: memref<128x128xf32, #tpu.memory_space<vmem>>, %arg7: memref<1x128x128xbf16, #tpu.memory_space<vmem>>, %arg8: memref<1x128x128xbf16, #tpu.memory_space<vmem>>, %arg9: memref<1x128xf32, #tpu.memory_space<vmem>>) attributes {dimension_semantics = [#tpu.dimension_semantics<parallel>, #tpu.dimension_semantics<parallel>, #tpu.dimension_semantics<arbitrary>], iteration_bounds = array<i64: 2, 2, 1>, scalar_prefetch = 0 : i64, scratch_operands = 1 : i64, tpu.core_type = #tpu.core_type<tc>, window_params = [{transform_indices = @transform_0, window_bounds = array<i64: 1, 128, 128>}, {transform_indices = @transform_1, window_bounds = array<i64: 1, 128, 128>}, {transform_indices = @transform_2, window_bounds = array<i64: 1, 1, 128>}, {pipeline_mode = #tpu.pipeline_mode<synchronous>, transform_indices = @transform_3, window_bounds = array<i64: 128, 128>}, {transform_indices = @transform_4, window_bounds = array<i64: 1, 128, 128>}, {transform_indices = @transform_5, window_bounds = array<i64: 1, 128, 128>}]} {
    %c0_i32 = arith.constant 0 : i32
    %0 = arith.cmpi eq, %arg2, %c0_i32 : i32
    %1 = arith.extui %0 : i1 to i32
    %c0_i32_0 = arith.constant 0 : i32
    %2 = arith.cmpi ne, %1, %c0_i32_0 : i32
    scf.if %2 {
      %c0_18 = arith.constant 0 : index
      %c0_19 = arith.constant 0 : index
      %c0_20 = arith.constant 0 : index
      %29 = vector.load %arg5[%c0_18, %c0_19, %c0_20] : memref<1x1x128xf32, #tpu.memory_space<vmem>>, vector<1x1x128xf32>
      %30 = vector.shape_cast %29 : vector<1x1x128xf32> to vector<1x128xf32>
      %c0_21 = arith.constant 0 : index
      %c0_22 = arith.constant 0 : index
      %31 = vector.load %arg9[%c0_21, %c0_22] : memref<1x128xf32, #tpu.memory_space<vmem>>, vector<1x128xf32>
      tpu.vector_store %arg9[%c0_21, %c0_22], %30 {strides = array<i32>} : memref<1x128xf32, #tpu.memory_space<vmem>>, vector<1x128xf32>,
    } else {
    }
    %c0 = arith.constant 0 : index
    %c0_1 = arith.constant 0 : index
    %c0_2 = arith.constant 0 : index
    %3 = vector.load %arg3[%c0, %c0_1, %c0_2] : memref<1x128x128xf32, #tpu.memory_space<vmem>>, vector<1x128x128xf32>
    %4 = vector.shape_cast %3 : vector<1x128x128xf32> to vector<128x128xf32>
    %c0_3 = arith.constant 0 : index
    %c0_4 = arith.constant 0 : index
    %5 = vector.load %arg6[%c0_3, %c0_4] : memref<128x128xf32, #tpu.memory_space<vmem>>, vector<128x128xf32>
    %cst = arith.constant dense<0.000000e+00> : vector<128x128xf32>
    %6 = tpu.matmul %5, %4, %cst {dimension_numbers = #tpu.dot_dimension_numbers<[1], [0], [0], [1], [0, 0, 1, 1], [], []>} : vector<128x128xf32>, vector<128x128xf32>, vector<128x128xf32> -> vector<128x128xf32>
    %c0_5 = arith.constant 0 : index
    %c0_6 = arith.constant 0 : index
    %7 = vector.load %arg9[%c0_5, %c0_6] : memref<1x128xf32, #tpu.memory_space<vmem>>, vector<1x128xf32>
    %8 = vector.broadcast %7 : vector<1x128xf32> to vector<128x128xf32>
    %9 = arith.addf %8, %6 : vector<128x128xf32>
    %c0_7 = arith.constant 0 : index
    %c0_8 = arith.constant 0 : index
    %c0_9 = arith.constant 0 : index
    %10 = vector.load %arg4[%c0_7, %c0_8, %c0_9] : memref<1x128x128xf32, #tpu.memory_space<vmem>>, vector<1x128x128xf32>
    %11 = vector.shape_cast %10 : vector<1x128x128xf32> to vector<128x128xf32>
    %12 = math.cos %9 : vector<128x128xf32>
    %13 = arith.mulf %11, %12 : vector<128x128xf32>
    %14 = arith.truncf %13 : vector<128x128xf32> to vector<128x128xbf16>
    %c0_10 = arith.constant 0 : index
    %c0_11 = arith.constant 0 : index
    %c0_12 = arith.constant 0 : index
    %15 = vector.load %arg7[%c0_10, %c0_11, %c0_12] : memref<1x128x128xbf16, #tpu.memory_space<vmem>>, vector<1x128x128xbf16>
    %16 = vector.shape_cast %15 : vector<1x128x128xbf16> to vector<128x128xbf16>
    %17 = vector.shape_cast %14 : vector<128x128xbf16> to vector<1x128x128xbf16>
    tpu.vector_store %arg7[%c0_10, %c0_11, %c0_12], %17 {strides = array<i32>} : memref<1x128x128xbf16, #tpu.memory_space<vmem>>, vector<1x128x128xbf16>,
    %18 = math.sin %9 : vector<128x128xf32>
    %19 = arith.mulf %11, %18 : vector<128x128xf32>
    %20 = arith.truncf %19 : vector<128x128xf32> to vector<128x128xbf16>
    %c0_13 = arith.constant 0 : index
    %c0_14 = arith.constant 0 : index
    %c0_15 = arith.constant 0 : index
    %21 = vector.load %arg8[%c0_13, %c0_14, %c0_15] : memref<1x128x128xbf16, #tpu.memory_space<vmem>>, vector<1x128x128xbf16>
    %22 = vector.shape_cast %21 : vector<1x128x128xbf16> to vector<128x128xbf16>
    %23 = vector.shape_cast %20 : vector<128x128xbf16> to vector<1x128x128xbf16>
    tpu.vector_store %arg8[%c0_13, %c0_14, %c0_15], %23 {strides = array<i32>} : memref<1x128x128xbf16, #tpu.memory_space<vmem>>, vector<1x128x128xbf16>,
    %24 = vector.extract_strided_slice %6 {offsets = [127, 0], sizes = [1, 128], strides = [1, 1]} : vector<128x128xf32> to vector<1x128xf32>
    %25 = arith.addf %7, %24 : vector<1x128xf32>
    %26 = vector.extract_strided_slice %4 {offsets = [127, 0], sizes = [1, 128], strides = [1, 1]} : vector<128x128xf32> to vector<1x128xf32>
    %27 = arith.addf %25, %26 : vector<1x128xf32>
    %c0_16 = arith.constant 0 : index
    %c0_17 = arith.constant 0 : index
    %28 = vector.load %arg9[%c0_16, %c0_17] : memref<1x128xf32, #tpu.memory_space<vmem>>, vector<1x128xf32>
    tpu.vector_store %arg9[%c0_16, %c0_17], %27 {strides = array<i32>} : memref<1x128xf32, #tpu.memory_space<vmem>>, vector<1x128xf32>,
    return
  }
  func.func @transform_0(%arg0: i32, %arg1: i32, %arg2: i32) -> (i32, i32, i32) {
    %c0_i32 = arith.constant 0 : i32
    return %arg1, %arg2, %arg0 : i32, i32, i32
  }
  func.func @transform_1(%arg0: i32, %arg1: i32, %arg2: i32) -> (i32, i32, i32) {
    %c0_i32 = arith.constant 0 : i32
    return %arg1, %arg2, %arg0 : i32, i32, i32
  }
  func.func @transform_2(%arg0: i32, %arg1: i32, %arg2: i32) -> (i32, i32, i32) {
    %c0_i32 = arith.constant 0 : i32
    %c0_i32_0 = arith.constant 0 : i32
    return %arg1, %c0_i32, %arg0 : i32, i32, i32
  }
  func.func @transform_3(%arg0: i32, %arg1: i32, %arg2: i32) -> (i32, i32) {
    %c0_i32 = arith.constant 0 : i32
    %c0_i32_0 = arith.constant 0 : i32
    %c0_i32_1 = arith.constant 0 : i32
    return %c0_i32, %c0_i32_0 : i32, i32
  }
  func.func @transform_4(%arg0: i32, %arg1: i32, %arg2: i32) -> (i32, i32, i32) {
    %c0_i32 = arith.constant 0 : i32
    return %arg1, %arg2, %arg0 : i32, i32, i32
  }
  func.func @transform_5(%arg0: i32, %arg1: i32, %arg2: i32) -> (i32, i32, i32) {
    %c0_i32 = arith.constant 0 : i32
    return %arg1, %arg2, %arg0 : i32, i32, i32
  }
}

module attributes {stable_mosaic.version = 11 : i64} {
  func.func @_istft_kernel(%arg0: i32, %arg1: memref<144x256xbf16, #tpu.memory_space<vmem>>, %arg2: memref<144x256xbf16, #tpu.memory_space<vmem>>, %arg3: memref<144x1xf32, #tpu.memory_space<vmem>>, %arg4: memref<256x512xbf16, #tpu.memory_space<vmem>>, %arg5: memref<256x512xbf16, #tpu.memory_space<vmem>>, %arg6: memref<1x512xf32, #tpu.memory_space<vmem>>, %arg7: memref<144x512xf32, #tpu.memory_space<vmem>>) attributes {dimension_semantics = [#tpu.dimension_semantics<parallel>], iteration_bounds = array<i64: 1>, scalar_prefetch = 0 : i64, scratch_operands = 0 : i64, tpu.core_type = #tpu.core_type<tc>, window_params = [{transform_indices = @transform_0, window_bounds = array<i64: 144, 256>}, {transform_indices = @transform_1, window_bounds = array<i64: 144, 256>}, {transform_indices = @transform_2, window_bounds = array<i64: 144, 1>}, {pipeline_mode = #tpu.pipeline_mode<synchronous>, transform_indices = @transform_3, window_bounds = array<i64: 256, 512>}, {pipeline_mode = #tpu.pipeline_mode<synchronous>, transform_indices = @transform_4, window_bounds = array<i64: 256, 512>}, {pipeline_mode = #tpu.pipeline_mode<synchronous>, transform_indices = @transform_5, window_bounds = array<i64: 1, 512>}, {transform_indices = @transform_6, window_bounds = array<i64: 144, 512>}]} {
    %c0 = arith.constant 0 : index
    %c0_0 = arith.constant 0 : index
    %0 = vector.load %arg1[%c0, %c0_0] : memref<144x256xbf16, #tpu.memory_space<vmem>>, vector<144x256xbf16>
    %c0_1 = arith.constant 0 : index
    %c0_2 = arith.constant 0 : index
    %1 = vector.load %arg4[%c0_1, %c0_2] : memref<256x512xbf16, #tpu.memory_space<vmem>>, vector<256x512xbf16>
    %cst = arith.constant dense<0.000000e+00> : vector<144x512xf32>
    %2 = tpu.matmul %0, %1, %cst {dimension_numbers = #tpu.dot_dimension_numbers<[1], [0], [0], [1], [0, 0, 1, 1], [], []>} : vector<144x256xbf16>, vector<256x512xbf16>, vector<144x512xf32> -> vector<144x512xf32>
    %c0_3 = arith.constant 0 : index
    %c0_4 = arith.constant 0 : index
    %3 = vector.load %arg2[%c0_3, %c0_4] : memref<144x256xbf16, #tpu.memory_space<vmem>>, vector<144x256xbf16>
    %c0_5 = arith.constant 0 : index
    %c0_6 = arith.constant 0 : index
    %4 = vector.load %arg5[%c0_5, %c0_6] : memref<256x512xbf16, #tpu.memory_space<vmem>>, vector<256x512xbf16>
    %cst_7 = arith.constant dense<0.000000e+00> : vector<144x512xf32>
    %5 = tpu.matmul %3, %4, %cst_7 {dimension_numbers = #tpu.dot_dimension_numbers<[1], [0], [0], [1], [0, 0, 1, 1], [], []>} : vector<144x256xbf16>, vector<256x512xbf16>, vector<144x512xf32> -> vector<144x512xf32>
    %6 = arith.addf %2, %5 : vector<144x512xf32>
    %c0_8 = arith.constant 0 : index
    %c0_9 = arith.constant 0 : index
    %7 = vector.load %arg3[%c0_8, %c0_9] : memref<144x1xf32, #tpu.memory_space<vmem>>, vector<144x1xf32>
    %c0_10 = arith.constant 0 : index
    %c0_11 = arith.constant 0 : index
    %8 = vector.load %arg6[%c0_10, %c0_11] : memref<1x512xf32, #tpu.memory_space<vmem>>, vector<1x512xf32>
    %9 = vector.broadcast %7 : vector<144x1xf32> to vector<144x512xf32>
    %10 = vector.broadcast %8 : vector<1x512xf32> to vector<144x512xf32>
    %11 = arith.mulf %9, %10 : vector<144x512xf32>
    %12 = arith.addf %6, %11 : vector<144x512xf32>
    %c0_12 = arith.constant 0 : index
    %c0_13 = arith.constant 0 : index
    %13 = vector.load %arg7[%c0_12, %c0_13] : memref<144x512xf32, #tpu.memory_space<vmem>>, vector<144x512xf32>
    tpu.vector_store %arg7[%c0_12, %c0_13], %12 {strides = array<i32>} : memref<144x512xf32, #tpu.memory_space<vmem>>, vector<144x512xf32>,
    return
  }
  func.func @transform_0(%arg0: i32) -> (i32, i32) {
    %c0_i32 = arith.constant 0 : i32
    %c0_i32_0 = arith.constant 0 : i32
    return %arg0, %c0_i32 : i32, i32
  }
  func.func @transform_1(%arg0: i32) -> (i32, i32) {
    %c0_i32 = arith.constant 0 : i32
    %c0_i32_0 = arith.constant 0 : i32
    return %arg0, %c0_i32 : i32, i32
  }
  func.func @transform_2(%arg0: i32) -> (i32, i32) {
    %c0_i32 = arith.constant 0 : i32
    %c0_i32_0 = arith.constant 0 : i32
    return %arg0, %c0_i32 : i32, i32
  }
  func.func @transform_3(%arg0: i32) -> (i32, i32) {
    %c0_i32 = arith.constant 0 : i32
    %c0_i32_0 = arith.constant 0 : i32
    %c0_i32_1 = arith.constant 0 : i32
    return %c0_i32, %c0_i32_0 : i32, i32
  }
  func.func @transform_4(%arg0: i32) -> (i32, i32) {
    %c0_i32 = arith.constant 0 : i32
    %c0_i32_0 = arith.constant 0 : i32
    %c0_i32_1 = arith.constant 0 : i32
    return %c0_i32, %c0_i32_0 : i32, i32
  }
  func.func @transform_5(%arg0: i32) -> (i32, i32) {
    %c0_i32 = arith.constant 0 : i32
    %c0_i32_0 = arith.constant 0 : i32
    %c0_i32_1 = arith.constant 0 : i32
    return %c0_i32, %c0_i32_0 : i32, i32
  }
  func.func @transform_6(%arg0: i32) -> (i32, i32) {
    %c0_i32 = arith.constant 0 : i32
    %c0_i32_0 = arith.constant 0 : i32
    return %arg0, %c0_i32 : i32, i32
  }
}

module attributes {stable_mosaic.version = 11 : i64} {
  func.func @_matmul_kernel(%arg0: i32, %arg1: i32, %arg2: memref<16x128xbf16, #tpu.memory_space<vmem>>, %arg3: memref<128x1024xbf16, #tpu.memory_space<vmem>>, %arg4: memref<16x1024xf32, #tpu.memory_space<vmem>>) attributes {dimension_semantics = [#tpu.dimension_semantics<parallel>, #tpu.dimension_semantics<parallel>], iteration_bounds = array<i64: 1, 9>, scalar_prefetch = 0 : i64, scratch_operands = 0 : i64, tpu.core_type = #tpu.core_type<tc>, window_params = [{transform_indices = @transform_0, window_bounds = array<i64: 16, 128>}, {transform_indices = @transform_1, window_bounds = array<i64: 128, 1024>}, {transform_indices = @transform_2, window_bounds = array<i64: 16, 1024>}]} {
    %c0 = arith.constant 0 : index
    %c0_0 = arith.constant 0 : index
    %0 = vector.load %arg2[%c0, %c0_0] : memref<16x128xbf16, #tpu.memory_space<vmem>>, vector<16x128xbf16>
    %c0_1 = arith.constant 0 : index
    %c0_2 = arith.constant 0 : index
    %1 = vector.load %arg3[%c0_1, %c0_2] : memref<128x1024xbf16, #tpu.memory_space<vmem>>, vector<128x1024xbf16>
    %cst = arith.constant dense<0.000000e+00> : vector<16x1024xf32>
    %2 = tpu.matmul %0, %1, %cst {dimension_numbers = #tpu.dot_dimension_numbers<[1], [0], [0], [1], [0, 0, 1, 1], [], []>} : vector<16x128xbf16>, vector<128x1024xbf16>, vector<16x1024xf32> -> vector<16x1024xf32>
    %c0_3 = arith.constant 0 : index
    %c0_4 = arith.constant 0 : index
    %3 = vector.load %arg4[%c0_3, %c0_4] : memref<16x1024xf32, #tpu.memory_space<vmem>>, vector<16x1024xf32>
    tpu.vector_store %arg4[%c0_3, %c0_4], %2 {strides = array<i32>} : memref<16x1024xf32, #tpu.memory_space<vmem>>, vector<16x1024xf32>,
    return
  }
  func.func @transform_0(%arg0: i32, %arg1: i32) -> (i32, i32) {
    %c0_i32 = arith.constant 0 : i32
    %c0_i32_0 = arith.constant 0 : i32
    return %arg0, %c0_i32 : i32, i32
  }
  func.func @transform_1(%arg0: i32, %arg1: i32) -> (i32, i32) {
    %c0_i32 = arith.constant 0 : i32
    %c0_i32_0 = arith.constant 0 : i32
    return %c0_i32, %arg1 : i32, i32
  }
  func.func @transform_2(%arg0: i32, %arg1: i32) -> (i32, i32) {
    %c0_i32 = arith.constant 0 : i32
    return %arg0, %arg1 : i32, i32
  }
}

</mosaic_0001>

<bundles_post_ra>
// kernel: pitch_shift.4
= control target key start
LH: loop header
LB: loop body
LE: loop exit
PB: predicated region body
PF: predicated region fallthrough
CT: control target
= control target key end

     0   :  { %s2304_s1 = inlined_call_operand.vmem [shape: bf16[512,512], index: 1, kind: input, shape index: {}]   ;;  %s2305_s0 = inlined_call_operand.vmem [shape: bf16[80,512], index: 0, kind: input, shape index: {}]   ;;  %s2306_s2 = inlined_call_operand.vmem [shape: f32[80,512], index: 2, kind: output, shape index: {}]  }
   0x1   :  { %v1423_v0 = vld [vmem:[%s2304_s1 + $0xe4] ss:$16 sps:$4 sm:$0xff]   ;;  %v1427_v2 = vld [vmem:[%s2304_s1 + $0xe0] ss:$16 sps:$4 sm:$0xff]   ;;  %v1818_v51 = vld [vmem:[%s2305_s0 + $0xc] ss:$16 sps:$4 sm:$0xff]  }
   0x2   :  { %v1425_v1 = vld [vmem:[%s2304_s1 + $0x2e4] ss:$16 sps:$4 sm:$0xff]   ;;  %899 = vmatprep.subr.bf16.mxu0 %v1423_v0  ;;  %v1428_v3 = vld [vmem:[%s2304_s1 + $0x2e0] ss:$16 sps:$4 sm:$0xff]   ;;  %1014 = vmatprep.mubr.bf16.mxu1 %v1818_v51 }
   0x3   :  { %982 = vmatprep.subr.bf16.mxu1 %v1425_v1  ;;  %v1429_v4 = vld [vmem:[%s2304_s1 + $0xc4] ss:$16 sps:$4 sm:$0xff]   ;;  %900 = vmatpush1.bf16.msra.mxu0 %v1427_v2  ;;  %v1433_v6 = vld [vmem:[%s2304_s1 + $0xc0] ss:$16 sps:$4 sm:$0xff]   ;;  %v1527_v2 = vld [vmem:[%s2304_s1 + $0xec] ss:$16 sps:$4 sm:$0xff]  }
   0x4   :  { %983 = vmatpush1.bf16.msra.mxu1 %v1428_v3  ;;  %v1431_v5 = vld [vmem:[%s2304_s1 + $0x2c4] ss:$16 sps:$4 sm:$0xff]   ;;  %901 = vmatprep.subr.bf16.mxu0 %v1429_v4  ;;  %v1434_v7 = vld [vmem:[%s2304_s1 + $0x2c0] ss:$16 sps:$4 sm:$0xff]   ;;  %v1530_v3 = vld [vmem:[%s2304_s1 + $0x2ec] ss:$16 sps:$4 sm:$0xff]  }
   0x5   :  { %984 = vmatprep.subr.bf16.mxu1 %v1431_v5  ;;  %v1435_v8 = vld [vmem:[%s2304_s1 + $0xa4] ss:$16 sps:$4 sm:$0xff]   ;;  %v1439_v10 = vld [vmem:[%s2304_s1 + $0xa0] ss:$16 sps:$4 sm:$0xff]   ;;  %v1878_v5 = vld [vmem:[%s2305_s0 + $0x8] ss:$16 sps:$4 sm:$0xff]  }
   0x6   :  { %v1437_v9 = vld [vmem:[%s2304_s1 + $0x2a4] ss:$16 sps:$4 sm:$0xff]   ;;  %v1440_v11 = vld [vmem:[%s2304_s1 + $0x2a0] ss:$16 sps:$4 sm:$0xff]  }
   0x7   :  { %902 = vmatpush1.bf16.msra.mxu0 %v1433_v6  ;;  %v1441_v12 = vld [vmem:[%s2304_s1 + $0x84] ss:$16 sps:$4 sm:$0xff]   ;;  %v1445_v14 = vld [vmem:[%s2304_s1 + $0x80] ss:$16 sps:$4 sm:$0xff]   ;;  %v1525_v6 = vld [vmem:[%s2304_s1 + $0xe8] ss:$16 sps:$4 sm:$0xff]  }
   0x8   :  { %985 = vmatpush1.bf16.msra.mxu1 %v1434_v7  ;;  %903 = vmatprep.subr.bf16.mxu0 %v1435_v8  ;;  %v1443_v13 = vld [vmem:[%s2304_s1 + $0x284] ss:$16 sps:$4 sm:$0xff]   ;;  %v1446_v15 = vld [vmem:[%s2304_s1 + $0x280] ss:$16 sps:$4 sm:$0xff]   ;;  %v1528_v7 = vld [vmem:[%s2304_s1 + $0x2e8] ss:$16 sps:$4 sm:$0xff]  }
   0x9   :  { %986 = vmatprep.subr.bf16.mxu1 %v1437_v9  ;;  %v1447_v16 = vld [vmem:[%s2304_s1 + $0x64] ss:$16 sps:$4 sm:$0xff]   ;;  %v1451_v18 = vld [vmem:[%s2304_s1 + $0x60] ss:$16 sps:$4 sm:$0xff]   ;;  %v1533_v8 = vld [vmem:[%s2304_s1 + $0xcc] ss:$16 sps:$4 sm:$0xff]  }
   0xa   :  { %v1449_v17 = vld [vmem:[%s2304_s1 + $0x264] ss:$16 sps:$4 sm:$0xff]   ;;  %v1452_v19 = vld [vmem:[%s2304_s1 + $0x260] ss:$16 sps:$4 sm:$0xff]   ;;  %v1536_v9 = vld [vmem:[%s2304_s1 + $0x2cc] ss:$16 sps:$4 sm:$0xff]  }
   0xb   :  { %904 = vmatpush1.bf16.msra.mxu0 %v1439_v10  ;;  %v1453_v20 = vld [vmem:[%s2304_s1 + $0x44] ss:$16 sps:$4 sm:$0xff]   ;;  %v1457_v22 = vld [vmem:[%s2304_s1 + $0x40] ss:$16 sps:$4 sm:$0xff]  }
   0xc   :  { %987 = vmatpush1.bf16.msra.mxu1 %v1440_v11  ;;  %905 = vmatprep.subr.bf16.mxu0 %v1441_v12  ;;  %v1455_v21 = vld [vmem:[%s2304_s1 + $0x244] ss:$16 sps:$4 sm:$0xff]   ;;  %v1458_v23 = vld [vmem:[%s2304_s1 + $0x240] ss:$16 sps:$4 sm:$0xff]   ;;  %v1900_v11 = vld [vmem:[%s2305_s0 + $0x2c] ss:$16 sps:$4 sm:$0xff]  }
   0xd   :  { %988 = vmatprep.subr.bf16.mxu1 %v1443_v13  ;;  %v1459_v24 = vld [vmem:[%s2304_s1 + $0x24] ss:$16 sps:$4 sm:$0xff]   ;;  %v1463_v26 = vld [vmem:[%s2304_s1 + $0x20] ss:$16 sps:$4 sm:$0xff]   ;;  %v1531_v12 = vld [vmem:[%s2304_s1 + $0xc8] ss:$16 sps:$4 sm:$0xff]  }
   0xe   :  { %v1461_v25 = vld [vmem:[%s2304_s1 + $0x224] ss:$16 sps:$4 sm:$0xff]   ;;  %v1464_v27 = vld [vmem:[%s2304_s1 + $0x220] ss:$16 sps:$4 sm:$0xff]   ;;  %v1534_v13 = vld [vmem:[%s2304_s1 + $0x2c8] ss:$16 sps:$4 sm:$0xff]  }
   0xf   :  { %906 = vmatpush1.bf16.msra.mxu0 %v1445_v14  ;;  %v1465_v28 = vld [vmem:[%s2304_s1 + $0x4] ss:$16 sps:$4 sm:$0xff]   ;;  %v1469_v30 = vld [vmem:[%s2304_s1] ss:$16 sps:$4 sm:$0xff]   ;;  %v1539_v14 = vld [vmem:[%s2304_s1 + $0xac] ss:$16 sps:$4 sm:$0xff]  }
  0x10   :  { %989 = vmatpush1.bf16.msra.mxu1 %v1446_v15  ;;  %907 = vmatprep.subr.bf16.mxu0 %v1447_v16  ;;  %v1467_v29 = vld [vmem:[%s2304_s1 + $0x204] ss:$16 sps:$4 sm:$0xff]   ;;  %v1470_v31 = vld [vmem:[%s2304_s1 + $0x200] ss:$16 sps:$4 sm:$0xff]   ;;  %v1542_v15 = vld [vmem:[%s2304_s1 + $0x2ac] ss:$16 sps:$4 sm:$0xff]  }
  0x11   :  { %990 = vmatprep.subr.bf16.mxu1 %v1449_v17  ;;  %v1471_v32 = vld [vmem:[%s2304_s1 + $0x1e4] ss:$16 sps:$4 sm:$0xff]   ;;  %v1475_v34 = vld [vmem:[%s2304_s1 + $0x1e0] ss:$16 sps:$4 sm:$0xff]   ;;  %v1537_v16 = vld [vmem:[%s2304_s1 + $0xa8] ss:$16 sps:$4 sm:$0xff]  }
  0x12   :  { %v1473_v33 = vld [vmem:[%s2304_s1 + $0x3e4] ss:$16 sps:$4 sm:$0xff]   ;;  %v1476_v35 = vld [vmem:[%s2304_s1 + $0x3e0] ss:$16 sps:$4 sm:$0xff]   ;;  %v1540_v17 = vld [vmem:[%s2304_s1 + $0x2a8] ss:$16 sps:$4 sm:$0xff]  }
  0x13   :  { %908 = vmatpush1.bf16.msra.mxu0 %v1451_v18  ;;  %v1477_v36 = vld [vmem:[%s2304_s1 + $0x1c4] ss:$16 sps:$4 sm:$0xff]   ;;  %v1481_v38 = vld [vmem:[%s2304_s1 + $0x1c0] ss:$16 sps:$4 sm:$0xff]  }
  0x14   :  { %991 = vmatpush1.bf16.msra.mxu1 %v1452_v19  ;;  %909 = vmatprep.subr.bf16.mxu0 %v1453_v20  ;;  %v1479_v37 = vld [vmem:[%s2304_s1 + $0x3c4] ss:$16 sps:$4 sm:$0xff]   ;;  %v1482_v39 = vld [vmem:[%s2304_s1 + $0x3c0] ss:$16 sps:$4 sm:$0xff]   ;;  %v1932_v19 = vld [vmem:[%s2305_s0 + $0x28] ss:$16 sps:$4 sm:$0xff]  }
  0x15   :  { %992 = vmatprep.subr.bf16.mxu1 %v1455_v21  ;;  %v1483_v40 = vld [vmem:[%s2304_s1 + $0x1a4] ss:$16 sps:$4 sm:$0xff]   ;;  %v1487_v42 = vld [vmem:[%s2304_s1 + $0x1a0] ss:$16 sps:$4 sm:$0xff]   ;;  %v1545_v20 = vld [vmem:[%s2304_s1 + $0x8c] ss:$16 sps:$4 sm:$0xff]  }
  0x16   :  { %v1485_v41 = vld [vmem:[%s2304_s1 + $0x3a4] ss:$16 sps:$4 sm:$0xff]   ;;  %v1488_v43 = vld [vmem:[%s2304_s1 + $0x3a0] ss:$16 sps:$4 sm:$0xff]   ;;  %v1548_v21 = vld [vmem:[%s2304_s1 + $0x28c] ss:$16 sps:$4 sm:$0xff]  }
  0x17   :  { %910 = vmatpush1.bf16.msra.mxu0 %v1457_v22  ;;  %v1489_v44 = vld [vmem:[%s2304_s1 + $0x184] ss:$16 sps:$4 sm:$0xff]   ;;  %v1493_v46 = vld [vmem:[%s2304_s1 + $0x180] ss:$16 sps:$4 sm:$0xff]  }
  0x18   :  { %993 = vmatpush1.bf16.msra.mxu1 %v1458_v23  ;;  %911 = vmatprep.subr.bf16.mxu0 %v1459_v24  ;;  %v1491_v45 = vld [vmem:[%s2304_s1 + $0x384] ss:$16 sps:$4 sm:$0xff]   ;;  %v1494_v47 = vld [vmem:[%s2304_s1 + $0x380] ss:$16 sps:$4 sm:$0xff]   ;;  %v1948_v23 = vld [vmem:[%s2305_s0 + $0x4c] ss:$16 sps:$4 sm:$0xff]  }
  0x19   :  { %994 = vmatprep.subr.bf16.mxu1 %v1461_v25  ;;  %v1495_v48 = vld [vmem:[%s2304_s1 + $0x164] ss:$16 sps:$4 sm:$0xff]   ;;  %v1499_v52 = vld [vmem:[%s2304_s1 + $0x160] ss:$16 sps:$4 sm:$0xff]   ;;  %v1543_v24 = vld [vmem:[%s2304_s1 + $0x88] ss:$16 sps:$4 sm:$0xff]  }
  0x1a   :  { %v1810_v49 = vld [vmem:[%s2305_s0 + $0x4] ss:$16 sps:$4 sm:$0xff]   ;;  %v1500_v53 = vld [vmem:[%s2304_s1 + $0x360] ss:$16 sps:$4 sm:$0xff]   ;;  %v1546_v25 = vld [vmem:[%s2304_s1 + $0x288] ss:$16 sps:$4 sm:$0xff]  }
  0x1b   :  { %912 = vmatpush1.bf16.msra.mxu0 %v1463_v26  ;;  %v1497_v50 = vld [vmem:[%s2304_s1 + $0x364] ss:$16 sps:$4 sm:$0xff]   ;;  %931 = vmatprep.mubr.bf16.mxu0 %v1810_v49  ;;  %v1505_v56 = vld [vmem:[%s2304_s1 + $0x140] ss:$16 sps:$4 sm:$0xff]   ;;  %v1551_v26 = vld [vmem:[%s2304_s1 + $0x6c] ss:$16 sps:$4 sm:$0xff]  }
  0x1c   :  { %995 = vmatpush1.bf16.msra.mxu1 %v1464_v27  ;;  %913 = vmatprep.subr.bf16.mxu0 %v1465_v28  ;;  %v1501_v54 = vld [vmem:[%s2304_s1 + $0x144] ss:$16 sps:$4 sm:$0xff]   ;;  %v1506_v57 = vld [vmem:[%s2304_s1 + $0x340] ss:$16 sps:$4 sm:$0xff]   ;;  %v1554_v27 = vld [vmem:[%s2304_s1 + $0x26c] ss:$16 sps:$4 sm:$0xff]  }
  0x1d   :  { %996 = vmatprep.subr.bf16.mxu1 %v1467_v29  ;;  %v1503_v55 = vld [vmem:[%s2304_s1 + $0x344] ss:$16 sps:$4 sm:$0xff]   ;;  %v1511_v60 = vld [vmem:[%s2304_s1 + $0x120] ss:$16 sps:$4 sm:$0xff]   ;;  %v1549_v28 = vld [vmem:[%s2304_s1 + $0x68] ss:$16 sps:$4 sm:$0xff]  }
  0x1e   :  { %v1507_v58 = vld [vmem:[%s2304_s1 + $0x124] ss:$16 sps:$4 sm:$0xff]   ;;  %v1512_v61 = vld [vmem:[%s2304_s1 + $0x320] ss:$16 sps:$4 sm:$0xff]   ;;  %v1552_v29 = vld [vmem:[%s2304_s1 + $0x268] ss:$16 sps:$4 sm:$0xff]  }
  0x1f   :  { %914 = vmatpush1.bf16.msra.mxu0 %v1469_v30  ;;  %v1509_v59 = vld [vmem:[%s2304_s1 + $0x324] ss:$16 sps:$4 sm:$0xff]   ;;  %v1517_v0 = vld [vmem:[%s2304_s1 + $0x100] ss:$16 sps:$4 sm:$0xff]  }
  0x20   :  { %997 = vmatpush1.bf16.msra.mxu1 %v1470_v31  ;;  %915 = vmatprep.subr.bf16.mxu0 %v1471_v32  ;;  %v1513_v62 = vld [vmem:[%s2304_s1 + $0x104] ss:$16 sps:$4 sm:$0xff]   ;;  %v1518_v1 = vld [vmem:[%s2304_s1 + $0x300] ss:$16 sps:$4 sm:$0xff]   ;;  %v1980_v31 = vld [vmem:[%s2305_s0 + $0x48] ss:$16 sps:$4 sm:$0xff]  }
  0x21   :  { %998 = vmatprep.subr.bf16.mxu1 %v1473_v33  ;;  %v1515_v63 = vld [vmem:[%s2304_s1 + $0x304] ss:$16 sps:$4 sm:$0xff]   ;;  %v1873_v4 = vld [vmem:[%s2305_s0] ss:$16 sps:$4 sm:$0xff]   ;;  %v1557_v32 = vld [vmem:[%s2304_s1 + $0x4c] ss:$16 sps:$4 sm:$0xff]  }
  0x22   :  { %v1895_v10 = vld [vmem:[%s2305_s0 + $0x24] ss:$16 sps:$4 sm:$0xff]   ;;  %v1927_v18 = vld [vmem:[%s2305_s0 + $0x20] ss:$16 sps:$4 sm:$0xff]   ;;  %v1560_v33 = vld [vmem:[%s2304_s1 + $0x24c] ss:$16 sps:$4 sm:$0xff]  }
  0x23   :  { %916 = vmatpush2.bf16.msra.mxu0 %v1475_v34  ;;  %v1943_v22 = vld [vmem:[%s2305_s0 + $0x44] ss:$16 sps:$4 sm:$0xff]   ;;  %v1975_v30 = vld [vmem:[%s2305_s0 + $0x40] ss:$16 sps:$4 sm:$0xff]  }
  0x24   :  { %999 = vmatpush2.bf16.msra.mxu1 %v1476_v35  ;;  %917 = vmatprep.subr.bf16.mxu0 %v1477_v36  ;;  %v1991_v34 = vld [vmem:[%s2305_s0 + $0x64] ss:$16 sps:$4 sm:$0xff]   ;;  %v1996_v35 = vld [vmem:[%s2305_s0 + $0x6c] ss:$16 sps:$4 sm:$0xff]   ;;  %v1555_v36 = vld [vmem:[%s2304_s1 + $0x48] ss:$16 sps:$4 sm:$0xff]  }
  0x25   :  { %1000 = vmatprep.subr.bf16.mxu1 %v1479_v37  ;;  %v1558_v37 = vld [vmem:[%s2304_s1 + $0x248] ss:$16 sps:$4 sm:$0xff]  }
  0x27   :  { %918 = vmatpush2.bf16.msra.mxu0 %v1481_v38  ;;  %v1563_v38 = vld [vmem:[%s2304_s1 + $0x2c] ss:$16 sps:$4 sm:$0xff]  }
  0x28   :  { %1001 = vmatpush2.bf16.msra.mxu1 %v1482_v39  ;;  %919 = vmatprep.subr.bf16.mxu0 %v1483_v40  ;;  %v1566_v39 = vld [vmem:[%s2304_s1 + $0x22c] ss:$16 sps:$4 sm:$0xff]   ;;  %v1561_v40 = vld [vmem:[%s2304_s1 + $0x28] ss:$16 sps:$4 sm:$0xff]  }
  0x29   :  { %1002 = vmatprep.subr.bf16.mxu1 %v1485_v41  ;;  %v1564_v41 = vld [vmem:[%s2304_s1 + $0x228] ss:$16 sps:$4 sm:$0xff]  }
  0x2b   :  { %920 = vmatpush2.bf16.msra.mxu0 %v1487_v42  ;;  %v2023_v42 = vld [vmem:[%s2305_s0 + $0x60] ss:$16 sps:$4 sm:$0xff]  }
  0x2c   :  { %1003 = vmatpush2.bf16.msra.mxu1 %v1488_v43  ;;  %921 = vmatprep.subr.bf16.mxu0 %v1489_v44  ;;  %v2028_v43 = vld [vmem:[%s2305_s0 + $0x68] ss:$16 sps:$4 sm:$0xff]   ;;  %v1575_v44 = vld [vmem:[%s2304_s1 + $0xc] ss:$16 sps:$4 sm:$0xff]  }
  0x2d   :  { %1004 = vmatprep.subr.bf16.mxu1 %v1491_v45  ;;  %v1578_v45 = vld [vmem:[%s2304_s1 + $0x20c] ss:$16 sps:$4 sm:$0xff]  }
  0x2f   :  { %922 = vmatpush2.bf16.msra.mxu0 %v1493_v46  ;;  %v2039_v46 = vld [vmem:[%s2305_s0 + $0x84] ss:$16 sps:$4 sm:$0xff]  }
  0x30   :  { %1005 = vmatpush2.bf16.msra.mxu1 %v1494_v47  ;;  %923 = vmatprep.subr.bf16.mxu0 %v1495_v48  ;;  %v2044_v47 = vld [vmem:[%s2305_s0 + $0x8c] ss:$16 sps:$4 sm:$0xff]   ;;  %v1573_v48 = vld [vmem:[%s2304_s1 + $0x8] ss:$16 sps:$4 sm:$0xff]  }
  0x31   :  { %1006 = vmatprep.subr.bf16.mxu1 %v1497_v50  ;;  %v1576_v50 = vld [vmem:[%s2304_s1 + $0x208] ss:$16 sps:$4 sm:$0xff]  }
  0x33   :  { %924 = vmatpush2.bf16.msra.mxu0 %v1499_v52  ;;  %v1581_v52 = vld [vmem:[%s2304_s1 + $0x1ec] ss:$16 sps:$4 sm:$0xff]  }
  0x34   :  { %1007 = vmatpush2.bf16.msra.mxu1 %v1500_v53  ;;  %925 = vmatprep.subr.bf16.mxu0 %v1501_v54  ;;  %v1584_v53 = vld [vmem:[%s2304_s1 + $0x3ec] ss:$16 sps:$4 sm:$0xff]   ;;  %v1579_v54 = vld [vmem:[%s2304_s1 + $0x1e8] ss:$16 sps:$4 sm:$0xff]  }
  0x35   :  { %1008 = vmatprep.subr.bf16.mxu1 %v1503_v55  ;;  %v1582_v55 = vld [vmem:[%s2304_s1 + $0x3e8] ss:$16 sps:$4 sm:$0xff]  }
  0x37   :  { %926 = vmatpush2.bf16.msra.mxu0 %v1505_v56  ;;  %v2071_v56 = vld [vmem:[%s2305_s0 + $0x80] ss:$16 sps:$4 sm:$0xff]  }
  0x38   :  { %1009 = vmatpush2.bf16.msra.mxu1 %v1506_v57  ;;  %927 = vmatprep.subr.bf16.mxu0 %v1507_v58  ;;  %v2076_v57 = vld [vmem:[%s2305_s0 + $0x88] ss:$16 sps:$4 sm:$0xff]   ;;  %v1593_v58 = vld [vmem:[%s2304_s1 + $0x1cc] ss:$16 sps:$4 sm:$0xff]  }
  0x39   :  { %1010 = vmatprep.subr.bf16.mxu1 %v1509_v59  ;;  %v1596_v59 = vld [vmem:[%s2304_s1 + $0x3cc] ss:$16 sps:$4 sm:$0xff]  }
  0x3b   :  { %928 = vmatpush2.bf16.msra.mxu0 %v1511_v60  ;;  %v1591_v60 = vld [vmem:[%s2304_s1 + $0x1c8] ss:$16 sps:$4 sm:$0xff]  }
  0x3c   :  { %1011 = vmatpush2.bf16.msra.mxu1 %v1512_v61  ;;  %929 = vmatprep.subr.bf16.mxu0 %v1513_v62  ;;  %v1594_v61 = vld [vmem:[%s2304_s1 + $0x3c8] ss:$16 sps:$4 sm:$0xff]   ;;  %v1599_v62 = vld [vmem:[%s2304_s1 + $0x1ac] ss:$16 sps:$4 sm:$0xff]  }
  0x3d   :  { %1012 = vmatprep.subr.bf16.mxu1 %v1515_v63  ;;  %v1602_v63 = vld [vmem:[%s2304_s1 + $0x3ac] ss:$16 sps:$4 sm:$0xff]  }
  0x3f   :  { %930 = vmatpush2.bf16.msra.mxu0 %v1517_v0  ;;  %v1597_v0 = vld [vmem:[%s2304_s1 + $0x1a8] ss:$16 sps:$4 sm:$0xff]  }
  0x40   :  { %1013 = vmatpush2.bf16.msra.mxu1 %v1518_v1  ;;  %1065 = vmatprep.subr.bf16.mxu0 %v1527_v2  ;;  %v1600_v1 = vld [vmem:[%s2304_s1 + $0x3a8] ss:$16 sps:$4 sm:$0xff]   ;;  %v1611_v2 = vld [vmem:[%s2304_s1 + $0x18c] ss:$16 sps:$4 sm:$0xff]  }
  0x41   :  { %1148 = vmatprep.subr.bf16.mxu1 %v1530_v3  ;;  %v1612_v3 = vld [vmem:[%s2304_s1 + $0x388] ss:$16 sps:$4 sm:$0xff]  }
  0x42   :  { %932 = vmatmul.mubr.bf16.vlgmr.msra.gmra.mxu0 %v1873_v4 }
  0x43   :  { %1015 = vmatmul.mubr.bf16.vlgmr.msra.gmra.mxu1 %v1878_v5  ;;  %1066 = vmatpush1.bf16.msra.mxu0 %v1525_v6  ;;  %v1617_v6 = vld [vmem:[%s2304_s1 + $0x16c] ss:$16 sps:$4 sm:$0xff]  }
  0x44   :  { %1149 = vmatpush1.bf16.msra.mxu1 %v1528_v7  ;;  %1067 = vmatprep.subr.bf16.mxu0 %v1533_v8  ;;  %v1620_v7 = vld [vmem:[%s2304_s1 + $0x36c] ss:$16 sps:$4 sm:$0xff]   ;;  %v1615_v8 = vld [vmem:[%s2304_s1 + $0x168] ss:$16 sps:$4 sm:$0xff]  }
  0x45   :  { %1150 = vmatprep.subr.bf16.mxu1 %v1536_v9  ;;  %941 = vmatprep.mubr.bf16.mxu0 %v1895_v10  ;;  %v1618_v9 = vld [vmem:[%s2304_s1 + $0x368] ss:$16 sps:$4 sm:$0xff]  }
  0x46   :  { %1024 = vmatprep.mubr.bf16.mxu1 %v1900_v11 }
  0x47   :  { %1068 = vmatpush1.bf16.msra.mxu0 %v1531_v12  ;;  %v1629_v12 = vld [vmem:[%s2304_s1 + $0x14c] ss:$16 sps:$4 sm:$0xff]  }
  0x48   :  { %1151 = vmatpush1.bf16.msra.mxu1 %v1534_v13  ;;  %1069 = vmatprep.subr.bf16.mxu0 %v1539_v14  ;;  %v1632_v13 = vld [vmem:[%s2304_s1 + $0x34c] ss:$16 sps:$4 sm:$0xff]   ;;  %v1627_v14 = vld [vmem:[%s2304_s1 + $0x148] ss:$16 sps:$4 sm:$0xff]  }
  0x49   :  { %1152 = vmatprep.subr.bf16.mxu1 %v1542_v15  ;;  %v1630_v15 = vld [vmem:[%s2304_s1 + $0x348] ss:$16 sps:$4 sm:$0xff]  }
  0x4a   :  { %942 = vmatmul.mubr.bf16.gmra.mxu0 %v1927_v18 }
  0x4b   :  { %1025 = vmatmul.mubr.bf16.gmra.mxu1 %v1932_v19  ;;  %1070 = vmatpush1.bf16.msra.mxu0 %v1537_v16  ;;  %v1635_v16 = vld [vmem:[%s2304_s1 + $0x12c] ss:$16 sps:$4 sm:$0xff]  }
  0x4c   :  { %1153 = vmatpush1.bf16.msra.mxu1 %v1540_v17  ;;  %1071 = vmatprep.subr.bf16.mxu0 %v1545_v20  ;;  %v1638_v17 = vld [vmem:[%s2304_s1 + $0x32c] ss:$16 sps:$4 sm:$0xff]   ;;  %v1633_v20 = vld [vmem:[%s2304_s1 + $0x128] ss:$16 sps:$4 sm:$0xff]  }
  0x4d   :  { %1154 = vmatprep.subr.bf16.mxu1 %v1548_v21  ;;  %951 = vmatprep.mubr.bf16.mxu0 %v1943_v22  ;;  %v1636_v21 = vld [vmem:[%s2304_s1 + $0x328] ss:$16 sps:$4 sm:$0xff]  }
  0x4e   :  { %1034 = vmatprep.mubr.bf16.mxu1 %v1948_v23 }
  0x4f   :  { %1072 = vmatpush1.bf16.msra.mxu0 %v1543_v24  ;;  %v1641_v24 = vld [vmem:[%s2304_s1 + $0x10c] ss:$16 sps:$4 sm:$0xff]  }
  0x50   :  { %1155 = vmatpush1.bf16.msra.mxu1 %v1546_v25  ;;  %1073 = vmatprep.subr.bf16.mxu0 %v1551_v26  ;;  %v1644_v25 = vld [vmem:[%s2304_s1 + $0x30c] ss:$16 sps:$4 sm:$0xff]   ;;  %v1639_v26 = vld [vmem:[%s2304_s1 + $0x108] ss:$16 sps:$4 sm:$0xff]  }
  0x51   :  { %1156 = vmatprep.subr.bf16.mxu1 %v1554_v27  ;;  %v1642_v27 = vld [vmem:[%s2304_s1 + $0x308] ss:$16 sps:$4 sm:$0xff]  }
  0x52   :  { %952 = vmatmul.mubr.bf16.gmra.mxu0 %v1975_v30 }
  0x53   :  { %1035 = vmatmul.mubr.bf16.gmra.mxu1 %v1980_v31  ;;  %1074 = vmatpush1.bf16.msra.mxu0 %v1549_v28 }
  0x54   :  { %1157 = vmatpush1.bf16.msra.mxu1 %v1552_v29  ;;  %1075 = vmatprep.subr.bf16.mxu0 %v1557_v32 }
  0x55   :  { %1158 = vmatprep.subr.bf16.mxu1 %v1560_v33  ;;  %961 = vmatprep.mubr.bf16.mxu0 %v1991_v34 }
  0x56   :  { %1044 = vmatprep.mubr.bf16.mxu1 %v1996_v35 }
  0x57   :  { %1076 = vmatpush1.bf16.msra.mxu0 %v1555_v36 }
  0x58   :  { %1159 = vmatpush1.bf16.msra.mxu1 %v1558_v37  ;;  %1077 = vmatprep.subr.bf16.mxu0 %v1563_v38 }
  0x59   :  { %1160 = vmatprep.subr.bf16.mxu1 %v1566_v39 }
  0x5a   :  { %962 = vmatmul.mubr.bf16.gmra.mxu0 %v2023_v42 }
  0x5b   :  { %1045 = vmatmul.mubr.bf16.gmra.mxu1 %v2028_v43  ;;  %1078 = vmatpush1.bf16.msra.mxu0 %v1561_v40 }
  0x5c   :  { %1161 = vmatpush1.bf16.msra.mxu1 %v1564_v41  ;;  %1079 = vmatprep.subr.bf16.mxu0 %v1575_v44 }
  0x5d   :  { %1162 = vmatprep.subr.bf16.mxu1 %v1578_v45  ;;  %971 = vmatprep.mubr.bf16.mxu0 %v2039_v46 }
  0x5e   :  { %1054 = vmatprep.mubr.bf16.mxu1 %v2044_v47 }
  0x5f   :  { %1080 = vmatpush1.bf16.msra.mxu0 %v1573_v48 }
  0x60   :  { %1163 = vmatpush1.bf16.msra.mxu1 %v1576_v50  ;;  %1081 = vmatprep.subr.bf16.mxu0 %v1581_v52 }
  0x61   :  { %1164 = vmatprep.subr.bf16.mxu1 %v1584_v53 }
  0x62   :  { %972 = vmatmul.mubr.bf16.gmra.mxu0 %v2071_v56 }
  0x63   :  { %1055 = vmatmul.mubr.bf16.gmra.mxu1 %v2076_v57  ;;  %1082 = vmatpush2.bf16.msra.mxu0 %v1579_v54 }
  0x64   :  { %1165 = vmatpush2.bf16.msra.mxu1 %v1582_v55  ;;  %1083 = vmatprep.subr.bf16.mxu0 %v1593_v58 }
  0x65   :  { %1166 = vmatprep.subr.bf16.mxu1 %v1596_v59  ;;  %1097 = vmatprep.mubr.bf16.mxu0 %v1810_v49  ;;  %v1614_v49 = vld [vmem:[%s2304_s1 + $0x38c] ss:$16 sps:$4 sm:$0xff]  }
  0x66   :  { %1180 = vmatprep.mubr.bf16.mxu1 %v1818_v51  ;;  %v1609_v51 = vld [vmem:[%s2304_s1 + $0x188] ss:$16 sps:$4 sm:$0xff]  }
  0x67   :  { %1084 = vmatpush2.bf16.msra.mxu0 %v1591_v60 }
  0x68   :  { %1167 = vmatpush2.bf16.msra.mxu1 %v1594_v61  ;;  %1085 = vmatprep.subr.bf16.mxu0 %v1599_v62 }
  0x69   :  { %1168 = vmatprep.subr.bf16.mxu1 %v1602_v63 }
  0x6b   :  { %1086 = vmatpush2.bf16.msra.mxu0 %v1597_v0 }
  0x6c   :  { %1169 = vmatpush2.bf16.msra.mxu1 %v1600_v1  ;;  %1087 = vmatprep.subr.bf16.mxu0 %v1611_v2 }
  0x6d   :  { %1170 = vmatprep.subr.bf16.mxu1 %v1614_v49 }
  0x6f   :  { %1088 = vmatpush2.bf16.msra.mxu0 %v1609_v51 }
  0x70   :  { %1171 = vmatpush2.bf16.msra.mxu1 %v1612_v3  ;;  %1089 = vmatprep.subr.bf16.mxu0 %v1617_v6 }
  0x71   :  { %1172 = vmatprep.subr.bf16.mxu1 %v1620_v7 }
  0x73   :  { %1090 = vmatpush2.bf16.msra.mxu0 %v1615_v8 }
  0x74   :  { %1173 = vmatpush2.bf16.msra.mxu1 %v1618_v9  ;;  %1091 = vmatprep.subr.bf16.mxu0 %v1629_v12 }
  0x75   :  { %1174 = vmatprep.subr.bf16.mxu1 %v1632_v13 }
  0x77   :  { %1092 = vmatpush2.bf16.msra.mxu0 %v1627_v14 }
  0x78   :  { %1175 = vmatpush2.bf16.msra.mxu1 %v1630_v15  ;;  %1093 = vmatprep.subr.bf16.mxu0 %v1635_v16 }
  0x79   :  { %1176 = vmatprep.subr.bf16.mxu1 %v1638_v17 }
  0x7b   :  { %1094 = vmatpush2.bf16.msra.mxu0 %v1633_v20 }
  0x7c   :  { %1177 = vmatpush2.bf16.msra.mxu1 %v1636_v21  ;;  %1095 = vmatprep.subr.bf16.mxu0 %v1641_v24 }
  0x7d   :  { %1178 = vmatprep.subr.bf16.mxu1 %v1644_v25 }
  0x7f   :  { %1096 = vmatpush2.bf16.msra.mxu0 %v1639_v26 }
  0x80   :  { %1179 = vmatpush2.bf16.msra.mxu1 %v1642_v27 }
  0x82   :  { %1098 = vmatmul.mubr.bf16.vlgmr.msra.gmra.mxu0 %v1873_v4 }
  0x83   :  { %1181 = vmatmul.mubr.bf16.vlgmr.msra.gmra.mxu1 %v1878_v5  ;;  %1107 = vmatprep.mubr.bf16.mxu0 %v1895_v10 }
  0x84   :  { %1190 = vmatprep.mubr.bf16.mxu1 %v1900_v11 }
  0x8a   :  { %1108 = vmatmul.mubr.bf16.gmra.mxu0 %v1927_v18 }
  0x8b   :  { %1191 = vmatmul.mubr.bf16.gmra.mxu1 %v1932_v19  ;;  %1117 = vmatprep.mubr.bf16.mxu0 %v1943_v22 }
  0x8c   :  { %1200 = vmatprep.mubr.bf16.mxu1 %v1948_v23 }
  0x92   :  { %1118 = vmatmul.mubr.bf16.gmra.mxu0 %v1975_v30 }
  0x93   :  { %1201 = vmatmul.mubr.bf16.gmra.mxu1 %v1980_v31  ;;  %1127 = vmatprep.mubr.bf16.mxu0 %v1991_v34 }
  0x94   :  { %1210 = vmatprep.mubr.bf16.mxu1 %v1996_v35 }
  0x9a   :  { %1128 = vmatmul.mubr.bf16.gmra.mxu0 %v2023_v42 }
  0x9b   :  { %1211 = vmatmul.mubr.bf16.gmra.mxu1 %v2028_v43  ;;  %1137 = vmatprep.mubr.bf16.mxu0 %v2039_v46 }
  0x9c   :  { %1220 = vmatprep.mubr.bf16.mxu1 %v2044_v47 }
  0xa2   :  { %1138 = vmatmul.mubr.bf16.gmra.mxu0 %v2071_v56 }
  0xa3   :  { %1221 = vmatmul.mubr.bf16.gmra.mxu1 %v2076_v57 }
 0x102   :  { %v933_v4 = vpop.f32.mrf.mxu0 }
 0x103   :  { %v1016_v5 = vpop.f32.mrf.mxu1 }
 0x104   :  { %v1017_v10 = vadd.f32 %v1016_v5, %v933_v4  ;;  %v935_v11 = vpop.f32.mrf.mxu0 }
 0x105   :  { %v1018_v18 = vpop.f32.mrf.mxu1 }
 0x106   :  { %1231 = vst [vmem:[%s2306_s2] sm:$0xff] %v1017_v10  ;;  %v1019_v19 = vadd.f32 %v1018_v18, %v935_v11  ;;  %v937_v22 = vpop.f32.mrf.mxu0 }
 0x107   :  { %v1020_v23 = vpop.f32.mrf.mxu1 }
 0x108   :  { %1232 = vst [vmem:[%s2306_s2 + $0x8] sm:$0xff] %v1019_v19  ;;  %v1021_v28 = vadd.f32 %v1020_v23, %v937_v22  ;;  %v939_v29 = vpop.f32.mrf.mxu0 }
 0x109   :  { %v1022_v30 = vpop.f32.mrf.mxu1 }
 0x10a   :  { %1235 = vst [vmem:[%s2306_s2 + $0x20] sm:$0xff] %v1021_v28  ;;  %v1023_v31 = vadd.f32 %v1022_v30, %v939_v29  ;;  %v943_v32 = vpop.f32.mrf.mxu0 }
 0x10b   :  { %v1026_v33 = vpop.f32.mrf.mxu1 }
 0x10c   :  { %1236 = vst [vmem:[%s2306_s2 + $0x28] sm:$0xff] %v1023_v31  ;;  %v1027_v34 = vadd.f32 %v1026_v33, %v943_v32  ;;  %v945_v35 = vpop.f32.mrf.mxu0 }
 0x10d   :  { %v1028_v36 = vpop.f32.mrf.mxu1 }
 0x10e   :  { %1239 = vst [vmem:[%s2306_s2 + $0x40] sm:$0xff] %v1027_v34  ;;  %v1029_v37 = vadd.f32 %v1028_v36, %v945_v35  ;;  %v947_v38 = vpop.f32.mrf.mxu0 }
 0x10f   :  { %v1030_v39 = vpop.f32.mrf.mxu1 }
 0x110   :  { %1240 = vst [vmem:[%s2306_s2 + $0x48] sm:$0xff] %v1029_v37  ;;  %v1031_v40 = vadd.f32 %v1030_v39, %v947_v38  ;;  %v949_v41 = vpop.f32.mrf.mxu0 }
 0x111   :  { %v1032_v42 = vpop.f32.mrf.mxu1 }
 0x112   :  { %1243 = vst [vmem:[%s2306_s2 + $0x60] sm:$0xff] %v1031_v40  ;;  %v1033_v43 = vadd.f32 %v1032_v42, %v949_v41  ;;  %v953_v44 = vpop.f32.mrf.mxu0 }
 0x113   :  { %v1036_v45 = vpop.f32.mrf.mxu1 }
 0x114   :  { %1244 = vst [vmem:[%s2306_s2 + $0x68] sm:$0xff] %v1033_v43  ;;  %v1037_v46 = vadd.f32 %v1036_v45, %v953_v44  ;;  %v955_v47 = vpop.f32.mrf.mxu0 }
 0x115   :  { %v1038_v48 = vpop.f32.mrf.mxu1 }
 0x116   :  { %1247 = vst [vmem:[%s2306_s2 + $0x80] sm:$0xff] %v1037_v46  ;;  %v1039_v50 = vadd.f32 %v1038_v48, %v955_v47  ;;  %v957_v52 = vpop.f32.mrf.mxu0 }
 0x117   :  { %v1040_v53 = vpop.f32.mrf.mxu1 }
 0x118   :  { %1248 = vst [vmem:[%s2306_s2 + $0x88] sm:$0xff] %v1039_v50  ;;  %v1041_v54 = vadd.f32 %v1040_v53, %v957_v52  ;;  %v959_v55 = vpop.f32.mrf.mxu0 }
 0x119   :  { %v1042_v56 = vpop.f32.mrf.mxu1 }
 0x11a   :  { %1251 = vst [vmem:[%s2306_s2 + $0xa0] sm:$0xff] %v1041_v54  ;;  %v1043_v57 = vadd.f32 %v1042_v56, %v959_v55  ;;  %v963_v58 = vpop.f32.mrf.mxu0 }
 0x11b   :  { %v1046_v59 = vpop.f32.mrf.mxu1 }
 0x11c   :  { %1252 = vst [vmem:[%s2306_s2 + $0xa8] sm:$0xff] %v1043_v57  ;;  %v1047_v60 = vadd.f32 %v1046_v59, %v963_v58  ;;  %v965_v61 = vpop.f32.mrf.mxu0 }
 0x11d   :  { %v1048_v62 = vpop.f32.mrf.mxu1 }
 0x11e   :  { %1255 = vst [vmem:[%s2306_s2 + $0xc0] sm:$0xff] %v1047_v60  ;;  %v1049_v63 = vadd.f32 %v1048_v62, %v965_v61  ;;  %v967_v0 = vpop.f32.mrf.mxu0 }
 0x11f   :  { %v1050_v1 = vpop.f32.mrf.mxu1 }
 0x120   :  { %1256 = vst [vmem:[%s2306_s2 + $0xc8] sm:$0xff] %v1049_v63  ;;  %v1051_v2 = vadd.f32 %v1050_v1, %v967_v0  ;;  %v969_v49 = vpop.f32.mrf.mxu0 }
 0x121   :  { %v1052_v51 = vpop.f32.mrf.mxu1 }
 0x122   :  { %1259 = vst [vmem:[%s2306_s2 + $0xe0] sm:$0xff] %v1051_v2  ;;  %v1053_v3 = vadd.f32 %v1052_v51, %v969_v49  ;;  %v973_v6 = vpop.f32.mrf.mxu0 }
 0x123   :  { %v1056_v7 = vpop.f32.mrf.mxu1 }
 0x124   :  { %1260 = vst [vmem:[%s2306_s2 + $0xe8] sm:$0xff] %v1053_v3  ;;  %v1057_v8 = vadd.f32 %v1056_v7, %v973_v6  ;;  %v975_v9 = vpop.f32.mrf.mxu0 }
 0x125   :  { %v1058_v12 = vpop.f32.mrf.mxu1 }
 0x126   :  { %1263 = vst [vmem:[%s2306_s2 + $0x100] sm:$0xff] %v1057_v8  ;;  %v1059_v13 = vadd.f32 %v1058_v12, %v975_v9  ;;  %v977_v14 = vpop.f32.mrf.mxu0 }
 0x127   :  { %v1060_v15 = vpop.f32.mrf.mxu1 }
 0x128   :  { %1264 = vst [vmem:[%s2306_s2 + $0x108] sm:$0xff] %v1059_v13  ;;  %v1061_v16 = vadd.f32 %v1060_v15, %v977_v14  ;;  %v979_v17 = vpop.f32.mrf.mxu0 }
 0x129   :  { %v1062_v20 = vpop.f32.mrf.mxu1 }
 0x12a   :  { %1267 = vst [vmem:[%s2306_s2 + $0x120] sm:$0xff] %v1061_v16  ;;  %v1063_v21 = vadd.f32 %v1062_v20, %v979_v17 }
 0x12c   :  { %1268 = vst [vmem:[%s2306_s2 + $0x128] sm:$0xff] %v1063_v21 }
 0x142   :  { %v1099_v24 = vpop.f32.mrf.mxu0 }
 0x143   :  { %v1182_v25 = vpop.f32.mrf.mxu1 }
 0x144   :  { %v1183_v26 = vadd.f32 %v1182_v25, %v1099_v24  ;;  %v1101_v27 = vpop.f32.mrf.mxu0 }
 0x145   :  { %v1184_v4 = vpop.f32.mrf.mxu1 }
 0x146   :  { %1233 = vst [vmem:[%s2306_s2 + $0x10] sm:$0xff] %v1183_v26  ;;  %v1185_v5 = vadd.f32 %v1184_v4, %v1101_v27  ;;  %v1103_v10 = vpop.f32.mrf.mxu0 }
 0x147   :  { %v1186_v11 = vpop.f32.mrf.mxu1 }
 0x148   :  { %1234 = vst [vmem:[%s2306_s2 + $0x18] sm:$0xff] %v1185_v5  ;;  %v1187_v18 = vadd.f32 %v1186_v11, %v1103_v10  ;;  %v1105_v19 = vpop.f32.mrf.mxu0 }
 0x149   :  { %v1188_v22 = vpop.f32.mrf.mxu1 }
 0x14a   :  { %1237 = vst [vmem:[%s2306_s2 + $0x30] sm:$0xff] %v1187_v18  ;;  %v1189_v23 = vadd.f32 %v1188_v22, %v1105_v19  ;;  %v1109_v28 = vpop.f32.mrf.mxu0 }
 0x14b   :  { %v1192_v29 = vpop.f32.mrf.mxu1 }
 0x14c   :  { %1238 = vst [vmem:[%s2306_s2 + $0x38] sm:$0xff] %v1189_v23  ;;  %v1193_v30 = vadd.f32 %v1192_v29, %v1109_v28  ;;  %v1111_v31 = vpop.f32.mrf.mxu0 }
 0x14d   :  { %v1194_v32 = vpop.f32.mrf.mxu1 }
 0x14e   :  { %1241 = vst [vmem:[%s2306_s2 + $0x50] sm:$0xff] %v1193_v30  ;;  %v1195_v33 = vadd.f32 %v1194_v32, %v1111_v31  ;;  %v1113_v34 = vpop.f32.mrf.mxu0 }
 0x14f   :  { %v1196_v35 = vpop.f32.mrf.mxu1 }
 0x150   :  { %1242 = vst [vmem:[%s2306_s2 + $0x58] sm:$0xff] %v1195_v33  ;;  %v1197_v36 = vadd.f32 %v1196_v35, %v1113_v34  ;;  %v1115_v37 = vpop.f32.mrf.mxu0 }
 0x151   :  { %v1198_v38 = vpop.f32.mrf.mxu1 }
 0x152   :  { %1245 = vst [vmem:[%s2306_s2 + $0x70] sm:$0xff] %v1197_v36  ;;  %v1199_v39 = vadd.f32 %v1198_v38, %v1115_v37  ;;  %v1119_v40 = vpop.f32.mrf.mxu0 }
 0x153   :  { %v1202_v41 = vpop.f32.mrf.mxu1 }
 0x154   :  { %1246 = vst [vmem:[%s2306_s2 + $0x78] sm:$0xff] %v1199_v39  ;;  %v1203_v42 = vadd.f32 %v1202_v41, %v1119_v40  ;;  %v1121_v43 = vpop.f32.mrf.mxu0 }
 0x155   :  { %v1204_v44 = vpop.f32.mrf.mxu1 }
 0x156   :  { %1249 = vst [vmem:[%s2306_s2 + $0x90] sm:$0xff] %v1203_v42  ;;  %v1205_v45 = vadd.f32 %v1204_v44, %v1121_v43  ;;  %v1123_v46 = vpop.f32.mrf.mxu0 }
 0x157   :  { %v1206_v47 = vpop.f32.mrf.mxu1 }
 0x158   :  { %1250 = vst [vmem:[%s2306_s2 + $0x98] sm:$0xff] %v1205_v45  ;;  %v1207_v48 = vadd.f32 %v1206_v47, %v1123_v46  ;;  %v1125_v50 = vpop.f32.mrf.mxu0 }
 0x159   :  { %v1208_v52 = vpop.f32.mrf.mxu1 }
 0x15a   :  { %1253 = vst [vmem:[%s2306_s2 + $0xb0] sm:$0xff] %v1207_v48  ;;  %v1209_v53 = vadd.f32 %v1208_v52, %v1125_v50  ;;  %v1129_v54 = vpop.f32.mrf.mxu0 }
 0x15b   :  { %v1212_v55 = vpop.f32.mrf.mxu1 }
 0x15c   :  { %1254 = vst [vmem:[%s2306_s2 + $0xb8] sm:$0xff] %v1209_v53  ;;  %v1213_v56 = vadd.f32 %v1212_v55, %v1129_v54  ;;  %v1131_v57 = vpop.f32.mrf.mxu0 }
 0x15d   :  { %v1214_v58 = vpop.f32.mrf.mxu1 }
 0x15e   :  { %1257 = vst [vmem:[%s2306_s2 + $0xd0] sm:$0xff] %v1213_v56  ;;  %v1215_v59 = vadd.f32 %v1214_v58, %v1131_v57  ;;  %v1133_v60 = vpop.f32.mrf.mxu0 }
 0x15f   :  { %v1216_v61 = vpop.f32.mrf.mxu1 }
 0x160   :  { %1258 = vst [vmem:[%s2306_s2 + $0xd8] sm:$0xff] %v1215_v59  ;;  %v1217_v62 = vadd.f32 %v1216_v61, %v1133_v60  ;;  %v1135_v63 = vpop.f32.mrf.mxu0 }
 0x161   :  { %v1218_v0 = vpop.f32.mrf.mxu1 }
 0x162   :  { %1261 = vst [vmem:[%s2306_s2 + $0xf0] sm:$0xff] %v1217_v62  ;;  %v1219_v1 = vadd.f32 %v1218_v0, %v1135_v63  ;;  %v1139_v2 = vpop.f32.mrf.mxu0 }
 0x163   :  { %v1222_v49 = vpop.f32.mrf.mxu1 }
 0x164   :  { %1262 = vst [vmem:[%s2306_s2 + $0xf8] sm:$0xff] %v1219_v1  ;;  %v1223_v51 = vadd.f32 %v1222_v49, %v1139_v2  ;;  %v1141_v3 = vpop.f32.mrf.mxu0 }
 0x165   :  { %v1224_v6 = vpop.f32.mrf.mxu1 }
 0x166   :  { %1265 = vst [vmem:[%s2306_s2 + $0x110] sm:$0xff] %v1223_v51  ;;  %v1225_v7 = vadd.f32 %v1224_v6, %v1141_v3  ;;  %v1143_v8 = vpop.f32.mrf.mxu0 }
 0x167   :  { %v1226_v9 = vpop.f32.mrf.mxu1 }
 0x168   :  { %1266 = vst [vmem:[%s2306_s2 + $0x118] sm:$0xff] %v1225_v7  ;;  %v1227_v12 = vadd.f32 %v1226_v9, %v1143_v8  ;;  %v1145_v13 = vpop.f32.mrf.mxu0 }
 0x169   :  { %v1228_v14 = vpop.f32.mrf.mxu1 }
 0x16a   :  { %1269 = vst [vmem:[%s2306_s2 + $0x130] sm:$0xff] %v1227_v12  ;;  %v1229_v15 = vadd.f32 %v1228_v14, %v1145_v13 }
 0x16c   :  { %1270 = vst [vmem:[%s2306_s2 + $0x138] sm:$0xff] %v1229_v15 }

// kernel: pitch_shift.5
= control target key start
LH: loop header
LB: loop body
LE: loop exit
PB: predicated region body
PF: predicated region fallthrough
CT: control target
= control target key end

     0   :  { %s5376_s18 = smov 0   ;;  %s5378_s19 = smov 0   ;;  %s7238_s0 = inlined_call_operand.vmem [shape: f32[2,128,256], index: 0, kind: input, shape index: {}]   ;;  %s7239_s1 = inlined_call_operand.vmem [shape: f32[2,128,256], index: 1, kind: input, shape index: {}]   ;;  %s7240_s2 = inlined_call_operand.vmem [shape: f32[2,1,256], index: 2, kind: input, shape index: {}]   ;;  %s7241_s3 = inlined_call_operand.vmem [shape: f32[128,128], index: 3, kind: input, shape index: {}]   ;;  %s7242_s4 = inlined_call_operand.vmem [shape: bf16[2,128,256], index: 4, kind: output, shape index: {0}]   ;;  %s7243_s5 = inlined_call_operand.vmem [shape: bf16[2,128,256], index: 5, kind: output, shape index: {1}]  }
   0x1   :  { %s5380_s20 = smov 0   ;;  %s5382_s21 = smov 0  }
   0x2   :  { %s5384_s22 = smov 0   ;;  %s5386_s23 = smov 0  }
   0x3   :  { %s5388_s24 = smov 0  }
   0x4 LB: > { %s31_s25 = sadd.s32 1, %s5329_s22  ;;  %s35_s26 = sadd.s32 1, %s5333_s23  ;;  %s5337_s24 = sphi %s5388_s24, %s16_s24   ;;  %s5333_s23 = sphi %s5386_s23, %s7279_s23   ;;  %s5329_s22 = sphi %s5384_s22, %s7278_s22   ;;  %s5325_s21 = sphi %s5382_s21, %s7277_s21   ;;  %s5321_s20 = sphi %s5380_s20, %s7276_s20   ;;  %s5317_s19 = sphi %s5378_s19, %s7275_s19   ;;  %s5313_s18 = sphi %s5376_s18, %s7274_s18  }
   0x5   : > { %p33_p0 = scmp.ge.s32.totalorder %s31_s25, 2  ;;  %s4658_s27 = sadd.s32 4294967295, %s5337_s24  }
   0x6   : > { %p53_p1 = scmp.ne.s32.totalorder %s5317_s19, %s5313_s18  ;;  %p54_p2 = scmp.eq.s32.totalorder %s5337_s24, 0 }
   0x7   : > { %s7281_s25 = smov (%p33_p0, %s31_s25), 0  ;;  %s7283_s26 = smov (!%p33_p0, %s35_s26), %s5333_s23 }
   0x8   : > { %p37_p3 = scmp.ge.s32.totalorder %s7283_s26, 2  ;;  %p166_p4 = scmp.eq.s32.totalorder %s4658_s27, 3 }
   0x9   : > { %s39_s28 = ssub.s32 %s5329_s22, %s7281_s25  ;;  %p5422_p5 = por %p54_p2, %p53_p1 }
   0xa   : > { %s7285_s26 = smov (%p37_p3, %s7283_s26), 0  ;;  %p5428_p6 = por %p166_p4, %p53_p1 }
   0xb   : > { %s42_s6 = ssub.s32 %s5333_s23, %s7285_s26  ;;  %s46_s8 = sadd.s32 1, %s5317_s19 }
   0xc   : > { %s43_s7 = sor.u32 %s42_s6, %s39_s28  ;;  %p4661_p8 = scmp.ge.s32.totalorder %s5337_s24, 4 }
   0xd   : > { %p44_p7 = scmp.eq.s32.totalorder %s43_s7, 0 }
   0xe   : > { %221 = sbr.rel (%p4661_p8) target bundleno = 47 (0x2f), region = 20 }
   0xf   : > { %s5436_s9 = scalar_select %p44_p7, %s5317_s19, %s46_s8  }
  0x13   : > { %224 = sbr.rel (!%p5422_p5) target bundleno = 33 (0x21), region = 24  ;;  %s226_s10 = sand.u32 (%p5422_p5), 1, %s5317_s19  }
  0x14   : > { %s4663_s11 = sshll.u32 (%p5422_p5), %s5329_s22, 5  ;;  %s4662_s12 = sshll.u32 (%p5422_p5), %s226_s10, 7 }
  0x15   : > { %s233_s13 = sadd.s32 (%p5422_p5), %s5333_s23, %s4663_s11  ;;  %s228_s27 = scalar_lea.vmem (%p5422_p5), [#allocation3], %s4662_s12 }
  0x16   : > { %s4664_s14 = sshll.u32 (%p5422_p5), %s233_s13, 3 }
  0x17   : > { %s5447_s17 = scalar_lea.vmem (%p5422_p5), %s7238_s0, %s4664_s14 }
  0x18   : > { %v294_v0 = vld [vmem:[%s5447_s17] sm:$0xff]  ;;  %v296_v1 = vld [vmem:[%s5447_s17 + $0x10] sm:$0xff] }
  0x19   : > { %v298_v2 = vld [vmem:[%s5447_s17 + $0x20] sm:$0xff]  ;;  %295 = vst [vmem:[%s228_s27] sm:$0xff] %v294_v0  ;;  %297 = vst [vmem:[%s228_s27 + $0x8] sm:$0xff] %v296_v1  ;;  %v300_v3 = vld [vmem:[%s5447_s17 + $0x30] sm:$0xff] }
  0x1a   : > { %299 = vst [vmem:[%s228_s27 + $0x10] sm:$0xff] %v298_v2  ;;  %v302_v4 = vld [vmem:[%s5447_s17 + $0x40] sm:$0xff]  ;;  %v304_v5 = vld [vmem:[%s5447_s17 + $0x50] sm:$0xff]  ;;  %301 = vst [vmem:[%s228_s27 + $0x18] sm:$0xff] %v300_v3 }
  0x1b   : > { %303 = vst [vmem:[%s228_s27 + $0x20] sm:$0xff] %v302_v4  ;;  %305 = vst [vmem:[%s228_s27 + $0x28] sm:$0xff] %v304_v5  ;;  %v306_v6 = vld [vmem:[%s5447_s17 + $0x60] sm:$0xff]  ;;  %v308_v7 = vld [vmem:[%s5447_s17 + $0x70] sm:$0xff] }
  0x1c   : > { %v310_v8 = vld [vmem:[%s5447_s17 + $0x80] sm:$0xff]  ;;  %307 = vst [vmem:[%s228_s27 + $0x30] sm:$0xff] %v306_v6  ;;  %309 = vst [vmem:[%s228_s27 + $0x38] sm:$0xff] %v308_v7  ;;  %v312_v9 = vld [vmem:[%s5447_s17 + $0x90] sm:$0xff] }
  0x1d   : > { %311 = vst [vmem:[%s228_s27 + $0x40] sm:$0xff] %v310_v8  ;;  %v314_v10 = vld [vmem:[%s5447_s17 + $0xa0] sm:$0xff]  ;;  %v316_v11 = vld [vmem:[%s5447_s17 + $0xb0] sm:$0xff]  ;;  %313 = vst [vmem:[%s228_s27 + $0x48] sm:$0xff] %v312_v9 }
  0x1e   : > { %315 = vst [vmem:[%s228_s27 + $0x50] sm:$0xff] %v314_v10  ;;  %317 = vst [vmem:[%s228_s27 + $0x58] sm:$0xff] %v316_v11  ;;  %v318_v12 = vld [vmem:[%s5447_s17 + $0xc0] sm:$0xff]  ;;  %v320_v13 = vld [vmem:[%s5447_s17 + $0xd0] sm:$0xff] }
  0x1f   : > { %v322_v14 = vld [vmem:[%s5447_s17 + $0xe0] sm:$0xff]  ;;  %319 = vst [vmem:[%s228_s27 + $0x60] sm:$0xff] %v318_v12  ;;  %321 = vst [vmem:[%s228_s27 + $0x68] sm:$0xff] %v320_v13  ;;  %v324_v15 = vld [vmem:[%s5447_s17 + $0xf0] sm:$0xff] }
  0x20   : > { %323 = vst [vmem:[%s228_s27 + $0x70] sm:$0xff] %v322_v14  ;;  %325 = vst [vmem:[%s228_s27 + $0x78] sm:$0xff] %v324_v15 }
  0x21 PF: > { %331 = sbr.rel (!%p5422_p5) target bundleno = 47 (0x2f), region = 62  ;;  %s333_s28 = sand.u32 (%p5422_p5), 1, %s5317_s19  }
  0x22   : > { %s4666_s6 = sshll.u32 (%p5422_p5), %s5329_s22, 5  ;;  %s4665_s7 = sshll.u32 (%p5422_p5), %s333_s28, 7 }
  0x23   : > { %s340_s8 = sadd.s32 (%p5422_p5), %s5333_s23, %s4666_s6  ;;  %s335_s29 = scalar_lea.vmem (%p5422_p5), [#allocation4], %s4665_s7 }
  0x24   : > { %s4667_s10 = sshll.u32 (%p5422_p5), %s340_s8, 3 }
  0x25   : > { %s5473_s13 = scalar_lea.vmem (%p5422_p5), %s7239_s1, %s4667_s10 }
  0x26   : > { %v401_v16 = vld [vmem:[%s5473_s13] sm:$0xff]  ;;  %v403_v17 = vld [vmem:[%s5473_s13 + $0x10] sm:$0xff] }
  0x27   : > { %v405_v18 = vld [vmem:[%s5473_s13 + $0x20] sm:$0xff]  ;;  %402 = vst [vmem:[%s335_s29] sm:$0xff] %v401_v16  ;;  %404 = vst [vmem:[%s335_s29 + $0x8] sm:$0xff] %v403_v17  ;;  %v407_v19 = vld [vmem:[%s5473_s13 + $0x30] sm:$0xff] }
  0x28   : > { %406 = vst [vmem:[%s335_s29 + $0x10] sm:$0xff] %v405_v18  ;;  %v409_v20 = vld [vmem:[%s5473_s13 + $0x40] sm:$0xff]  ;;  %v411_v21 = vld [vmem:[%s5473_s13 + $0x50] sm:$0xff]  ;;  %408 = vst [vmem:[%s335_s29 + $0x18] sm:$0xff] %v407_v19 }
  0x29   : > { %410 = vst [vmem:[%s335_s29 + $0x20] sm:$0xff] %v409_v20  ;;  %412 = vst [vmem:[%s335_s29 + $0x28] sm:$0xff] %v411_v21  ;;  %v413_v22 = vld [vmem:[%s5473_s13 + $0x60] sm:$0xff]  ;;  %v415_v23 = vld [vmem:[%s5473_s13 + $0x70] sm:$0xff] }
  0x2a   : > { %v417_v24 = vld [vmem:[%s5473_s13 + $0x80] sm:$0xff]  ;;  %414 = vst [vmem:[%s335_s29 + $0x30] sm:$0xff] %v413_v22  ;;  %416 = vst [vmem:[%s335_s29 + $0x38] sm:$0xff] %v415_v23  ;;  %v419_v25 = vld [vmem:[%s5473_s13 + $0x90] sm:$0xff] }
  0x2b   : > { %418 = vst [vmem:[%s335_s29 + $0x40] sm:$0xff] %v417_v24  ;;  %v421_v26 = vld [vmem:[%s5473_s13 + $0xa0] sm:$0xff]  ;;  %v423_v27 = vld [vmem:[%s5473_s13 + $0xb0] sm:$0xff]  ;;  %420 = vst [vmem:[%s335_s29 + $0x48] sm:$0xff] %v419_v25 }
  0x2c   : > { %422 = vst [vmem:[%s335_s29 + $0x50] sm:$0xff] %v421_v26  ;;  %424 = vst [vmem:[%s335_s29 + $0x58] sm:$0xff] %v423_v27  ;;  %v425_v28 = vld [vmem:[%s5473_s13 + $0xc0] sm:$0xff]  ;;  %v427_v29 = vld [vmem:[%s5473_s13 + $0xd0] sm:$0xff] }
  0x2d   : > { %v429_v30 = vld [vmem:[%s5473_s13 + $0xe0] sm:$0xff]  ;;  %426 = vst [vmem:[%s335_s29 + $0x60] sm:$0xff] %v425_v28  ;;  %428 = vst [vmem:[%s335_s29 + $0x68] sm:$0xff] %v427_v29  ;;  %v431_v31 = vld [vmem:[%s5473_s13 + $0xf0] sm:$0xff] }
  0x2e   : > { %430 = vst [vmem:[%s335_s29 + $0x70] sm:$0xff] %v429_v30  ;;  %432 = vst [vmem:[%s335_s29 + $0x78] sm:$0xff] %v431_v31 }
  0x2f PF: > { %p4668_p9 = scmp.ge.s32.totalorder %s5337_s24, 1  ;;  %p447_p10 = scmp.lt.s32.totalorder %s5337_s24, 5 }
  0x31   : > { %p448_p11 = pnand %p4668_p9, %p447_p10 }
  0x32   : > { %s454_s14 = sand.u32 (!%p448_p11), 1, %s5313_s18   ;;  %p504_p12 = scmp.lt.s32.totalorder (!%p448_p11), %s5321_s20, 1 }
  0x33   : > { %451 = sbr.rel (%p448_p11) target bundleno = 776 (0x308), region = 104  ;;  %s5503_s28 = sshll.u32 (!%p448_p11), %s454_s14, 7 }
  0x34   : > { %p506_p13 = scmp.lt.s32.totalorder (!%p448_p11), %s5325_s21, 1  ;;  %s5507_s6 = scalar_lea.vmem (!%p448_p11), [#allocation3], %s5503_s28 }
  0x38   : > { %v535_v32 = vld [vmem:[%s7241_s3] sm:$0xff]  ;;  %v533_v35 = vld [vmem:[%s5507_s6 + $0x70] sm:$0xff]  ;;  %s505_s7 = scalar_select %p504_p12, %s5321_s20, 1  ;;  %v532_v36 = vld [vmem:[%s5507_s6 + $0x68] sm:$0xff]  ;;  %v698_v1 = vlaneseq }
  0x39   : > { %v543_v33 = vld [vmem:[%s7241_s3 + $0x40] sm:$0xff]  ;;  %5032 = vmatprep.mubr.f32.mxu0 %v535_v32  ;;  %s507_s8 = scalar_select %p506_p13, %s5325_s21, 1  ;;  %v529_v40 = vld [vmem:[%s5507_s6 + $0x50] sm:$0xff]  ;;  %v528_v41 = vld [vmem:[%s5507_s6 + $0x48] sm:$0xff] }
  0x3a   : > { %5044 = vmatprep.mubr.f32.mxu1 %v543_v33  ;;  %v534_v34 = vld [vmem:[%s5507_s6 + $0x78] sm:$0xff]  ;;  %s4673_s10 = sshll.u32 %s505_s7, 1  ;;  %v531_v37 = vld [vmem:[%s5507_s6 + $0x60] sm:$0xff]  ;;  %v525_v44 = vld [vmem:[%s5507_s6 + $0x30] sm:$0xff]  ;;  %v5572_v2 = vshrl.u32 %v698_v1, 7 }
  0x3b   : > { %5000 = vmatprep.subr.mxu0 %v534_v34  ;;  %5056 = vmatprep.subr.mxu1 %v534_v34  ;;  %s509_s11 = sadd.s32 %s4673_s10, %s507_s8  ;;  %v530_v38 = vld [vmem:[%s5507_s6 + $0x58] sm:$0xff]  ;;  %v527_v42 = vld [vmem:[%s5507_s6 + $0x40] sm:$0xff]  ;;  %v524_v45 = vld [vmem:[%s5507_s6 + $0x28] sm:$0xff]  ;;  %s5877_s10 = scalar_lea.vmem [#allocation4], %s5503_s28 }
  0x3c   : > { %5001 = vmatpush3.msra.mxu0 %v534_v34  ;;  %5072 = vmatpush3.msra.mxu1 %v534_v34  ;;  %s510_s29 = scalar_lea.vmem %s7240_s2, %s509_s11  ;;  %v526_v43 = vld [vmem:[%s5507_s6 + $0x38] sm:$0xff]  ;;  %v523_v46 = vld [vmem:[%s5507_s6 + $0x20] sm:$0xff]  ;;  %v521_v48 = vld [vmem:[%s5507_s6 + $0x10] sm:$0xff]  ;;  %s4671_s28 = sshll.u32 %s454_s14, 6 }
  0x3d   : > { %5002 = vmatprep.subr.mxu0 %v533_v35  ;;  %5057 = vmatprep.subr.mxu1 %v533_v35  ;;  %v517_v39 = vld [vmem:[%s510_s29] sm:$0x1]  ;;  %v520_v49 = vld [vmem:[%s5507_s6 + $0x8] sm:$0xff]  ;;  %v519_v50 = vld [vmem:[%s5507_s6] sm:$0xff]  ;;  %s6055_s18 = scalar_lea.vmem [#allocation5], %s4671_s28  ;;  %s6058_s14 = scalar_lea.vmem [#allocation6], %s4671_s28 }
  0x3e   : > { %5003 = vmatpush3.msra.mxu0 %v533_v35  ;;  %5073 = vmatpush3.msra.mxu1 %v533_v35  ;;  %518 = vst [vmem:[#allocation2] sm:$0x1] %v517_v39  ;;  %v522_v47 = vld [vmem:[%s5507_s6 + $0x18] sm:$0xff]  ;;  %v536_v51 = vld [vmem:[%s7241_s3 + $0x8] sm:$0xff]  ;;  %v537_v53 = vld [vmem:[%s7241_s3 + $0x10] sm:$0xff] }
  0x3f   : > { %5004 = vmatprep.subr.mxu0 %v532_v36  ;;  %5058 = vmatprep.subr.mxu1 %v532_v36  ;;  %v544_v52 = vld [vmem:[%s7241_s3 + $0x48] sm:$0xff]  ;;  %v545_v54 = vld [vmem:[%s7241_s3 + $0x50] sm:$0xff]  ;;  %v538_v55 = vld [vmem:[%s7241_s3 + $0x18] sm:$0xff]  ;;  %v5339_v35 = vmov 683565275  }
  0x40   : > { %5005 = vmatpush3.msra.mxu0 %v532_v36  ;;  %5074 = vmatpush3.msra.mxu1 %v532_v36  ;;  %v546_v56 = vld [vmem:[%s7241_s3 + $0x58] sm:$0xff]  ;;  %v539_v57 = vld [vmem:[%s7241_s3 + $0x20] sm:$0xff]  ;;  %v540_v59 = vld [vmem:[%s7241_s3 + $0x28] sm:$0xff]  ;;  %v5340_v39 = vmov 2475754826  }
  0x41   : > { %5006 = vmatprep.subr.mxu0 %v531_v37  ;;  %5059 = vmatprep.subr.mxu1 %v531_v37  ;;  %v547_v58 = vld [vmem:[%s7241_s3 + $0x60] sm:$0xff]  ;;  %v548_v60 = vld [vmem:[%s7241_s3 + $0x68] sm:$0xff]  ;;  %v541_v61 = vld [vmem:[%s7241_s3 + $0x30] sm:$0xff] }
  0x42   : > { %5007 = vmatpush3.msra.mxu0 %v531_v37  ;;  %5075 = vmatpush3.msra.mxu1 %v531_v37  ;;  %v549_v62 = vld [vmem:[%s7241_s3 + $0x70] sm:$0xff]  ;;  %v542_v63 = vld [vmem:[%s7241_s3 + $0x38] sm:$0xff] }
  0x43   : > { %5008 = vmatprep.subr.mxu0 %v530_v38  ;;  %5060 = vmatprep.subr.mxu1 %v530_v38  ;;  %v550_v0 = vld [vmem:[%s7241_s3 + $0x78] sm:$0xff] }
  0x44   : > { %5009 = vmatpush3.msra.mxu0 %v530_v38  ;;  %5076 = vmatpush3.msra.mxu1 %v530_v38 }
  0x45   : > { %5010 = vmatprep.subr.mxu0 %v529_v40  ;;  %5061 = vmatprep.subr.mxu1 %v529_v40  ;;  %v5574_v3 = vld [vmem:[#allocation2] ss:$0 sm:$0xff] }
  0x46   : > { %5011 = vmatpush3.msra.mxu0 %v529_v40  ;;  %5077 = vmatpush3.msra.mxu1 %v529_v40 }
  0x47   : > { %5012 = vmatprep.subr.mxu0 %v528_v41  ;;  %5062 = vmatprep.subr.mxu1 %v528_v41 }
  0x48   : > { %5013 = vmatpush3.msra.mxu0 %v528_v41  ;;  %5078 = vmatpush3.msra.mxu1 %v528_v41  ;;  %v5341_v41 = vmov 2131351028  }
  0x49   : > { %5014 = vmatprep.subr.mxu0 %v527_v42  ;;  %5063 = vmatprep.subr.mxu1 %v527_v42 }
  0x4a   : > { %5015 = vmatpush3.msra.mxu0 %v527_v42  ;;  %5079 = vmatpush3.msra.mxu1 %v527_v42 }
  0x4b   : > { %5016 = vmatprep.subr.mxu0 %v526_v43  ;;  %5064 = vmatprep.subr.mxu1 %v526_v43 }
  0x4c   : > { %5017 = vmatpush3.msra.mxu0 %v526_v43  ;;  %5080 = vmatpush3.msra.mxu1 %v526_v43  ;;  %v5342_v43 = vmov 2102212464  }
  0x4d   : > { %5018 = vmatprep.subr.mxu0 %v525_v44  ;;  %5065 = vmatprep.subr.mxu1 %v525_v44 }
  0x4e   : > { %5019 = vmatpush3.msra.mxu0 %v525_v44  ;;  %5081 = vmatpush3.msra.mxu1 %v525_v44 }
  0x4f   : > { %5020 = vmatprep.subr.mxu0 %v524_v45  ;;  %5066 = vmatprep.subr.mxu1 %v524_v45 }
  0x50   : > { %5021 = vmatpush3.msra.mxu0 %v524_v45  ;;  %5082 = vmatpush3.msra.mxu1 %v524_v45  ;;  %v5343_v45 = vmov 920167782  }
  0x51   : > { %5022 = vmatprep.subr.mxu0 %v523_v46  ;;  %5067 = vmatprep.subr.mxu1 %v523_v46 }
  0x52   : > { %5023 = vmatpush3.msra.mxu0 %v523_v46  ;;  %5083 = vmatpush3.msra.mxu1 %v523_v46 }
  0x53   : > { %5024 = vmatprep.subr.mxu0 %v522_v47  ;;  %5068 = vmatprep.subr.mxu1 %v522_v47 }
  0x54   : > { %5025 = vmatpush3.msra.mxu0 %v522_v47  ;;  %5084 = vmatpush3.msra.mxu1 %v522_v47 }
  0x55   : > { %5026 = vmatprep.subr.mxu0 %v521_v48  ;;  %5069 = vmatprep.subr.mxu1 %v521_v48 }
  0x56   : > { %5027 = vmatpush3.msra.mxu0 %v521_v48  ;;  %5085 = vmatpush3.msra.mxu1 %v521_v48 }
  0x57   : > { %5028 = vmatprep.subr.mxu0 %v520_v49  ;;  %5070 = vmatprep.subr.mxu1 %v520_v49 }
  0x58   : > { %5029 = vmatpush3.msra.mxu0 %v520_v49  ;;  %5086 = vmatpush3.msra.mxu1 %v520_v49 }
  0x59   : > { %5030 = vmatprep.subr.mxu0 %v519_v50  ;;  %5071 = vmatprep.subr.mxu1 %v519_v50 }
  0x5a   : > { %5031 = vmatpush3.msra.mxu0 %v519_v50  ;;  %5087 = vmatpush3.msra.mxu1 %v519_v50 }
  0x5b   : > { %5033 = vmatmul.mubr.f32.vlgmr.msra.gmra.mxu0 %v536_v51  ;;  %5045 = vmatmul.mubr.f32.vlgmr.msra.gmra.mxu1 %v544_v52  ;;  %v5344_v52 = vmov 1326507024  }
  0x5c   : > { %5035 = vmatprep.mubr.f32.mxu0 %v537_v53  ;;  %5047 = vmatprep.mubr.f32.mxu1 %v545_v54 }
  0x5f   : > { %5036 = vmatmul.mubr.f32.gmra.mxu0 %v538_v55  ;;  %5048 = vmatmul.mubr.f32.gmra.mxu1 %v546_v56 }
  0x60   : > { %5038 = vmatprep.mubr.f32.mxu0 %v539_v57  ;;  %5050 = vmatprep.mubr.f32.mxu1 %v547_v58 }
  0x63   : > { %5039 = vmatmul.mubr.f32.gmra.mxu0 %v540_v59  ;;  %5051 = vmatmul.mubr.f32.gmra.mxu1 %v548_v60 }
  0x64   : > { %5041 = vmatprep.mubr.f32.mxu0 %v541_v61  ;;  %5053 = vmatprep.mubr.f32.mxu1 %v549_v62 }
  0x67   : > { %5042 = vmatmul.mubr.f32.gmra.mxu0 %v542_v63  ;;  %5054 = vmatmul.mubr.f32.gmra.mxu1 %v550_v0 }
 0x11b   : > { %v5034_v4 = vpop.f32.mrf.mxu0  ;;  %v5046_v5 = vpop.f32.mrf.mxu1 }
 0x11c   : > { %v5577_v6 = vadd.f32 %v5574_v3, %v5034_v4  ;;  %v5580_v7 = vadd.f32 %v5574_v3, %v5046_v5 }
 0x11d   : > { %v617_v8 = vpop.f32.mrf.mxu0 }
 0x11e   : > { %v838_v9 = vand.u32 2147483647, %v5577_v6  ;;  %v841_v10 = vand.u32 2139095040, %v5577_v6  ;;  %v1662_v11 = vand.u32 2147483647, %v5580_v7  ;;  %v1665_v12 = vand.u32 2139095040, %v5580_v7 }
 0x11f   : > { %v5587_v14 = vadd.f32 %v5574_v3, %v617_v8 }
 0x120   : > { %v842_v13 = vshrl.u32 %v841_v10, 23  ;;  %v845_v15 = vand.u32 8388607, %v838_v9  ;;  %v1666_v16 = vshrl.u32 %v1665_v12, 23  ;;  %v1669_v17 = vand.u32 8388607, %v1662_v11 }
 0x121   : > { %v738_v20 = vand.u32 2139095040, %v5587_v14 }
 0x122   : > { %v4678_v18 = vadd.s32 4294967169, %v842_v13  ;;  %v4710_v19 = vadd.s32 4294967169, %v1666_v16  ;;  %v846_v22 = vor.u32 8388608, %v845_v15  ;;  %v1670_v23 = vor.u32 8388608, %v1669_v17 }
 0x123   : > { %v739_v25 = vshrl.u32 %v738_v20, 23 }
 0x124   : > { %v848_v21 = vadd.s32 1, %v4678_v18  ;;  %v1672_v24 = vadd.s32 1, %v4710_v19  ;;  %v5594_v31 = vshll.u32 %v846_v22, 8  ;;  %v5598_v33 = vshll.u32 %v1670_v23, 8 }
 0x125   : > { %v4674_v27 = vadd.s32 4294967169, %v739_v25 }
 0x126   : > { %vm849_vm0 = vcmp.gt.s32.totalorder %v848_v21, 0  ;;  %vm1673_vm1 = vcmp.gt.s32.totalorder %v1672_v24, 0 }
 0x127   : > { %v850_v26 = vsel %vm849_vm0, %v848_v21, 0  ;;  %v1674_v30 = vsel %vm1673_vm1, %v1672_v24, 0  ;;  %v5601_v38 = vadd.s32 1, %v4674_v27  ;;  %vm840_vm1 = vcmp.lt.s32.totalorder %v5577_v6, 0 }
 0x128   : > { %v851_v28 = vshrl.u32 %v850_v26, 5  ;;  %v852_v29 = vand.u32 31, %v850_v26  ;;  %v5596_v32 = vshrl.u32 %v1674_v30, 5  ;;  %v1676_v37 = vand.u32 31, %v1674_v30 }
 0x129   : > { %vm746_vm11 = vcmp.gt.s32.totalorder %v5601_v38, 0 }
 0x12a   : > { %v853_v34 = vsub.s32 32, %v852_v29  ;;  %v855_v36 = vshll.u32 %v5339_v35, %v852_v29  ;;  %v858_v40 = vshll.u32 %v5340_v39, %v852_v29  ;;  %v861_v42 = vshll.u32 %v5341_v41, %v852_v29 }
 0x12b   : > { %v864_v44 = vshll.u32 %v5342_v43, %v852_v29  ;;  %v867_v46 = vshll.u32 %v5343_v45, %v852_v29  ;;  %vm870_vm2 = vcmp.lt.s32.totalorder %v851_v28, 1  ;;  %vm871_vm3 = vcmp.lt.s32.totalorder %v851_v28, 2 }
 0x12c   : > { %v856_v47 = vshrl.u32 %v5340_v39, %v853_v34  ;;  %v859_v48 = vshrl.u32 %v5341_v41, %v853_v34  ;;  %v862_v49 = vshrl.u32 %v5342_v43, %v853_v34  ;;  %v854_v50 = vshrl.u32 %v5339_v35, %v853_v34 }
 0x12d   : > { %v865_v51 = vshrl.u32 %v5343_v45, %v853_v34  ;;  %v868_v53 = vshrl.u32 %v5344_v52, %v853_v34  ;;  %v1677_v57 = vsub.s32 32, %v1676_v37  ;;  %vm872_vm4 = vcmp.lt.s32.totalorder %v851_v28, 3 }
 0x12e   : > { %v857_v54 = vor.u32 %v856_v47, %v855_v36  ;;  %v860_v55 = vor.u32 %v859_v48, %v858_v40  ;;  %v863_v56 = vor.u32 %v862_v49, %v861_v42  ;;  %vm873_vm5 = vcmp.lt.s32.totalorder %v851_v28, 4 }
 0x12f   : > { %v866_v58 = vor.u32 %v865_v51, %v864_v44  ;;  %v869_v59 = vor.u32 %v868_v53, %v867_v46  ;;  %v1679_v5 = vshll.u32 %v5339_v35, %v1676_v37  ;;  %v1680_v12 = vshrl.u32 %v5340_v39, %v1677_v57 }
 0x130   : > { %v874_v60 = vsel %vm870_vm2, %v854_v50, %v857_v54  ;;  %v875_v61 = vsel %vm873_vm5, %v863_v56, 2102212464  ;;  %v878_v62 = vsel %vm870_vm2, %v857_v54, %v860_v55  ;;  %v882_v63 = vsel %vm870_vm2, %v860_v55, %v863_v56 }
 0x131   : > { %v876_v0 = vsel %vm872_vm4, %v860_v55, %v875_v61  ;;  %v879_v1 = vsel %vm873_vm5, %v866_v58, 920167782  ;;  %v883_v4 = vsel %vm873_vm5, %v869_v59, 1326507024  ;;  %v1682_v13 = vshll.u32 %v5340_v39, %v1676_v37 }
 0x132   : > { %v880_v8 = vsel %vm872_vm4, %v863_v56, %v879_v1  ;;  %v884_v10 = vsel %vm872_vm4, %v866_v58, %v883_v4  ;;  %v877_v15 = vsel %vm871_vm3, %v874_v60, %v876_v0  ;;  %v1683_v18 = vshrl.u32 %v5341_v41, %v1677_v57  ;;  %v657_v58 = vpop.f32.mrf.mxu1 }
 0x133   : > { %v881_v16 = vsel %vm871_vm3, %v878_v62, %v880_v8  ;;  %v885_v17 = vsel %vm871_vm3, %v882_v63, %v884_v10  ;;  %v1681_v23 = vor.u32 %v1680_v12, %v1679_v5  ;;  %v1685_v25 = vshll.u32 %v5341_v41, %v1676_v37 }
 0x134   : > { %v5624_v19 = vmul.u32.u64.low %v5594_v31, %v885_v17  ;;  %v5625_v20 = vmul.u32.u64.high %v5594_v31, %v885_v17, %v5624_v19  ;;  %v5628_v21 = vmul.u32.u64.low %v5594_v31, %v881_v16  ;;  %v5629_v22 = vmul.u32.u64.high %v5594_v31, %v881_v16, %v5628_v21 }
 0x135   : > { %v1684_v24 = vor.u32 %v1683_v18, %v1682_v13  ;;  %v1686_v26 = vshrl.u32 %v5342_v43, %v1677_v57  ;;  %v1678_v27 = vshrl.u32 %v5339_v35, %v1677_v57  ;;  %v1688_v28 = vshll.u32 %v5342_v43, %v1676_v37 }
 0x136   : > { %v1689_v29 = vshrl.u32 %v5343_v45, %v1677_v57  ;;  %v1692_v30 = vshrl.u32 %v5344_v52, %v1677_v57  ;;  %v893_v34 = vmul.u32 %v5594_v31, %v877_v15  ;;  %v1691_v40 = vshll.u32 %v5343_v45, %v1676_v37 }
 0x137   : > { %v1687_v36 = vor.u32 %v1686_v26, %v1685_v25  ;;  %vm1694_vm6 = vcmp.lt.s32.totalorder %v5596_v32, 1  ;;  %vm895_vm7 = vc.u32 %v5625_v20, %v5628_v21  ;;  %v896_v42 = vadd.s32 1, %v5629_v22 }
 0x138   : > { %v1690_v44 = vor.u32 %v1689_v29, %v1688_v28  ;;  %vm1695_vm8 = vcmp.lt.s32.totalorder %v5596_v32, 2  ;;  %v1693_v46 = vor.u32 %v1692_v30, %v1691_v40  ;;  %vm1696_vm9 = vcmp.lt.s32.totalorder %v5596_v32, 3 }
 0x139   : > { %vm1697_vm10 = vcmp.lt.s32.totalorder %v5596_v32, 4  ;;  %v1702_v47 = vsel %vm1694_vm6, %v1681_v23, %v1684_v24  ;;  %v897_v31 = vsel %vm895_vm7, %v896_v42, %v5629_v22  ;;  %v1706_v49 = vsel %vm1694_vm6, %v1684_v24, %v1687_v36 }
 0x13a   : > { %v1699_v48 = vsel %vm1697_vm10, %v1687_v36, 2102212464  ;;  %v1703_v37 = vsel %vm1697_vm10, %v1690_v44, 920167782  ;;  %v898_v50 = vadd.s32 %v897_v31, %v893_v34  ;;  %v1698_v51 = vsel %vm1694_vm6, %v1678_v27, %v1681_v23 }
 0x13b   : > { %v1704_v53 = vsel %vm1696_vm9, %v1687_v36, %v1703_v37  ;;  %v1707_v54 = vsel %vm1697_vm10, %v1693_v46, 1326507024  ;;  %v1700_v55 = vsel %vm1696_vm9, %v1684_v24, %v1699_v48  ;;  %v735_v1 = vand.u32 2147483647, %v5587_v14 }
 0x13c   : > { %v1705_v56 = vsel %vm1695_vm8, %v1702_v47, %v1704_v53  ;;  %v1708_v57 = vsel %vm1696_vm9, %v1690_v44, %v1707_v54  ;;  %v899_v59 = vadd.s32 536870912, %v898_v50  ;;  %v1701_v5 = vsel %vm1695_vm8, %v1698_v51, %v1700_v55 }
 0x13d   : > { %v1709_v60 = vsel %vm1695_vm8, %v1706_v49, %v1708_v57  ;;  %v5654_v61 = vmul.u32.u64.low %v5598_v33, %v1705_v56  ;;  %v5655_v62 = vmul.u32.u64.high %v5598_v33, %v1705_v56, %v5654_v61  ;;  %v5667_v8 = vadd.f32 %v5574_v3, %v657_v58 }
 0x13e   : > { %v5658_v63 = vmul.u32.u64.low %v5598_v33, %v1709_v60  ;;  %v5659_v0 = vmul.u32.u64.high %v5598_v33, %v1709_v60, %v5658_v63  ;;  %v5662_v4 = vshrl.u32 %v899_v59, 30  ;;  %v747_v10 = vsel %vm746_vm11, %v5601_v38, 0 }
 0x13f   : > { %v1720_v13 = vadd.s32 1, %v5655_v62  ;;  %v1717_v15 = vmul.u32 %v5598_v33, %v1701_v5  ;;  %v742_v16 = vand.u32 8388607, %v735_v1  ;;  %v749_v18 = vand.u32 31, %v747_v10 }
 0x140   : > { %v901_v12 = vshll.u32 %v5662_v4, 30  ;;  %vm1719_vm12 = vc.u32 %v5659_v0, %v5654_v61  ;;  %v1562_v19 = vand.u32 2139095040, %v5667_v8  ;;  %v894_v29 = vadd.s32 %v5628_v21, %v5625_v20 }
 0x141   : > { %v1721_v32 = vsel %vm1719_vm12, %v1720_v13, %v5655_v62  ;;  %v743_v24 = vor.u32 8388608, %v742_v16  ;;  %v750_v26 = vsub.s32 32, %v749_v18  ;;  %v5683_v34 = vshrl.u32 %v747_v10, 5 }
 0x142   : > { %v902_v17 = vsub.s32 %v898_v50, %v901_v12  ;;  %v1722_v22 = vadd.s32 %v1721_v32, %v1717_v15  ;;  %v1563_v27 = vshrl.u32 %v1562_v19, 23  ;;  %v1718_v42 = vadd.s32 %v5654_v61, %v5659_v0 }
 0x143   : > { %v5685_v36 = vshll.u32 %v743_v24, 8  ;;  %v762_v44 = vshrl.u32 %v5343_v45, %v750_v26  ;;  %v753_v31 = vshrl.u32 %v5340_v39, %v750_v26  ;;  %v756_v48 = vshrl.u32 %v5341_v41, %v750_v26 }
 0x144   : > { %v904_v23 = vsub.s32 0, %v902_v17  ;;  %v1723_v38 = vadd.s32 536870912, %v1722_v22  ;;  %v4706_v46 = vadd.s32 4294967169, %v1563_v27  ;;  %v759_v20 = vshrl.u32 %v5342_v43, %v750_v26 }
 0x145   : > { %v752_v21 = vshll.u32 %v5339_v35, %v749_v18  ;;  %v761_v37 = vshll.u32 %v5342_v43, %v749_v18  ;;  %v765_v49 = vshrl.u32 %v5344_v52, %v750_v26  ;;  %v755_v53 = vshll.u32 %v5340_v39, %v749_v18 }
 0x146   : > { %v4679_v25 = vmin.u32 %v904_v23, %v902_v17  ;;  %v5678_v28 = vshrl.u32 %v1723_v38, 30  ;;  %v758_v54 = vshll.u32 %v5341_v41, %v749_v18  ;;  %v764_v58 = vshll.u32 %v5343_v45, %v749_v18 }
 0x147   : > { %v763_v57 = vor.u32 %v762_v44, %v761_v37  ;;  %v754_v60 = vor.u32 %v753_v31, %v752_v21  ;;  %v757_v61 = vor.u32 %v756_v48, %v755_v53  ;;  %v751_v13 = vshrl.u32 %v5339_v35, %v750_v26 }
 0x148   : > { %v906_v33 = vclz %v4679_v25  ;;  %v1725_v30 = vshll.u32 %v5678_v28, 30  ;;  %v760_v62 = vor.u32 %v759_v20, %v758_v54  ;;  %v766_v10 = vor.u32 %v765_v49, %v764_v58 }
 0x149   : > { %vm767_vm14 = vcmp.lt.s32.totalorder %v5683_v34, 1  ;;  %vm770_vm15 = vcmp.lt.s32.totalorder %v5683_v34, 4  ;;  %vm768_vm0 = vcmp.lt.s32.totalorder %v5683_v34, 2  ;;  %vm769_vm2 = vcmp.lt.s32.totalorder %v5683_v34, 3 }
 0x14a   : > { %v4680_v40 = vadd.s32 4294967294, %v906_v33  ;;  %v5689_v47 = vsub.s32 %v1722_v22, %v1725_v30  ;;  %v776_v32 = vsel %vm770_vm15, %v763_v57, 920167782  ;;  %v779_v19 = vsel %vm767_vm14, %v757_v61, %v760_v62 }
 0x14b   : > { %v772_v23 = vsel %vm770_vm15, %v760_v62, 2102212464  ;;  %v777_v38 = vsel %vm769_vm2, %v760_v62, %v776_v32  ;;  %v780_v24 = vsel %vm770_vm15, %v766_v10, 1326507024  ;;  %v771_v26 = vsel %vm767_vm14, %v751_v13, %v754_v60 }
 0x14c   : > { %vm4681_vm13 = vcmp.lt.s32.totalorder %v4680_v40, 0  ;;  %v1728_v51 = vsub.s32 0, %v5689_v47  ;;  %v781_v27 = vsel %vm769_vm2, %v763_v57, %v780_v24  ;;  %v773_v48 = vsel %vm769_vm2, %v757_v61, %v772_v23 }
 0x14d   : > { %v909_v50 = vsel %vm4681_vm13, 0, %v4680_v40  ;;  %v782_v40 = vsel %vm768_vm0, %v779_v19, %v781_v27  ;;  %v1569_v20 = vadd.s32 1, %v4706_v46  ;;  %v924_v57 = vsub.s32 4, %v5662_v4 }
 0x14e   : > { %v910_v55 = vsub.s32 32, %v909_v50  ;;  %v914_v56 = vsub.s32 4294967266, %v909_v50  ;;  %v4711_v59 = vmin.u32 %v1728_v51, %v5689_v47  ;;  %v911_v63 = vshll.u32 %v902_v17, %v909_v50 }
 0x14f   : > { %v775_v17 = vsel %vm767_vm14, %v754_v60, %v757_v61  ;;  %v5726_v49 = vmul.u32.u64.low %v5685_v36, %v782_v40  ;;  %v5727_v50 = vmul.u32.u64.high %v5685_v36, %v782_v40, %v5726_v49  ;;  %v1559_v58 = vand.u32 2147483647, %v5667_v8 }
 0x150   : > { %v912_v0 = vshrl.u32 %v894_v29, %v910_v55  ;;  %v915_v5 = vadd.s32 127, %v914_v56  ;;  %v1730_v12 = vclz %v4711_v59  ;;  %v778_v30 = vsel %vm768_vm0, %v775_v17, %v777_v38 }
 0x151   : > { %v5730_v54 = vmul.u32.u64.low %v5685_v36, %v778_v30  ;;  %v5731_v55 = vmul.u32.u64.high %v5685_v36, %v778_v30, %v5730_v54  ;;  %vm1570_vm4 = vcmp.gt.s32.totalorder %v1569_v20, 0  ;;  %vm5740_vm5 = vcmp.le.f32.partialorder %v838_v9, 0.7853982 }
 0x152   : > { %v913_v15 = vor.u32 %v912_v0, %v911_v63  ;;  %v916_v16 = vshll.u32 %v915_v5, 23  ;;  %v4712_v18 = vadd.s32 4294967294, %v1730_v12  ;;  %v1571_v60 = vsel %vm1570_vm4, %v1569_v20, 0 }
 0x153   : > { %vm792_vm6 = vc.u32 %v5727_v50, %v5730_v54  ;;  %v793_v34 = vadd.s32 1, %v5731_v55  ;;  %v925_v9 = vsel %vm840_vm1, %v924_v57, %v5662_v4  ;;  %vm1664_vm7 = vcmp.lt.s32.totalorder %v5580_v7, 0 }
 0x154   : > { %v917_v22 = vor.u32 4788187, %v916_v16  ;;  %v920_v25 = vcvt.s32.f32 %v913_v15  ;;  %vm4713_vm3 = vcmp.lt.s32.totalorder %v4712_v18, 0  ;;  %v1566_v5 = vand.u32 8388607, %v1559_v58 }
 0x155   : > { %v1733_v29 = vsel %vm4713_vm3, 0, %v4712_v18  ;;  %v1573_v10 = vand.u32 31, %v1571_v60  ;;  %v794_v15 = vsel %vm792_vm6, %v793_v34, %v5731_v55  ;;  %v5760_v32 = vshrl.u32 %v1571_v60, 5 }
 0x156   : > { %v918_v33 = vand.u32 2147483647, %v917_v22  ;;  %v1734_v44 = vsub.s32 32, %v1733_v29  ;;  %v1738_v31 = vsub.s32 4294967266, %v1733_v29  ;;  %v1735_v37 = vshll.u32 %v5689_v47, %v1733_v29 }
 0x157   : > { %v774_v47 = vsel %vm768_vm0, %v771_v26, %v773_v48  ;;  %v1574_v18 = vsub.s32 32, %v1573_v10  ;;  %v1576_v4 = vshll.u32 %v5339_v35, %v1573_v10  ;;  %v1579_v19 = vshll.u32 %v5340_v39, %v1573_v10 }
 0x158   : > { %v921_v21 = vmul.f32 %v920_v25, %v918_v33  ;;  %v1736_v51 = vshrl.u32 %v1718_v42, %v1734_v44  ;;  %v1739_v53 = vadd.s32 127, %v1738_v31  ;;  %v790_v0 = vmul.u32 %v5685_v36, %v774_v47 }
 0x159   : > { %v1582_v36 = vshll.u32 %v5341_v41, %v1573_v10  ;;  %v1577_v23 = vshrl.u32 %v5340_v39, %v1574_v18  ;;  %v1580_v38 = vshrl.u32 %v5341_v41, %v1574_v18  ;;  %v1585_v24 = vshll.u32 %v5342_v43, %v1573_v10 }
 0x15a   : > { %v922_v56 = vxor.u32 2147483648, %v921_v21  ;;  %v1737_v46 = vor.u32 %v1736_v51, %v1735_v37  ;;  %v1740_v59 = vshll.u32 %v1739_v53, 23  ;;  %v795_v16 = vadd.s32 %v794_v15, %v790_v0  ;;  %v5037_v37 = vpop.f32.mrf.mxu0 }
 0x15b   : > { %v1583_v26 = vshrl.u32 %v5342_v43, %v1574_v18  ;;  %v1586_v27 = vshrl.u32 %v5343_v45, %v1574_v18  ;;  %v1589_v33 = vshrl.u32 %v5344_v52, %v1574_v18  ;;  %v927_v29 = vsel %vm5740_vm5, 0, %v925_v9 }
 0x15c   : > { %v923_v61 = vsel %vm840_vm1, %v922_v56, %v921_v21  ;;  %v1741_v63 = vor.u32 4788187, %v1740_v59  ;;  %v1744_v13 = vcvt.s32.f32 %v1737_v46  ;;  %v796_v22 = vadd.s32 536870912, %v795_v16 }
 0x15d   : > { %v926_v62 = vsel %vm5740_vm5, %v5577_v6, %v923_v61  ;;  %v1578_v40 = vor.u32 %v1577_v23, %v1576_v4  ;;  %v1581_v44 = vor.u32 %v1580_v38, %v1579_v19  ;;  %v1567_v31 = vor.u32 8388608, %v1566_v5 }
 0x15e   : > { %5216 = vcosq.f32 %v926_v62  ;;  %v1742_v12 = vand.u32 2147483647, %v1741_v63  ;;  %v5773_v30 = vshrl.u32 %v796_v22, 30  ;;  %v1584_v48 = vor.u32 %v1583_v26, %v1582_v36 }
 0x15f   : > { %5218 = vsinq.f32 %v926_v62  ;;  %v1587_v20 = vor.u32 %v1586_v27, %v1585_v24  ;;  %v1588_v21 = vshll.u32 %v5343_v45, %v1573_v10  ;;  %vm5778_vm8 = vcmp.le.f32.partialorder %v1662_v11, 0.7853982 }
 0x160   : > { %v1745_v17 = vmul.f32 %v1744_v13, %v1742_v12  ;;  %v798_v51 = vshll.u32 %v5773_v30, 30  ;;  %vm1591_vm9 = vcmp.lt.s32.totalorder %v5760_v32, 1  ;;  %vm1594_vm10 = vcmp.lt.s32.totalorder %v5760_v32, 4 }
 0x161   : > { %v1590_v55 = vor.u32 %v1589_v33, %v1588_v21  ;;  %v1599_v56 = vsel %vm1591_vm9, %v1578_v40, %v1581_v44  ;;  %v1600_v57 = vsel %vm1594_vm10, %v1587_v20, 920167782  ;;  %v2676_v11 = vadd.s32 3, %v927_v29 }
 0x162   : > { %v1746_v25 = vxor.u32 2147483648, %v1745_v17  ;;  %v5791_v46 = vsub.s32 %v795_v16, %v798_v51  ;;  %vm1593_vm11 = vcmp.lt.s32.totalorder %v5760_v32, 3  ;;  %v5795_v59 = vadd.f32 %v5574_v3, %v5037_v37  ;;  %v5049_v16 = vpop.f32.mrf.mxu1 }
 0x163   : > { %v1575_v47 = vshrl.u32 %v5339_v35, %v1574_v18  ;;  %vm1592_vm12 = vcmp.lt.s32.totalorder %v5760_v32, 2  ;;  %v1601_v60 = vsel %vm1593_vm11, %v1584_v48, %v1600_v57  ;;  %v1607_v42 = vshll.u32 %v1567_v31, 8 }
 0x164   : > { %v1747_v53 = vsel %vm1664_vm7, %v1746_v25, %v1745_v17  ;;  %v801_v62 = vsub.s32 0, %v5791_v46  ;;  %v1596_v63 = vsel %vm1594_vm10, %v1584_v48, 2102212464  ;;  %v1602_v34 = vsel %vm1592_vm12, %v1599_v56, %v1601_v60 }
 0x165   : > { %v1750_v61 = vsel %vm5778_vm8, %v5580_v7, %v1747_v53  ;;  %v1603_v9 = vsel %vm1591_vm9, %v1581_v44, %v1584_v48  ;;  %v1604_v0 = vsel %vm1594_vm10, %v1590_v55, 1326507024  ;;  %v931_v13 = vand.u32 3, %v927_v29 }
 0x166   : > { %v5813_v5 = vmul.u32.u64.low %v1607_v42, %v1602_v34  ;;  %v5814_v10 = vmul.u32.u64.high %v1607_v42, %v1602_v34, %v5813_v5  ;;  %vm737_vm13 = vcmp.lt.s32.totalorder %v5587_v14, 0  ;;  %v4675_v15 = vmin.u32 %v801_v62, %v5791_v46 }
 0x167   : > { %5220 = vcosq.f32 %v1750_v61  ;;  %v1595_v17 = vsel %vm1591_vm9, %v1575_v47, %v1578_v40  ;;  %v1597_v4 = vsel %vm1593_vm11, %v1581_v44, %v1596_v63  ;;  %v1605_v19 = vsel %vm1593_vm11, %v1587_v20, %v1604_v0 }
 0x168   : > { %v2677_v36 = vand.u32 3, %v2676_v11  ;;  %vm5827_vm14 = vcmp.le.f32.partialorder %v735_v1, 0.7853982  ;;  %v803_v23 = vclz %v4675_v15  ;;  %v1606_v38 = vsel %vm1592_vm12, %v1603_v9, %v1605_v19 }
 0x169   : > { %v1748_v24 = vsub.s32 4, %v5678_v28  ;;  %5222 = vsinq.f32 %v1750_v61  ;;  %v1047_v25 = vand.u32 2139095040, %v5795_v59  ;;  %v5836_v26 = vadd.f32 %v5574_v3, %v5049_v16 }
 0x16a   : > { %vm932_vm15 = vcmp.lt.s32.totalorder %v931_v13, 2  ;;  %vm933_vm0 = vcmp.eq.s32.totalorder %v931_v13, 0  ;;  %v4676_v27 = vadd.s32 4294967294, %v803_v23  ;;  %v821_v1 = vsub.s32 4, %v5773_v30 }
 0x16b   : > { %v5217_v12 = vpop.eup %5216  ;;  %v1598_v33 = vsel %vm1592_vm12, %v1595_v17, %v1597_v4  ;;  %v5841_v44 = vmul.u32.u64.low %v1607_v42, %v1606_v38  ;;  %v5842_v31 = vmul.u32.u64.high %v1607_v42, %v1606_v38, %v5841_v44  ;;  %vm936_vm1 = vcmp.eq.s32.totalorder %v931_v13, 2 }
 0x16c   : > { %v5219_v18 = vpop.eup %5218  ;;  %v937_v40 = vxor.u32 2147483648, %v5217_v12  ;;  %vm2679_vm2 = vcmp.eq.s32.totalorder %v2677_v36, 0  ;;  %vm4677_vm3 = vcmp.lt.s32.totalorder %v4676_v27, 0  ;;  %v1617_v48 = vadd.s32 1, %v5814_v10 }
 0x16d   : > { %v934_v29 = vxor.u32 2147483648, %v5219_v18  ;;  %vm930_vm4 = vweird.f32 %v5577_v6  ;;  %v1749_v20 = vsel %vm1664_vm7, %v1748_v24, %v5678_v28  ;;  %v791_v32 = vadd.s32 %v5730_v54, %v5727_v50 }
 0x16e   : > { %v806_v21 = vsel %vm4677_vm3, 0, %v4676_v27  ;;  %v1048_v37 = vshrl.u32 %v1047_v25, 23  ;;  %v822_v55 = vsel %vm737_vm13, %v821_v1, %v5773_v30  ;;  %v1614_v56 = vmul.u32 %v1607_v42, %v1598_v33 }
 0x16f   : > { %v807_v51 = vsub.s32 32, %v806_v21  ;;  %v811_v53 = vsub.s32 4294967266, %v806_v21  ;;  %v935_v57 = vsel %vm933_vm0, %v5217_v12, %v934_v29  ;;  %v938_v11 = vsel %vm936_vm1, %v937_v40, %v5219_v18 }
 0x170   : > { %vm1616_vm5 = vc.u32 %v5842_v31, %v5813_v5  ;;  %v4686_v47 = vadd.s32 4294967169, %v1048_v37  ;;  %v808_v28 = vshll.u32 %v5791_v46, %v806_v21  ;;  %vm2682_vm6 = vcmp.eq.s32.totalorder %v2677_v36, 2 }
 0x171   : > { %v809_v60 = vshrl.u32 %v791_v32, %v807_v51  ;;  %v812_v50 = vadd.s32 127, %v811_v53  ;;  %v1618_v54 = vsel %vm1616_vm5, %v1617_v48, %v5814_v10  ;;  %v1751_v61 = vsel %vm5778_vm8, 0, %v1749_v20 }
 0x172   : > { %v824_v30 = vsel %vm5827_vm14, 0, %v822_v55  ;;  %v1619_v42 = vadd.s32 %v1618_v54, %v1614_v56  ;;  %v2681_v62 = vsel %vm2679_vm2, %v5217_v12, %v934_v29  ;;  %v2684_v63 = vsel %vm2682_vm6, %v937_v40, %v5219_v18 }
 0x173   : > { %v810_v34 = vor.u32 %v809_v60, %v808_v28  ;;  %v813_v9 = vshll.u32 %v812_v50, 23  ;;  %v939_v0 = vsel %vm932_vm15, %v935_v57, %v938_v11  ;;  %v1044_v15 = vand.u32 2147483647, %v5795_v59 }
 0x174   : > { %v1620_v46 = vadd.s32 536870912, %v1619_v42  ;;  %v1054_v10 = vadd.s32 1, %v4686_v47  ;;  %v5866_v16 = vpop.eup %5220  ;;  %vm2678_vm7 = vcmp.lt.s32.totalorder %v2677_v36, 2  ;;  %v5868_v49 = vand.u32 3, %v1751_v61  ;;  %v5880_v36 = vld [vmem:[%s5877_s10 + $0x8] sm:$0xff] }
 0x175   : > { %v3508_v17 = vadd.s32 3, %v1751_v61  ;;  %v814_v4 = vor.u32 4788187, %v813_v9  ;;  %v2685_v19 = vsel %vm2678_vm7, %v2681_v62, %v2684_v63  ;;  %v2572_v23 = vadd.s32 3, %v824_v30 }
 0x176   : > { %v5870_v12 = vshrl.u32 %v1620_v46, 30  ;;  %vm1055_vm8 = vcmp.gt.s32.totalorder %v1054_v10, 0  ;;  %v5872_v18 = vpop.eup %5222  ;;  %v940_v13 = vsel %vm930_vm4, nan, %v939_v0  ;;  %v817_v24 = vcvt.s32.f32 %v810_v34 }
 0x177   : > { %v815_v38 = vand.u32 2147483647, %v814_v4  ;;  %v1056_v25 = vsel %vm1055_vm8, %v1054_v10, 0  ;;  %v1761_v27 = vxor.u32 2147483648, %v5866_v16  ;;  %v1051_v33 = vand.u32 8388607, %v1044_v15 }
 0x178   : > { %v1622_v1 = vshll.u32 %v5870_v12, 30  ;;  %v1058_v29 = vand.u32 31, %v1056_v25  ;;  %vm1757_vm9 = vcmp.eq.s32.totalorder %v5868_v49, 0  ;;  %vm1760_vm10 = vcmp.eq.s32.totalorder %v5868_v49, 2 }
 0x179   : > { %v5888_v40 = vand.u32 3, %v3508_v17  ;;  %v818_v44 = vmul.f32 %v817_v24, %v815_v38  ;;  %v1758_v48 = vxor.u32 2147483648, %v5872_v18  ;;  %v5891_v20 = vand.u32 3, %v824_v30 }
 0x17a   : > { %v5893_v32 = vsub.s32 %v1619_v42, %v1622_v1  ;;  %v1059_v21 = vsub.s32 32, %v1058_v29  ;;  %v5896_v37 = vmul.f32 %v940_v13, %v5880_v36  ;;  %v5900_v51 = vsel %vm930_vm4, nan, %v2685_v19 }
 0x17b   : > { %v819_v53 = vxor.u32 2147483648, %v818_v44  ;;  %v5902_v55 = vand.u32 3, %v2572_v23  ;;  %v5907_v56 = vsel %vm1760_vm10, %v1761_v27, %v5872_v18  ;;  %v1615_v57 = vadd.s32 %v5813_v5, %v5842_v31 }
 0x17c   : > { %v1625_v11 = vsub.s32 0, %v5893_v32  ;;  %v1052_v47 = vor.u32 8388608, %v1051_v33  ;;  %v1062_v6 = vshrl.u32 %v5340_v39, %v1059_v21  ;;  %v1065_v60 = vshrl.u32 %v5341_v41, %v1059_v21 }
 0x17d   : > { %v820_v28 = vsel %vm737_vm13, %v819_v53, %v818_v44  ;;  %v1068_v50 = vshrl.u32 %v5342_v43, %v1059_v21  ;;  %v5922_v54 = vsel %vm1757_vm9, %v5866_v16, %v1758_v48  ;;  %v5928_v61 = vshrl.u32 %v1056_v25, 5 }
 0x17e   : > { %v823_v5 = vsel %vm5827_vm14, %v5587_v14, %v820_v28  ;;  %v4707_v31 = vmin.u32 %v1625_v11, %v5893_v32  ;;  %v1061_v30 = vshll.u32 %v5339_v35, %v1058_v29  ;;  %v1064_v42 = vshll.u32 %v5340_v39, %v1058_v29 }
 0x17f   : > { %5224 = vcosq.f32 %v823_v5  ;;  %v1067_v62 = vshll.u32 %v5341_v41, %v1058_v29  ;;  %v1645_v34 = vsub.s32 4, %v5870_v12  ;;  %v5934_v9 = vshll.u32 %v1052_v47, 8 }
 0x180   : > { %5226 = vsinq.f32 %v823_v5  ;;  %v1627_v63 = vclz %v4707_v31  ;;  %v1063_v0 = vor.u32 %v1062_v6, %v1061_v30  ;;  %v1066_v22 = vor.u32 %v1065_v60, %v1064_v42 }
 0x181   : > { %v1069_v46 = vor.u32 %v1068_v50, %v1067_v62  ;;  %v1070_v10 = vshll.u32 %v5342_v43, %v1058_v29  ;;  %v1071_v4 = vshrl.u32 %v5343_v45, %v1059_v21  ;;  %v1073_v19 = vshll.u32 %v5343_v45, %v1058_v29 }
 0x182   : > { %v4708_v17 = vadd.s32 4294967294, %v1627_v63  ;;  %v1074_v23 = vshrl.u32 %v5344_v52, %v1059_v21  ;;  %vm1756_vm11 = vcmp.lt.s32.totalorder %v5868_v49, 2  ;;  %vm3511_vm12 = vcmp.eq.s32.totalorder %v5888_v40, 0 }
 0x183   : > { %vm3514_vm13 = vcmp.eq.s32.totalorder %v5888_v40, 2  ;;  %v1060_v13 = vshrl.u32 %v5339_v35, %v1059_v21  ;;  %vm1076_vm14 = vcmp.lt.s32.totalorder %v5928_v61, 1  ;;  %vm1077_vm15 = vcmp.lt.s32.totalorder %v5928_v61, 2 }
 0x184   : > { %v1871_v38 = vand.u32 2139095040, %v5836_v26  ;;  %vm1561_vm0 = vcmp.lt.s32.totalorder %v5667_v8, 0  ;;  %vm4709_vm1 = vcmp.lt.s32.totalorder %v4708_v17, 0  ;;  %v1072_v24 = vor.u32 %v1071_v4, %v1070_v10 }
 0x185   : > { %v1075_v25 = vor.u32 %v1074_v23, %v1073_v19  ;;  %vm1079_vm2 = vcmp.lt.s32.totalorder %v5928_v61, 4  ;;  %v1630_v1 = vsel %vm4709_vm1, 0, %v4708_v17  ;;  %vm1078_vm3 = vcmp.lt.s32.totalorder %v5928_v61, 3 }
 0x186   : > { %v1080_v33 = vsel %vm1076_vm14, %v1060_v13, %v1063_v0  ;;  %v1081_v29 = vsel %vm1079_vm2, %v1069_v46, 2102212464  ;;  %vm833_vm4 = vcmp.eq.s32.totalorder %v5891_v20, 2  ;;  %vm2578_vm5 = vcmp.eq.s32.totalorder %v5902_v55, 2 }
 0x187   : > { %v1631_v44 = vsub.s32 32, %v1630_v1  ;;  %v1635_v21 = vsub.s32 4294967266, %v1630_v1  ;;  %v1084_v53 = vsel %vm1076_vm14, %v1063_v0, %v1066_v22  ;;  %v1088_v11 = vsel %vm1076_vm14, %v1066_v22, %v1069_v46 }
 0x188   : > { %vm830_vm6 = vcmp.eq.s32.totalorder %v5891_v20, 0  ;;  %vm2575_vm7 = vcmp.eq.s32.totalorder %v5902_v55, 0  ;;  %v1632_v47 = vshll.u32 %v5893_v32, %v1630_v1  ;;  %v1085_v28 = vsel %vm1079_vm2, %v1072_v24, 920167782 }
 0x189   : > { %v1089_v6 = vsel %vm1079_vm2, %v1075_v25, 1326507024  ;;  %v1872_v60 = vshrl.u32 %v1871_v38, 23  ;;  %vm829_vm8 = vcmp.lt.s32.totalorder %v5891_v20, 2  ;;  %vm2574_vm9 = vcmp.lt.s32.totalorder %v5902_v55, 2 }
 0x18a   : > { %v1633_v50 = vshrl.u32 %v1615_v57, %v1631_v44  ;;  %v1636_v5 = vadd.s32 127, %v1635_v21  ;;  %v1086_v31 = vsel %vm1078_vm3, %v1069_v46, %v1085_v28  ;;  %v1090_v30 = vsel %vm1078_vm3, %v1072_v24, %v1089_v6 }
 0x18b   : > { %vm827_vm10 = vweird.f32 %v5587_v14  ;;  %v1082_v32 = vsel %vm1078_vm3, %v1066_v22, %v1081_v29  ;;  %v1087_v42 = vsel %vm1077_vm15, %v1084_v53, %v1086_v31  ;;  %v1091_v62 = vsel %vm1077_vm15, %v1088_v11, %v1090_v30 }
 0x18c   : > { %v4718_v63 = vadd.s32 4294967169, %v1872_v60  ;;  %vm3510_vm14 = vcmp.lt.s32.totalorder %v5888_v40, 2  ;;  %v1634_v57 = vor.u32 %v1633_v50, %v1632_v47  ;;  %v1637_v0 = vshll.u32 %v1636_v5, 23  ;;  %v5225_v23 = vpop.eup %5224 }
 0x18d   : > { %v5976_v46 = vmul.u32.u64.low %v5934_v9, %v1091_v62  ;;  %v5977_v10 = vmul.u32.u64.high %v5934_v9, %v1091_v62, %v5976_v46  ;;  %v4144_v17 = vmul.f32 %v5900_v51, %v5880_v36  ;;  %vm1754_vm1 = vweird.f32 %v5580_v7 }
 0x18e   : > { %v5983_v22 = vmul.u32.u64.low %v5934_v9, %v1087_v42  ;;  %v5984_v4 = vmul.u32.u64.high %v5934_v9, %v1087_v42, %v5983_v22  ;;  %v1878_v19 = vadd.s32 1, %v4718_v63  ;;  %v1763_v13 = vsel %vm1756_vm11, %v5922_v54, %v5907_v56  ;;  %v5227_v56 = vpop.eup %5226 }
 0x18f   : > { %v3513_v36 = vsel %vm3511_vm12, %v5866_v16, %v1758_v48  ;;  %v3516_v51 = vsel %vm3514_vm13, %v1761_v27, %v5872_v18  ;;  %vm6003_vm2 = vcmp.le.f32.partialorder %v1559_v58, 0.7853982  ;;  %v1638_v49 = vor.u32 4788187, %v1637_v0 }
 0x190   : > { %v834_v54 = vxor.u32 2147483648, %v5225_v23  ;;  %v1646_v48 = vsel %vm1561_vm0, %v1645_v34, %v5870_v12  ;;  %v1083_v16 = vsel %vm1077_vm15, %v1080_v33, %v1082_v32  ;;  %vm1879_vm11 = vcmp.gt.s32.totalorder %v1878_v19, 0  ;;  %v719_v34 = vld [vmem:[%s5877_s10] sm:$0xff] }
 0x191   : > { %v831_v18 = vxor.u32 2147483648, %v5227_v56  ;;  %v1639_v27 = vand.u32 2147483647, %v1638_v49  ;;  %v1641_v58 = vcvt.s32.f32 %v1634_v57  ;;  %vm1101_vm12 = vc.u32 %v5977_v10, %v5983_v22 }
 0x192   : > { %v835_v24 = vsel %vm833_vm4, %v834_v54, %v5227_v56  ;;  %v2580_v25 = vsel %vm2578_vm5, %v834_v54, %v5227_v56  ;;  %v1102_v1 = vadd.s32 1, %v5984_v4  ;;  %v1880_v12 = vsel %vm1879_vm11, %v1878_v19, 0  ;;  %v6073_v54 = vld [vmem:[%s5877_s10 + $0x48] sm:$0xff] }
 0x193   : > { %v832_v61 = vsel %vm830_vm6, %v5225_v23, %v831_v18  ;;  %v2577_v33 = vsel %vm2575_vm7, %v5225_v23, %v831_v18  ;;  %v1642_v29 = vmul.f32 %v1641_v58, %v1639_v27  ;;  %v1099_v44 = vmul.u32 %v5934_v9, %v1083_v16 }
 0x194   : > { %v836_v21 = vsel %vm829_vm8, %v832_v61, %v835_v24  ;;  %v2581_v53 = vsel %vm2574_vm9, %v2577_v33, %v2580_v25  ;;  %v1103_v11 = vsel %vm1101_vm12, %v1102_v1, %v5984_v4  ;;  %v1882_v47 = vand.u32 31, %v1880_v12 }
 0x195   : > { %v837_v28 = vsel %vm827_vm10, nan, %v836_v21  ;;  %v2582_v6 = vsel %vm827_vm10, nan, %v2581_v53  ;;  %v1643_v60 = vxor.u32 2147483648, %v1642_v29  ;;  %v1104_v50 = vadd.s32 %v1103_v11, %v1099_v44 }
 0x196   : > { %v3517_v9 = vsel %vm3510_vm14, %v3513_v36, %v3516_v51  ;;  %v2383_v5 = vmul.f32 %v837_v28, %v719_v34  ;;  %v4143_v20 = vmul.f32 %v2582_v6, %v719_v34  ;;  %v1883_v31 = vsub.s32 32, %v1882_v47  ;;  %v627_v28 = vpop.f32.mrf.mxu0 }
 0x197   : > { %v1764_v55 = vsel %vm1754_vm1, nan, %v1763_v13  ;;  %v1644_v30 = vsel %vm1561_vm0, %v1643_v60, %v1642_v29  ;;  %v1105_v32 = vadd.s32 536870912, %v1104_v50  ;;  %v1868_v42 = vand.u32 2147483647, %v5836_v26 }
 0x198   : > { %v4877_v14 = vpack.c.bf16 %v5896_v37, %v2383_v5  ;;  %v4917_v62 = vpack.c.bf16 %v4144_v17, %v4143_v20  ;;  %v1647_v40 = vsel %vm6003_vm2, %v5667_v8, %v1644_v30  ;;  %v1648_v63 = vsel %vm6003_vm2, 0, %v1646_v48 }
 0x199   : > { %5228 = vcosq.f32 %v1647_v40  ;;  %v6051_v57 = vshrl.u32 %v1105_v32, 30  ;;  %v1886_v0 = vshrl.u32 %v5340_v39, %v1883_v31  ;;  %v1889_v46 = vshrl.u32 %v5341_v41, %v1883_v31 }
 0x19a   : > { %4878 = vst [vmem:[%s6055_s18] sm:$0xff] %v4877_v14   ;;  %4918 = vst [vmem:[%s6058_s14] sm:$0xff] %v4917_v62   ;;  %5230 = vsinq.f32 %v1647_v40  ;;  %v1892_v37 = vshrl.u32 %v5342_v43, %v1883_v31  ;;  %v1894_v17 = vshll.u32 %v5342_v43, %v1882_v47  ;;  %v1895_v4 = vshrl.u32 %v5343_v45, %v1883_v31 }
 0x19b   : > { %v1107_v19 = vshll.u32 %v6051_v57, 30  ;;  %v6065_v23 = vshrl.u32 %v1880_v12, 5  ;;  %v1888_v13 = vshll.u32 %v5340_v39, %v1882_v47  ;;  %v1891_v36 = vshll.u32 %v5341_v41, %v1882_v47 }
 0x19c   : > { %v1885_v51 = vshll.u32 %v5339_v35, %v1882_v47  ;;  %v1896_v38 = vor.u32 %v1895_v4, %v1894_v17  ;;  %v1897_v49 = vshll.u32 %v5343_v45, %v1882_v47  ;;  %v1898_v56 = vshrl.u32 %v5344_v52, %v1883_v31 }
 0x19d   : > { %v6075_v48 = vsub.s32 %v1104_v50, %v1107_v19  ;;  %v1875_v16 = vand.u32 8388607, %v1868_v42  ;;  %v1890_v18 = vor.u32 %v1889_v46, %v1888_v13  ;;  %v1893_v27 = vor.u32 %v1892_v37, %v1891_v36 }
 0x19e   : > { %v1652_v58 = vand.u32 3, %v1648_v63  ;;  %v3404_v24 = vadd.s32 3, %v1648_v63  ;;  %v1887_v25 = vor.u32 %v1886_v0, %v1885_v51  ;;  %v1899_v1 = vor.u32 %v1898_v56, %v1897_v49 }
 0x19f   : > { %v1110_v12 = vsub.s32 0, %v6075_v48  ;;  %vm1903_vm13 = vcmp.lt.s32.totalorder %v6065_v23, 4  ;;  %v6082_v34 = vmul.f32 %v1764_v55, %v6073_v54  ;;  %v3518_v61 = vsel %vm1754_vm1, nan, %v3517_v9 }
 0x1a0   : > { %vm1900_vm15 = vcmp.lt.s32.totalorder %v6065_v23, 1  ;;  %v1909_v33 = vsel %vm1903_vm13, %v1896_v38, 920167782  ;;  %v1876_v44 = vor.u32 8388608, %v1875_v16  ;;  %vm1902_vm0 = vcmp.lt.s32.totalorder %v6065_v23, 3 }
 0x1a1   : > { %v4687_v29 = vmin.u32 %v1110_v12, %v6075_v48  ;;  %v1912_v21 = vsel %vm1900_vm15, %v1890_v18, %v1893_v27  ;;  %vm1653_vm3 = vcmp.lt.s32.totalorder %v1652_v58, 2  ;;  %v3405_v53 = vand.u32 3, %v3404_v24 }
 0x1a2   : > { %v1908_v11 = vsel %vm1900_vm15, %v1887_v25, %v1890_v18  ;;  %v1910_v7 = vsel %vm1902_vm0, %v1893_v27, %v1909_v33  ;;  %v1913_v47 = vsel %vm1903_vm13, %v1899_v1, 1326507024  ;;  %vm1651_vm4 = vweird.f32 %v5667_v8 }
 0x1a3   : > { %v1112_v6 = vclz %v4687_v29  ;;  %vm1901_vm5 = vcmp.lt.s32.totalorder %v6065_v23, 2  ;;  %v1905_v60 = vsel %vm1903_vm13, %v1893_v27, 2102212464  ;;  %v1914_v50 = vsel %vm1902_vm0, %v1896_v38, %v1913_v47  ;;  %v727_v38 = vld [vmem:[%s5877_s10 + $0x40] sm:$0xff] }
 0x1a4   : > { %vm1654_vm6 = vcmp.eq.s32.totalorder %v1652_v58, 0  ;;  %vm1657_vm7 = vcmp.eq.s32.totalorder %v1652_v58, 2  ;;  %v1884_v9 = vshrl.u32 %v5339_v35, %v1883_v31  ;;  %v1915_v5 = vsel %vm1901_vm5, %v1912_v21, %v1914_v50  ;;  %v667_v58 = vpop.f32.mrf.mxu1 }
 0x1a5   : > { %v4688_v20 = vadd.s32 4294967294, %v1112_v6  ;;  %v1911_v55 = vsel %vm1901_vm5, %v1908_v11, %v1910_v7  ;;  %v1916_v30 = vshll.u32 %v1876_v44, 8  ;;  %v6111_v32 = vadd.f32 %v5574_v3, %v627_v28 }
 0x1a6   : > { %v5229_v14 = vpop.eup %5228  ;;  %vm3406_vm8 = vcmp.lt.s32.totalorder %v3405_v53, 2  ;;  %vm3410_vm9 = vcmp.eq.s32.totalorder %v3405_v53, 2  ;;  %v1904_v62 = vsel %vm1900_vm15, %v1884_v9, %v1887_v25  ;;  %v1906_v31 = vsel %vm1902_vm0, %v1890_v18, %v1905_v60 }
 0x1a7   : > { %v5231_v40 = vpop.eup %5230  ;;  %v1658_v63 = vxor.u32 2147483648, %v5229_v14  ;;  %vm4689_vm10 = vcmp.lt.s32.totalorder %v4688_v20, 0  ;;  %v6117_v0 = vmul.u32.u64.low %v1916_v30, %v1915_v5  ;;  %v6118_v46 = vmul.u32.u64.high %v1916_v30, %v1915_v5, %v6117_v0 }
 0x1a8   : > { %v1655_v37 = vxor.u32 2147483648, %v5231_v40  ;;  %v1115_v17 = vsel %vm4689_vm10, 0, %v4688_v20  ;;  %v6120_v4 = vmul.u32.u64.low %v1916_v30, %v1911_v55  ;;  %v6121_v19 = vmul.u32.u64.high %v1916_v30, %v1911_v55, %v6120_v4 }
 0x1a9   : > { %v1659_v13 = vsel %vm1657_vm7, %v1658_v63, %v5231_v40  ;;  %vm3407_vm14 = vcmp.eq.s32.totalorder %v3405_v53, 0  ;;  %v3412_v36 = vsel %vm3410_vm9, %v1658_v63, %v5231_v40  ;;  %v944_v51 = vand.u32 2139095040, %v6111_v32 }
 0x1aa   : > { %v1656_v49 = vsel %vm1654_vm6, %v5229_v14, %v1655_v37  ;;  %v3409_v56 = vsel %vm3407_vm14, %v5229_v14, %v1655_v37  ;;  %v1116_v16 = vsub.s32 32, %v1115_v17  ;;  %v1120_v18 = vsub.s32 4294967266, %v1115_v17 }
 0x1ab   : > { %v1660_v27 = vsel %vm1653_vm3, %v1656_v49, %v1659_v13  ;;  %v3413_v24 = vsel %vm3406_vm8, %v3409_v56, %v3412_v36  ;;  %v1100_v25 = vadd.s32 %v5983_v22, %v5977_v10  ;;  %v1907_v1 = vsel %vm1901_vm5, %v1904_v62, %v1906_v31 }
 0x1ac   : > { %v1661_v12 = vsel %vm1651_vm4, nan, %v1660_v27  ;;  %v3414_v33 = vsel %vm1651_vm4, nan, %v3413_v24  ;;  %v1121_v29 = vadd.s32 127, %v1120_v18  ;;  %vm1925_vm1 = vc.u32 %v6118_v46, %v6120_v4 }
 0x1ad   : > { %v4152_v44 = vmul.f32 %v3518_v61, %v6073_v54  ;;  %v2391_v21 = vmul.f32 %v1661_v12, %v727_v38  ;;  %v4151_v10 = vmul.f32 %v3414_v33, %v727_v38  ;;  %v1926_v22 = vadd.s32 1, %v6121_v19 }
 0x1ae   : > { %v1118_v23 = vshrl.u32 %v1100_v25, %v1116_v16  ;;  %v1122_v53 = vshll.u32 %v1121_v29, 23  ;;  %v1923_v11 = vmul.u32 %v1916_v30, %v1907_v1  ;;  %v945_v7 = vshrl.u32 %v944_v51, 23 }
 0x1af   : > { %v4897_v8 = vpack.c.bf16 %v6082_v34, %v2391_v21  ;;  %v4937_v47 = vpack.c.bf16 %v4152_v44, %v4151_v10  ;;  %v1927_v28 = vsel %vm1925_vm1, %v1926_v22, %v6121_v19  ;;  %v6145_v6 = vadd.f32 %v5574_v3, %v667_v58 }
 0x1b0   : > { %v1117_v54 = vshll.u32 %v6075_v48, %v1115_v17  ;;  %v1123_v61 = vor.u32 4788187, %v1122_v53  ;;  %v1928_v60 = vadd.s32 %v1927_v28, %v1923_v11  ;;  %v4682_v50 = vadd.s32 4294967169, %v945_v7 }
 0x1b1   : > { %4957 = vst [vmem:[%s6055_s18 + $0x20] sm:$0xff] %v4897_v8   ;;  %4964 = vst [vmem:[%s6058_s14 + $0x20] sm:$0xff] %v4937_v47   ;;  %v941_v55 = vand.u32 2147483647, %v6111_v32  ;;  %v1768_v34 = vand.u32 2139095040, %v6145_v6  ;;  %v1130_v14 = vsub.s32 4, %v6051_v57  ;;  %v1924_v27 = vadd.s32 %v6120_v4, %v6118_v46 }
 0x1b2   : > { %v1119_v9 = vor.u32 %v1118_v23, %v1117_v54  ;;  %v1929_v5 = vadd.s32 536870912, %v1928_v60  ;;  %v951_v20 = vadd.s32 1, %v4682_v50  ;;  %v1124_v30 = vand.u32 2147483647, %v1123_v61 }
 0x1b3   : > { %vm1046_vm11 = vcmp.lt.s32.totalorder %v5795_v59, 0  ;;  %v948_v63 = vand.u32 8388607, %v941_v55  ;;  %v1769_v37 = vshrl.u32 %v1768_v34, 23  ;;  %vm6166_vm12 = vcmp.le.f32.partialorder %v1044_v15, 0.7853982 }
 0x1b4   : > { %v6153_v62 = vshrl.u32 %v1929_v5, 30  ;;  %vm952_vm2 = vcmp.gt.s32.totalorder %v951_v20, 0  ;;  %v1126_v48 = vcvt.s32.f32 %v1119_v9  ;;  %v1131_v19 = vsel %vm1046_vm11, %v1130_v14, %v6051_v57 }
 0x1b5   : > { %v953_v31 = vsel %vm952_vm2, %v951_v20, 0  ;;  %v6173_v49 = vsel %vm6166_vm12, 0, %v1131_v19  ;;  %v949_v56 = vor.u32 8388608, %v948_v63  ;;  %v4714_v18 = vadd.s32 4294967169, %v1769_v37 }
 0x1b6   : > { %v1931_v40 = vshll.u32 %v6153_v62, 30  ;;  %v955_v0 = vand.u32 31, %v953_v31  ;;  %v1127_v17 = vmul.f32 %v1126_v48, %v1124_v30  ;;  %v954_v15 = vshrl.u32 %v953_v31, 5 }
 0x1b7   : > { %v989_v4 = vshll.u32 %v949_v56, 8  ;;  %v1775_v22 = vadd.s32 1, %v4714_v18  ;;  %vm6252_vm7 = vcmp.le.f32.partialorder %v1868_v42, 0.7853982  ;;  %vm1870_vm8 = vcmp.lt.s32.totalorder %v5836_v26, 0 }
 0x1b8   : > { %v6162_v13 = vsub.s32 %v1928_v60, %v1931_v40  ;;  %v956_v36 = vsub.s32 32, %v955_v0  ;;  %v1128_v57 = vxor.u32 2147483648, %v1127_v17  ;;  %v958_v25 = vshll.u32 %v5339_v35, %v955_v0 }
 0x1b9   : > { %v961_v1 = vshll.u32 %v5340_v39, %v955_v0  ;;  %v964_v33 = vshll.u32 %v5341_v41, %v955_v0  ;;  %v967_v44 = vshll.u32 %v5342_v43, %v955_v0  ;;  %v970_v8 = vshll.u32 %v5343_v45, %v955_v0 }
 0x1ba   : > { %v1934_v38 = vsub.s32 0, %v6162_v13  ;;  %v959_v16 = vshrl.u32 %v5340_v39, %v956_v36  ;;  %v962_v12 = vshrl.u32 %v5341_v41, %v956_v36  ;;  %v965_v58 = vshrl.u32 %v5342_v43, %v956_v36 }
 0x1bb   : > { %v968_v21 = vshrl.u32 %v5343_v45, %v956_v36  ;;  %v1129_v23 = vsel %vm1046_vm11, %v1128_v57, %v1127_v17  ;;  %v971_v47 = vshrl.u32 %v5344_v52, %v956_v36  ;;  %vm973_vm13 = vcmp.lt.s32.totalorder %v954_v15, 1 }
 0x1bc   : > { %v4719_v24 = vmin.u32 %v1934_v38, %v6162_v13  ;;  %v960_v10 = vor.u32 %v959_v16, %v958_v25  ;;  %v963_v46 = vor.u32 %v962_v12, %v961_v1  ;;  %v966_v11 = vor.u32 %v965_v58, %v964_v33 }
 0x1bd   : > { %v969_v7 = vor.u32 %v968_v21, %v967_v44  ;;  %vm976_vm15 = vcmp.lt.s32.totalorder %v954_v15, 4  ;;  %v957_v28 = vshrl.u32 %v5339_v35, %v956_v36  ;;  %vm974_vm3 = vcmp.lt.s32.totalorder %v954_v15, 2 }
 0x1be   : > { %v1936_v29 = vclz %v4719_v24  ;;  %v978_v54 = vsel %vm976_vm15, %v966_v11, 2102212464  ;;  %v972_v60 = vor.u32 %v971_v47, %v970_v8  ;;  %v981_v50 = vsel %vm973_vm13, %v960_v10, %v963_v46 }
 0x1bf   : > { %v982_v9 = vsel %vm976_vm15, %v969_v7, 920167782  ;;  %vm975_vm4 = vcmp.lt.s32.totalorder %v954_v15, 3  ;;  %v977_v34 = vsel %vm973_vm13, %v957_v28, %v960_v10  ;;  %v985_v31 = vsel %vm973_vm13, %v963_v46, %v966_v11 }
 0x1c0   : > { %v4720_v53 = vadd.s32 4294967294, %v1936_v29  ;;  %v979_v30 = vsel %vm975_vm4, %v963_v46, %v978_v54  ;;  %v983_v14 = vsel %vm975_vm4, %v966_v11, %v982_v9  ;;  %v986_v48 = vsel %vm976_vm15, %v972_v60, 1326507024  ;;  %v5040_v9 = vpop.f32.mrf.mxu0 }
 0x1c1   : > { %v984_v0 = vsel %vm974_vm3, %v981_v50, %v983_v14  ;;  %v987_v37 = vsel %vm975_vm4, %v969_v7, %v986_v48  ;;  %vm1776_vm5 = vcmp.gt.s32.totalorder %v1775_v22, 0  ;;  %v1132_v38 = vsel %vm6166_vm12, %v5795_v59, %v1129_v23 }
 0x1c2   : > { %vm4721_vm0 = vcmp.lt.s32.totalorder %v4720_v53, 0  ;;  %v988_v17 = vsel %vm974_vm3, %v985_v31, %v987_v37  ;;  %v6199_v19 = vmul.u32.u64.low %v989_v4, %v984_v0  ;;  %v6200_v36 = vmul.u32.u64.high %v989_v4, %v984_v0, %v6199_v19 }
 0x1c3   : > { %v1939_v61 = vsel %vm4721_vm0, 0, %v4720_v53  ;;  %v1777_v18 = vsel %vm1776_vm5, %v1775_v22, 0  ;;  %v2884_v24 = vadd.s32 3, %v6173_v49  ;;  %v980_v12 = vsel %vm974_vm3, %v977_v34, %v979_v30 }
 0x1c4   : > { %v1940_v5 = vsub.s32 32, %v1939_v61  ;;  %v1944_v20 = vsub.s32 4294967266, %v1939_v61  ;;  %v1941_v56 = vshll.u32 %v6162_v13, %v1939_v61  ;;  %5232 = vcosq.f32 %v1132_v38 }
 0x1c5   : > { %v999_v33 = vadd.s32 1, %v6200_v36  ;;  %v1765_v29 = vand.u32 2147483647, %v6145_v6  ;;  %v1779_v51 = vand.u32 31, %v1777_v18  ;;  %5234 = vsinq.f32 %v1132_v38 }
 0x1c6   : > { %v1942_v40 = vshrl.u32 %v1924_v27, %v1940_v5  ;;  %v1945_v63 = vadd.s32 127, %v1944_v20  ;;  %v6207_v57 = vmul.u32.u64.low %v989_v4, %v988_v17  ;;  %v6208_v27 = vmul.u32.u64.high %v989_v4, %v988_v17, %v6207_v57 }
 0x1c7   : > { %v996_v13 = vmul.u32 %v989_v4, %v980_v12  ;;  %v6217_v44 = vand.u32 3, %v6173_v49  ;;  %v6220_v15 = vand.u32 3, %v2884_v24  ;;  %v1772_v22 = vand.u32 8388607, %v1765_v29 }
 0x1c8   : > { %v1946_v16 = vshll.u32 %v1945_v63, 23  ;;  %v1943_v25 = vor.u32 %v1942_v40, %v1941_v56  ;;  %vm998_vm6 = vc.u32 %v6208_v27, %v6199_v19  ;;  %v6224_v23 = vsub.s32 32, %v1779_v51 }
 0x1c9   : > { %v1000_v10 = vsel %vm998_vm6, %v999_v33, %v6200_v36  ;;  %v6226_v11 = vshrl.u32 %v1777_v18, 5  ;;  %v1782_v4 = vshll.u32 %v5339_v35, %v1779_v51  ;;  %v1785_v7 = vshll.u32 %v5340_v39, %v1779_v51  ;;  %v5052_v36 = vpop.f32.mrf.mxu1 }
 0x1ca   : > { %v1947_v1 = vor.u32 4788187, %v1946_v16  ;;  %v1950_v21 = vcvt.s32.f32 %v1943_v25  ;;  %v1001_v46 = vadd.s32 %v1000_v10, %v996_v13  ;;  %v1783_v8 = vshrl.u32 %v5340_v39, %v6224_v23 }
 0x1cb   : > { %v1786_v47 = vshrl.u32 %v5341_v41, %v6224_v23  ;;  %v1788_v28 = vshll.u32 %v5341_v41, %v1779_v51  ;;  %v1789_v54 = vshrl.u32 %v5342_v43, %v6224_v23  ;;  %v1791_v61 = vshll.u32 %v5342_v43, %v1779_v51 }
 0x1cc   : > { %v1948_v58 = vand.u32 2147483647, %v1947_v1  ;;  %v1002_v49 = vadd.s32 536870912, %v1001_v46  ;;  %v1792_v60 = vshrl.u32 %v5343_v45, %v6224_v23  ;;  %v1795_v50 = vshrl.u32 %v5344_v52, %v6224_v23 }
 0x1cd   : > { %v1954_v5 = vsub.s32 4, %v6153_v62  ;;  %v6245_v34 = vor.u32 %v1783_v8, %v1782_v4  ;;  %v6247_v30 = vor.u32 %v1786_v47, %v1785_v7  ;;  %v1790_v31 = vor.u32 %v1789_v54, %v1788_v28 }
 0x1ce   : > { %v1951_v53 = vmul.f32 %v1950_v21, %v1948_v58  ;;  %v6243_v20 = vshrl.u32 %v1002_v49, 30  ;;  %v1793_v48 = vor.u32 %v1792_v60, %v1791_v61  ;;  %v1794_v40 = vshll.u32 %v5343_v45, %v1779_v51 }
 0x1cf   : > { %v1773_v37 = vor.u32 8388608, %v1772_v22  ;;  %v6258_v17 = vadd.f32 %v5574_v3, %v5040_v9  ;;  %vm1797_vm9 = vcmp.lt.s32.totalorder %v6226_v11, 1  ;;  %vm1800_vm10 = vcmp.lt.s32.totalorder %v6226_v11, 4 }
 0x1d0   : > { %v1952_v14 = vxor.u32 2147483648, %v1951_v53  ;;  %v1004_v0 = vshll.u32 %v6243_v20, 30  ;;  %v1796_v38 = vor.u32 %v1795_v50, %v1794_v40  ;;  %vm1142_vm14 = vcmp.eq.s32.totalorder %v6217_v44, 2 }
 0x1d1   : > { %vm2890_vm1 = vcmp.eq.s32.totalorder %v6220_v15, 2  ;;  %vm1799_vm2 = vcmp.lt.s32.totalorder %v6226_v11, 3  ;;  %v1805_v56 = vsel %vm1797_vm9, %v6245_v34, %v6247_v30  ;;  %v1806_v16 = vsel %vm1800_vm10, %v1793_v48, 920167782  ;;  %v5233_v18 = vpop.eup %5232 }
 0x1d2   : > { %v6265_v42 = vsub.s32 %v1001_v46, %v1004_v0  ;;  %vm1139_vm11 = vcmp.eq.s32.totalorder %v6217_v44, 0  ;;  %vm2887_vm12 = vcmp.eq.s32.totalorder %v6220_v15, 0  ;;  %v1953_v57 = vsel %vm1870_vm8, %v1952_v14, %v1951_v53  ;;  %v5235_v12 = vpop.eup %5234 }
 0x1d3   : > { %v1955_v24 = vsel %vm1870_vm8, %v1954_v5, %v6153_v62  ;;  %v1807_v25 = vsel %vm1799_vm2, %v1790_v31, %v1806_v16  ;;  %v6280_v1 = vadd.f32 %v5574_v3, %v5052_v36  ;;  %vm943_vm13 = vcmp.lt.s32.totalorder %v6111_v32, 0 }
 0x1d4   : > { %v1007_v33 = vsub.s32 0, %v6265_v42  ;;  %vm1798_vm15 = vcmp.lt.s32.totalorder %v6226_v11, 2  ;;  %v6285_v51 = vshll.u32 %v1773_v37, 8  ;;  %v1250_v58 = vand.u32 2147483647, %v6258_v17 }
 0x1d5   : > { %v1808_v62 = vsel %vm1798_vm15, %v1805_v56, %v1807_v25  ;;  %v1809_v13 = vsel %vm1797_vm9, %v6247_v30, %v1790_v31  ;;  %v1810_v21 = vsel %vm1800_vm10, %v1796_v38, 1326507024  ;;  %v1253_v10 = vand.u32 2139095040, %v6258_v17 }
 0x1d6   : > { %vm1138_vm0 = vcmp.lt.s32.totalorder %v6217_v44, 2  ;;  %v1143_v46 = vxor.u32 2147483648, %v5233_v18  ;;  %vm2886_vm3 = vcmp.lt.s32.totalorder %v6220_v15, 2  ;;  %v1956_v22 = vsel %vm6252_vm7, %v5836_v26, %v1953_v57  ;;  %v637_v15 = vpop.f32.mrf.mxu0 }
 0x1d7   : > { %v1957_v53 = vsel %vm6252_vm7, 0, %v1955_v24  ;;  %v4683_v4 = vmin.u32 %v1007_v33, %v6265_v42  ;;  %v1140_v7 = vxor.u32 2147483648, %v5235_v12  ;;  %vm6306_vm4 = vcmp.le.f32.partialorder %v941_v55, 0.7853982 }
 0x1d8   : > { %v1811_v8 = vsel %vm1799_vm2, %v1793_v48, %v1810_v21  ;;  %v6313_v47 = vmul.u32.u64.low %v6285_v51, %v1808_v62  ;;  %v6314_v28 = vmul.u32.u64.high %v6285_v51, %v1808_v62, %v6313_v47  ;;  %v1802_v61 = vsel %vm1800_vm10, %v1790_v31, 2102212464 }
 0x1d9   : > { %v1009_v54 = vclz %v4683_v4  ;;  %v1812_v60 = vsel %vm1798_vm15, %v1809_v13, %v1811_v8  ;;  %v1254_v50 = vshrl.u32 %v1253_v10, 23  ;;  %vm1136_vm5 = vweird.f32 %v5795_v59  ;;  %v722_v10 = vld [vmem:[%s5877_s10 + $0x18] sm:$0xff] }
 0x1da   : > { %5236 = vcosq.f32 %v1956_v22  ;;  %v3716_v55 = vadd.s32 3, %v1957_v53  ;;  %v1027_v9 = vsub.s32 4, %v6243_v20  ;;  %v1781_v5 = vshrl.u32 %v5339_v35, %v6224_v23 }
 0x1db   : > { %v4684_v14 = vadd.s32 4294967294, %v1009_v54  ;;  %v6326_v48 = vmul.u32.u64.low %v6285_v51, %v1812_v60  ;;  %v6327_v40 = vmul.u32.u64.high %v6285_v51, %v1812_v60, %v6326_v48  ;;  %v4694_v63 = vadd.s32 4294967169, %v1254_v50 }
 0x1dc   : > { %v1144_v31 = vsel %vm1142_vm14, %v1143_v46, %v5235_v12  ;;  %v2892_v0 = vsel %vm2890_vm1, %v1143_v46, %v5235_v12  ;;  %v1801_v37 = vsel %vm1797_vm9, %v1781_v5, %v6245_v34  ;;  %v1803_v23 = vsel %vm1799_vm2, %v6247_v30, %v1802_v61 }
 0x1dd   : > { %v1141_v36 = vsel %vm1139_vm11, %v5233_v18, %v1140_v7  ;;  %v2889_v38 = vsel %vm2887_vm12, %v5233_v18, %v1140_v7  ;;  %v997_v56 = vadd.s32 %v6199_v19, %v6208_v27  ;;  %vm4685_vm6 = vcmp.lt.s32.totalorder %v4684_v14, 0 }
 0x1de   : > { %v1012_v16 = vsel %vm4685_vm6, 0, %v4684_v14  ;;  %v1028_v57 = vsel %vm943_vm13, %v1027_v9, %v6243_v20  ;;  %v1823_v34 = vadd.s32 1, %v6314_v28  ;;  %v1260_v24 = vadd.s32 1, %v4694_v63 }
 0x1df   : > { %5238 = vsinq.f32 %v1956_v22  ;;  %v1013_v30 = vsub.s32 32, %v1012_v16  ;;  %v1017_v25 = vsub.s32 4294967266, %v1012_v16  ;;  %v1804_v12 = vsel %vm1798_vm15, %v1801_v37, %v1803_v23 }
 0x1e0   : > { %v1145_v18 = vsel %vm1138_vm0, %v1141_v36, %v1144_v31  ;;  %v2893_v19 = vsel %vm2886_vm3, %v2889_v38, %v2892_v0  ;;  %v6355_v27 = vand.u32 3, %v1957_v53  ;;  %vm1822_vm7 = vc.u32 %v6327_v40, %v6313_v47 }
 0x1e1   : > { %v1014_v20 = vshll.u32 %v6265_v42, %v1012_v16  ;;  %v1015_v33 = vshrl.u32 %v997_v56, %v1013_v30  ;;  %v1018_v62 = vadd.s32 127, %v1017_v25  ;;  %v1030_v13 = vsel %vm6306_vm4, 0, %v1028_v57 }
 0x1e2   : > { %v6362_v11 = vand.u32 3, %v3716_v55  ;;  %v1820_v44 = vmul.u32 %v6285_v51, %v1804_v12  ;;  %v1824_v21 = vsel %vm1822_vm7, %v1823_v34, %v6314_v28  ;;  %vm1261_vm8 = vcmp.gt.s32.totalorder %v1260_v24, 0 }
 0x1e3   : > { %v1146_v46 = vsel %vm1136_vm5, nan, %v1145_v18  ;;  %v2894_v42 = vsel %vm1136_vm5, nan, %v2893_v19  ;;  %v1016_v22 = vor.u32 %v1015_v33, %v1014_v20  ;;  %v1019_v53 = vshll.u32 %v1018_v62, 23 }
 0x1e4   : > { %v2780_v4 = vadd.s32 3, %v1030_v13  ;;  %v1825_v7 = vadd.s32 %v1824_v21, %v1820_v44  ;;  %v1257_v8 = vand.u32 8388607, %v1250_v58  ;;  %v1262_v54 = vsel %vm1261_vm8, %v1260_v24, 0 }
 0x1e5   : > { %v1020_v51 = vor.u32 4788187, %v1019_v53  ;;  %v1264_v61 = vand.u32 31, %v1262_v54  ;;  %v6374_v28 = vadd.f32 %v5574_v3, %v637_v15  ;;  %v6376_v60 = vmul.f32 %v1146_v46, %v722_v10 }
 0x1e6   : > { %v6378_v50 = vmul.f32 %v2894_v42, %v722_v10  ;;  %vm1966_vm9 = vcmp.eq.s32.totalorder %v6355_v27, 2  ;;  %v1826_v59 = vadd.s32 536870912, %v1825_v7  ;;  %vm3722_vm10 = vcmp.eq.s32.totalorder %v6362_v11, 2 }
 0x1e7   : > { %v6381_v55 = vpop.eup %5236  ;;  %v1021_v9 = vand.u32 2147483647, %v1020_v51  ;;  %v1023_v5 = vcvt.s32.f32 %v1016_v22  ;;  %v6384_v14 = vand.u32 3, %v1030_v13  ;;  %v1265_v48 = vsub.s32 32, %v1264_v61 }
 0x1e8   : > { %v6386_v63 = vand.u32 3, %v2780_v4  ;;  %v6388_v31 = vshrl.u32 %v1826_v59, 30  ;;  %v1258_v0 = vor.u32 8388608, %v1257_v8  ;;  %v2074_v37 = vand.u32 2147483647, %v6280_v1 }
 0x1e9   : > { %v1024_v23 = vmul.f32 %v1023_v5, %v1021_v9  ;;  %v1268_v36 = vshrl.u32 %v5340_v39, %v1265_v48  ;;  %v1271_v38 = vshrl.u32 %v5341_v41, %v1265_v48  ;;  %v2077_v56 = vand.u32 2139095040, %v6280_v1 }
 0x1ea   : > { %vm1963_vm14 = vcmp.eq.s32.totalorder %v6355_v27, 0  ;;  %v1967_v16 = vxor.u32 2147483648, %v6381_v55  ;;  %v1828_v57 = vshll.u32 %v6388_v31, 30  ;;  %v1274_v34 = vshrl.u32 %v5342_v43, %v1265_v48 }
 0x1eb   : > { %v1277_v24 = vshrl.u32 %v5343_v45, %v1265_v48  ;;  %v1025_v30 = vxor.u32 2147483648, %v1024_v23  ;;  %v6399_v25 = vshrl.u32 %v1262_v54, 5  ;;  %v1267_v12 = vshll.u32 %v5339_v35, %v1264_v61 }
 0x1ec   : > { %v1270_v18 = vshll.u32 %v5340_v39, %v1264_v61  ;;  %v6403_v19 = vpop.eup %5238  ;;  %v6405_v20 = vsub.s32 %v1825_v7, %v1828_v57  ;;  %v1273_v33 = vshll.u32 %v5341_v41, %v1264_v61  ;;  %v1276_v62 = vshll.u32 %v5342_v43, %v1264_v61 }
 0x1ed   : > { %v1280_v13 = vshrl.u32 %v5344_v52, %v1265_v48  ;;  %v1026_v44 = vsel %vm943_vm13, %v1025_v30, %v1024_v23  ;;  %v1269_v21 = vor.u32 %v1268_v36, %v1267_v12  ;;  %v1279_v10 = vshll.u32 %v5343_v45, %v1264_v61 }
 0x1ee   : > { %v1272_v15 = vor.u32 %v1271_v38, %v1270_v18  ;;  %v1029_v46 = vsel %vm6306_vm4, %v6111_v32, %v1026_v44  ;;  %v1831_v42 = vsub.s32 0, %v6405_v20  ;;  %v1275_v22 = vor.u32 %v1274_v34, %v1273_v33 }
 0x1ef   : > { %v1278_v53 = vor.u32 %v1277_v24, %v1276_v62  ;;  %v1964_v4 = vxor.u32 2147483648, %v6403_v19  ;;  %v1968_v7 = vsel %vm1966_vm9, %v1967_v16, %v6403_v19  ;;  %5240 = vcosq.f32 %v1029_v46 }
 0x1f0   : > { %v6421_v8 = vshll.u32 %v1258_v0, 8  ;;  %vm1962_vm1 = vcmp.lt.s32.totalorder %v6355_v27, 2  ;;  %vm3719_vm2 = vcmp.eq.s32.totalorder %v6362_v11, 0  ;;  %v3724_v49 = vsel %vm3722_vm10, %v1967_v16, %v6403_v19 }
 0x1f1   : > { %5242 = vsinq.f32 %v1029_v46  ;;  %v4715_v54 = vmin.u32 %v1831_v42, %v6405_v20  ;;  %v1281_v51 = vor.u32 %v1280_v13, %v1279_v10  ;;  %v1266_v61 = vshrl.u32 %v5339_v35, %v1265_v48 }
 0x1f2   : > { %vm1282_vm11 = vcmp.lt.s32.totalorder %v6399_v25, 1  ;;  %vm1285_vm12 = vcmp.lt.s32.totalorder %v6399_v25, 4  ;;  %v2078_v59 = vshrl.u32 %v2077_v56, 23  ;;  %v1965_v36 = vsel %vm1963_vm14, %v6381_v55, %v1964_v4 }
 0x1f3   : > { %v1833_v9 = vclz %v4715_v54  ;;  %v1287_v5 = vsel %vm1285_vm12, %v1275_v22, 2102212464  ;;  %v1290_v0 = vsel %vm1282_vm11, %v1269_v21, %v1272_v15  ;;  %v1291_v23 = vsel %vm1285_vm12, %v1278_v53, 920167782 }
 0x1f4   : > { %vm3718_vm13 = vcmp.lt.s32.totalorder %v6362_v11, 2  ;;  %vm1283_vm15 = vcmp.lt.s32.totalorder %v6399_v25, 2  ;;  %vm1284_vm0 = vcmp.lt.s32.totalorder %v6399_v25, 3  ;;  %v1286_v48 = vsel %vm1282_vm11, %v1266_v61, %v1269_v21 }
 0x1f5   : > { %vm1960_vm3 = vweird.f32 %v5836_v26  ;;  %v4716_v38 = vadd.s32 4294967294, %v1833_v9  ;;  %v1292_v16 = vsel %vm1284_vm0, %v1275_v22, %v1291_v23  ;;  %v1294_v56 = vsel %vm1282_vm11, %v1272_v15, %v1275_v22 }
 0x1f6   : > { %v1295_v57 = vsel %vm1285_vm12, %v1281_v51, 1326507024  ;;  %vm1767_vm4 = vcmp.lt.s32.totalorder %v6145_v6, 0  ;;  %v1288_v34 = vsel %vm1284_vm0, %v1272_v15, %v1287_v5  ;;  %v1293_v24 = vsel %vm1283_vm15, %v1290_v0, %v1292_v16 }
 0x1f7   : > { %v1296_v30 = vsel %vm1284_vm0, %v1278_v53, %v1295_v57  ;;  %v4726_v12 = vadd.s32 4294967169, %v2078_v59  ;;  %vm1039_vm5 = vcmp.eq.s32.totalorder %v6384_v14, 2  ;;  %vm4717_vm6 = vcmp.lt.s32.totalorder %v4716_v38, 0 }
 0x1f8   : > { %v1297_v18 = vsel %vm1283_vm15, %v1294_v56, %v1296_v30  ;;  %v6446_v19 = vmul.u32.u64.low %v6421_v8, %v1293_v24  ;;  %v6447_v33 = vmul.u32.u64.high %v6421_v8, %v1293_v24, %v6446_v19  ;;  %vm1036_vm7 = vcmp.eq.s32.totalorder %v6384_v14, 0 }
 0x1f9   : > { %vm2783_vm8 = vcmp.eq.s32.totalorder %v6386_v63, 0  ;;  %v1821_v62 = vadd.s32 %v6313_v47, %v6327_v40  ;;  %v1836_v13 = vsel %vm4717_vm6, 0, %v4716_v38  ;;  %vm1035_vm9 = vcmp.lt.s32.totalorder %v6384_v14, 2 }
 0x1fa   : > { %v6455_v44 = vmul.u32.u64.low %v6421_v8, %v1297_v18  ;;  %v6456_v21 = vmul.u32.u64.high %v6421_v8, %v1297_v18, %v6455_v44  ;;  %vm2782_vm10 = vcmp.lt.s32.totalorder %v6386_v63, 2  ;;  %vm6462_vm14 = vcmp.le.f32.partialorder %v1765_v29, 0.7853982 }
 0x1fb   : > { %v1837_v10 = vsub.s32 32, %v1836_v13  ;;  %v1841_v46 = vsub.s32 4294967266, %v1836_v13  ;;  %v1289_v47 = vsel %vm1283_vm15, %v1286_v48, %v1288_v34  ;;  %v2084_v40 = vadd.s32 1, %v4726_v12  ;;  %v721_v34 = vld [vmem:[%s5877_s10 + $0x10] sm:$0xff] }
 0x1fc   : > { %v1969_v42 = vsel %vm1962_vm1, %v1965_v36, %v1968_v7  ;;  %v3721_v22 = vsel %vm3719_vm2, %v6381_v55, %v1964_v4  ;;  %vm1033_vm11 = vweird.f32 %v6111_v32  ;;  %v1838_v29 = vshll.u32 %v6405_v20, %v1836_v13  ;;  %v5241_v55 = vpop.eup %5240 }
 0x1fd   : > { %v1851_v53 = vsub.s32 4, %v6388_v31  ;;  %v1839_v54 = vshrl.u32 %v1821_v62, %v1837_v10  ;;  %v1842_v51 = vadd.s32 127, %v1841_v46  ;;  %v1308_v61 = vadd.s32 1, %v6447_v33 }
 0x1fe   : > { %vm2085_vm12 = vcmp.gt.s32.totalorder %v2084_v40, 0  ;;  %vm2786_vm15 = vcmp.eq.s32.totalorder %v6386_v63, 2  ;;  %v1305_v27 = vmul.u32 %v6421_v8, %v1289_v47  ;;  %vm1307_vm1 = vc.u32 %v6456_v21, %v6446_v19  ;;  %v5243_v9 = vpop.eup %5242 }
 0x1ff   : > { %v2086_v25 = vsel %vm2085_vm12, %v2084_v40, 0  ;;  %v3725_v4 = vsel %vm3718_vm13, %v3721_v22, %v3724_v49  ;;  %v1840_v20 = vor.u32 %v1839_v54, %v1838_v29  ;;  %v1843_v7 = vshll.u32 %v1842_v51, 23 }
 0x200   : > { %v1309_v59 = vsel %vm1307_vm1, %v1308_v61, %v6447_v33  ;;  %v6486_v5 = vsel %vm1960_vm3, nan, %v1969_v42  ;;  %v1040_v0 = vxor.u32 2147483648, %v5241_v55  ;;  %v2081_v23 = vand.u32 8388607, %v2074_v37 }
 0x201   : > { %v1310_v8 = vadd.s32 %v1309_v59, %v1305_v27  ;;  %v1037_v36 = vxor.u32 2147483648, %v5243_v9  ;;  %v1844_v48 = vor.u32 4788187, %v1843_v7  ;;  %v1852_v11 = vsel %vm1767_vm4, %v1851_v53, %v6388_v31 }
 0x202   : > { %v2088_v49 = vand.u32 31, %v2086_v25  ;;  %v1041_v38 = vsel %vm1039_vm5, %v1040_v0, %v5243_v9  ;;  %v2788_v16 = vsel %vm2786_vm15, %v1040_v0, %v5243_v9  ;;  %v1150_v57 = vand.u32 2139095040, %v6374_v28 }
 0x203   : > { %v1311_v56 = vadd.s32 536870912, %v1310_v8  ;;  %v1038_v24 = vsel %vm1036_vm7, %v5241_v55, %v1037_v36  ;;  %v2785_v30 = vsel %vm2783_vm8, %v5241_v55, %v1037_v36  ;;  %v1845_v12 = vand.u32 2147483647, %v1844_v48 }
 0x204   : > { %v1847_v18 = vcvt.s32.f32 %v1840_v20  ;;  %v1042_v31 = vsel %vm1035_vm9, %v1038_v24, %v1041_v38  ;;  %v2789_v33 = vsel %vm2782_vm10, %v2785_v30, %v2788_v16  ;;  %v1854_v62 = vsel %vm6462_vm14, 0, %v1852_v11 }
 0x205   : > { %v6509_v13 = vshrl.u32 %v1311_v56, 30  ;;  %v1043_v44 = vsel %vm1033_vm11, nan, %v1042_v31  ;;  %v2790_v10 = vsel %vm1033_vm11, nan, %v2789_v33  ;;  %v2089_v47 = vsub.s32 32, %v2088_v49 }
 0x206   : > { %v1848_v46 = vmul.f32 %v1847_v18, %v1845_v12  ;;  %v6517_v14 = vsel %vm1960_vm3, nan, %v3725_v4  ;;  %v2385_v63 = vmul.f32 %v1043_v44, %v721_v34  ;;  %v4145_v40 = vmul.f32 %v2790_v10, %v721_v34 }
 0x207   : > { %v1313_v42 = vshll.u32 %v6509_v13, 30  ;;  %v3612_v29 = vadd.s32 3, %v1854_v62  ;;  %v2082_v53 = vor.u32 8388608, %v2081_v23  ;;  %v1151_v54 = vshrl.u32 %v1150_v57, 23 }
 0x208   : > { %v1849_v22 = vxor.u32 2147483648, %v1848_v46  ;;  %v4882_v51 = vpack.c.bf16 %v6376_v60, %v2385_v63  ;;  %v4922_v32 = vpack.c.bf16 %v6378_v50, %v4145_v40  ;;  %v2087_v27 = vshrl.u32 %v2086_v25, 5 }
 0x209   : > { %v6522_v61 = vsub.s32 %v1310_v8, %v1313_v42  ;;  %v2091_v55 = vshll.u32 %v5339_v35, %v2088_v49  ;;  %v2092_v4 = vshrl.u32 %v5340_v39, %v2089_v47  ;;  %v2095_v20 = vshrl.u32 %v5341_v41, %v2089_v47 }
 0x20a   : > { %v1850_v26 = vsel %vm1767_vm4, %v1849_v22, %v1848_v46  ;;  %4954 = vst [vmem:[%s6055_s18 + $0x8] sm:$0xff] %v4882_v51   ;;  %4961 = vst [vmem:[%s6058_s14 + $0x8] sm:$0xff] %v4922_v32   ;;  %v2094_v7 = vshll.u32 %v5340_v39, %v2088_v49  ;;  %v2097_v25 = vshll.u32 %v5341_v41, %v2088_v49  ;;  %v6540_v8 = vand.u32 3, %v1854_v62 }
 0x20b   : > { %v1853_v60 = vsel %vm6462_vm14, %v6145_v6, %v1850_v26  ;;  %v1316_v50 = vsub.s32 0, %v6522_v61  ;;  %v2098_v59 = vshrl.u32 %v5342_v43, %v2089_v47  ;;  %v2100_v9 = vshll.u32 %v5342_v43, %v2088_v49 }
 0x20c   : > { %5244 = vcosq.f32 %v1853_v60  ;;  %v2101_v0 = vshrl.u32 %v5343_v45, %v2089_v47  ;;  %v6542_v23 = vand.u32 3, %v3612_v29  ;;  %v2093_v36 = vor.u32 %v2092_v4, %v2091_v55 }
 0x20d   : > { %5246 = vsinq.f32 %v1853_v60  ;;  %v4695_v15 = vmin.u32 %v1316_v50, %v6522_v61  ;;  %v2096_v48 = vor.u32 %v2095_v20, %v2094_v7  ;;  %v2099_v11 = vor.u32 %v2098_v59, %v2097_v25 }
 0x20e   : > { %v2102_v38 = vor.u32 %v2101_v0, %v2100_v9  ;;  %v2103_v56 = vshll.u32 %v5343_v45, %v2088_v49  ;;  %v2104_v57 = vshrl.u32 %v5344_v52, %v2089_v47  ;;  %v6547_v34 = vshll.u32 %v2082_v53, 8  ;;  %v730_v0 = vld [vmem:[%s5877_s10 + $0x58] sm:$0xff] }
 0x20f   : > { %v1318_v16 = vclz %v4695_v15  ;;  %v2090_v24 = vshrl.u32 %v5339_v35, %v2089_v47  ;;  %vm2106_vm2 = vcmp.lt.s32.totalorder %v2087_v27, 1  ;;  %vm2107_vm13 = vcmp.lt.s32.totalorder %v2087_v27, 2 }
 0x210   : > { %v4690_v30 = vadd.s32 4294967169, %v1151_v54  ;;  %v2105_v18 = vor.u32 %v2104_v57, %v2103_v56  ;;  %vm2108_vm0 = vcmp.lt.s32.totalorder %v2087_v27, 3  ;;  %vm2109_vm3 = vcmp.lt.s32.totalorder %v2087_v27, 4  ;;  %v729_v57 = vld [vmem:[%s5877_s10 + $0x50] sm:$0xff] }
 0x211   : > { %v4696_v12 = vadd.s32 4294967294, %v1318_v16  ;;  %v2111_v31 = vsel %vm2109_vm3, %v2099_v11, 2102212464  ;;  %v2114_v33 = vsel %vm2106_vm2, %v2093_v36, %v2096_v48  ;;  %v2115_v62 = vsel %vm2109_vm3, %v2102_v38, 920167782 }
 0x212   : > { %v2118_v44 = vsel %vm2106_vm2, %v2096_v48, %v2099_v11  ;;  %v2110_v10 = vsel %vm2106_vm2, %v2090_v24, %v2093_v36  ;;  %v2116_v49 = vsel %vm2108_vm0, %v2099_v11, %v2115_v62  ;;  %v2119_v46 = vsel %vm2109_vm3, %v2105_v18, 1326507024 }
 0x213   : > { %vm4697_vm4 = vcmp.lt.s32.totalorder %v4696_v12, 0  ;;  %v2112_v40 = vsel %vm2108_vm0, %v2096_v48, %v2111_v31  ;;  %v2117_v42 = vsel %vm2107_vm13, %v2114_v33, %v2116_v49  ;;  %v2120_v47 = vsel %vm2108_vm0, %v2102_v38, %v2119_v46 }
 0x214   : > { %v1321_v63 = vsel %vm4697_vm4, 0, %v4696_v12  ;;  %vm1859_vm5 = vcmp.lt.s32.totalorder %v6540_v8, 2  ;;  %v1306_v22 = vadd.s32 %v6446_v19, %v6456_v21  ;;  %v2121_v54 = vsel %vm2107_vm13, %v2118_v44, %v2120_v47 }
 0x215   : > { %v1322_v29 = vsub.s32 32, %v1321_v63  ;;  %v1326_v53 = vsub.s32 4294967266, %v1321_v63  ;;  %vm1857_vm6 = vweird.f32 %v6145_v6  ;;  %v1323_v4 = vshll.u32 %v6522_v61, %v1321_v63 }
 0x216   : > { %v6557_v51 = vmul.u32.u64.low %v6547_v34, %v2121_v54  ;;  %v6558_v32 = vmul.u32.u64.high %v6547_v34, %v2121_v54, %v6557_v51  ;;  %v6561_v26 = vmul.u32.u64.low %v6547_v34, %v2117_v42  ;;  %v6562_v55 = vmul.u32.u64.high %v6547_v34, %v2117_v42, %v6561_v26 }
 0x217   : > { %v1324_v20 = vshrl.u32 %v1306_v22, %v1322_v29  ;;  %v1327_v60 = vadd.s32 127, %v1326_v53  ;;  %v2113_v19 = vsel %vm2107_vm13, %v2110_v10, %v2112_v40  ;;  %vm1860_vm7 = vcmp.eq.s32.totalorder %v6540_v8, 0 }
 0x218   : > { %vm1863_vm8 = vcmp.eq.s32.totalorder %v6540_v8, 2  ;;  %vm3614_vm9 = vcmp.lt.s32.totalorder %v6542_v23, 2  ;;  %v1157_v21 = vadd.s32 1, %v4690_v30  ;;  %vm3615_vm10 = vcmp.eq.s32.totalorder %v6542_v23, 0 }
 0x219   : > { %v5245_v50 = vpop.eup %5244  ;;  %vm3618_vm14 = vcmp.eq.s32.totalorder %v6542_v23, 2  ;;  %v1325_v7 = vor.u32 %v1324_v20, %v1323_v4  ;;  %v1328_v61 = vshll.u32 %v1327_v60, 23  ;;  %v2129_v27 = vmul.u32 %v6547_v34, %v2113_v19 }
 0x21a   : > { %v5247_v25 = vpop.eup %5246  ;;  %v1864_v59 = vxor.u32 2147483648, %v5245_v50  ;;  %vm2131_vm11 = vc.u32 %v6558_v32, %v6561_v26  ;;  %v2132_v9 = vadd.s32 1, %v6562_v55  ;;  %vm1158_vm12 = vcmp.gt.s32.totalorder %v1157_v21, 0 }
 0x21b   : > { %v1861_v15 = vxor.u32 2147483648, %v5247_v25  ;;  %v1329_v36 = vor.u32 4788187, %v1328_v61  ;;  %v1332_v48 = vcvt.s32.f32 %v1325_v7  ;;  %v1159_v56 = vsel %vm1158_vm12, %v1157_v21, 0 }
 0x21c   : > { %v1865_v11 = vsel %vm1863_vm8, %v1864_v59, %v5247_v25  ;;  %v3620_v38 = vsel %vm3618_vm14, %v1864_v59, %v5247_v25  ;;  %v2133_v16 = vsel %vm2131_vm11, %v2132_v9, %v6562_v55  ;;  %v2394_v18 = vmul.f32 %v6486_v5, %v730_v0 }
 0x21d   : > { %v1862_v34 = vsel %vm1860_vm7, %v5245_v50, %v1861_v15  ;;  %v3617_v24 = vsel %vm3615_vm10, %v5245_v50, %v1861_v15  ;;  %v1330_v30 = vand.u32 2147483647, %v1329_v36  ;;  %v2134_v12 = vadd.s32 %v2133_v16, %v2129_v27 }
 0x21e   : > { %v1866_v31 = vsel %vm1859_vm5, %v1862_v34, %v1865_v11  ;;  %v3621_v33 = vsel %vm3614_vm9, %v3617_v24, %v3620_v38  ;;  %v1161_v62 = vand.u32 31, %v1159_v56  ;;  %v4154_v63 = vmul.f32 %v6517_v14, %v730_v0  ;;  %v677_v0 = vpop.f32.mrf.mxu1 }
 0x21f   : > { %v1867_v44 = vsel %vm1857_vm6, nan, %v1866_v31  ;;  %v3622_v10 = vsel %vm1857_vm6, nan, %v3621_v33  ;;  %v1333_v49 = vmul.f32 %v1332_v48, %v1330_v30  ;;  %v2135_v46 = vadd.s32 536870912, %v2134_v12 }
 0x220   : > { %v2393_v5 = vmul.f32 %v1867_v44, %v729_v57  ;;  %v4153_v40 = vmul.f32 %v3622_v10, %v729_v57  ;;  %v1162_v8 = vsub.s32 32, %v1161_v62  ;;  %v1147_v23 = vand.u32 2147483647, %v6374_v28 }
 0x221   : > { %v6595_v42 = vshrl.u32 %v2135_v46, 30  ;;  %v1334_v29 = vxor.u32 2147483648, %v1333_v49  ;;  %vm6603_vm15 = vcmp.le.f32.partialorder %v1250_v58, 0.7853982  ;;  %vm1252_vm1 = vcmp.lt.s32.totalorder %v6258_v17, 0 }
 0x222   : > { %v4902_v47 = vpack.c.bf16 %v2394_v18, %v2393_v5  ;;  %v4942_v22 = vpack.c.bf16 %v4154_v63, %v4153_v40  ;;  %v1165_v14 = vshrl.u32 %v5340_v39, %v1162_v8  ;;  %v1168_v54 = vshrl.u32 %v5341_v41, %v1162_v8 }
 0x223   : > { %v2137_v53 = vshll.u32 %v6595_v42, 30  ;;  %v1154_v55 = vand.u32 8388607, %v1147_v23  ;;  %v1171_v4 = vshrl.u32 %v5342_v43, %v1162_v8  ;;  %v1335_v20 = vsel %vm1252_vm1, %v1334_v29, %v1333_v49 }
 0x224   : > { %4958 = vst [vmem:[%s6055_s18 + $0x28] sm:$0xff] %v4902_v47   ;;  %4965 = vst [vmem:[%s6058_s14 + $0x28] sm:$0xff] %v4942_v22   ;;  %v1164_v58 = vshll.u32 %v5339_v35, %v1161_v62  ;;  %v1167_v60 = vshll.u32 %v5340_v39, %v1161_v62  ;;  %v1174_v19 = vshrl.u32 %v5343_v45, %v1162_v8  ;;  %v1160_v50 = vshrl.u32 %v1159_v56, 5 }
 0x225   : > { %v6610_v51 = vsub.s32 %v2134_v12, %v2137_v53  ;;  %v1170_v7 = vshll.u32 %v5341_v41, %v1161_v62  ;;  %v1173_v61 = vshll.u32 %v5342_v43, %v1161_v62  ;;  %v1176_v27 = vshll.u32 %v5343_v45, %v1161_v62 }
 0x226   : > { %v1166_v25 = vor.u32 %v1165_v14, %v1164_v58  ;;  %v1169_v59 = vor.u32 %v1168_v54, %v1167_v60  ;;  %v1177_v9 = vshrl.u32 %v5344_v52, %v1162_v8  ;;  %v1338_v15 = vsel %vm6603_vm15, %v6258_v17, %v1335_v20 }
 0x227   : > { %v2140_v21 = vsub.s32 0, %v6610_v51  ;;  %v1172_v48 = vor.u32 %v1171_v4, %v1170_v7  ;;  %v1175_v11 = vor.u32 %v1174_v19, %v1173_v61  ;;  %v1155_v38 = vor.u32 8388608, %v1154_v55  ;;  %v5043_v61 = vpop.f32.mrf.mxu0 }
 0x228   : > { %v1178_v16 = vor.u32 %v1177_v9, %v1176_v27  ;;  %vm1179_vm2 = vcmp.lt.s32.totalorder %v1160_v50, 1  ;;  %v6630_v57 = vadd.f32 %v5574_v3, %v677_v0  ;;  %5248 = vcosq.f32 %v1338_v15 }
 0x229   : > { %v4727_v36 = vmin.u32 %v2140_v21, %v6610_v51  ;;  %vm1180_vm13 = vcmp.lt.s32.totalorder %v1160_v50, 2  ;;  %vm1182_vm0 = vcmp.lt.s32.totalorder %v1160_v50, 4  ;;  %v1187_v34 = vsel %vm1179_vm2, %v1166_v25, %v1169_v59 }
 0x22a   : > { %vm1181_vm3 = vcmp.lt.s32.totalorder %v1160_v50, 3  ;;  %v1188_v30 = vsel %vm1182_vm0, %v1175_v11, 920167782  ;;  %v1191_v12 = vsel %vm1179_vm2, %v1169_v59, %v1172_v48  ;;  %v1184_v18 = vsel %vm1182_vm0, %v1172_v48, 2102212464 }
 0x22b   : > { %v2142_v56 = vclz %v4727_v36  ;;  %v1189_v31 = vsel %vm1181_vm3, %v1172_v48, %v1188_v30  ;;  %v1192_v33 = vsel %vm1182_vm0, %v1178_v16, 1326507024  ;;  %v1195_v62 = vshll.u32 %v1155_v38, 8 }
 0x22c   : > { %v1163_v44 = vshrl.u32 %v5339_v35, %v1162_v8  ;;  %v1190_v10 = vsel %vm1180_vm13, %v1187_v34, %v1189_v31  ;;  %v1193_v49 = vsel %vm1181_vm3, %v1175_v11, %v1192_v33  ;;  %v1336_v47 = vsub.s32 4, %v6509_v13 }
 0x22d   : > { %v4728_v24 = vadd.s32 4294967294, %v2142_v56  ;;  %v1194_v63 = vsel %vm1180_vm13, %v1191_v12, %v1193_v49  ;;  %v6639_v5 = vmul.u32.u64.low %v1195_v62, %v1190_v10  ;;  %v6640_v40 = vmul.u32.u64.high %v1195_v62, %v1190_v10, %v6639_v5 }
 0x22e   : > { %5250 = vsinq.f32 %v1338_v15  ;;  %v1183_v22 = vsel %vm1179_vm2, %v1163_v44, %v1166_v25  ;;  %v1185_v29 = vsel %vm1181_vm3, %v1169_v59, %v1184_v18  ;;  %v1974_v54 = vand.u32 2139095040, %v6630_v57 }
 0x22f   : > { %vm4729_vm4 = vcmp.lt.s32.totalorder %v4728_v24, 0  ;;  %v6646_v8 = vmul.u32.u64.low %v1195_v62, %v1194_v63  ;;  %v6647_v14 = vmul.u32.u64.high %v1195_v62, %v1194_v63, %v6646_v8  ;;  %v1186_v55 = vsel %vm1180_vm13, %v1183_v22, %v1185_v29 }
 0x230   : > { %v2145_v46 = vsel %vm4729_vm4, 0, %v4728_v24  ;;  %v1205_v4 = vadd.s32 1, %v6640_v40  ;;  %v1975_v20 = vshrl.u32 %v1974_v54, 23  ;;  %v1337_v58 = vsel %vm1252_vm1, %v1336_v47, %v6509_v13 }
 0x231   : > { %v2150_v53 = vsub.s32 4294967266, %v2145_v46  ;;  %vm1204_vm5 = vc.u32 %v6647_v14, %v6639_v5  ;;  %v1202_v19 = vmul.u32 %v1195_v62, %v1186_v55  ;;  %v1339_v50 = vsel %vm6603_vm15, 0, %v1337_v58  ;;  %v6683_v62 = vld [vmem:[%s5507_s6 + $0x78] sm:$0xff]  ;;  %s4836_s6 = sshll.u32 (%p5428_p6), %s5321_s20, 5 }
 0x232   : > { %v1206_v21 = vsel %vm1204_vm5, %v1205_v4, %v6640_v40  ;;  %v4722_v7 = vadd.s32 4294967169, %v1975_v20  ;;  %v2160_v59 = vsub.s32 4, %v6595_v42  ;;  %v2146_v9 = vsub.s32 32, %v2145_v46  ;;  %s4295_s11 = sadd.s32 (%p5428_p6), %s5325_s21, %s4836_s6 }
 0x233   : > { %v2151_v60 = vadd.s32 127, %v2150_v53  ;;  %v1207_v27 = vadd.s32 %v1206_v21, %v1202_v19  ;;  %v1971_v13 = vand.u32 2147483647, %v6630_v57  ;;  %vm2076_vm6 = vcmp.lt.s32.totalorder %v6280_v1, 0  ;;  %s4837_s12 = sshll.u32 (%p5428_p6), %s4295_s11, 2 }
 0x234   : > { %v1981_v15 = vadd.s32 1, %v4722_v7  ;;  %v6666_v48 = vadd.f32 %v5574_v3, %v5043_v61  ;;  %v6668_v11 = vand.u32 3, %v1339_v50  ;;  %v3092_v38 = vadd.s32 3, %v1339_v50  ;;  %s4297_s15 = scalar_lea.vmem (%p5428_p6), %s7242_s4, %s4837_s12 }
 0x235   : > { %v6658_v25 = vpop.eup %5248  ;;  %v2152_v0 = vshll.u32 %v2151_v60, 23  ;;  %v1208_v36 = vadd.s32 536870912, %v1207_v27  ;;  %v2130_v6 = vadd.s32 %v6561_v26, %v6558_v32  ;;  %v2161_v56 = vsel %vm2076_vm6, %v2160_v59, %v6595_v42 }
 0x236   : > { %vm1982_vm7 = vcmp.gt.s32.totalorder %v1981_v15, 0  ;;  %v1349_v16 = vxor.u32 2147483648, %v6658_v25  ;;  %v1978_v31 = vand.u32 8388607, %v1971_v13  ;;  %v4260_v32 = vcombine.high %v6683_v62, %v6683_v62 }
 0x237   : > { %v6676_v34 = vshrl.u32 %v1208_v36, 30  ;;  %v1983_v24 = vsel %vm1982_vm7, %v1981_v15, 0  ;;  %v2148_v12 = vshrl.u32 %v2130_v6, %v2146_v9  ;;  %v2153_v18 = vor.u32 4788187, %v2152_v0 }
 0x238   : > { %v1985_v33 = vand.u32 31, %v1983_v24  ;;  %vm6689_vm8 = vcmp.le.f32.partialorder %v2074_v37, 0.7853982  ;;  %v1459_v44 = vand.u32 2139095040, %v6666_v48  ;;  %vm1348_vm9 = vcmp.eq.s32.totalorder %v6668_v11, 2 }
 0x239   : > { %v1210_v42 = vshll.u32 %v6676_v34, 30  ;;  %v6696_v10 = vand.u32 3, %v3092_v38  ;;  %v2147_v49 = vshll.u32 %v6610_v51, %v2145_v46  ;;  %v6707_v47 = vsel %vm6689_vm8, 0, %v2161_v56 }
 0x23a   : > { %v1986_v63 = vsub.s32 32, %v1985_v33  ;;  %v2154_v53 = vand.u32 2147483647, %v2153_v18  ;;  %v1979_v8 = vor.u32 8388608, %v1978_v31  ;;  %v1988_v46 = vshll.u32 %v5339_v35, %v1985_v33 }
 0x23b   : > { %v6678_v30 = vpop.eup %5250  ;;  %v6709_v22 = vsub.s32 %v1207_v27, %v1210_v42  ;;  %v2149_v29 = vor.u32 %v2148_v12, %v2147_v49  ;;  %v1460_v4 = vshrl.u32 %v1459_v44, 23  ;;  %v1991_v20 = vshll.u32 %v5340_v39, %v1985_v33 }
 0x23c   : > { %v1346_v40 = vxor.u32 2147483648, %v6678_v30  ;;  %v6703_v37 = vsel %vm1348_vm9, %v1349_v16, %v6678_v30  ;;  %v1989_v54 = vshrl.u32 %v5340_v39, %v1986_v63  ;;  %v1992_v55 = vshrl.u32 %v5341_v41, %v1986_v63 }
 0x23d   : > { %v1213_v51 = vsub.s32 0, %v6709_v22  ;;  %v1995_v58 = vshrl.u32 %v5342_v43, %v1986_v63  ;;  %v1997_v60 = vshll.u32 %v5342_v43, %v1985_v33  ;;  %v1998_v19 = vshrl.u32 %v5343_v45, %v1986_v63 }
 0x23e   : > { %v1203_v21 = vadd.s32 %v6639_v5, %v6647_v14  ;;  %v1984_v61 = vshrl.u32 %v1983_v24, 5  ;;  %v1994_v50 = vshll.u32 %v5341_v41, %v1985_v33  ;;  %v2156_v59 = vcvt.s32.f32 %v2149_v29 }
 0x23f   : > { %v4691_v7 = vmin.u32 %v1213_v51, %v6709_v22  ;;  %v1990_v27 = vor.u32 %v1989_v54, %v1988_v46  ;;  %v1993_v9 = vor.u32 %v1992_v55, %v1991_v20  ;;  %v1999_v0 = vor.u32 %v1998_v19, %v1997_v60 }
 0x240   : > { %vm1345_vm10 = vcmp.eq.s32.totalorder %v6668_v11, 0  ;;  %v1996_v36 = vor.u32 %v1995_v58, %v1994_v50  ;;  %v2000_v38 = vshll.u32 %v5343_v45, %v1985_v33  ;;  %v2001_v6 = vshrl.u32 %v5344_v52, %v1986_v63 }
 0x241   : > { %v1215_v15 = vclz %v4691_v7  ;;  %v2157_v56 = vmul.f32 %v2156_v59, %v2154_v53  ;;  %v1987_v5 = vshrl.u32 %v5339_v35, %v1986_v63  ;;  %v6727_v14 = vshll.u32 %v1979_v8, 8 }
 0x242   : > { %v4702_v24 = vadd.s32 4294967169, %v1460_v4  ;;  %vm3095_vm14 = vcmp.eq.s32.totalorder %v6696_v10, 0  ;;  %vm3098_vm11 = vcmp.eq.s32.totalorder %v6696_v10, 2  ;;  %v2002_v18 = vor.u32 %v2001_v6, %v2000_v38 }
 0x243   : > { %v4692_v12 = vadd.s32 4294967294, %v1215_v15  ;;  %vm2003_vm12 = vcmp.lt.s32.totalorder %v1984_v61, 1  ;;  %vm2006_vm15 = vcmp.lt.s32.totalorder %v1984_v61, 4  ;;  %vm1344_vm1 = vcmp.lt.s32.totalorder %v6668_v11, 2 }
 0x244   : > { %vm2004_vm2 = vcmp.lt.s32.totalorder %v1984_v61, 2  ;;  %vm2005_vm13 = vcmp.lt.s32.totalorder %v1984_v61, 3  ;;  %v2011_v31 = vsel %vm2003_vm12, %v1990_v27, %v1993_v9  ;;  %v2012_v33 = vsel %vm2006_vm15, %v1999_v0, 920167782 }
 0x245   : > { %vm1149_vm0 = vcmp.lt.s32.totalorder %v6374_v28, 0  ;;  %vm4693_vm3 = vcmp.lt.s32.totalorder %v4692_v12, 0  ;;  %v2008_v42 = vsel %vm2006_vm15, %v1996_v36, 2102212464  ;;  %v2013_v44 = vsel %vm2005_vm13, %v1996_v36, %v2012_v33 }
 0x246   : > { %v2015_v49 = vsel %vm2003_vm12, %v1993_v9, %v1996_v36  ;;  %v2158_v63 = vxor.u32 2147483648, %v2157_v56  ;;  %v1218_v29 = vsel %vm4693_vm3, 0, %v4692_v12  ;;  %v2014_v53 = vsel %vm2004_vm2, %v2011_v31, %v2013_v44 }
 0x247   : > { %v2016_v8 = vsel %vm2006_vm15, %v2002_v18, 1326507024  ;;  %vm1342_vm4 = vweird.f32 %v6258_v17  ;;  %v1219_v54 = vsub.s32 32, %v1218_v29  ;;  %v1223_v51 = vsub.s32 4294967266, %v1218_v29  ;;  %v6793_v18 = vpop.f32.mrf.mxu1 }
 0x248   : > { %v2007_v46 = vsel %vm2003_vm12, %v1987_v5, %v1990_v27  ;;  %v2017_v55 = vsel %vm2005_vm13, %v1999_v0, %v2016_v8  ;;  %vm6742_vm5 = vcmp.le.f32.partialorder %v1147_v23, 0.7853982  ;;  %v2009_v20 = vsel %vm2005_vm13, %v1993_v9, %v2008_v42 }
 0x249   : > { %v2018_v58 = vsel %vm2004_vm2, %v2015_v49, %v2017_v55  ;;  %v6749_v60 = vmul.u32.u64.low %v6727_v14, %v2014_v53  ;;  %v6750_v19 = vmul.u32.u64.high %v6727_v14, %v2014_v53, %v6749_v60  ;;  %v1220_v7 = vshll.u32 %v6709_v22, %v1218_v29 }
 0x24a   : > { %v1221_v50 = vshrl.u32 %v1203_v21, %v1219_v54  ;;  %v1224_v59 = vadd.s32 127, %v1223_v51  ;;  %v1466_v27 = vadd.s32 1, %v4702_v24  ;;  %v1347_v23 = vsel %vm1345_vm10, %v6658_v25, %v1346_v40 }
 0x24b   : > { %v1233_v9 = vsub.s32 4, %v6676_v34  ;;  %v6761_v0 = vmul.u32.u64.low %v6727_v14, %v2018_v58  ;;  %v6762_v15 = vmul.u32.u64.high %v6727_v14, %v2018_v58, %v6761_v0  ;;  %v2159_v36 = vsel %vm2076_vm6, %v2158_v63, %v2157_v56 }
 0x24c   : > { %v1222_v38 = vor.u32 %v1221_v50, %v1220_v7  ;;  %v1225_v22 = vshll.u32 %v1224_v59, 23  ;;  %v2010_v21 = vsel %vm2004_vm2, %v2007_v46, %v2009_v20  ;;  %vm3094_vm7 = vcmp.lt.s32.totalorder %v6696_v10, 2 }
 0x24d   : > { %v3097_v6 = vsel %vm3095_vm14, %v6658_v25, %v1346_v40  ;;  %v3100_v5 = vsel %vm3098_vm11, %v1349_v16, %v6678_v30  ;;  %v2029_v56 = vadd.s32 1, %v6750_v19  ;;  %v1351_v61 = vsel %vm1344_vm1, %v1347_v23, %v6703_v37 }
 0x24e   : > { %v3924_v24 = vadd.s32 3, %v6707_v47  ;;  %v1226_v12 = vor.u32 4788187, %v1225_v22  ;;  %vm1467_vm6 = vcmp.gt.s32.totalorder %v1466_v27, 0  ;;  %v2162_v40 = vsel %vm6689_vm8, %v6280_v1, %v2159_v36 }
 0x24f   : > { %v1234_v25 = vsel %vm1149_vm0, %v1233_v9, %v6676_v34  ;;  %v2026_v16 = vmul.u32 %v6727_v14, %v2010_v21  ;;  %vm2028_vm9 = vc.u32 %v6762_v15, %v6749_v60  ;;  %v3101_v11 = vsel %vm3094_vm7, %v3097_v6, %v3100_v5  ;;  %v724_v34 = vld [vmem:[%s5877_s10 + $0x28] sm:$0xff] }
 0x250   : > { %v1227_v30 = vand.u32 2147483647, %v1226_v12  ;;  %v1229_v10 = vcvt.s32.f32 %v1222_v38  ;;  %v2030_v37 = vsel %vm2028_vm9, %v2029_v56, %v6750_v19  ;;  %v1352_v26 = vsel %vm1342_vm4, nan, %v1351_v61 }
 0x251   : > { %v2031_v31 = vadd.s32 %v2030_v37, %v2026_v16  ;;  %v1456_v33 = vand.u32 2147483647, %v6666_v48  ;;  %v1468_v42 = vsel %vm1467_vm6, %v1466_v27, 0  ;;  %5252 = vcosq.f32 %v2162_v40 }
 0x252   : > { %v1230_v14 = vmul.f32 %v1229_v10, %v1227_v30  ;;  %v1236_v44 = vsel %vm6742_vm5, 0, %v1234_v25  ;;  %v1470_v49 = vand.u32 31, %v1468_v42  ;;  %5254 = vsinq.f32 %v2162_v40 }
 0x253   : > { %v6802_v63 = vand.u32 3, %v6707_v47  ;;  %v2032_v29 = vadd.s32 536870912, %v2031_v31  ;;  %v6806_v53 = vadd.f32 %v5574_v3, %v6793_v18  ;;  %v3102_v8 = vsel %vm1342_vm4, nan, %v3101_v11 }
 0x254   : > { %v6810_v54 = vand.u32 3, %v3924_v24  ;;  %v1231_v51 = vxor.u32 2147483648, %v1230_v14  ;;  %v1471_v46 = vsub.s32 32, %v1470_v49  ;;  %v6812_v55 = vmul.f32 %v1352_v26, %v724_v34 }
 0x255   : > { %v2988_v20 = vadd.s32 3, %v1236_v44  ;;  %v6814_v58 = vshrl.u32 %v2032_v29, 30  ;;  %v1463_v47 = vand.u32 8388607, %v1456_v33  ;;  %v1473_v7 = vshll.u32 %v5339_v35, %v1470_v49 }
 0x256   : > { %v1232_v19 = vsel %vm1149_vm0, %v1231_v51, %v1230_v14  ;;  %v1474_v17 = vshrl.u32 %v5340_v39, %v1471_v46  ;;  %v1477_v50 = vshrl.u32 %v5341_v41, %v1471_v46  ;;  %v1476_v23 = vshll.u32 %v5340_v39, %v1470_v49 }
 0x257   : > { %v1235_v59 = vsel %vm6742_vm5, %v6374_v28, %v1232_v19  ;;  %v2034_v27 = vshll.u32 %v6814_v58, 30  ;;  %v1480_v9 = vshrl.u32 %v5342_v43, %v1471_v46  ;;  %v1479_v0 = vshll.u32 %v5341_v41, %v1470_v49 }
 0x258   : > { %5256 = vcosq.f32 %v1235_v59  ;;  %v1482_v36 = vshll.u32 %v5342_v43, %v1470_v49  ;;  %v1483_v38 = vshrl.u32 %v5343_v45, %v1471_v46  ;;  %v1469_v21 = vshrl.u32 %v1468_v42, 5 }
 0x259   : > { %5258 = vsinq.f32 %v1235_v59  ;;  %v6832_v22 = vsub.s32 %v2031_v31, %v2034_v27  ;;  %v1475_v6 = vor.u32 %v1474_v17, %v1473_v7  ;;  %v1478_v4 = vor.u32 %v1477_v50, %v1476_v23 }
 0x25a   : > { %v1481_v5 = vor.u32 %v1480_v9, %v1479_v0  ;;  %v1484_v56 = vor.u32 %v1483_v38, %v1482_v36  ;;  %v1486_v61 = vshrl.u32 %v5344_v52, %v1471_v46  ;;  %v6835_v24 = vand.u32 3, %v1236_v44 }
 0x25b   : > { %v6837_v12 = vand.u32 3, %v2988_v20  ;;  %v2037_v40 = vsub.s32 0, %v6832_v22  ;;  %v1485_v25 = vshll.u32 %v5343_v45, %v1470_v49  ;;  %v6841_v16 = vmul.f32 %v3102_v8, %v724_v34 }
 0x25c   : > { %v1464_v11 = vor.u32 8388608, %v1463_v47  ;;  %v1472_v30 = vshrl.u32 %v5339_v35, %v1471_v46  ;;  %v2283_v10 = vand.u32 2139095040, %v6806_v53  ;;  %vm1488_vm8 = vcmp.lt.s32.totalorder %v1469_v21, 1 }
 0x25d   : > { %v4723_v37 = vmin.u32 %v2037_v40, %v6832_v22  ;;  %v1487_v26 = vor.u32 %v1486_v61, %v1485_v25  ;;  %vm1491_vm10 = vcmp.lt.s32.totalorder %v1469_v21, 4  ;;  %vm1490_vm14 = vcmp.lt.s32.totalorder %v1469_v21, 3 }
 0x25e   : > { %v1493_v31 = vsel %vm1491_vm10, %v1481_v5, 2102212464  ;;  %v1496_v42 = vsel %vm1488_vm8, %v1475_v6, %v1478_v4  ;;  %v1497_v14 = vsel %vm1491_vm10, %v1484_v56, 920167782  ;;  %v6849_v44 = vpop.eup %5252  ;;  %vm1245_vm11 = vcmp.eq.s32.totalorder %v6835_v24, 2 }
 0x25f   : > { %vm2994_vm12 = vcmp.eq.s32.totalorder %v6837_v12, 2  ;;  %v2039_v34 = vclz %v4723_v37  ;;  %v1498_v49 = vsel %vm1490_vm14, %v1481_v5, %v1497_v14  ;;  %v6854_v29 = vpop.eup %5254  ;;  %vm1242_vm15 = vcmp.eq.s32.totalorder %v6835_v24, 0 }
 0x260   : > { %vm2991_vm1 = vcmp.eq.s32.totalorder %v6837_v12, 0  ;;  %vm1489_vm2 = vcmp.lt.s32.totalorder %v1469_v21, 2  ;;  %v1492_v8 = vsel %vm1488_vm8, %v1472_v30, %v1475_v6  ;;  %v1500_v51 = vsel %vm1488_vm8, %v1478_v4, %v1481_v5 }
 0x261   : > { %v1504_v46 = vshll.u32 %v1464_v11, 8  ;;  %vm1241_vm13 = vcmp.lt.s32.totalorder %v6835_v24, 2  ;;  %vm2990_vm0 = vcmp.lt.s32.totalorder %v6837_v12, 2  ;;  %v4724_v20 = vadd.s32 4294967294, %v2039_v34 }
 0x262   : > { %v1494_v47 = vsel %vm1490_vm14, %v1478_v4, %v1493_v31  ;;  %v1499_v19 = vsel %vm1489_vm2, %v1496_v42, %v1498_v49  ;;  %v1501_v7 = vsel %vm1491_vm10, %v1487_v26, 1326507024  ;;  %vm1239_vm3 = vweird.f32 %v6374_v28  ;;  %v723_v49 = vld [vmem:[%s5877_s10 + $0x20] sm:$0xff] }
 0x263   : > { %vm1973_vm4 = vcmp.lt.s32.totalorder %v6630_v57, 0  ;;  %v1502_v17 = vsel %vm1490_vm14, %v1484_v56, %v1501_v7  ;;  %v6868_v50 = vmul.u32.u64.low %v1504_v46, %v1499_v19  ;;  %v6869_v59 = vmul.u32.u64.high %v1504_v46, %v1499_v19, %v6868_v50 }
 0x264   : > { %v2284_v27 = vshrl.u32 %v2283_v10, 23  ;;  %v2170_v23 = vxor.u32 2147483648, %v6854_v29  ;;  %v2173_v9 = vxor.u32 2147483648, %v6849_v44  ;;  %vm4725_vm5 = vcmp.lt.s32.totalorder %v4724_v20, 0 }
 0x265   : > { %v1503_v0 = vsel %vm1489_vm2, %v1500_v51, %v1502_v17  ;;  %v2042_v36 = vsel %vm4725_vm5, 0, %v4724_v20  ;;  %v5257_v5 = vpop.eup %5256  ;;  %vm6880_vm7 = vcmp.le.f32.partialorder %v1971_v13, 0.7853982  ;;  %v2027_v61 = vadd.s32 %v6749_v60, %v6762_v15 }
 0x266   : > { %v6875_v38 = vmul.u32.u64.low %v1504_v46, %v1503_v0  ;;  %v6876_v6 = vmul.u32.u64.high %v1504_v46, %v1503_v0, %v6875_v38  ;;  %v4734_v4 = vadd.s32 4294967169, %v2284_v27  ;;  %v2043_v40 = vsub.s32 32, %v2042_v36  ;;  %v5259_v30 = vpop.eup %5258 }
 0x267   : > { %v2047_v25 = vsub.s32 4294967266, %v2042_v36  ;;  %v1495_v11 = vsel %vm1489_vm2, %v1492_v8, %v1494_v47  ;;  %v1246_v10 = vxor.u32 2147483648, %v5257_v5  ;;  %v2057_v37 = vsub.s32 4, %v6814_v58 }
 0x268   : > { %v1514_v26 = vadd.s32 1, %v6869_v59  ;;  %v2290_v31 = vadd.s32 1, %v4734_v4  ;;  %vm2169_vm6 = vcmp.eq.s32.totalorder %v6802_v63, 0  ;;  %vm2172_vm9 = vcmp.eq.s32.totalorder %v6802_v63, 2 }
 0x269   : > { %v1243_v13 = vxor.u32 2147483648, %v5259_v30  ;;  %v2044_v42 = vshll.u32 %v6832_v22, %v2042_v36  ;;  %v2045_v60 = vshrl.u32 %v2027_v61, %v2043_v40  ;;  %v2048_v15 = vadd.s32 127, %v2047_v25 }
 0x26a   : > { %vm3927_vm8 = vcmp.eq.s32.totalorder %v6810_v54, 0  ;;  %v1247_v21 = vsel %vm1245_vm11, %v1246_v10, %v5259_v30  ;;  %v2996_v14 = vsel %vm2994_vm12, %v1246_v10, %v5259_v30  ;;  %v1511_v34 = vmul.u32 %v1504_v46, %v1495_v11 }
 0x26b   : > { %vm1513_vm10 = vc.u32 %v6876_v6, %v6868_v50  ;;  %v1244_v8 = vsel %vm1242_vm15, %v5257_v5, %v1243_v13  ;;  %v2993_v22 = vsel %vm2991_vm1, %v5257_v5, %v1243_v13  ;;  %v2046_v51 = vor.u32 %v2045_v60, %v2044_v42 }
 0x26c   : > { %v2049_v20 = vshll.u32 %v2048_v15, 23  ;;  %v1248_v47 = vsel %vm1241_vm13, %v1244_v8, %v1247_v21  ;;  %v2997_v19 = vsel %vm2990_vm0, %v2993_v22, %v2996_v14  ;;  %v1515_v46 = vsel %vm1513_vm10, %v1514_v26, %v6869_v59 }
 0x26d   : > { %vm2291_vm14 = vcmp.gt.s32.totalorder %v2290_v31, 0  ;;  %v1249_v7 = vsel %vm1239_vm3, nan, %v1248_v47  ;;  %v2998_v17 = vsel %vm1239_vm3, nan, %v2997_v19  ;;  %v2058_v0 = vsel %vm1973_vm4, %v2057_v37, %v6814_v58 }
 0x26e   : > { %v2050_v27 = vor.u32 4788187, %v2049_v20  ;;  %v2387_v36 = vmul.f32 %v1249_v7, %v723_v49  ;;  %v4147_v24 = vmul.f32 %v2998_v17, %v723_v49  ;;  %v1516_v38 = vadd.s32 %v1515_v46, %v1511_v34 }
 0x26f   : > { %v2292_v4 = vsel %vm2291_vm14, %v2290_v31, 0  ;;  %v2053_v59 = vcvt.s32.f32 %v2046_v51  ;;  %v2280_v5 = vand.u32 2147483647, %v6806_v53  ;;  %vm2168_vm11 = vcmp.lt.s32.totalorder %v6802_v63, 2 }
 0x270   : > { %v2051_v12 = vand.u32 2147483647, %v2050_v27  ;;  %v2294_v61 = vand.u32 31, %v2292_v4  ;;  %v4887_v28 = vpack.c.bf16 %v6812_v55, %v2387_v36  ;;  %v4927_v40 = vpack.c.bf16 %v6841_v16, %v4147_v24 }
 0x271   : > { %v2060_v58 = vsel %vm6880_vm7, 0, %v2058_v0  ;;  %v1517_v25 = vadd.s32 536870912, %v1516_v38  ;;  %vm3930_vm12 = vcmp.eq.s32.totalorder %v6810_v54, 2  ;;  %v2171_v10 = vsel %vm2169_vm6, %v6849_v44, %v2170_v23 }
 0x272   : > { %v2054_v11 = vmul.f32 %v2053_v59, %v2051_v12  ;;  %v2295_v30 = vsub.s32 32, %v2294_v61  ;;  %v2174_v55 = vsel %vm2172_vm9, %v2173_v9, %v6854_v29  ;;  %v3932_v16 = vsel %vm3930_vm12, %v2173_v9, %v6854_v29  ;;  %4955 = vst [vmem:[%s6055_s18 + $0x10] sm:$0xff] %v4887_v28   ;;  %4962 = vst [vmem:[%s6058_s14 + $0x10] sm:$0xff] %v4927_v40  }
 0x273   : > { %v6934_v37 = vshrl.u32 %v1517_v25, 30  ;;  %v3929_v26 = vsel %vm3927_vm8, %v6849_v44, %v2170_v23  ;;  %v3820_v13 = vadd.s32 3, %v2060_v58  ;;  %v2287_v42 = vand.u32 8388607, %v2280_v5 }
 0x274   : > { %v2055_v31 = vxor.u32 2147483648, %v2054_v11  ;;  %v2298_v60 = vshrl.u32 %v5340_v39, %v2295_v30  ;;  %v2301_v15 = vshrl.u32 %v5341_v41, %v2295_v30  ;;  %v2307_v9 = vshrl.u32 %v5343_v45, %v2295_v30 }
 0x275   : > { %v5345_v21 = vmov 1966171168   ;;  %v1519_v34 = vshll.u32 %v6934_v37, 30  ;;  %v2297_v44 = vshll.u32 %v5339_v35, %v2294_v61  ;;  %v2304_v23 = vshrl.u32 %v5342_v43, %v2295_v30 }
 0x276   : > { %v4242_v14 = vunpack.c.l.s4 %v5345_v21  ;;  %v2056_v29 = vsel %vm1973_vm4, %v2055_v31, %v2054_v11  ;;  %v2300_v8 = vshll.u32 %v5340_v39, %v2294_v61  ;;  %v2306_v22 = vshll.u32 %v5342_v43, %v2294_v61 }
 0x277   : > { %v2059_v49 = vsel %vm6880_vm7, %v6630_v57, %v2056_v29  ;;  %v2310_v51 = vshrl.u32 %v5344_v52, %v2295_v30  ;;  %v2293_v20 = vshrl.u32 %v2292_v4, 5  ;;  %v2303_v47 = vshll.u32 %v5341_v41, %v2294_v61 }
 0x278   : > { %5260 = vcosq.f32 %v2059_v49  ;;  %v2309_v19 = vshll.u32 %v5343_v45, %v2294_v61  ;;  %v2299_v46 = vor.u32 %v2298_v60, %v2297_v44  ;;  %v2302_v7 = vor.u32 %v2301_v15, %v2300_v8  ;;  %v647_v15 = vpop.f32.mrf.mxu0 }
 0x279   : > { %5262 = vsinq.f32 %v2059_v49  ;;  %v2308_v17 = vor.u32 %v2307_v9, %v2306_v22  ;;  %vm2166_vm15 = vweird.f32 %v6280_v1  ;;  %v2175_v56 = vsel %vm2168_vm11, %v2171_v10, %v2174_v55 }
 0x27a   : > { %vm3926_vm1 = vcmp.lt.s32.totalorder %v6810_v54, 2  ;;  %v6963_v27 = vsub.s32 %v1516_v38, %v1519_v34  ;;  %v2305_v0 = vor.u32 %v2304_v23, %v2303_v47  ;;  %v2288_v24 = vor.u32 8388608, %v2287_v42 }
 0x27b   : > { %v3933_v36 = vsel %vm3926_vm1, %v3929_v26, %v3932_v16  ;;  %v2311_v4 = vor.u32 %v2310_v51, %v2309_v19  ;;  %v4240_v12 = vcombine.high %v6793_v18, %v6793_v18  ;;  %v6967_v59 = vand.u32 3, %v2060_v58 }
 0x27c   : > { %vm2312_vm2 = vcmp.lt.s32.totalorder %v2293_v20, 1  ;;  %vm2315_vm13 = vcmp.lt.s32.totalorder %v2293_v20, 4  ;;  %v4243_v61 = vunpack.c.0.s8 %v4242_v14  ;;  %v3821_v28 = vand.u32 3, %v3820_v13 }
 0x27d   : > { %v2296_v63 = vshrl.u32 %v5339_v35, %v2295_v30  ;;  %v2320_v40 = vsel %vm2312_vm2, %v2299_v46, %v2302_v7  ;;  %v2321_v25 = vsel %vm2315_vm13, %v2308_v17, 920167782  ;;  %v1522_v54 = vsub.s32 0, %v6963_v27 }
 0x27e   : > { %vm2314_vm0 = vcmp.lt.s32.totalorder %v2293_v20, 3  ;;  %v2317_v38 = vsel %vm2315_vm13, %v2305_v0, 2102212464  ;;  %v2324_v11 = vsel %vm2312_vm2, %v2302_v7, %v2305_v0  ;;  %vm2313_vm3 = vcmp.lt.s32.totalorder %v2293_v20, 2  ;;  %v732_v20 = vld [vmem:[%s5877_s10 + $0x68] sm:$0xff] }
 0x27f   : > { %v2322_v10 = vsel %vm2314_vm0, %v2305_v0, %v2321_v25  ;;  %v2325_v55 = vsel %vm2315_vm13, %v2311_v4, 1326507024  ;;  %v2328_v16 = vshll.u32 %v2288_v24, 8  ;;  %v2316_v18 = vsel %vm2312_vm2, %v2296_v63, %v2299_v46  ;;  %v731_v4 = vld [vmem:[%s5877_s10 + $0x60] sm:$0xff] }
 0x280   : > { %v2323_v58 = vsel %vm2313_vm3, %v2320_v40, %v2322_v10  ;;  %v2326_v26 = vsel %vm2314_vm0, %v2308_v17, %v2325_v55  ;;  %v4246_v31 = vsub.s32 %v4243_v61, %v5572_v2  ;;  %v2318_v13 = vsel %vm2314_vm0, %v2302_v7, %v2317_v38  ;;  %v5281_v55 = vld [vmem:[#allocation2] sm:$0x1] }
 0x281   : > { %v2327_v30 = vsel %vm2313_vm3, %v2324_v11, %v2326_v26  ;;  %v6974_v42 = vmul.u32.u64.low %v2328_v16, %v2323_v58  ;;  %v6975_v60 = vmul.u32.u64.high %v2328_v16, %v2323_v58, %v6974_v42  ;;  %vm2063_vm4 = vweird.f32 %v6630_v57 }
 0x282   : > { %v4703_v9 = vmin.u32 %v1522_v54, %v6963_v27  ;;  %v6980_v21 = vmul.u32.u64.low %v2328_v16, %v2327_v30  ;;  %v6981_v14 = vmul.u32.u64.high %v2328_v16, %v2327_v30, %v6980_v21  ;;  %v4247_v29 = vrot.slane %v4240_v12, %v4246_v31 }
 0x283   : > { %v2176_v34 = vsel %vm2166_vm15, nan, %v2175_v56  ;;  %v3934_v2 = vsel %vm2166_vm15, nan, %v3933_v36  ;;  %vm2065_vm5 = vcmp.lt.s32.totalorder %v6967_v59, 2  ;;  %v4267_v44 = vrot.slane %v4260_v32, %v4246_v31 }
 0x284   : > { %vm2066_vm7 = vcmp.eq.s32.totalorder %v6967_v59, 0  ;;  %v2319_v23 = vsel %vm2313_vm3, %v2316_v18, %v2318_v13  ;;  %v4248_v49 = vcombine.high %v4247_v29, %v4247_v29  ;;  %v6994_v8 = vadd.f32 %v5574_v3, %v647_v15 }
 0x285   : > { %v5261_v22 = vpop.eup %5260  ;;  %vm2069_vm6 = vcmp.eq.s32.totalorder %v6967_v59, 2  ;;  %vm3823_vm9 = vcmp.eq.s32.totalorder %v3821_v28, 0  ;;  %vm3826_vm8 = vcmp.eq.s32.totalorder %v3821_v28, 2  ;;  %v2338_v1 = vadd.s32 1, %v6975_v60 }
 0x286   : > { %v5263_v51 = vpop.eup %5262  ;;  %v2070_v62 = vxor.u32 2147483648, %v5261_v22  ;;  %v1524_v47 = vclz %v4703_v9  ;;  %vm2337_vm10 = vc.u32 %v6981_v14, %v6974_v42  ;;  %v4255_v32 = vrot.slane %v4248_v49, %v4246_v31 }
 0x287   : > { %v2067_v19 = vxor.u32 2147483648, %v5263_v51  ;;  %v2335_v46 = vmul.u32 %v2328_v16, %v2319_v23  ;;  %v2339_v7 = vsel %vm2337_vm10, %v2338_v1, %v6975_v60  ;;  %v4268_v17 = vcombine.high %v4267_v44, %v4267_v44 }
 0x288   : > { %v2071_v56 = vsel %vm2069_vm6, %v2070_v62, %v5263_v51  ;;  %v3828_v0 = vsel %vm3826_vm8, %v2070_v62, %v5263_v51  ;;  %v4256_v36 = vcombine.high %v4255_v32, %v4255_v32  ;;  %v1356_v24 = vand.u32 2139095040, %v6994_v8 }
 0x289   : > { %v2068_v12 = vsel %vm2066_vm7, %v5261_v22, %v2067_v19  ;;  %vm3822_vm14 = vcmp.lt.s32.totalorder %v3821_v28, 2  ;;  %v3825_v61 = vsel %vm3823_vm9, %v5261_v22, %v2067_v19  ;;  %v2340_v63 = vadd.s32 %v2339_v7, %v2335_v46 }
 0x28a   : > { %v2396_v40 = vmul.f32 %v2176_v34, %v732_v20  ;;  %v2072_v25 = vsel %vm2065_vm5, %v2068_v12, %v2071_v56  ;;  %v3829_v54 = vsel %vm3822_vm14, %v3825_v61, %v3828_v0  ;;  %v4704_v38 = vadd.s32 4294967294, %v1524_v47 }
 0x28b   : > { %v2073_v11 = vsel %vm2063_vm4, nan, %v2072_v25  ;;  %v3830_v10 = vsel %vm2063_vm4, nan, %v3829_v54  ;;  %v4258_v16 = vadd.f32 %v5281_v55, %v4256_v36  ;;  %v4275_v18 = vrot.slane %v4268_v17, %v4246_v31  ;;  %v687_v25 = vpop.f32.mrf.mxu1 }
 0x28c   : > { %v4156_v28 = vmul.f32 %v3934_v2, %v732_v20  ;;  %v2395_v58 = vmul.f32 %v2073_v11, %v731_v4  ;;  %v4155_v26 = vmul.f32 %v3830_v10, %v731_v4  ;;  %v1357_v13 = vshrl.u32 %v1356_v24, 23 }
 0x28d   : > { %v2341_v30 = vadd.s32 536870912, %v2340_v63  ;;  %v4276_v59 = vcombine.high %v4275_v18, %v4275_v18  ;;  %vm4705_vm11 = vcmp.lt.s32.totalorder %v4704_v38, 0  ;;  %v1353_v2 = vand.u32 2147483647, %v6994_v8 }
 0x28e   : > { %v4907_v60 = vpack.c.bf16 %v2396_v40, %v2395_v58  ;;  %v4947_v15 = vpack.c.bf16 %v4156_v28, %v4155_v26  ;;  %v4698_v21 = vadd.s32 4294967169, %v1357_v13  ;;  %v1527_v57 = vsel %vm4705_vm11, 0, %v4704_v38 }
 0x28f   : > { %v4278_v9 = vadd.f32 %v4276_v59, %v4258_v16  ;;  %v7015_v29 = vshrl.u32 %v2341_v30, 30  ;;  %v1532_v31 = vsub.s32 4294967266, %v1527_v57  ;;  %v1360_v1 = vand.u32 8388607, %v1353_v2 }
 0x290   : > { %4959 = vst [vmem:[%s6055_s18 + $0x30] sm:$0xff] %v4907_v60   ;;  %4966 = vst [vmem:[%s6058_s14 + $0x30] sm:$0xff] %v4947_v15   ;;  %v1363_v34 = vadd.s32 1, %v4698_v21  ;;  %v1528_v54 = vsub.s32 32, %v1527_v57  ;;  %v1512_v10 = vadd.s32 %v6868_v50, %v6876_v6  ;;  %v7037_v18 = vadd.f32 %v5574_v3, %v687_v25 }
 0x291   : > { %4279 = vst [vmem:[#allocation2] sm:$0x1] %v4278_v9  ;;  %v2343_v44 = vshll.u32 %v7015_v29, 30  ;;  %v1533_v22 = vadd.s32 127, %v1532_v31  ;;  %v1361_v55 = vor.u32 8388608, %v1360_v1  ;;  %v1529_v30 = vshll.u32 %v6963_v27, %v1527_v57 }
 0x292   : > { %vm1364_vm12 = vcmp.gt.s32.totalorder %v1363_v34, 0  ;;  %v1530_v59 = vshrl.u32 %v1512_v10, %v1528_v54  ;;  %v2180_v31 = vand.u32 2139095040, %v7037_v18  ;;  %vm1458_vm5 = vcmp.lt.s32.totalorder %v6666_v48, 0 }
 0x293   : > { %v1365_v23 = vsel %vm1364_vm12, %v1363_v34, 0  ;;  %v7021_v62 = vsub.s32 %v2340_v63, %v2343_v44  ;;  %v1534_v38 = vshll.u32 %v1533_v22, 23  ;;  %v1401_v9 = vshll.u32 %v1361_v55, 8 }
 0x294   : > { %v1367_v49 = vand.u32 31, %v1365_v23  ;;  %v1366_v47 = vshrl.u32 %v1365_v23, 5  ;;  %v1531_v27 = vor.u32 %v1530_v59, %v1529_v30  ;;  %vm7073_vm7 = vcmp.le.f32.partialorder %v1456_v33, 0.7853982 }
 0x295   : > { %v2346_v11 = vsub.s32 0, %v7021_v62  ;;  %v1535_v60 = vor.u32 4788187, %v1534_v38  ;;  %vm1355_vm12 = vcmp.lt.s32.totalorder %v6994_v8, 0 }
 0x296   : > { %v1368_v51 = vsub.s32 32, %v1367_v49  ;;  %v1370_v32 = vshll.u32 %v5339_v35, %v1367_v49  ;;  %v1373_v20 = vshll.u32 %v5340_v39, %v1367_v49  ;;  %v1376_v7 = vshll.u32 %v5341_v41, %v1367_v49 }
 0x297   : > { %v1379_v17 = vshll.u32 %v5342_v43, %v1367_v49  ;;  %v1382_v36 = vshll.u32 %v5343_v45, %v1367_v49  ;;  %vm1388_vm15 = vcmp.lt.s32.totalorder %v1366_v47, 4  ;;  %vm1385_vm1 = vcmp.lt.s32.totalorder %v1366_v47, 1 }
 0x298   : > { %v1371_v19 = vshrl.u32 %v5340_v39, %v1368_v51  ;;  %v1374_v46 = vshrl.u32 %v5341_v41, %v1368_v51  ;;  %v1377_v56 = vshrl.u32 %v5342_v43, %v1368_v51  ;;  %v1380_v0 = vshrl.u32 %v5343_v45, %v1368_v51 }
 0x299   : > { %v1383_v24 = vshrl.u32 %v5344_v52, %v1368_v51  ;;  %vm1387_vm2 = vcmp.lt.s32.totalorder %v1366_v47, 3  ;;  %v4735_v50 = vmin.u32 %v2346_v11, %v7021_v62  ;;  %vm1386_vm13 = vcmp.lt.s32.totalorder %v1366_v47, 2 }
 0x29a   : > { %v1372_v4 = vor.u32 %v1371_v19, %v1370_v32  ;;  %v1375_v12 = vor.u32 %v1374_v46, %v1373_v20  ;;  %v1378_v61 = vor.u32 %v1377_v56, %v1376_v7  ;;  %v1381_v63 = vor.u32 %v1380_v0, %v1379_v17 }
 0x29b   : > { %v1384_v40 = vor.u32 %v1383_v24, %v1382_v36  ;;  %v1369_v3 = vshrl.u32 %v5339_v35, %v1368_v51  ;;  %v2348_v57 = vclz %v4735_v50  ;;  %v1536_v20 = vand.u32 2147483647, %v1535_v60 }
 0x29c   : > { %v1394_v16 = vsel %vm1388_vm15, %v1381_v63, 920167782  ;;  %v1393_v28 = vsel %vm1385_vm1, %v1372_v4, %v1375_v12  ;;  %v1397_v26 = vsel %vm1385_vm1, %v1375_v12, %v1378_v61  ;;  %v1390_v6 = vsel %vm1388_vm15, %v1378_v61, 2102212464 }
 0x29d   : > { %v1395_v58 = vsel %vm1387_vm2, %v1378_v61, %v1394_v16  ;;  %v1398_v13 = vsel %vm1388_vm15, %v1384_v40, 1326507024  ;;  %v1389_v49 = vsel %vm1385_vm1, %v1369_v3, %v1372_v4  ;;  %v1391_v22 = vsel %vm1387_vm2, %v1375_v12, %v1390_v6 }
 0x29e   : > { %v1399_v15 = vsel %vm1387_vm2, %v1381_v63, %v1398_v13  ;;  %v1396_v21 = vsel %vm1386_vm13, %v1393_v28, %v1395_v58  ;;  %v2181_v51 = vshrl.u32 %v2180_v31, 23  ;;  %v1392_v19 = vsel %vm1386_vm13, %v1389_v49, %v1391_v22 }
 0x29f   : > { %v1400_v34 = vsel %vm1386_vm13, %v1397_v26, %v1399_v15  ;;  %v7054_v1 = vmul.u32.u64.low %v1401_v9, %v1396_v21  ;;  %v7055_v32 = vmul.u32.u64.high %v1401_v9, %v1396_v21, %v7054_v1  ;;  %v1538_v46 = vcvt.s32.f32 %v1531_v27 }
 0x2a0   : > { %v7049_v44 = vmul.u32.u64.low %v1401_v9, %v1400_v34  ;;  %v7050_v23 = vmul.u32.u64.high %v1401_v9, %v1400_v34, %v7049_v44  ;;  %v4736_v7 = vadd.s32 4294967294, %v2348_v57  ;;  %v4730_v17 = vadd.s32 4294967169, %v2181_v51 }
 0x2a1   : > { %v1411_v56 = vadd.s32 1, %v7055_v32  ;;  %v1539_v0 = vmul.f32 %v1538_v46, %v1536_v20  ;;  %v1408_v36 = vmul.u32 %v1401_v9, %v1392_v19  ;;  %v2177_v11 = vand.u32 2147483647, %v7037_v18 }
 0x2a2   : > { %vm1410_vm0 = vc.u32 %v7050_v23, %v7054_v1  ;;  %v2187_v24 = vadd.s32 1, %v4730_v17  ;;  %vm4737_vm3 = vcmp.lt.s32.totalorder %v4736_v7, 0  ;;  %v2336_v51 = vadd.s32 %v6974_v42, %v6981_v14 }
 0x2a3   : > { %v1412_v4 = vsel %vm1410_vm0, %v1411_v56, %v7055_v32  ;;  %v1540_v63 = vxor.u32 2147483648, %v1539_v0  ;;  %v7061_v25 = vsel %vm4737_vm3, 0, %v4736_v7  ;;  %v2184_v59 = vand.u32 8388607, %v2177_v11 }
 0x2a4   : > { %v1413_v12 = vadd.s32 %v1412_v4, %v1408_v36  ;;  %vm2188_vm4 = vcmp.gt.s32.totalorder %v2187_v24, 0  ;;  %v2356_v55 = vsub.s32 4294967266, %v7061_v25  ;;  %vm1354_vm15 = vcmp.le.f32.partialorder %v1353_v2, 0.7853982 }
 0x2a5   : > { %v2189_v61 = vsel %vm2188_vm4, %v2187_v24, 0  ;;  %v1541_v10 = vsel %vm1458_vm5, %v1540_v63, %v1539_v0  ;;  %v2185_v49 = vor.u32 8388608, %v2184_v59  ;;  %vm2282_vm0 = vcmp.lt.s32.totalorder %v6806_v53, 0 }
 0x2a6   : > { %v1414_v40 = vadd.s32 536870912, %v1413_v12  ;;  %v2191_v47 = vand.u32 31, %v2189_v61  ;;  %v1544_v30 = vsel %vm7073_vm7, %v6666_v48, %v1541_v10  ;;  %v2357_v33 = vadd.s32 127, %v2356_v55 }
 0x2a7   : > { %v2190_v3 = vshrl.u32 %v2189_v61, 5  ;;  %5264 = vcosq.f32 %v1544_v30  ;;  %v2225_v0 = vshll.u32 %v2185_v49, 8  ;;  %vm7133_vm4 = vcmp.le.f32.partialorder %v2280_v5, 0.7853982 }
 0x2a8   : > { %v7063_v54 = vshrl.u32 %v1414_v40, 30  ;;  %v2192_v38 = vsub.s32 32, %v2191_v47  ;;  %v2194_v15 = vshll.u32 %v5339_v35, %v2191_v47  ;;  %v2197_v9 = vshll.u32 %v5340_v39, %v2191_v47 }
 0x2a9   : > { %v2200_v21 = vshll.u32 %v5341_v41, %v2191_v47  ;;  %v2203_v34 = vshll.u32 %v5342_v43, %v2191_v47  ;;  %v2206_v20 = vshll.u32 %v5343_v45, %v2191_v47  ;;  %vm2209_vm6 = vcmp.lt.s32.totalorder %v2190_v3, 1 }
 0x2aa   : > { %v1416_v16 = vshll.u32 %v7063_v54, 30  ;;  %v2195_v26 = vshrl.u32 %v5340_v39, %v2192_v38  ;;  %v2198_v13 = vshrl.u32 %v5341_v41, %v2192_v38  ;;  %v2201_v60 = vshrl.u32 %v5342_v43, %v2192_v38 }
 0x2ab   : > { %v2204_v50 = vshrl.u32 %v5343_v45, %v2192_v38  ;;  %v2207_v31 = vshrl.u32 %v5344_v52, %v2192_v38  ;;  %v2352_v39 = vsub.s32 32, %v7061_v25  ;;  %v2358_v41 = vshll.u32 %v2357_v33, 23 }
 0x2ac   : > { %v1417_v58 = vsub.s32 %v1413_v12, %v1416_v16  ;;  %v2196_v27 = vor.u32 %v2195_v26, %v2194_v15  ;;  %v2199_v57 = vor.u32 %v2198_v13, %v2197_v9  ;;  %v2202_v22 = vor.u32 %v2201_v60, %v2200_v21 }
 0x2ad   : > { %v2205_v32 = vor.u32 %v2204_v50, %v2203_v34  ;;  %v1409_v43 = vadd.s32 %v7054_v1, %v7050_v23  ;;  %v2208_v46 = vor.u32 %v2207_v31, %v2206_v20  ;;  %v2193_v7 = vshrl.u32 %v5339_v35, %v2192_v38 }
 0x2ae   : > { %v1419_v6 = vsub.s32 0, %v1417_v58  ;;  %vm2212_vm9 = vcmp.lt.s32.totalorder %v2190_v3, 4  ;;  %v2217_v17 = vsel %vm2209_vm6, %v2196_v27, %v2199_v57  ;;  %vm2211_vm8 = vcmp.lt.s32.totalorder %v2190_v3, 3 }
 0x2af   : > { %v2214_v56 = vsel %vm2212_vm9, %v2202_v22, 2102212464  ;;  %v2218_v45 = vsel %vm2212_vm9, %v2205_v32, 920167782  ;;  %vm2210_vm14 = vcmp.lt.s32.totalorder %v2190_v3, 2  ;;  %v2213_v42 = vsel %vm2209_vm6, %v2193_v7, %v2196_v27 }
 0x2b0   : > { %v4699_v44 = vmin.u32 %v1419_v6, %v1417_v58  ;;  %v2219_v14 = vsel %vm2211_vm8, %v2202_v22, %v2218_v45  ;;  %v2221_v4 = vsel %vm2209_vm6, %v2199_v57, %v2202_v22  ;;  %v2222_v23 = vsel %vm2212_vm9, %v2208_v46, 1326507024 }
 0x2b1   : > { %v2220_v24 = vsel %vm2210_vm14, %v2217_v17, %v2219_v14  ;;  %v2215_v61 = vsel %vm2211_vm8, %v2199_v57, %v2214_v56  ;;  %v2223_v63 = vsel %vm2211_vm8, %v2205_v32, %v2222_v23  ;;  %v1542_v13 = vsub.s32 4, %v6934_v37 }
 0x2b2   : > { %v1421_v19 = vclz %v4699_v44  ;;  %v2224_v40 = vsel %vm2210_vm14, %v2221_v4, %v2223_v63  ;;  %v7099_v47 = vmul.u32.u64.low %v2225_v0, %v2220_v24  ;;  %v7100_v38 = vmul.u32.u64.high %v2225_v0, %v2220_v24, %v7099_v47 }
 0x2b3   : > { %v7103_v16 = vmul.u32.u64.low %v2225_v0, %v2224_v40  ;;  %v7104_v26 = vmul.u32.u64.high %v2225_v0, %v2224_v40, %v7103_v16  ;;  %5266 = vsinq.f32 %v1544_v30  ;;  %v2216_v59 = vsel %vm2210_vm14, %v2213_v42, %v2215_v61 }
 0x2b4   : > { %v4700_v52 = vadd.s32 4294967294, %v1421_v19  ;;  %v2354_v60 = vshrl.u32 %v2336_v51, %v2352_v39  ;;  %v2235_v6 = vadd.s32 1, %v7100_v38  ;;  %v2359_v15 = vor.u32 4788187, %v2358_v41  ;;  %v5265_v34 = vpop.eup %5264 }
 0x2b5   : > { %v2232_v21 = vmul.u32 %v2225_v0, %v2216_v59  ;;  %vm2234_vm11 = vc.u32 %v7104_v26, %v7099_v47  ;;  %v1543_v30 = vsel %vm1458_vm5, %v1542_v13, %v6934_v37  ;;  %v1439_v37 = vsub.s32 4, %v7063_v54 }
 0x2b6   : > { %vm4701_vm10 = vcmp.lt.s32.totalorder %v4700_v52, 0  ;;  %v2236_v3 = vsel %vm2234_vm11, %v2235_v6, %v7100_v38  ;;  %v1555_v45 = vxor.u32 2147483648, %v5265_v34  ;;  %vm1548_vm9 = vweird.f32 %v6666_v48 }
 0x2b7   : > { %v1424_v36 = vsel %vm4701_vm10, 0, %v4700_v52  ;;  %v2237_v57 = vadd.s32 %v2236_v3, %v2232_v21  ;;  %v1440_v56 = vsel %vm1355_vm12, %v1439_v37, %v7063_v54  ;;  %vm1445_vm8 = vweird.f32 %v6994_v8 }
 0x2b8   : > { %v1425_v1 = vsub.s32 32, %v1424_v36  ;;  %v1429_v12 = vsub.s32 4294967266, %v1424_v36  ;;  %v1426_v35 = vshll.u32 %v1417_v58, %v1424_v36  ;;  %v2353_v58 = vshll.u32 %v7021_v62, %v7061_v25 }
 0x2b9   : > { %v1545_v62 = vsel %vm7073_vm7, 0, %v1543_v30  ;;  %v2360_v25 = vand.u32 2147483647, %v2359_v15  ;;  %v2238_v22 = vadd.s32 536870912, %v2237_v57  ;;  %v1442_v36 = vsel %vm1354_vm15, 0, %v1440_v56  ;;  %v726_v30 = vld [vmem:[%s5877_s10 + $0x38] sm:$0xff] }
 0x2ba   : > { %v1427_v10 = vshrl.u32 %v1409_v43, %v1425_v1  ;;  %v1430_v55 = vadd.s32 127, %v1429_v12  ;;  %v2355_v31 = vor.u32 %v2354_v60, %v2353_v58  ;;  %v3300_v39 = vadd.s32 3, %v1545_v62 }
 0x2bb   : > { %v7119_v51 = vshrl.u32 %v2238_v22, 30  ;;  %v1549_v7 = vand.u32 3, %v1545_v62  ;;  %v3196_v61 = vadd.s32 3, %v1442_v36  ;;  %v1446_v38 = vand.u32 3, %v1442_v36 }
 0x2bc   : > { %v1428_v50 = vor.u32 %v1427_v10, %v1426_v35  ;;  %v1431_v33 = vshll.u32 %v1430_v55, 23  ;;  %v2362_v32 = vcvt.s32.f32 %v2355_v31  ;;  %v3301_v17 = vand.u32 3, %v3300_v39 }
 0x2bd   : > { %v2240_v28 = vshll.u32 %v7119_v51, 30  ;;  %vm1551_vm1 = vcmp.eq.s32.totalorder %v1549_v7, 0  ;;  %vm1554_vm2 = vcmp.eq.s32.totalorder %v1549_v7, 2  ;;  %vm1550_vm5 = vcmp.lt.s32.totalorder %v1549_v7, 2 }
 0x2be   : > { %v1432_v9 = vor.u32 4788187, %v1431_v33  ;;  %v1435_v27 = vcvt.s32.f32 %v1428_v50  ;;  %v2363_v19 = vmul.f32 %v2362_v32, %v2360_v25  ;;  %vm3303_vm13 = vcmp.eq.s32.totalorder %v3301_v17, 0 }
 0x2bf   : > { %v2241_v52 = vsub.s32 %v2237_v57, %v2240_v28  ;;  %vm3306_vm3 = vcmp.eq.s32.totalorder %v3301_v17, 2  ;;  %vm3302_vm7 = vcmp.lt.s32.totalorder %v3301_v17, 2  ;;  %v3197_v16 = vand.u32 3, %v3196_v61 }
 0x2c0   : > { %v1433_v44 = vand.u32 2147483647, %v1432_v9  ;;  %v5267_v46 = vpop.eup %5266  ;;  %v2364_v0 = vxor.u32 2147483648, %v2363_v19  ;;  %v2233_v13 = vadd.s32 %v7099_v47, %v7104_v26  ;;  %vm1448_vm10 = vcmp.eq.s32.totalorder %v1446_v38, 0 }
 0x2c1   : > { %v2243_v42 = vsub.s32 0, %v2241_v52  ;;  %v1552_v14 = vxor.u32 2147483648, %v5267_v46  ;;  %v1556_v2 = vsel %vm1554_vm2, %v1555_v45, %v5267_v46  ;;  %v3308_v12 = vsel %vm3306_vm3, %v1555_v45, %v5267_v46 }
 0x2c2   : > { %v1436_v49 = vmul.f32 %v1435_v27, %v1433_v44  ;;  %v2365_v4 = vsel %vm2282_vm0, %v2364_v0, %v2363_v19  ;;  %vm1451_vm14 = vcmp.eq.s32.totalorder %v1446_v38, 2  ;;  %vm3199_vm11 = vcmp.eq.s32.totalorder %v3197_v16, 0  ;;  %v725_v44 = vld [vmem:[%s5877_s10 + $0x30] sm:$0xff] }
 0x2c3   : > { %v4731_v24 = vmin.u32 %v2243_v42, %v2241_v52  ;;  %v1553_v1 = vsel %vm1551_vm1, %v5265_v34, %v1552_v14  ;;  %v3305_v54 = vsel %vm3303_vm13, %v5265_v34, %v1552_v14  ;;  %v2368_v40 = vsel %vm7133_vm4, %v6806_v53, %v2365_v4 }
 0x2c4   : > { %v1437_v20 = vxor.u32 2147483648, %v1436_v49  ;;  %v1557_v10 = vsel %vm1550_vm5, %v1553_v1, %v1556_v2  ;;  %v3309_v55 = vsel %vm3302_vm7, %v3305_v54, %v3308_v12  ;;  %vm3198_vm1 = vcmp.lt.s32.totalorder %v3197_v16, 2 }
 0x2c5   : > { %v2245_v23 = vclz %v4731_v24  ;;  %v1558_v33 = vsel %vm1548_vm9, nan, %v1557_v10  ;;  %v3310_v58 = vsel %vm1548_vm9, nan, %v3309_v55  ;;  %v2366_v62 = vsub.s32 4, %v7015_v29 }
 0x2c6   : > { %v1438_v41 = vsel %vm1355_vm12, %v1437_v20, %v1436_v49  ;;  %vm3202_vm12 = vcmp.eq.s32.totalorder %v3197_v16, 2  ;;  %v2390_v32 = vmul.f32 %v1558_v33, %v726_v30  ;;  %v4150_v20 = vmul.f32 %v3310_v58, %v726_v30  ;;  %v734_v58 = vld [vmem:[%s5877_s10 + $0x78] sm:$0xff] }
 0x2c7   : > { %v1441_v43 = vsel %vm1354_vm15, %v6994_v8, %v1438_v41  ;;  %v4732_v35 = vadd.s32 4294967294, %v2245_v23  ;;  %vm1447_vm15 = vcmp.lt.s32.totalorder %v1446_v38, 2  ;;  %v2367_v46 = vsel %vm2282_vm0, %v2366_v62, %v7015_v29  ;;  %v4320_v62 = vld [vmem:[%s6055_s18 + $0xc] sm:$0xf] (%p5428_p6) }
 0x2c8   : > { %5268 = vcosq.f32 %v1441_v43  ;;  %v2369_v0 = vsel %vm7133_vm4, 0, %v2367_v46  ;;  %vm2179_vm2 = vcmp.lt.s32.totalorder %v7037_v18, 0  ;;  %v2263_v8 = vsub.s32 4, %v7119_v51  ;;  %4321 = vst [vmem:[%s4297_s15 + $0x18] sm:$0xf] (%p5428_p6), %v4320_v62 }
 0x2c9   : > { %5270 = vsinq.f32 %v1441_v43  ;;  %vm4733_vm6 = vcmp.lt.s32.totalorder %v4732_v35, 0  ;;  %vm2178_vm13 = vcmp.le.f32.partialorder %v2177_v11, 0.7853982  ;;  %v4132_v36 = vadd.s32 3, %v2369_v0 }
 0x2ca   : > { %v2248_v5 = vsel %vm4733_vm6, 0, %v4732_v35  ;;  %5272 = vcosq.f32 %v2368_v40  ;;  %v2264_v24 = vsel %vm2179_vm2, %v2263_v8, %v7119_v51  ;;  %v2373_v2 = vand.u32 3, %v2369_v0 }
 0x2cb   : > { %v2249_v59 = vsub.s32 32, %v2248_v5  ;;  %v2253_v60 = vsub.s32 4294967266, %v2248_v5  ;;  %5274 = vsinq.f32 %v2368_v40  ;;  %v2250_v48 = vshll.u32 %v2241_v52, %v2248_v5 }
 0x2cc   : > { %v4133_v1 = vand.u32 3, %v4132_v36  ;;  %v2266_v54 = vsel %vm2178_vm13, 0, %v2264_v24  ;;  %vm2375_vm0 = vcmp.eq.s32.totalorder %v2373_v2, 0  ;;  %vm2378_vm3 = vcmp.eq.s32.totalorder %v2373_v2, 2 }
 0x2cd   : > { %v2251_v9 = vshrl.u32 %v2233_v13, %v2249_v59  ;;  %v2254_v21 = vadd.s32 127, %v2253_v60  ;;  %v4028_v12 = vadd.s32 3, %v2266_v54  ;;  %vm2374_vm7 = vcmp.lt.s32.totalorder %v2373_v2, 2 }
 0x2ce   : > { %vm4135_vm4 = vcmp.eq.s32.totalorder %v4133_v1, 0  ;;  %vm4138_vm5 = vcmp.eq.s32.totalorder %v4133_v1, 2  ;;  %vm4134_vm6 = vcmp.lt.s32.totalorder %v4133_v1, 2  ;;  %v2270_v38 = vand.u32 3, %v2266_v54 }
 0x2cf   : > { %v2252_v3 = vor.u32 %v2251_v9, %v2250_v48  ;;  %v2255_v31 = vshll.u32 %v2254_v21, 23  ;;  %v4029_v51 = vand.u32 3, %v4028_v12  ;;  %vm2372_vm9 = vweird.f32 %v6806_v53 }
 0x2d1   : > { %v2256_v22 = vor.u32 4788187, %v2255_v31  ;;  %v2259_v43 = vcvt.s32.f32 %v2252_v3 }
 0x2d3   : > { %v2257_v28 = vand.u32 2147483647, %v2256_v22 }
 0x2d5   : > { %v5269_v50 = vpop.eup %5268  ;;  %v2260_v17 = vmul.f32 %v2259_v43, %v2257_v28  ;;  %v4340_v28 = vld [vmem:[%s6055_s18 + $0x34] sm:$0xf] (%p5428_p6) }
 0x2d6   : > { %v5271_v6 = vpop.eup %5270  ;;  %v1452_v15 = vxor.u32 2147483648, %v5269_v50  ;;  %4341 = vst [vmem:[%s4297_s15 + $0x68] sm:$0xf] (%p5428_p6), %v4340_v28 }
 0x2d7   : > { %v1449_v34 = vxor.u32 2147483648, %v5271_v6  ;;  %v2261_v56 = vxor.u32 2147483648, %v2260_v17  ;;  %v5273_v45 = vpop.eup %5272 }
 0x2d8   : > { %v1453_v47 = vsel %vm1451_vm14, %v1452_v15, %v5271_v6  ;;  %v3204_v26 = vsel %vm3202_vm12, %v1452_v15, %v5271_v6  ;;  %v5275_v42 = vpop.eup %5274  ;;  %v2379_v23 = vxor.u32 2147483648, %v5273_v45  ;;  %vm2272_vm14 = vcmp.eq.s32.totalorder %v2270_v38, 0  ;;  %v733_v6 = vld [vmem:[%s5877_s10 + $0x70] sm:$0xff] }
 0x2d9   : > { %v1450_v27 = vsel %vm1448_vm10, %v5269_v50, %v1449_v34  ;;  %v3201_v57 = vsel %vm3199_vm11, %v5269_v50, %v1449_v34  ;;  %v2262_v14 = vsel %vm2179_vm2, %v2261_v56, %v2260_v17  ;;  %v2376_v4 = vxor.u32 2147483648, %v5275_v42 }
 0x2da   : > { %v1454_v25 = vsel %vm1447_vm15, %v1450_v27, %v1453_v47  ;;  %v3205_v49 = vsel %vm3198_vm1, %v3201_v57, %v3204_v26  ;;  %v2265_v29 = vsel %vm2178_vm13, %v7037_v18, %v2262_v14  ;;  %v2380_v63 = vsel %vm2378_vm3, %v2379_v23, %v5275_v42  ;;  %v4316_v27 = vld [vmem:[%s6055_s18 + $0x4] sm:$0xf] (%p5428_p6)  ;;  %v4318_v57 = vld [vmem:[%s6055_s18 + $0x8] sm:$0xf] (%p5428_p6) }
 0x2db   : > { %v1455_v39 = vsel %vm1445_vm8, nan, %v1454_v25  ;;  %v3206_v37 = vsel %vm1445_vm8, nan, %v3205_v49  ;;  %5276 = vcosq.f32 %v2265_v29  ;;  %v2377_v61 = vsel %vm2375_vm0, %v5273_v45, %v2376_v4  ;;  %v4322_v25 = vld [vmem:[%s6055_s18 + $0x10] sm:$0xf] (%p5428_p6)  ;;  %v4324_v49 = vld [vmem:[%s6055_s18 + $0x14] sm:$0xf] (%p5428_p6) }
 0x2dc   : > { %v2389_v19 = vmul.f32 %v1455_v39, %v725_v44  ;;  %v4149_v41 = vmul.f32 %v3206_v37, %v725_v44  ;;  %5278 = vsinq.f32 %v2265_v29  ;;  %v4137_v11 = vsel %vm4135_vm4, %v5273_v45, %v2376_v4  ;;  %v4332_v39 = vld [vmem:[%s6055_s18 + $0x24] sm:$0xf] (%p5428_p6)  ;;  %4317 = vst [vmem:[%s4297_s15 + $0x8] sm:$0xf] (%p5428_p6), %v4316_v27  ;;  %4319 = vst [vmem:[%s4297_s15 + $0x10] sm:$0xf] (%p5428_p6), %v4318_v57 }
 0x2dd   : > { %v4140_v35 = vsel %vm4138_vm5, %v2379_v23, %v5275_v42  ;;  %v2381_v40 = vsel %vm2374_vm7, %v2377_v61, %v2380_v63  ;;  %vm2275_vm8 = vcmp.eq.s32.totalorder %v2270_v38, 2  ;;  %vm4034_vm10 = vcmp.eq.s32.totalorder %v4029_v51, 2  ;;  %4323 = vst [vmem:[%s4297_s15 + $0x20] sm:$0xf] (%p5428_p6), %v4322_v25  ;;  %4325 = vst [vmem:[%s4297_s15 + $0x28] sm:$0xf] (%p5428_p6), %v4324_v49 }
 0x2de   : > { %v4892_v52 = vpack.c.bf16 %v2390_v32, %v2389_v19  ;;  %v4932_v7 = vpack.c.bf16 %v4150_v20, %v4149_v41  ;;  %v4141_v10 = vsel %vm4134_vm6, %v4137_v11, %v4140_v35  ;;  %v2382_v5 = vsel %vm2372_vm9, nan, %v2381_v40  ;;  %v4330_v20 = vld [vmem:[%s6055_s18 + $0x20] sm:$0xf] (%p5428_p6)  ;;  %4333 = vst [vmem:[%s4297_s15 + $0x48] sm:$0xf] (%p5428_p6), %v4332_v39 }
 0x2df   : > { %v4142_v59 = vsel %vm2372_vm9, nan, %v4141_v10  ;;  %vm4031_vm11 = vcmp.eq.s32.totalorder %v4029_v51, 0  ;;  %vm2271_vm12 = vcmp.lt.s32.totalorder %v2270_v38, 2  ;;  %vm4030_vm15 = vcmp.lt.s32.totalorder %v4029_v51, 2  ;;  %4331 = vst [vmem:[%s4297_s15 + $0x40] sm:$0xf] (%p5428_p6), %v4330_v20 }
 0x2e0   : > { %4956 = vst [vmem:[%s6055_s18 + $0x18] sm:$0xff] %v4892_v52   ;;  %4963 = vst [vmem:[%s6058_s14 + $0x18] sm:$0xff] %v4932_v7   ;;  %vm2269_vm1 = vweird.f32 %v7037_v18  ;;  %v2398_v30 = vmul.f32 %v2382_v5, %v734_v58  ;;  %v4158_v47 = vmul.f32 %v4142_v59, %v734_v58  ;;  %v4314_v18 = vld [vmem:[%s6055_s18] sm:$0xf] (%p5428_p6)  ;;  %v4334_v37 = vld [vmem:[%s6055_s18 + $0x28] sm:$0xf] (%p5428_p6) }
 0x2e1   : > { %4315 = vst [vmem:[%s4297_s15] sm:$0xf] (%p5428_p6), %v4314_v18  ;;  %v4336_v19 = vld [vmem:[%s6055_s18 + $0x2c] sm:$0xf] (%p5428_p6)  ;;  %v4338_v41 = vld [vmem:[%s6055_s18 + $0x30] sm:$0xf] (%p5428_p6) }
 0x2e2   : > { %4335 = vst [vmem:[%s4297_s15 + $0x50] sm:$0xf] (%p5428_p6), %v4334_v37  ;;  %4337 = vst [vmem:[%s4297_s15 + $0x58] sm:$0xf] (%p5428_p6), %v4336_v19 }
 0x2e3   : > { %4339 = vst [vmem:[%s4297_s15 + $0x60] sm:$0xf] (%p5428_p6), %v4338_v41 }
 0x2e7   : > { %v4326_v22 = vld [vmem:[%s6055_s18 + $0x18] sm:$0xf] (%p5428_p6)  ;;  %v4328_v32 = vld [vmem:[%s6055_s18 + $0x1c] sm:$0xf] (%p5428_p6) }
 0x2e8   : > { %v5277_v55 = vpop.eup %5276  ;;  %4327 = vst [vmem:[%s4297_s15 + $0x30] sm:$0xf] (%p5428_p6), %v4326_v22  ;;  %4329 = vst [vmem:[%s4297_s15 + $0x38] sm:$0xf] (%p5428_p6), %v4328_v32 }
 0x2e9   : > { %v5279_v16 = vpop.eup %5278  ;;  %v2276_v13 = vxor.u32 2147483648, %v5277_v55 }
 0x2ea   : > { %v2273_v60 = vxor.u32 2147483648, %v5279_v16 }
 0x2eb   : > { %v2277_v50 = vsel %vm2275_vm8, %v2276_v13, %v5279_v16  ;;  %v4036_v33 = vsel %vm4034_vm10, %v2276_v13, %v5279_v16 }
 0x2ec   : > { %v2274_v15 = vsel %vm2272_vm14, %v5277_v55, %v2273_v60  ;;  %v4033_v48 = vsel %vm4031_vm11, %v5277_v55, %v2273_v60 }
 0x2ed   : > { %v2278_v53 = vsel %vm2271_vm12, %v2274_v15, %v2277_v50  ;;  %v4037_v9 = vsel %vm4030_vm15, %v4033_v48, %v4036_v33 }
 0x2ee   : > { %v2279_v21 = vsel %vm2269_vm1, nan, %v2278_v53  ;;  %v4038_v34 = vsel %vm2269_vm1, nan, %v4037_v9 }
 0x2ef   : > { %v2397_v26 = vmul.f32 %v2279_v21, %v733_v6  ;;  %v4157_v3 = vmul.f32 %v4038_v34, %v733_v6  ;;  %4290 = sbr.rel (!%p5428_p6) target bundleno = 764 (0x2fc), region = 120 }
 0x2f1   : > { %v4912_v31 = vpack.c.bf16 %v2398_v30, %v2397_v26  ;;  %v4952_v44 = vpack.c.bf16 %v4158_v47, %v4157_v3 }
 0x2f3   : > { %4960 = vst [vmem:[%s6055_s18 + $0x38] sm:$0xff] %v4912_v31   ;;  %4967 = vst [vmem:[%s6058_s14 + $0x38] sm:$0xff] %v4952_v44  }
 0x2fa   : > { %v4342_v43 = vld [vmem:[%s6055_s18 + $0x38] sm:$0xf]  ;;  %v4344_v46 = vld [vmem:[%s6055_s18 + $0x3c] sm:$0xf] }
 0x2fb   : > { %4343 = vst [vmem:[%s4297_s15 + $0x70] sm:$0xf] %v4342_v43  ;;  %4345 = vst [vmem:[%s4297_s15 + $0x78] sm:$0xf] %v4344_v46 }
 0x2fc PF: > { %4401 = sbr.rel (!%p5428_p6) target bundleno = 776 (0x308), region = 161  ;;  %s4838_s16 = sshll.u32 (%p5428_p6), %s5321_s20, 5  ;;  %v4425_v52 = vld [vmem:[%s6058_s14] sm:$0xf] (%p5428_p6)  ;;  %v4427_v7 = vld [vmem:[%s6058_s14 + $0x4] sm:$0xf] (%p5428_p6) }
 0x2fd   : > { %s4406_s17 = sadd.s32 (%p5428_p6), %s5325_s21, %s4838_s16  ;;  %v4429_v17 = vld [vmem:[%s6058_s14 + $0x8] sm:$0xf] (%p5428_p6)  ;;  %v4431_v56 = vld [vmem:[%s6058_s14 + $0xc] sm:$0xf] (%p5428_p6)  ;;  %v4433_v45 = vld [vmem:[%s6058_s14 + $0x10] sm:$0xf] (%p5428_p6) }
 0x2fe   : > { %s4839_s30 = sshll.u32 (%p5428_p6), %s4406_s17, 2  ;;  %v4435_v0 = vld [vmem:[%s6058_s14 + $0x14] sm:$0xf] (%p5428_p6)  ;;  %v4437_v8 = vld [vmem:[%s6058_s14 + $0x18] sm:$0xf] (%p5428_p6) }
 0x2ff   : > { %s4408_s8 = scalar_lea.vmem (%p5428_p6), %s7243_s5, %s4839_s30  ;;  %v4439_v42 = vld [vmem:[%s6058_s14 + $0x1c] sm:$0xf] (%p5428_p6)  ;;  %v4441_v14 = vld [vmem:[%s6058_s14 + $0x20] sm:$0xf] (%p5428_p6)  ;;  %v4443_v29 = vld [vmem:[%s6058_s14 + $0x24] sm:$0xf] (%p5428_p6) }
 0x300   : > { %4426 = vst [vmem:[%s4408_s8] sm:$0xf] (%p5428_p6), %v4425_v52  ;;  %4428 = vst [vmem:[%s4408_s8 + $0x8] sm:$0xf] (%p5428_p6), %v4427_v7  ;;  %v4445_v36 = vld [vmem:[%s6058_s14 + $0x28] sm:$0xf] (%p5428_p6) }
 0x301   : > { %4430 = vst [vmem:[%s4408_s8 + $0x10] sm:$0xf] %v4429_v17  ;;  %4432 = vst [vmem:[%s4408_s8 + $0x18] sm:$0xf] %v4431_v56  ;;  %v4447_v24 = vld [vmem:[%s6058_s14 + $0x2c] sm:$0xf] }
 0x302   : > { %4434 = vst [vmem:[%s4408_s8 + $0x20] sm:$0xf] %v4433_v45  ;;  %4436 = vst [vmem:[%s4408_s8 + $0x28] sm:$0xf] %v4435_v0  ;;  %v4449_v2 = vld [vmem:[%s6058_s14 + $0x30] sm:$0xf] }
 0x303   : > { %4438 = vst [vmem:[%s4408_s8 + $0x30] sm:$0xf] %v4437_v8  ;;  %4440 = vst [vmem:[%s4408_s8 + $0x38] sm:$0xf] %v4439_v42  ;;  %v4451_v4 = vld [vmem:[%s6058_s14 + $0x34] sm:$0xf] }
 0x304   : > { %4442 = vst [vmem:[%s4408_s8 + $0x40] sm:$0xf] %v4441_v14  ;;  %4444 = vst [vmem:[%s4408_s8 + $0x48] sm:$0xf] %v4443_v29  ;;  %v4453_v23 = vld [vmem:[%s6058_s14 + $0x38] sm:$0xf] }
 0x305   : > { %4446 = vst [vmem:[%s4408_s8 + $0x50] sm:$0xf] %v4445_v36  ;;  %4448 = vst [vmem:[%s4408_s8 + $0x58] sm:$0xf] %v4447_v24  ;;  %v4455_v1 = vld [vmem:[%s6058_s14 + $0x3c] sm:$0xf] }
 0x306   : > { %4450 = vst [vmem:[%s4408_s8 + $0x60] sm:$0xf] %v4449_v2  ;;  %4452 = vst [vmem:[%s4408_s8 + $0x68] sm:$0xf] %v4451_v4 }
 0x307   : > { %4454 = vst [vmem:[%s4408_s8 + $0x70] sm:$0xf] %v4453_v23  ;;  %4456 = vst [vmem:[%s4408_s8 + $0x78] sm:$0xf] %v4455_v1 }
 0x308 PF: > { %s16_s24 = sadd.s32 1, %s5337_s24   ;;  %s7274_s18 = smov %s5317_s19 }
 0x309   : > { %p13_p0 = scmp.ge.s32.totalorder %s16_s24, 6   ;;  %s7275_s19 = smov %s5436_s9 }
 0x30a   : > { %s7276_s20 = smov %s5329_s22  ;;  %s7277_s21 = smov %s5333_s23 }
 0x30b   : > { %s7278_s22 = smov %s7281_s25  ;;  %s7279_s23 = smov %s7285_s26 }
 0x30c   :  { %15 = sbr.rel (!%p13_p0) target bundleno = 4 (0x4), region = 256 }

// kernel: pitch_shift.6
= control target key start
LH: loop header
LB: loop body
LE: loop exit
PB: predicated region body
PF: predicated region fallthrough
CT: control target
= control target key end

     0   :  { %s3359_s4 = inlined_call_operand.vmem [shape: bf16[256,512], index: 4, kind: input, shape index: {}]   ;;  %s3360_s1 = inlined_call_operand.vmem [shape: bf16[144,256], index: 1, kind: input, shape index: {}]   ;;  %s3361_s3 = inlined_call_operand.vmem [shape: bf16[256,512], index: 3, kind: input, shape index: {}]   ;;  %s3362_s0 = inlined_call_operand.vmem [shape: bf16[144,256], index: 0, kind: input, shape index: {}]   ;;  %s3363_s2 = inlined_call_operand.vmem [shape: f32[144,1], index: 2, kind: input, shape index: {}]   ;;  %s3364_s5 = inlined_call_operand.vmem [shape: f32[1,512], index: 5, kind: input, shape index: {}]   ;;  %s3365_s6 = inlined_call_operand.vmem [shape: f32[144,512], index: 6, kind: output, shape index: {}]  }
   0x1   :  { %v2016_v0 = vld [vmem:[%s3359_s4 + $0xe4] ss:$16 sps:$4 sm:$0xff]   ;;  %v2018_v1 = vld [vmem:[%s3359_s4 + $0xec] ss:$16 sps:$4 sm:$0xff]   ;;  %v2020_v2 = vld [vmem:[%s3359_s4 + $0xe0] ss:$16 sps:$4 sm:$0xff]  }
   0x2   :  { %597 = vmatprep.subr.bf16.mxu0 %v2016_v0  ;;  %v2021_v3 = vld [vmem:[%s3359_s4 + $0xe8] ss:$16 sps:$4 sm:$0xff]   ;;  %720 = vmatprep.subr.bf16.mxu1 %v2018_v1  ;;  %v2022_v4 = vld [vmem:[%s3359_s4 + $0xc4] ss:$16 sps:$4 sm:$0xff]   ;;  %v2024_v5 = vld [vmem:[%s3359_s4 + $0xcc] ss:$16 sps:$4 sm:$0xff]  }
   0x3   :  { %598 = vmatpush1.bf16.msra.mxu0 %v2020_v2  ;;  %721 = vmatpush1.bf16.msra.mxu1 %v2021_v3  ;;  %v2026_v6 = vld [vmem:[%s3359_s4 + $0xc0] ss:$16 sps:$4 sm:$0xff]   ;;  %v2027_v7 = vld [vmem:[%s3359_s4 + $0xc8] ss:$16 sps:$4 sm:$0xff]   ;;  %v2028_v8 = vld [vmem:[%s3359_s4 + $0xa4] ss:$16 sps:$4 sm:$0xff]  }
   0x4   :  { %599 = vmatprep.subr.bf16.mxu0 %v2022_v4  ;;  %722 = vmatprep.subr.bf16.mxu1 %v2024_v5  ;;  %v2030_v9 = vld [vmem:[%s3359_s4 + $0xac] ss:$16 sps:$4 sm:$0xff]   ;;  %v2032_v10 = vld [vmem:[%s3359_s4 + $0xa0] ss:$16 sps:$4 sm:$0xff]   ;;  %v2033_v11 = vld [vmem:[%s3359_s4 + $0xa8] ss:$16 sps:$4 sm:$0xff]  }
   0x5   :  { %v2034_v12 = vld [vmem:[%s3359_s4 + $0x84] ss:$16 sps:$4 sm:$0xff]   ;;  %v2036_v13 = vld [vmem:[%s3359_s4 + $0x8c] ss:$16 sps:$4 sm:$0xff]   ;;  %v2038_v14 = vld [vmem:[%s3359_s4 + $0x80] ss:$16 sps:$4 sm:$0xff]  }
   0x6   :  { %v2039_v15 = vld [vmem:[%s3359_s4 + $0x88] ss:$16 sps:$4 sm:$0xff]   ;;  %v2040_v16 = vld [vmem:[%s3359_s4 + $0x64] ss:$16 sps:$4 sm:$0xff]   ;;  %v2042_v17 = vld [vmem:[%s3359_s4 + $0x6c] ss:$16 sps:$4 sm:$0xff]  }
   0x7   :  { %600 = vmatpush1.bf16.msra.mxu0 %v2026_v6  ;;  %723 = vmatpush1.bf16.msra.mxu1 %v2027_v7  ;;  %v2044_v18 = vld [vmem:[%s3359_s4 + $0x60] ss:$16 sps:$4 sm:$0xff]   ;;  %v2045_v19 = vld [vmem:[%s3359_s4 + $0x68] ss:$16 sps:$4 sm:$0xff]   ;;  %v2046_v20 = vld [vmem:[%s3359_s4 + $0x44] ss:$16 sps:$4 sm:$0xff]  }
   0x8   :  { %601 = vmatprep.subr.bf16.mxu0 %v2028_v8  ;;  %724 = vmatprep.subr.bf16.mxu1 %v2030_v9  ;;  %v2048_v21 = vld [vmem:[%s3359_s4 + $0x4c] ss:$16 sps:$4 sm:$0xff]   ;;  %v2050_v22 = vld [vmem:[%s3359_s4 + $0x40] ss:$16 sps:$4 sm:$0xff]   ;;  %v2051_v23 = vld [vmem:[%s3359_s4 + $0x48] ss:$16 sps:$4 sm:$0xff]  }
   0x9   :  { %v2052_v24 = vld [vmem:[%s3359_s4 + $0x24] ss:$16 sps:$4 sm:$0xff]   ;;  %v2054_v25 = vld [vmem:[%s3359_s4 + $0x2c] ss:$16 sps:$4 sm:$0xff]   ;;  %v2056_v26 = vld [vmem:[%s3359_s4 + $0x20] ss:$16 sps:$4 sm:$0xff]  }
   0xa   :  { %v2057_v27 = vld [vmem:[%s3359_s4 + $0x28] ss:$16 sps:$4 sm:$0xff]   ;;  %v2058_v28 = vld [vmem:[%s3359_s4 + $0x4] ss:$16 sps:$4 sm:$0xff]   ;;  %v2060_v29 = vld [vmem:[%s3359_s4 + $0xc] ss:$16 sps:$4 sm:$0xff]  }
   0xb   :  { %602 = vmatpush1.bf16.msra.mxu0 %v2032_v10  ;;  %725 = vmatpush1.bf16.msra.mxu1 %v2033_v11  ;;  %v2062_v30 = vld [vmem:[%s3359_s4] ss:$16 sps:$4 sm:$0xff]   ;;  %v2063_v31 = vld [vmem:[%s3359_s4 + $0x8] ss:$16 sps:$4 sm:$0xff]   ;;  %v2064_v32 = vld [vmem:[%s3359_s4 + $0x1e4] ss:$16 sps:$4 sm:$0xff]  }
   0xc   :  { %603 = vmatprep.subr.bf16.mxu0 %v2034_v12  ;;  %726 = vmatprep.subr.bf16.mxu1 %v2036_v13  ;;  %v2066_v33 = vld [vmem:[%s3359_s4 + $0x1ec] ss:$16 sps:$4 sm:$0xff]   ;;  %v2068_v34 = vld [vmem:[%s3359_s4 + $0x1e0] ss:$16 sps:$4 sm:$0xff]   ;;  %v2069_v35 = vld [vmem:[%s3359_s4 + $0x1e8] ss:$16 sps:$4 sm:$0xff]  }
   0xd   :  { %v2070_v36 = vld [vmem:[%s3359_s4 + $0x1c4] ss:$16 sps:$4 sm:$0xff]   ;;  %v2072_v37 = vld [vmem:[%s3359_s4 + $0x1cc] ss:$16 sps:$4 sm:$0xff]   ;;  %v2074_v38 = vld [vmem:[%s3359_s4 + $0x1c0] ss:$16 sps:$4 sm:$0xff]  }
   0xe   :  { %v2075_v39 = vld [vmem:[%s3359_s4 + $0x1c8] ss:$16 sps:$4 sm:$0xff]   ;;  %v2076_v40 = vld [vmem:[%s3359_s4 + $0x1a4] ss:$16 sps:$4 sm:$0xff]   ;;  %v2078_v41 = vld [vmem:[%s3359_s4 + $0x1ac] ss:$16 sps:$4 sm:$0xff]  }
   0xf   :  { %604 = vmatpush1.bf16.msra.mxu0 %v2038_v14  ;;  %727 = vmatpush1.bf16.msra.mxu1 %v2039_v15  ;;  %v2080_v42 = vld [vmem:[%s3359_s4 + $0x1a0] ss:$16 sps:$4 sm:$0xff]   ;;  %v2081_v43 = vld [vmem:[%s3359_s4 + $0x1a8] ss:$16 sps:$4 sm:$0xff]   ;;  %v2082_v44 = vld [vmem:[%s3359_s4 + $0x184] ss:$16 sps:$4 sm:$0xff]  }
  0x10   :  { %605 = vmatprep.subr.bf16.mxu0 %v2040_v16  ;;  %728 = vmatprep.subr.bf16.mxu1 %v2042_v17  ;;  %v2084_v45 = vld [vmem:[%s3359_s4 + $0x18c] ss:$16 sps:$4 sm:$0xff]   ;;  %v2086_v46 = vld [vmem:[%s3359_s4 + $0x180] ss:$16 sps:$4 sm:$0xff]   ;;  %v2087_v47 = vld [vmem:[%s3359_s4 + $0x188] ss:$16 sps:$4 sm:$0xff]  }
  0x11   :  { %v2114_v48 = vld [vmem:[%s3360_s1 + $0x4] ss:$8 sps:$4 sm:$0xff]   ;;  %v2092_v51 = vld [vmem:[%s3359_s4 + $0x160] ss:$16 sps:$4 sm:$0xff]   ;;  %v2093_v52 = vld [vmem:[%s3359_s4 + $0x168] ss:$16 sps:$4 sm:$0xff]  }
  0x12   :  { %v2088_v49 = vld [vmem:[%s3359_s4 + $0x164] ss:$16 sps:$4 sm:$0xff]   ;;  %v2090_v50 = vld [vmem:[%s3359_s4 + $0x16c] ss:$16 sps:$4 sm:$0xff]   ;;  %629 = vmatprep.mubr.bf16.mxu0 %v2114_v48  ;;  %752 = vmatprep.mubr.bf16.mxu1 %v2114_v48  ;;  %v2098_v55 = vld [vmem:[%s3359_s4 + $0x140] ss:$16 sps:$4 sm:$0xff]  }
  0x13   :  { %606 = vmatpush1.bf16.msra.mxu0 %v2044_v18  ;;  %729 = vmatpush1.bf16.msra.mxu1 %v2045_v19  ;;  %v2094_v53 = vld [vmem:[%s3359_s4 + $0x144] ss:$16 sps:$4 sm:$0xff]   ;;  %v2096_v54 = vld [vmem:[%s3359_s4 + $0x14c] ss:$16 sps:$4 sm:$0xff]   ;;  %v2099_v56 = vld [vmem:[%s3359_s4 + $0x148] ss:$16 sps:$4 sm:$0xff]  }
  0x14   :  { %607 = vmatprep.subr.bf16.mxu0 %v2046_v20  ;;  %730 = vmatprep.subr.bf16.mxu1 %v2048_v21  ;;  %v2100_v57 = vld [vmem:[%s3359_s4 + $0x124] ss:$16 sps:$4 sm:$0xff]   ;;  %v2102_v58 = vld [vmem:[%s3359_s4 + $0x12c] ss:$16 sps:$4 sm:$0xff]   ;;  %v2104_v59 = vld [vmem:[%s3359_s4 + $0x120] ss:$16 sps:$4 sm:$0xff]  }
  0x15   :  { %v2105_v60 = vld [vmem:[%s3359_s4 + $0x128] ss:$16 sps:$4 sm:$0xff]   ;;  %v2106_v61 = vld [vmem:[%s3359_s4 + $0x104] ss:$16 sps:$4 sm:$0xff]   ;;  %v2108_v62 = vld [vmem:[%s3359_s4 + $0x10c] ss:$16 sps:$4 sm:$0xff]  }
  0x16   :  { %v2110_v63 = vld [vmem:[%s3359_s4 + $0x100] ss:$16 sps:$4 sm:$0xff]   ;;  %v2111_v0 = vld [vmem:[%s3359_s4 + $0x108] ss:$16 sps:$4 sm:$0xff]   ;;  %v2117_v1 = vld [vmem:[%s3361_s3 + $0xe4] ss:$16 sps:$4 sm:$0xff]  }
  0x17   :  { %608 = vmatpush1.bf16.msra.mxu0 %v2050_v22  ;;  %731 = vmatpush1.bf16.msra.mxu1 %v2051_v23  ;;  %v2120_v2 = vld [vmem:[%s3361_s3 + $0xec] ss:$16 sps:$4 sm:$0xff]   ;;  %v2112_v3 = vld [vmem:[%s3360_s1] ss:$8 sps:$4 sm:$0xff]   ;;  %v2123_v6 = vld [vmem:[%s3361_s3 + $0xc4] ss:$16 sps:$4 sm:$0xff]  }
  0x18   :  { %609 = vmatprep.subr.bf16.mxu0 %v2052_v24  ;;  %732 = vmatprep.subr.bf16.mxu1 %v2054_v25  ;;  %v2115_v4 = vld [vmem:[%s3361_s3 + $0xe0] ss:$16 sps:$4 sm:$0xff]   ;;  %v2118_v5 = vld [vmem:[%s3361_s3 + $0xe8] ss:$16 sps:$4 sm:$0xff]   ;;  %v2126_v7 = vld [vmem:[%s3361_s3 + $0xcc] ss:$16 sps:$4 sm:$0xff]  }
  0x19   :  { %v2127_v8 = vld [vmem:[%s3360_s1 + $0x14] ss:$8 sps:$4 sm:$0xff]   ;;  %v2121_v9 = vld [vmem:[%s3361_s3 + $0xc0] ss:$16 sps:$4 sm:$0xff]   ;;  %v2124_v10 = vld [vmem:[%s3361_s3 + $0xc8] ss:$16 sps:$4 sm:$0xff]  }
  0x1a   :  { %v2132_v11 = vld [vmem:[%s3361_s3 + $0xa4] ss:$16 sps:$4 sm:$0xff]   ;;  %v2135_v12 = vld [vmem:[%s3361_s3 + $0xac] ss:$16 sps:$4 sm:$0xff]   ;;  %v2129_v13 = vld [vmem:[%s3360_s1 + $0x10] ss:$8 sps:$4 sm:$0xff]  }
  0x1b   :  { %610 = vmatpush1.bf16.msra.mxu0 %v2056_v26  ;;  %733 = vmatpush1.bf16.msra.mxu1 %v2057_v27  ;;  %v2130_v14 = vld [vmem:[%s3361_s3 + $0xa0] ss:$16 sps:$4 sm:$0xff]   ;;  %v2133_v15 = vld [vmem:[%s3361_s3 + $0xa8] ss:$16 sps:$4 sm:$0xff]   ;;  %v2138_v16 = vld [vmem:[%s3361_s3 + $0x84] ss:$16 sps:$4 sm:$0xff]  }
  0x1c   :  { %611 = vmatprep.subr.bf16.mxu0 %v2058_v28  ;;  %734 = vmatprep.subr.bf16.mxu1 %v2060_v29  ;;  %v2141_v17 = vld [vmem:[%s3361_s3 + $0x8c] ss:$16 sps:$4 sm:$0xff]   ;;  %v2136_v19 = vld [vmem:[%s3361_s3 + $0x80] ss:$16 sps:$4 sm:$0xff]   ;;  %v2139_v20 = vld [vmem:[%s3361_s3 + $0x88] ss:$16 sps:$4 sm:$0xff]  }
  0x1d   :  { %v2142_v18 = vld [vmem:[%s3360_s1 + $0x24] ss:$8 sps:$4 sm:$0xff]   ;;  %v2144_v23 = vld [vmem:[%s3360_s1 + $0x20] ss:$8 sps:$4 sm:$0xff]   ;;  %v2262_v25 = vmov 0  }
  0x1e   :  { %v2147_v21 = vld [vmem:[%s3361_s3 + $0x64] ss:$16 sps:$4 sm:$0xff]   ;;  %v2150_v22 = vld [vmem:[%s3361_s3 + $0x6c] ss:$16 sps:$4 sm:$0xff]   ;;  %v2145_v24 = vld [vmem:[%s3361_s3 + $0x60] ss:$16 sps:$4 sm:$0xff]   ;;  %2014 = vset.pattern.permute.xlu0 %v2262_v25  ;;  %2015 = vset.pattern.permute.xlu1 %v2262_v25 }
  0x1f   :  { %612 = vmatpush1.bf16.msra.mxu0 %v2062_v30  ;;  %735 = vmatpush1.bf16.msra.mxu1 %v2063_v31  ;;  %v2148_v26 = vld [vmem:[%s3361_s3 + $0x68] ss:$16 sps:$4 sm:$0xff]   ;;  %v2151_v27 = vld [vmem:[%s3360_s1 + $0x34] ss:$8 sps:$4 sm:$0xff]   ;;  %v2153_v30 = vld [vmem:[%s3361_s3 + $0x40] ss:$16 sps:$4 sm:$0xff]  }
  0x20   :  { %613 = vmatprep.subr.bf16.mxu0 %v2064_v32  ;;  %736 = vmatprep.subr.bf16.mxu1 %v2066_v33  ;;  %v2155_v28 = vld [vmem:[%s3361_s3 + $0x44] ss:$16 sps:$4 sm:$0xff]   ;;  %v2158_v29 = vld [vmem:[%s3361_s3 + $0x4c] ss:$16 sps:$4 sm:$0xff]   ;;  %v2156_v31 = vld [vmem:[%s3361_s3 + $0x48] ss:$16 sps:$4 sm:$0xff]  }
  0x21   :  { %v2162_v32 = vld [vmem:[%s3361_s3 + $0x24] ss:$16 sps:$4 sm:$0xff]   ;;  %v2165_v33 = vld [vmem:[%s3361_s3 + $0x2c] ss:$16 sps:$4 sm:$0xff]  }
  0x22   :  { %v2186_v48 = vld [vmem:[%s3361_s3 + $0x1c4] ss:$16 sps:$4 sm:$0xff]  }
  0x23   :  { %614 = vmatpush2.bf16.msra.mxu0 %v2068_v34  ;;  %737 = vmatpush2.bf16.msra.mxu1 %v2069_v35  ;;  %v2159_v34 = vld [vmem:[%s3360_s1 + $0x30] ss:$8 sps:$4 sm:$0xff]   ;;  %v2237_v25 = vld [vmem:[%s3362_s0 + $0x4] ss:$8 sps:$4 sm:$0xff]  }
  0x24   :  { %615 = vmatprep.subr.bf16.mxu0 %v2070_v36  ;;  %738 = vmatprep.subr.bf16.mxu1 %v2072_v37  ;;  %v2160_v35 = vld [vmem:[%s3361_s3 + $0x20] ss:$16 sps:$4 sm:$0xff]   ;;  %v2163_v36 = vld [vmem:[%s3361_s3 + $0x28] ss:$16 sps:$4 sm:$0xff]   ;;  %v2166_v37 = vld [vmem:[%s3360_s1 + $0x44] ss:$8 sps:$4 sm:$0xff]  }
  0x27   :  { %616 = vmatpush2.bf16.msra.mxu0 %v2074_v38  ;;  %739 = vmatpush2.bf16.msra.mxu1 %v2075_v39  ;;  %v2171_v38 = vld [vmem:[%s3361_s3 + $0x4] ss:$16 sps:$4 sm:$0xff]   ;;  %v2174_v39 = vld [vmem:[%s3361_s3 + $0xc] ss:$16 sps:$4 sm:$0xff]  }
  0x28   :  { %617 = vmatprep.subr.bf16.mxu0 %v2076_v40  ;;  %740 = vmatprep.subr.bf16.mxu1 %v2078_v41  ;;  %v2169_v40 = vld [vmem:[%s3361_s3] ss:$16 sps:$4 sm:$0xff]   ;;  %v2172_v41 = vld [vmem:[%s3361_s3 + $0x8] ss:$16 sps:$4 sm:$0xff]  }
  0x2b   :  { %618 = vmatpush2.bf16.msra.mxu0 %v2080_v42  ;;  %741 = vmatpush2.bf16.msra.mxu1 %v2081_v43  ;;  %v2177_v42 = vld [vmem:[%s3361_s3 + $0x1e4] ss:$16 sps:$4 sm:$0xff]   ;;  %v2180_v43 = vld [vmem:[%s3361_s3 + $0x1ec] ss:$16 sps:$4 sm:$0xff]  }
  0x2c   :  { %619 = vmatprep.subr.bf16.mxu0 %v2082_v44  ;;  %742 = vmatprep.subr.bf16.mxu1 %v2084_v45  ;;  %v2168_v44 = vld [vmem:[%s3360_s1 + $0x40] ss:$8 sps:$4 sm:$0xff]  }
  0x2d   :  { %v2175_v45 = vld [vmem:[%s3361_s3 + $0x1e0] ss:$16 sps:$4 sm:$0xff]  }
  0x2f   :  { %620 = vmatpush2.bf16.msra.mxu0 %v2086_v46  ;;  %743 = vmatpush2.bf16.msra.mxu1 %v2087_v47  ;;  %v2178_v46 = vld [vmem:[%s3361_s3 + $0x1e8] ss:$16 sps:$4 sm:$0xff]   ;;  %v2181_v47 = vld [vmem:[%s3360_s1 + $0x54] ss:$8 sps:$4 sm:$0xff]  }
  0x30   :  { %621 = vmatprep.subr.bf16.mxu0 %v2088_v49  ;;  %744 = vmatprep.subr.bf16.mxu1 %v2090_v50  ;;  %v2189_v49 = vld [vmem:[%s3361_s3 + $0x1cc] ss:$16 sps:$4 sm:$0xff]   ;;  %v2184_v50 = vld [vmem:[%s3361_s3 + $0x1c0] ss:$16 sps:$4 sm:$0xff]  }
  0x33   :  { %622 = vmatpush2.bf16.msra.mxu0 %v2092_v51  ;;  %745 = vmatpush2.bf16.msra.mxu1 %v2093_v52  ;;  %v2187_v51 = vld [vmem:[%s3361_s3 + $0x1c8] ss:$16 sps:$4 sm:$0xff]   ;;  %v2192_v52 = vld [vmem:[%s3361_s3 + $0x1a4] ss:$16 sps:$4 sm:$0xff]  }
  0x34   :  { %623 = vmatprep.subr.bf16.mxu0 %v2094_v53  ;;  %746 = vmatprep.subr.bf16.mxu1 %v2096_v54  ;;  %v2195_v53 = vld [vmem:[%s3361_s3 + $0x1ac] ss:$16 sps:$4 sm:$0xff]   ;;  %v2183_v54 = vld [vmem:[%s3360_s1 + $0x50] ss:$8 sps:$4 sm:$0xff]  }
  0x37   :  { %624 = vmatpush2.bf16.msra.mxu0 %v2098_v55  ;;  %747 = vmatpush2.bf16.msra.mxu1 %v2099_v56  ;;  %v2190_v55 = vld [vmem:[%s3361_s3 + $0x1a0] ss:$16 sps:$4 sm:$0xff]   ;;  %v2193_v56 = vld [vmem:[%s3361_s3 + $0x1a8] ss:$16 sps:$4 sm:$0xff]  }
  0x38   :  { %625 = vmatprep.subr.bf16.mxu0 %v2100_v57  ;;  %748 = vmatprep.subr.bf16.mxu1 %v2102_v58  ;;  %v2196_v57 = vld [vmem:[%s3360_s1 + $0x64] ss:$8 sps:$4 sm:$0xff]  }
  0x39   :  { %v2201_v58 = vld [vmem:[%s3361_s3 + $0x184] ss:$16 sps:$4 sm:$0xff]  }
  0x3b   :  { %626 = vmatpush2.bf16.msra.mxu0 %v2104_v59  ;;  %749 = vmatpush2.bf16.msra.mxu1 %v2105_v60  ;;  %v2204_v59 = vld [vmem:[%s3361_s3 + $0x18c] ss:$16 sps:$4 sm:$0xff]   ;;  %v2199_v60 = vld [vmem:[%s3361_s3 + $0x180] ss:$16 sps:$4 sm:$0xff]  }
  0x3c   :  { %627 = vmatprep.subr.bf16.mxu0 %v2106_v61  ;;  %750 = vmatprep.subr.bf16.mxu1 %v2108_v62  ;;  %v2202_v61 = vld [vmem:[%s3361_s3 + $0x188] ss:$16 sps:$4 sm:$0xff]   ;;  %v2207_v62 = vld [vmem:[%s3361_s3 + $0x164] ss:$16 sps:$4 sm:$0xff]  }
  0x3f   :  { %628 = vmatpush2.bf16.msra.mxu0 %v2110_v63  ;;  %751 = vmatpush2.bf16.msra.mxu1 %v2111_v0  ;;  %v2210_v63 = vld [vmem:[%s3361_s3 + $0x16c] ss:$16 sps:$4 sm:$0xff]   ;;  %v1499_v0 = vld [vmem:[%s3363_s2] sm:$0xff] }
  0x40   :  { %1253 = vmatprep.subr.bf16.mxu0 %v2117_v1  ;;  %1376 = vmatprep.subr.bf16.mxu1 %v2120_v2  ;;  %v1501_v1 = vld [vmem:[%s3363_s2 + $0x10] sm:$0xff]  ;;  %v2198_v2 = vld [vmem:[%s3360_s1 + $0x60] ss:$8 sps:$4 sm:$0xff]  }
  0x41   :  { %1520 = vperm.xlu0 %2014, %v1499_v0   ;;  %1530 = vperm.xlu1 %2015, %v1501_v1  }
  0x42   :  { %630 = vmatmul.mubr.bf16.vlgmr.msra.gmra.mxu0 %v2112_v3  ;;  %753 = vmatmul.mubr.bf16.vlgmr.msra.gmra.mxu1 %v2112_v3  ;;  %v2211_v3 = vld [vmem:[%s3360_s1 + $0x74] ss:$8 sps:$4 sm:$0xff]  }
  0x43   :  { %1254 = vmatpush1.bf16.msra.mxu0 %v2115_v4  ;;  %1377 = vmatpush1.bf16.msra.mxu1 %v2118_v5  ;;  %v2205_v4 = vld [vmem:[%s3361_s3 + $0x160] ss:$16 sps:$4 sm:$0xff]   ;;  %v2208_v5 = vld [vmem:[%s3361_s3 + $0x168] ss:$16 sps:$4 sm:$0xff]  }
  0x44   :  { %1255 = vmatprep.subr.bf16.mxu0 %v2123_v6  ;;  %1378 = vmatprep.subr.bf16.mxu1 %v2126_v7  ;;  %v2216_v6 = vld [vmem:[%s3361_s3 + $0x144] ss:$16 sps:$4 sm:$0xff]   ;;  %v2219_v7 = vld [vmem:[%s3361_s3 + $0x14c] ss:$16 sps:$4 sm:$0xff]  }
  0x45   :  { %639 = vmatprep.mubr.bf16.mxu0 %v2127_v8  ;;  %762 = vmatprep.mubr.bf16.mxu1 %v2127_v8  ;;  %v1500_v8 = vld [vmem:[%s3363_s2 + $0x8] sm:$0xff] }
  0x46   :  { %1525 = vperm.xlu0 %2014, %v1500_v8  }
  0x47   :  { %1256 = vmatpush1.bf16.msra.mxu0 %v2121_v9  ;;  %1379 = vmatpush1.bf16.msra.mxu1 %v2124_v10  ;;  %v1502_v9 = vld [vmem:[%s3363_s2 + $0x18] sm:$0xff]  ;;  %v2214_v10 = vld [vmem:[%s3361_s3 + $0x140] ss:$16 sps:$4 sm:$0xff]  }
  0x48   :  { %1257 = vmatprep.subr.bf16.mxu0 %v2132_v11  ;;  %1380 = vmatprep.subr.bf16.mxu1 %v2135_v12  ;;  %v2217_v11 = vld [vmem:[%s3361_s3 + $0x148] ss:$16 sps:$4 sm:$0xff]   ;;  %v2224_v12 = vld [vmem:[%s3361_s3 + $0x124] ss:$16 sps:$4 sm:$0xff]  }
  0x49   :  { %1535 = vperm.xlu1 %2015, %v1502_v9  }
  0x4a   :  { %640 = vmatmul.mubr.bf16.gmra.mxu0 %v2129_v13  ;;  %763 = vmatmul.mubr.bf16.gmra.mxu1 %v2129_v13  ;;  %v2227_v13 = vld [vmem:[%s3361_s3 + $0x12c] ss:$16 sps:$4 sm:$0xff]  }
  0x4b   :  { %1258 = vmatpush1.bf16.msra.mxu0 %v2130_v14  ;;  %1381 = vmatpush1.bf16.msra.mxu1 %v2133_v15  ;;  %v2213_v14 = vld [vmem:[%s3360_s1 + $0x70] ss:$8 sps:$4 sm:$0xff]   ;;  %v2220_v15 = vld [vmem:[%s3360_s1 + $0x84] ss:$8 sps:$4 sm:$0xff]  }
  0x4c   :  { %1259 = vmatprep.subr.bf16.mxu0 %v2138_v16  ;;  %1382 = vmatprep.subr.bf16.mxu1 %v2141_v17  ;;  %v2222_v16 = vld [vmem:[%s3361_s3 + $0x120] ss:$16 sps:$4 sm:$0xff]   ;;  %v2225_v17 = vld [vmem:[%s3361_s3 + $0x128] ss:$16 sps:$4 sm:$0xff]  }
  0x4d   :  { %649 = vmatprep.mubr.bf16.mxu0 %v2142_v18  ;;  %772 = vmatprep.mubr.bf16.mxu1 %v2142_v18  ;;  %v2231_v18 = vld [vmem:[%s3361_s3 + $0x104] ss:$16 sps:$4 sm:$0xff]  }
  0x4f   :  { %1260 = vmatpush1.bf16.msra.mxu0 %v2136_v19  ;;  %1383 = vmatpush1.bf16.msra.mxu1 %v2139_v20  ;;  %v2234_v19 = vld [vmem:[%s3361_s3 + $0x10c] ss:$16 sps:$4 sm:$0xff]  }
  0x50   :  { %1261 = vmatprep.subr.bf16.mxu0 %v2147_v21  ;;  %1384 = vmatprep.subr.bf16.mxu1 %v2150_v22  ;;  %v1504_v20 = vld [vmem:[%s3363_s2 + $0x28] sm:$0xff]  ;;  %v1503_v21 = vld [vmem:[%s3363_s2 + $0x20] sm:$0xff] }
  0x51   :  { %v2229_v22 = vld [vmem:[%s3361_s3 + $0x100] ss:$16 sps:$4 sm:$0xff]   ;;  %1545 = vperm.xlu1 %2015, %v1504_v20   ;;  %1540 = vperm.xlu0 %2014, %v1503_v21  }
  0x52   :  { %650 = vmatmul.mubr.bf16.gmra.mxu0 %v2144_v23  ;;  %773 = vmatmul.mubr.bf16.gmra.mxu1 %v2144_v23  ;;  %v2232_v23 = vld [vmem:[%s3361_s3 + $0x108] ss:$16 sps:$4 sm:$0xff]  }
  0x53   :  { %1262 = vmatpush1.bf16.msra.mxu0 %v2145_v24  ;;  %1385 = vmatpush1.bf16.msra.mxu1 %v2148_v26  ;;  %v2228_v24 = vld [vmem:[%s3360_s1 + $0x80] ss:$8 sps:$4 sm:$0xff]   ;;  %v1506_v26 = vld [vmem:[%s3363_s2 + $0x38] sm:$0xff] }
  0x54   :  { %659 = vmatprep.mubr.bf16.mxu0 %v2151_v27  ;;  %782 = vmatprep.mubr.bf16.mxu1 %v2151_v27  ;;  %v1505_v27 = vld [vmem:[%s3363_s2 + $0x30] sm:$0xff] }
  0x55   :  { %1263 = vmatprep.subr.bf16.mxu0 %v2155_v28  ;;  %1386 = vmatprep.subr.bf16.mxu1 %v2158_v29  ;;  %v1508_v28 = vld [vmem:[%s3363_s2 + $0x48] sm:$0xff]  ;;  %v1507_v29 = vld [vmem:[%s3363_s2 + $0x40] sm:$0xff] }
  0x56   :  { %1555 = vperm.xlu1 %2015, %v1506_v26   ;;  %1550 = vperm.xlu0 %2014, %v1505_v27  }
  0x57   :  { %1264 = vmatpush1.bf16.msra.mxu0 %v2153_v30  ;;  %1387 = vmatpush1.bf16.msra.mxu1 %v2156_v31  ;;  %v2235_v30 = vld [vmem:[%s3362_s0] ss:$8 sps:$4 sm:$0xff]   ;;  %v2238_v31 = vld [vmem:[%s3362_s0 + $0x14] ss:$8 sps:$4 sm:$0xff]  }
  0x58   :  { %1265 = vmatprep.subr.bf16.mxu0 %v2162_v32  ;;  %1388 = vmatprep.subr.bf16.mxu1 %v2165_v33  ;;  %v1510_v32 = vld [vmem:[%s3363_s2 + $0x58] sm:$0xff]  ;;  %v1509_v33 = vld [vmem:[%s3363_s2 + $0x50] sm:$0xff] }
  0x5a   :  { %660 = vmatmul.mubr.bf16.gmra.mxu0 %v2159_v34  ;;  %783 = vmatmul.mubr.bf16.gmra.mxu1 %v2159_v34  ;;  %v1512_v34 = vld [vmem:[%s3363_s2 + $0x68] sm:$0xff] }
  0x5b   :  { %1266 = vmatpush1.bf16.msra.mxu0 %v2160_v35  ;;  %1389 = vmatpush1.bf16.msra.mxu1 %v2163_v36  ;;  %v1511_v35 = vld [vmem:[%s3363_s2 + $0x60] sm:$0xff]  ;;  %v2240_v36 = vld [vmem:[%s3362_s0 + $0x10] ss:$8 sps:$4 sm:$0xff]  }
  0x5c   :  { %669 = vmatprep.mubr.bf16.mxu0 %v2166_v37  ;;  %792 = vmatprep.mubr.bf16.mxu1 %v2166_v37  ;;  %v2241_v37 = vld [vmem:[%s3362_s0 + $0x24] ss:$8 sps:$4 sm:$0xff]  }
  0x5d   :  { %1267 = vmatprep.subr.bf16.mxu0 %v2171_v38  ;;  %1390 = vmatprep.subr.bf16.mxu1 %v2174_v39  ;;  %v1514_v38 = vld [vmem:[%s3363_s2 + $0x78] sm:$0xff]  ;;  %v1513_v39 = vld [vmem:[%s3363_s2 + $0x70] sm:$0xff] }
  0x5e   :  { %1565 = vperm.xlu1 %2015, %v1508_v28   ;;  %1560 = vperm.xlu0 %2014, %v1507_v29  }
  0x5f   :  { %1268 = vmatpush1.bf16.msra.mxu0 %v2169_v40  ;;  %1391 = vmatpush1.bf16.msra.mxu1 %v2172_v41  ;;  %v1516_v40 = vld [vmem:[%s3363_s2 + $0x88] sm:$0xff]  ;;  %v1515_v41 = vld [vmem:[%s3363_s2 + $0x80] sm:$0xff] }
  0x60   :  { %1269 = vmatprep.subr.bf16.mxu0 %v2177_v42  ;;  %1392 = vmatprep.subr.bf16.mxu1 %v2180_v43  ;;  %v2243_v42 = vld [vmem:[%s3362_s0 + $0x20] ss:$8 sps:$4 sm:$0xff]   ;;  %v2244_v43 = vld [vmem:[%s3362_s0 + $0x34] ss:$8 sps:$4 sm:$0xff]  }
  0x62   :  { %670 = vmatmul.mubr.bf16.gmra.mxu0 %v2168_v44  ;;  %793 = vmatmul.mubr.bf16.gmra.mxu1 %v2168_v44  ;;  %v2246_v44 = vld [vmem:[%s3362_s0 + $0x30] ss:$8 sps:$4 sm:$0xff]  }
  0x63   :  { %1270 = vmatpush2.bf16.msra.mxu0 %v2175_v45  ;;  %1393 = vmatpush2.bf16.msra.mxu1 %v2178_v46  ;;  %v2247_v45 = vld [vmem:[%s3362_s0 + $0x44] ss:$8 sps:$4 sm:$0xff]   ;;  %v2249_v46 = vld [vmem:[%s3362_s0 + $0x40] ss:$8 sps:$4 sm:$0xff]  }
  0x64   :  { %679 = vmatprep.mubr.bf16.mxu0 %v2181_v47  ;;  %802 = vmatprep.mubr.bf16.mxu1 %v2181_v47  ;;  %v2250_v47 = vld [vmem:[%s3362_s0 + $0x54] ss:$8 sps:$4 sm:$0xff]  }
  0x65   :  { %1271 = vmatprep.subr.bf16.mxu0 %v2186_v48  ;;  %1394 = vmatprep.subr.bf16.mxu1 %v2189_v49  ;;  %v2252_v48 = vld [vmem:[%s3362_s0 + $0x50] ss:$8 sps:$4 sm:$0xff]   ;;  %v2253_v49 = vld [vmem:[%s3362_s0 + $0x64] ss:$8 sps:$4 sm:$0xff]  }
  0x66   :  { %1575 = vperm.xlu1 %2015, %v1510_v32   ;;  %1570 = vperm.xlu0 %2014, %v1509_v33  }
  0x67   :  { %1272 = vmatpush2.bf16.msra.mxu0 %v2184_v50  ;;  %1395 = vmatpush2.bf16.msra.mxu1 %v2187_v51  ;;  %v2255_v50 = vld [vmem:[%s3362_s0 + $0x60] ss:$8 sps:$4 sm:$0xff]   ;;  %v2256_v51 = vld [vmem:[%s3362_s0 + $0x74] ss:$8 sps:$4 sm:$0xff]  }
  0x68   :  { %1273 = vmatprep.subr.bf16.mxu0 %v2192_v52  ;;  %1396 = vmatprep.subr.bf16.mxu1 %v2195_v53  ;;  %v2258_v52 = vld [vmem:[%s3362_s0 + $0x70] ss:$8 sps:$4 sm:$0xff]   ;;  %v2259_v53 = vld [vmem:[%s3362_s0 + $0x84] ss:$8 sps:$4 sm:$0xff]  }
  0x6a   :  { %680 = vmatmul.mubr.bf16.gmra.mxu0 %v2183_v54  ;;  %803 = vmatmul.mubr.bf16.gmra.mxu1 %v2183_v54  ;;  %v2261_v54 = vld [vmem:[%s3362_s0 + $0x80] ss:$8 sps:$4 sm:$0xff]  }
  0x6b   :  { %1274 = vmatpush2.bf16.msra.mxu0 %v2190_v55  ;;  %1397 = vmatpush2.bf16.msra.mxu1 %v2193_v56 }
  0x6c   :  { %689 = vmatprep.mubr.bf16.mxu0 %v2196_v57  ;;  %812 = vmatprep.mubr.bf16.mxu1 %v2196_v57 }
  0x6d   :  { %1275 = vmatprep.subr.bf16.mxu0 %v2201_v58  ;;  %1398 = vmatprep.subr.bf16.mxu1 %v2204_v59 }
  0x6e   :  { %1585 = vperm.xlu1 %2015, %v1512_v34   ;;  %1580 = vperm.xlu0 %2014, %v1511_v35  }
  0x6f   :  { %1276 = vmatpush2.bf16.msra.mxu0 %v2199_v60  ;;  %1399 = vmatpush2.bf16.msra.mxu1 %v2202_v61 }
  0x70   :  { %1277 = vmatprep.subr.bf16.mxu0 %v2207_v62  ;;  %1400 = vmatprep.subr.bf16.mxu1 %v2210_v63 }
  0x72   :  { %690 = vmatmul.mubr.bf16.gmra.mxu0 %v2198_v2  ;;  %813 = vmatmul.mubr.bf16.gmra.mxu1 %v2198_v2 }
  0x73   :  { %699 = vmatprep.mubr.bf16.mxu0 %v2211_v3  ;;  %822 = vmatprep.mubr.bf16.mxu1 %v2211_v3 }
  0x74   :  { %1278 = vmatpush2.bf16.msra.mxu0 %v2205_v4  ;;  %1401 = vmatpush2.bf16.msra.mxu1 %v2208_v5 }
  0x75   :  { %1279 = vmatprep.subr.bf16.mxu0 %v2216_v6  ;;  %1402 = vmatprep.subr.bf16.mxu1 %v2219_v7 }
  0x76   :  { %1595 = vperm.xlu1 %2015, %v1514_v38   ;;  %1590 = vperm.xlu0 %2014, %v1513_v39  }
  0x78   :  { %1280 = vmatpush2.bf16.msra.mxu0 %v2214_v10  ;;  %1403 = vmatpush2.bf16.msra.mxu1 %v2217_v11 }
  0x79   :  { %1281 = vmatprep.subr.bf16.mxu0 %v2224_v12  ;;  %1404 = vmatprep.subr.bf16.mxu1 %v2227_v13 }
  0x7a   :  { %700 = vmatmul.mubr.bf16.gmra.mxu0 %v2213_v14  ;;  %823 = vmatmul.mubr.bf16.gmra.mxu1 %v2213_v14 }
  0x7b   :  { %709 = vmatprep.mubr.bf16.mxu0 %v2220_v15  ;;  %832 = vmatprep.mubr.bf16.mxu1 %v2220_v15 }
  0x7c   :  { %1282 = vmatpush2.bf16.msra.mxu0 %v2222_v16  ;;  %1405 = vmatpush2.bf16.msra.mxu1 %v2225_v17 }
  0x7d   :  { %1283 = vmatprep.subr.bf16.mxu0 %v2231_v18  ;;  %1406 = vmatprep.subr.bf16.mxu1 %v2234_v19 }
  0x7e   :  { %1605 = vperm.xlu1 %2015, %v1516_v40   ;;  %1600 = vperm.xlu0 %2014, %v1515_v41  }
  0x80   :  { %1284 = vmatpush2.bf16.msra.mxu0 %v2229_v22  ;;  %1407 = vmatpush2.bf16.msra.mxu1 %v2232_v23 }
  0x82   :  { %710 = vmatmul.mubr.bf16.gmra.mxu0 %v2228_v24  ;;  %833 = vmatmul.mubr.bf16.gmra.mxu1 %v2228_v24 }
  0x83   :  { %1285 = vmatprep.mubr.bf16.mxu0 %v2237_v25  ;;  %1408 = vmatprep.mubr.bf16.mxu1 %v2237_v25 }
  0x8a   :  { %1286 = vmatmul.mubr.bf16.vlgmr.msra.gmra.mxu0 %v2235_v30  ;;  %1409 = vmatmul.mubr.bf16.vlgmr.msra.gmra.mxu1 %v2235_v30 }
  0x8b   :  { %1295 = vmatprep.mubr.bf16.mxu0 %v2238_v31  ;;  %1418 = vmatprep.mubr.bf16.mxu1 %v2238_v31 }
  0x92   :  { %1296 = vmatmul.mubr.bf16.gmra.mxu0 %v2240_v36  ;;  %1419 = vmatmul.mubr.bf16.gmra.mxu1 %v2240_v36 }
  0x93   :  { %1305 = vmatprep.mubr.bf16.mxu0 %v2241_v37  ;;  %1428 = vmatprep.mubr.bf16.mxu1 %v2241_v37 }
  0x9a   :  { %1306 = vmatmul.mubr.bf16.gmra.mxu0 %v2243_v42  ;;  %1429 = vmatmul.mubr.bf16.gmra.mxu1 %v2243_v42 }
  0x9b   :  { %1315 = vmatprep.mubr.bf16.mxu0 %v2244_v43  ;;  %1438 = vmatprep.mubr.bf16.mxu1 %v2244_v43 }
  0xa2   :  { %1316 = vmatmul.mubr.bf16.gmra.mxu0 %v2246_v44  ;;  %1439 = vmatmul.mubr.bf16.gmra.mxu1 %v2246_v44 }
  0xa3   :  { %1325 = vmatprep.mubr.bf16.mxu0 %v2247_v45  ;;  %1448 = vmatprep.mubr.bf16.mxu1 %v2247_v45 }
  0xaa   :  { %1326 = vmatmul.mubr.bf16.gmra.mxu0 %v2249_v46  ;;  %1449 = vmatmul.mubr.bf16.gmra.mxu1 %v2249_v46 }
  0xab   :  { %1335 = vmatprep.mubr.bf16.mxu0 %v2250_v47  ;;  %1458 = vmatprep.mubr.bf16.mxu1 %v2250_v47  ;;  %v1609_v47 = vlaneseq }
  0xb2   :  { %1336 = vmatmul.mubr.bf16.gmra.mxu0 %v2252_v48  ;;  %1459 = vmatmul.mubr.bf16.gmra.mxu1 %v2252_v48 }
  0xb3   :  { %1345 = vmatprep.mubr.bf16.mxu0 %v2253_v49  ;;  %1468 = vmatprep.mubr.bf16.mxu1 %v2253_v49 }
  0xba   :  { %1346 = vmatmul.mubr.bf16.gmra.mxu0 %v2255_v50  ;;  %1469 = vmatmul.mubr.bf16.gmra.mxu1 %v2255_v50 }
  0xbb   :  { %1355 = vmatprep.mubr.bf16.mxu0 %v2256_v51  ;;  %1478 = vmatprep.mubr.bf16.mxu1 %v2256_v51 }
  0xc2   :  { %1356 = vmatmul.mubr.bf16.gmra.mxu0 %v2258_v52  ;;  %1479 = vmatmul.mubr.bf16.gmra.mxu1 %v2258_v52  ;;  %v1610_v52 = vshrl.u32 %v1609_v47, 7 }
  0xc3   :  { %1365 = vmatprep.mubr.bf16.mxu0 %v2259_v53  ;;  %1488 = vmatprep.mubr.bf16.mxu1 %v2259_v53 }
  0xc4   :  { %v1615_v47 = vsub.s32 1, %v1610_v52 }
  0xca   :  { %1366 = vmatmul.mubr.bf16.gmra.mxu0 %v2261_v54  ;;  %1489 = vmatmul.mubr.bf16.gmra.mxu1 %v2261_v54 }
 0x102   :  { %v2844_v55 = vpop.f32.mrf.mxu0  ;;  %v2846_v56 = vpop.f32.mrf.mxu1 }
 0x104   :  { %v2848_v57 = vpop.f32.mrf.mxu0  ;;  %v2850_v58 = vpop.f32.mrf.mxu1 }
 0x106   :  { %v2852_v59 = vpop.f32.mrf.mxu0  ;;  %v2854_v60 = vpop.f32.mrf.mxu1 }
 0x108   :  { %v2856_v61 = vpop.f32.mrf.mxu0  ;;  %v2858_v62 = vpop.f32.mrf.mxu1 }
 0x10a   :  { %v2860_v63 = vpop.f32.mrf.mxu0  ;;  %v2862_v0 = vpop.f32.mrf.mxu1 }
 0x10c   :  { %v2864_v1 = vpop.f32.mrf.mxu0  ;;  %v2866_v2 = vpop.f32.mrf.mxu1 }
 0x10e   :  { %v2868_v3 = vpop.f32.mrf.mxu0  ;;  %v2870_v4 = vpop.f32.mrf.mxu1 }
 0x110   :  { %v2872_v5 = vpop.f32.mrf.mxu0  ;;  %v2874_v6 = vpop.f32.mrf.mxu1 }
 0x112   :  { %v2876_v7 = vpop.f32.mrf.mxu0  ;;  %v2878_v8 = vpop.f32.mrf.mxu1 }
 0x114   :  { %v2880_v9 = vpop.f32.mrf.mxu0  ;;  %v2882_v10 = vpop.f32.mrf.mxu1 }
 0x116   :  { %v2884_v11 = vpop.f32.mrf.mxu0  ;;  %v2886_v12 = vpop.f32.mrf.mxu1 }
 0x118   :  { %v2888_v13 = vpop.f32.mrf.mxu0  ;;  %v2890_v14 = vpop.f32.mrf.mxu1 }
 0x11a   :  { %v2892_v15 = vpop.f32.mrf.mxu0  ;;  %v2894_v16 = vpop.f32.mrf.mxu1 }
 0x11c   :  { %v2896_v17 = vpop.f32.mrf.mxu0  ;;  %v2898_v18 = vpop.f32.mrf.mxu1 }
 0x11e   :  { %v2900_v19 = vpop.f32.mrf.mxu0  ;;  %v2902_v20 = vpop.f32.mrf.mxu1 }
 0x120   :  { %v2904_v21 = vpop.f32.mrf.mxu0  ;;  %v2906_v22 = vpop.f32.mrf.mxu1 }
 0x122   :  { %v2908_v23 = vpop.f32.mrf.mxu0  ;;  %v2910_v24 = vpop.f32.mrf.mxu1 }
 0x124   :  { %v2912_v25 = vpop.f32.mrf.mxu0  ;;  %v2914_v26 = vpop.f32.mrf.mxu1 }
 0x126   :  { %v2916_v27 = vpop.f32.mrf.mxu0  ;;  %v2918_v28 = vpop.f32.mrf.mxu1 }
 0x128   :  { %v2920_v29 = vpop.f32.mrf.mxu0  ;;  %v2922_v30 = vpop.f32.mrf.mxu1 }
 0x12a   :  { %v2924_v31 = vpop.f32.mrf.mxu0  ;;  %v2926_v32 = vpop.f32.mrf.mxu1 }
 0x12b   :  { %3366 = vst [vmem:[#allocation2_spill] sm:$0xff] %v2926_v32  ;;  %v1531_v32 = vpop.permute.xlu1 %1530 }
 0x12c   :  { %v2928_v33 = vpop.f32.mrf.mxu0  ;;  %v2930_v34 = vpop.f32.mrf.mxu1 }
 0x12d   :  { %3367 = vst [vmem:[#allocation3_spill] sm:$0xff] %v2928_v33  ;;  %3368 = vst [vmem:[#allocation4_spill] sm:$0xff] %v2930_v34 }
 0x12e   :  { %v2932_v35 = vpop.f32.mrf.mxu0  ;;  %v2934_v36 = vpop.f32.mrf.mxu1 }
 0x12f   :  { %3369 = vst [vmem:[#allocation5_spill] sm:$0xff] %v2932_v35  ;;  %3370 = vst [vmem:[#allocation6_spill] sm:$0xff] %v2934_v36 }
 0x130   :  { %v2936_v37 = vpop.f32.mrf.mxu0  ;;  %v2938_v38 = vpop.f32.mrf.mxu1 }
 0x131   :  { %3371 = vst [vmem:[#allocation7_spill] sm:$0xff] %v2936_v37  ;;  %3372 = vst [vmem:[#allocation8_spill] sm:$0xff] %v2938_v38 }
 0x132   :  { %v2940_v39 = vpop.f32.mrf.mxu0  ;;  %v2942_v40 = vpop.f32.mrf.mxu1 }
 0x133   :  { %3373 = vst [vmem:[#allocation9_spill] sm:$0xff] %v2940_v39  ;;  %3374 = vst [vmem:[#allocation10_spill] sm:$0xff] %v2942_v40 }
 0x134   :  { %v2944_v41 = vpop.f32.mrf.mxu0  ;;  %v2946_v42 = vpop.f32.mrf.mxu1 }
 0x135   :  { %3375 = vst [vmem:[#allocation11_spill] sm:$0xff] %v2944_v41  ;;  %3376 = vst [vmem:[#allocation12_spill] sm:$0xff] %v2946_v42 }
 0x136   :  { %v2948_v43 = vpop.f32.mrf.mxu0  ;;  %v2950_v44 = vpop.f32.mrf.mxu1 }
 0x137   :  { %3377 = vst [vmem:[#allocation13_spill] sm:$0xff] %v2948_v43  ;;  %3378 = vst [vmem:[#allocation14_spill] sm:$0xff] %v2950_v44 }
 0x138   :  { %v2952_v45 = vpop.f32.mrf.mxu0  ;;  %v2954_v46 = vpop.f32.mrf.mxu1 }
 0x139   :  { %3379 = vst [vmem:[#allocation15_spill] sm:$0xff] %v2952_v45  ;;  %3380 = vst [vmem:[#allocation16_spill] sm:$0xff] %v2954_v46  ;;  %v1611_v45 = vsub.s32 0, %v1610_v52  ;;  %v1619_v46 = vsub.s32 2, %v1610_v52 }
 0x13a   :  { %v2956_v48 = vpop.f32.mrf.mxu0  ;;  %v2958_v49 = vpop.f32.mrf.mxu1 }
 0x13b   :  { %3381 = vst [vmem:[#allocation17_spill] sm:$0xff] %v2956_v48  ;;  %3382 = vst [vmem:[#allocation18_spill] sm:$0xff] %v2958_v49  ;;  %v1623_v49 = vsub.s32 3, %v1610_v52 }
 0x13c   :  { %v2960_v50 = vpop.f32.mrf.mxu0  ;;  %v2962_v51 = vpop.f32.mrf.mxu1 }
 0x13d   :  { %3383 = vst [vmem:[#allocation19_spill] sm:$0xff] %v2960_v50  ;;  %3384 = vst [vmem:[#allocation20_spill] sm:$0xff] %v2962_v51  ;;  %v1517_v50 = vld [vmem:[%s3364_s5] sm:$0xf]  ;;  %v1521_v51 = vpop.permute.xlu0 %1520 }
 0x13e   :  { %v2964_v53 = vpop.f32.mrf.mxu0  ;;  %v2966_v54 = vpop.f32.mrf.mxu1  ;;  %v2993_v40 = vrot.slane %v1517_v50, %v1623_v49 }
 0x13f   :  { %3385 = vst [vmem:[#allocation21_spill] sm:$0xff] %v2964_v53  ;;  %3386 = vst [vmem:[#allocation22_spill] sm:$0xff] %v2966_v54 }
 0x140   :  { %v2968_v43 = vpop.f32.mrf.mxu0  ;;  %v2970_v44 = vpop.f32.mrf.mxu1  ;;  %v1632_v49 = vmul.f32 %v2993_v40, %v1521_v51 }
 0x141   :  { %3387 = vst [vmem:[#allocation23_spill] sm:$0xff] %v2968_v43  ;;  %3388 = vst [vmem:[#allocation24_spill] sm:$0xff] %v2970_v44  ;;  %v2983_v43 = vrot.slane %v1517_v50, %v1611_v45  ;;  %v2985_v44 = vrot.slane %v1517_v50, %v1619_v46  ;;  %v1526_v45 = vpop.permute.xlu0 %1525 }
 0x142   :  { %v2972_v42 = vpop.f32.mrf.mxu0  ;;  %v2974_v48 = vpop.f32.mrf.mxu1 }
 0x143   :  { %3389 = vst [vmem:[#allocation25_spill] sm:$0xff] %v2972_v42  ;;  %3390 = vst [vmem:[#allocation26_spill] sm:$0xff] %v2974_v48  ;;  %v2991_v48 = vrot.slane %v1517_v50, %v1615_v47  ;;  %v1629_v52 = vmul.f32 %v2983_v43, %v1521_v51 }
 0x144   :  { %v2979_v53 = vpop.f32.mrf.mxu0  ;;  %v2981_v54 = vpop.f32.mrf.mxu1 }
 0x145   :  { %3391 = vst [vmem:[#allocation27_spill] sm:$0xff] %v2979_v53  ;;  %3392 = vst [vmem:[#allocation28_spill] sm:$0xff] %v2981_v54  ;;  %v1631_v54 = vmul.f32 %v2985_v44, %v1521_v51  ;;  %v1630_v47 = vmul.f32 %v2991_v48, %v1521_v51 }
 0x146   :  { %v2987_v41 = vpop.f32.mrf.mxu0  ;;  %v2989_v42 = vpop.f32.mrf.mxu1 }
 0x147   :  { %3393 = vst [vmem:[#allocation29_spill] sm:$0xff] %v2987_v41  ;;  %3394 = vst [vmem:[#allocation30_spill] sm:$0xff] %v2989_v42 }
 0x148   :  { %v2995_v39 = vpop.f32.mrf.mxu0  ;;  %v2997_v38 = vpop.f32.mrf.mxu1 }
 0x149   :  { %3395 = vst [vmem:[#allocation31_spill] sm:$0xff] %v2995_v39  ;;  %3396 = vst [vmem:[#allocation32_spill] sm:$0xff] %v2997_v38  ;;  %v1633_v39 = vmul.f32 %v2983_v43, %v1526_v45  ;;  %v1635_v38 = vmul.f32 %v2985_v44, %v1526_v45 }
 0x14a   :  { %v1287_v53 = vpop.f32.mrf.mxu0  ;;  %v1410_v46 = vpop.f32.mrf.mxu1 }
 0x14b   :  { %v1288_v37 = vadd.f32 %v1287_v53, %v2844_v55  ;;  %v1411_v41 = vadd.f32 %v1410_v46, %v2846_v56  ;;  %v1634_v56 = vmul.f32 %v2991_v48, %v1526_v45  ;;  %v1636_v46 = vmul.f32 %v2993_v40, %v1526_v45 }
 0x14c   :  { %v1289_v50 = vpop.f32.mrf.mxu0  ;;  %v1412_v42 = vpop.f32.mrf.mxu1  ;;  %v1638_v45 = vmul.f32 %v2991_v48, %v1531_v32 }
 0x14d   :  { %v1701_v36 = vadd.f32 %v1629_v52, %v1288_v37  ;;  %v1703_v35 = vadd.f32 %v1631_v54, %v1411_v41  ;;  %v1290_v34 = vadd.f32 %v1289_v50, %v2848_v57  ;;  %v1413_v33 = vadd.f32 %v1412_v42, %v2850_v58 }
 0x14e   :  { %v1291_v55 = vpop.f32.mrf.mxu0  ;;  %v1414_v53 = vpop.f32.mrf.mxu1  ;;  %v1637_v54 = vmul.f32 %v2983_v43, %v1531_v32  ;;  %v1639_v52 = vmul.f32 %v2985_v44, %v1531_v32 }
 0x14f   :  { %1773 = vst [vmem:[%s3365_s6] sm:$0xff] %v1701_v36  ;;  %1775 = vst [vmem:[%s3365_s6 + $0x10] sm:$0xff] %v1703_v35  ;;  %v1702_v37 = vadd.f32 %v1630_v47, %v1290_v34  ;;  %v1704_v41 = vadd.f32 %v1632_v49, %v1413_v33  ;;  %v1292_v57 = vadd.f32 %v1291_v55, %v2852_v59  ;;  %v1536_v49 = vpop.permute.xlu1 %1535 }
 0x150   :  { %v1415_v58 = vadd.f32 %v1414_v53, %v2854_v60  ;;  %v1293_v42 = vpop.f32.mrf.mxu0  ;;  %v1416_v51 = vpop.f32.mrf.mxu1  ;;  %v1640_v47 = vmul.f32 %v2993_v40, %v1531_v32  ;;  %v1641_v53 = vmul.f32 %v2983_v43, %v1536_v49  ;;  %v1643_v32 = vmul.f32 %v2985_v44, %v1536_v49 }
 0x151   :  { %1774 = vst [vmem:[%s3365_s6 + $0x8] sm:$0xff] %v1702_v37  ;;  %1776 = vst [vmem:[%s3365_s6 + $0x18] sm:$0xff] %v1704_v41  ;;  %v1705_v34 = vadd.f32 %v1633_v39, %v1292_v57  ;;  %v1294_v59 = vadd.f32 %v1293_v42, %v2856_v61  ;;  %v1417_v60 = vadd.f32 %v1416_v51, %v2858_v62 }
 0x152   :  { %v1707_v33 = vadd.f32 %v1635_v38, %v1415_v58  ;;  %v1297_v35 = vpop.f32.mrf.mxu0  ;;  %v1420_v36 = vpop.f32.mrf.mxu1  ;;  %v1642_v57 = vmul.f32 %v2991_v48, %v1536_v49  ;;  %v1644_v58 = vmul.f32 %v2993_v40, %v1536_v49 }
 0x153   :  { %1777 = vst [vmem:[%s3365_s6 + $0x20] sm:$0xff] %v1705_v34  ;;  %v1706_v39 = vadd.f32 %v1634_v56, %v1294_v59  ;;  %v1708_v38 = vadd.f32 %v1636_v46, %v1417_v60  ;;  %v1298_v61 = vadd.f32 %v1297_v35, %v2860_v63  ;;  %v1421_v62 = vadd.f32 %v1420_v36, %v2862_v0 }
 0x154   :  { %1779 = vst [vmem:[%s3365_s6 + $0x30] sm:$0xff] %v1707_v33  ;;  %v1299_v50 = vpop.f32.mrf.mxu0  ;;  %v1422_v55 = vpop.f32.mrf.mxu1 }
 0x155   :  { %1778 = vst [vmem:[%s3365_s6 + $0x28] sm:$0xff] %v1706_v39  ;;  %1780 = vst [vmem:[%s3365_s6 + $0x38] sm:$0xff] %v1708_v38  ;;  %v1709_v56 = vadd.f32 %v1637_v54, %v1298_v61  ;;  %v1711_v46 = vadd.f32 %v1639_v52, %v1421_v62  ;;  %v1300_v63 = vadd.f32 %v1299_v50, %v2864_v1  ;;  %v1541_v54 = vpop.permute.xlu0 %1540  ;;  %v1546_v62 = vpop.permute.xlu1 %1545 }
 0x156   :  { %v1423_v0 = vadd.f32 %v1422_v55, %v2866_v2  ;;  %v1301_v37 = vpop.f32.mrf.mxu0  ;;  %v1424_v41 = vpop.f32.mrf.mxu1  ;;  %v1645_v33 = vmul.f32 %v2983_v43, %v1541_v54  ;;  %v1647_v59 = vmul.f32 %v2985_v44, %v1541_v54  ;;  %v1648_v39 = vmul.f32 %v2993_v40, %v1541_v54 }
 0x157   :  { %1781 = vst [vmem:[%s3365_s6 + $0x40] sm:$0xff] %v1709_v56  ;;  %1783 = vst [vmem:[%s3365_s6 + $0x50] sm:$0xff] %v1711_v46  ;;  %v1710_v42 = vadd.f32 %v1638_v45, %v1300_v63  ;;  %v1302_v1 = vadd.f32 %v1301_v37, %v2868_v3  ;;  %v1425_v2 = vadd.f32 %v1424_v41, %v2870_v4 }
 0x158   :  { %v1712_v51 = vadd.f32 %v1640_v47, %v1423_v0  ;;  %v1303_v52 = vpop.f32.mrf.mxu0  ;;  %v1426_v34 = vpop.f32.mrf.mxu1  ;;  %v1646_v47 = vmul.f32 %v2991_v48, %v1541_v54  ;;  %v1649_v55 = vmul.f32 %v2983_v43, %v1546_v62  ;;  %v1650_v0 = vmul.f32 %v2991_v48, %v1546_v62 }
 0x159   :  { %1782 = vst [vmem:[%s3365_s6 + $0x48] sm:$0xff] %v1710_v42  ;;  %v1713_v60 = vadd.f32 %v1641_v53, %v1302_v1  ;;  %v1715_v35 = vadd.f32 %v1643_v32, %v1425_v2  ;;  %v1304_v3 = vadd.f32 %v1303_v52, %v2872_v5  ;;  %v1427_v4 = vadd.f32 %v1426_v34, %v2874_v6 }
 0x15a   :  { %1784 = vst [vmem:[%s3365_s6 + $0x58] sm:$0xff] %v1712_v51  ;;  %v1307_v36 = vpop.f32.mrf.mxu0  ;;  %v1430_v45 = vpop.f32.mrf.mxu1  ;;  %v1651_v53 = vmul.f32 %v2985_v44, %v1546_v62  ;;  %v1652_v37 = vmul.f32 %v2993_v40, %v1546_v62 }
 0x15b   :  { %1785 = vst [vmem:[%s3365_s6 + $0x60] sm:$0xff] %v1713_v60  ;;  %1787 = vst [vmem:[%s3365_s6 + $0x70] sm:$0xff] %v1715_v35  ;;  %v1714_v38 = vadd.f32 %v1642_v57, %v1304_v3  ;;  %v1716_v61 = vadd.f32 %v1644_v58, %v1427_v4  ;;  %v1308_v5 = vadd.f32 %v1307_v36, %v2876_v7  ;;  %v1551_v58 = vpop.permute.xlu0 %1550  ;;  %v1556_v35 = vpop.permute.xlu1 %1555 }
 0x15c   :  { %v1431_v6 = vadd.f32 %v1430_v45, %v2878_v8  ;;  %v1309_v49 = vpop.f32.mrf.mxu0  ;;  %v1432_v50 = vpop.f32.mrf.mxu1  ;;  %v1653_v1 = vmul.f32 %v2983_v43, %v1551_v58  ;;  %v1655_v2 = vmul.f32 %v2985_v44, %v1551_v58  ;;  %v1656_v60 = vmul.f32 %v2993_v40, %v1551_v58 }
 0x15d   :  { %1786 = vst [vmem:[%s3365_s6 + $0x68] sm:$0xff] %v1714_v38  ;;  %1788 = vst [vmem:[%s3365_s6 + $0x78] sm:$0xff] %v1716_v61  ;;  %v1717_v32 = vadd.f32 %v1645_v33, %v1308_v5  ;;  %v1310_v7 = vadd.f32 %v1309_v49, %v2880_v9  ;;  %v1433_v8 = vadd.f32 %v1432_v50, %v2882_v10 }
 0x15e   :  { %v1719_v56 = vadd.f32 %v1647_v59, %v1431_v6  ;;  %v1311_v46 = vpop.f32.mrf.mxu0  ;;  %v1434_v63 = vpop.f32.mrf.mxu1  ;;  %v1654_v59 = vmul.f32 %v2991_v48, %v1551_v58  ;;  %v1658_v6 = vmul.f32 %v2991_v48, %v1556_v35  ;;  %v1660_v49 = vmul.f32 %v2993_v40, %v1556_v35 }
 0x15f   :  { %1789 = vst [vmem:[%s3365_s6 + $0x80] sm:$0xff] %v1717_v32  ;;  %v1718_v41 = vadd.f32 %v1646_v47, %v1310_v7  ;;  %v1720_v57 = vadd.f32 %v1648_v39, %v1433_v8  ;;  %v1312_v9 = vadd.f32 %v1311_v46, %v2884_v11  ;;  %v1435_v10 = vadd.f32 %v1434_v63, %v2886_v12  ;;  %v1561_v50 = vpop.permute.xlu0 %1560  ;;  %v1566_v58 = vpop.permute.xlu1 %1565 }
 0x160   :  { %1791 = vst [vmem:[%s3365_s6 + $0x90] sm:$0xff] %v1719_v56  ;;  %v1313_v42 = vpop.f32.mrf.mxu0  ;;  %v1436_v51 = vpop.f32.mrf.mxu1  ;;  %v1657_v47 = vmul.f32 %v2983_v43, %v1556_v35  ;;  %v1659_v39 = vmul.f32 %v2985_v44, %v1556_v35  ;;  %v1661_v7 = vmul.f32 %v2983_v43, %v1561_v50  ;;  %v1663_v8 = vmul.f32 %v2985_v44, %v1561_v50 }
 0x161   :  { %1790 = vst [vmem:[%s3365_s6 + $0x88] sm:$0xff] %v1718_v41  ;;  %1792 = vst [vmem:[%s3365_s6 + $0x98] sm:$0xff] %v1720_v57  ;;  %v1721_v54 = vadd.f32 %v1649_v55, %v1312_v9  ;;  %v1723_v52 = vadd.f32 %v1651_v53, %v1435_v10  ;;  %v1314_v11 = vadd.f32 %v1313_v42, %v2888_v13 }
 0x162   :  { %v1437_v12 = vadd.f32 %v1436_v51, %v2890_v14  ;;  %v1317_v34 = vpop.f32.mrf.mxu0  ;;  %v1440_v33 = vpop.f32.mrf.mxu1  ;;  %v1662_v41 = vmul.f32 %v2991_v48, %v1561_v50  ;;  %v1664_v57 = vmul.f32 %v2993_v40, %v1561_v50 }
 0x163   :  { %1793 = vst [vmem:[%s3365_s6 + $0xa0] sm:$0xff] %v1721_v54  ;;  %1795 = vst [vmem:[%s3365_s6 + $0xb0] sm:$0xff] %v1723_v52  ;;  %v1722_v3 = vadd.f32 %v1650_v0, %v1314_v11  ;;  %v1318_v13 = vadd.f32 %v1317_v34, %v2892_v15  ;;  %v1441_v14 = vadd.f32 %v1440_v33, %v2894_v16 }
 0x164   :  { %v1724_v4 = vadd.f32 %v1652_v37, %v1437_v12  ;;  %v1319_v36 = vpop.f32.mrf.mxu0  ;;  %v1442_v45 = vpop.f32.mrf.mxu1  ;;  %v1666_v34 = vmul.f32 %v2991_v48, %v1566_v58  ;;  %v1668_v33 = vmul.f32 %v2993_v40, %v1566_v58 }
 0x165   :  { %1794 = vst [vmem:[%s3365_s6 + $0xa8] sm:$0xff] %v1722_v3  ;;  %v1725_v38 = vadd.f32 %v1653_v1, %v1318_v13  ;;  %v1727_v61 = vadd.f32 %v1655_v2, %v1441_v14  ;;  %v1320_v15 = vadd.f32 %v1319_v36, %v2896_v17  ;;  %v1443_v16 = vadd.f32 %v1442_v45, %v2898_v18 }
 0x166   :  { %1796 = vst [vmem:[%s3365_s6 + $0xb8] sm:$0xff] %v1724_v4  ;;  %v1321_v62 = vpop.f32.mrf.mxu0  ;;  %v1444_v5 = vpop.f32.mrf.mxu1  ;;  %v1665_v1 = vmul.f32 %v2983_v43, %v1566_v58  ;;  %v1667_v2 = vmul.f32 %v2985_v44, %v1566_v58 }
 0x167   :  { %1797 = vst [vmem:[%s3365_s6 + $0xc0] sm:$0xff] %v1725_v38  ;;  %1799 = vst [vmem:[%s3365_s6 + $0xd0] sm:$0xff] %v1727_v61  ;;  %v1726_v55 = vadd.f32 %v1654_v59, %v1320_v15  ;;  %v1728_v53 = vadd.f32 %v1656_v60, %v1443_v16  ;;  %v1322_v17 = vadd.f32 %v1321_v62, %v2900_v19  ;;  %v1571_v4 = vpop.permute.xlu0 %1570  ;;  %v3397_v15 = vld [vmem:[#allocation2_spill] sm:$0xff] }
 0x168   :  { %v1445_v18 = vadd.f32 %v1444_v5, %v2902_v20  ;;  %v1323_v32 = vpop.f32.mrf.mxu0  ;;  %v1446_v56 = vpop.f32.mrf.mxu1  ;;  %v1670_v62 = vmul.f32 %v2991_v48, %v1571_v4 }
 0x169   :  { %1798 = vst [vmem:[%s3365_s6 + $0xc8] sm:$0xff] %v1726_v55  ;;  %1800 = vst [vmem:[%s3365_s6 + $0xd8] sm:$0xff] %v1728_v53  ;;  %v1729_v46 = vadd.f32 %v1657_v47, %v1322_v17  ;;  %v1324_v19 = vadd.f32 %v1323_v32, %v2904_v21  ;;  %v1447_v20 = vadd.f32 %v1446_v56, %v2906_v22  ;;  %v3399_v17 = vld [vmem:[#allocation4_spill] sm:$0xff] }
 0x16a   :  { %v1731_v63 = vadd.f32 %v1659_v39, %v1445_v18  ;;  %v1327_v0 = vpop.f32.mrf.mxu0  ;;  %v1450_v37 = vpop.f32.mrf.mxu1  ;;  %v1671_v39 = vmul.f32 %v2985_v44, %v1571_v4 }
 0x16b   :  { %1801 = vst [vmem:[%s3365_s6 + $0xe0] sm:$0xff] %v1729_v46  ;;  %v1730_v9 = vadd.f32 %v1658_v6, %v1324_v19  ;;  %v1732_v10 = vadd.f32 %v1660_v49, %v1447_v20  ;;  %v1328_v21 = vadd.f32 %v1327_v0, %v2908_v23  ;;  %v1451_v22 = vadd.f32 %v1450_v37, %v2910_v24  ;;  %v1576_v49 = vpop.permute.xlu1 %1575  ;;  %v3400_v19 = vld [vmem:[#allocation5_spill] sm:$0xff]  ;;  %v3401_v0 = vld [vmem:[#allocation6_spill] sm:$0xff] }
 0x16c   :  { %1803 = vst [vmem:[%s3365_s6 + $0xf0] sm:$0xff] %v1731_v63  ;;  %v1329_v42 = vpop.f32.mrf.mxu0  ;;  %v1452_v51 = vpop.f32.mrf.mxu1  ;;  %v1672_v6 = vmul.f32 %v2993_v40, %v1571_v4  ;;  %v1673_v56 = vmul.f32 %v2983_v43, %v1576_v49 }
 0x16d   :  { %1802 = vst [vmem:[%s3365_s6 + $0xe8] sm:$0xff] %v1730_v9  ;;  %1804 = vst [vmem:[%s3365_s6 + $0xf8] sm:$0xff] %v1732_v10  ;;  %v1733_v54 = vadd.f32 %v1661_v7, %v1328_v21  ;;  %v1735_v52 = vadd.f32 %v1663_v8, %v1451_v22  ;;  %v1330_v23 = vadd.f32 %v1329_v42, %v2912_v25  ;;  %v1581_v10 = vpop.permute.xlu0 %1580  ;;  %v3402_v42 = vld [vmem:[#allocation7_spill] sm:$0xff] }
 0x16e   :  { %v1453_v24 = vadd.f32 %v1452_v51, %v2914_v26  ;;  %v1331_v11 = vpop.f32.mrf.mxu0  ;;  %v1454_v12 = vpop.f32.mrf.mxu1  ;;  %v1675_v8 = vmul.f32 %v2985_v44, %v1576_v49  ;;  %v1676_v9 = vmul.f32 %v2993_v40, %v1576_v49 }
 0x16f   :  { %1805 = vst [vmem:[%s3365_s6 + $0x100] sm:$0xff] %v1733_v54  ;;  %1807 = vst [vmem:[%s3365_s6 + $0x110] sm:$0xff] %v1735_v52  ;;  %v1734_v59 = vadd.f32 %v1662_v41, %v1330_v23  ;;  %v1332_v25 = vadd.f32 %v1331_v11, %v2916_v27  ;;  %v1455_v26 = vadd.f32 %v1454_v12, %v2918_v28 }
 0x170   :  { %v1736_v60 = vadd.f32 %v1664_v57, %v1453_v24  ;;  %v1333_v35 = vpop.f32.mrf.mxu0  ;;  %v1456_v3 = vpop.f32.mrf.mxu1  ;;  %v1669_v28 = vmul.f32 %v2983_v43, %v1571_v4  ;;  %v1674_v57 = vmul.f32 %v2991_v48, %v1576_v49  ;;  %v1677_v52 = vmul.f32 %v2983_v43, %v1581_v10 }
 0x171   :  { %1806 = vst [vmem:[%s3365_s6 + $0x108] sm:$0xff] %v1734_v59  ;;  %v1737_v13 = vadd.f32 %v1665_v1, %v1332_v25  ;;  %v1739_v14 = vadd.f32 %v1667_v2, %v1455_v26  ;;  %v1334_v36 = vadd.f32 %v1333_v35, %v2920_v29  ;;  %v1457_v45 = vadd.f32 %v1456_v3, %v2922_v30  ;;  %v3403_v1 = vld [vmem:[#allocation8_spill] sm:$0xff]  ;;  %v3405_v59 = vld [vmem:[#allocation10_spill] sm:$0xff]  ;;  %v1586_v4 = vpop.permute.xlu1 %1585 }
 0x172   :  { %1808 = vst [vmem:[%s3365_s6 + $0x118] sm:$0xff] %v1736_v60  ;;  %v1337_v27 = vpop.f32.mrf.mxu0  ;;  %v1460_v47 = vpop.f32.mrf.mxu1  ;;  %v1679_v24 = vmul.f32 %v2985_v44, %v1581_v10  ;;  %v1678_v26 = vmul.f32 %v2991_v48, %v1581_v10  ;;  %v1680_v3 = vmul.f32 %v2993_v40, %v1581_v10  ;;  %v1682_v49 = vmul.f32 %v2991_v48, %v1586_v4 }
 0x173   :  { %1809 = vst [vmem:[%s3365_s6 + $0x120] sm:$0xff] %v1737_v13  ;;  %1811 = vst [vmem:[%s3365_s6 + $0x130] sm:$0xff] %v1739_v14  ;;  %v1738_v38 = vadd.f32 %v1666_v34, %v1334_v36  ;;  %v1740_v61 = vadd.f32 %v1668_v33, %v1457_v45  ;;  %v1338_v29 = vadd.f32 %v1337_v27, %v2924_v31  ;;  %v3398_v31 = vld [vmem:[#allocation3_spill] sm:$0xff]  ;;  %v3404_v34 = vld [vmem:[#allocation9_spill] sm:$0xff] }
 0x174   :  { %v1461_v30 = vadd.f32 %v1460_v47, %v3397_v15  ;;  %v1339_v16 = vpop.f32.mrf.mxu0  ;;  %v1462_v5 = vpop.f32.mrf.mxu1  ;;  %v3406_v36 = vld [vmem:[#allocation11_spill] sm:$0xff]  ;;  %v3407_v27 = vld [vmem:[#allocation12_spill] sm:$0xff] }
 0x175   :  { %1810 = vst [vmem:[%s3365_s6 + $0x128] sm:$0xff] %v1738_v38  ;;  %1812 = vst [vmem:[%s3365_s6 + $0x138] sm:$0xff] %v1740_v61  ;;  %v1741_v50 = vadd.f32 %v1669_v28, %v1338_v29  ;;  %v1340_v53 = vadd.f32 %v1339_v16, %v3398_v31  ;;  %v1463_v18 = vadd.f32 %v1462_v5, %v3399_v17  ;;  %v1591_v31 = vpop.permute.xlu0 %1590 }
 0x176   :  { %v1743_v55 = vadd.f32 %v1671_v39, %v1461_v30  ;;  %v1341_v32 = vpop.f32.mrf.mxu0  ;;  %v1464_v7 = vpop.f32.mrf.mxu1  ;;  %v1681_v39 = vmul.f32 %v2983_v43, %v1586_v4  ;;  %v1683_v61 = vmul.f32 %v2985_v44, %v1586_v4  ;;  %v3408_v30 = vld [vmem:[#allocation13_spill] sm:$0xff]  ;;  %v1686_v10 = vmul.f32 %v2991_v48, %v1591_v31 }
 0x177   :  { %1813 = vst [vmem:[%s3365_s6 + $0x140] sm:$0xff] %v1741_v50  ;;  %v1742_v46 = vadd.f32 %v1670_v62, %v1340_v53  ;;  %v1744_v63 = vadd.f32 %v1672_v6, %v1463_v18  ;;  %v1342_v20 = vadd.f32 %v1341_v32, %v3400_v19  ;;  %v1465_v37 = vadd.f32 %v1464_v7, %v3401_v0  ;;  %v3409_v62 = vld [vmem:[#allocation14_spill] sm:$0xff]  ;;  %v3410_v18 = vld [vmem:[#allocation15_spill] sm:$0xff] }
 0x178   :  { %1815 = vst [vmem:[%s3365_s6 + $0x150] sm:$0xff] %v1743_v55  ;;  %v1343_v41 = vpop.f32.mrf.mxu0  ;;  %v1466_v58 = vpop.f32.mrf.mxu1  ;;  %v1684_v55 = vmul.f32 %v2993_v40, %v1586_v4  ;;  %v1687_v19 = vmul.f32 %v2985_v44, %v1591_v31 }
 0x179   :  { %1814 = vst [vmem:[%s3365_s6 + $0x148] sm:$0xff] %v1742_v46  ;;  %1816 = vst [vmem:[%s3365_s6 + $0x158] sm:$0xff] %v1744_v63  ;;  %v1745_v21 = vadd.f32 %v1673_v56, %v1342_v20  ;;  %v1747_v22 = vadd.f32 %v1675_v8, %v1465_v37  ;;  %v1344_v51 = vadd.f32 %v1343_v41, %v3402_v42  ;;  %v3411_v56 = vld [vmem:[#allocation16_spill] sm:$0xff]  ;;  %v3412_v37 = vld [vmem:[#allocation17_spill] sm:$0xff]  ;;  %v1596_v42 = vpop.permute.xlu1 %1595 }
 0x17a   :  { %v1467_v2 = vadd.f32 %v1466_v58, %v3403_v1  ;;  %v1347_v54 = vpop.f32.mrf.mxu0  ;;  %v1470_v23 = vpop.f32.mrf.mxu1  ;;  %v1685_v46 = vmul.f32 %v2983_v43, %v1591_v31 }
 0x17b   :  { %1817 = vst [vmem:[%s3365_s6 + $0x160] sm:$0xff] %v1745_v21  ;;  %1819 = vst [vmem:[%s3365_s6 + $0x170] sm:$0xff] %v1747_v22  ;;  %v1746_v11 = vadd.f32 %v1674_v57, %v1344_v51  ;;  %v1348_v33 = vadd.f32 %v1347_v54, %v3404_v34  ;;  %v1471_v60 = vadd.f32 %v1470_v23, %v3405_v59  ;;  %v3413_v57 = vld [vmem:[#allocation18_spill] sm:$0xff] }
 0x17c   :  { %v1748_v12 = vadd.f32 %v1676_v9, %v1467_v2  ;;  %v1349_v25 = vpop.f32.mrf.mxu0  ;;  %v1472_v35 = vpop.f32.mrf.mxu1  ;;  %v1688_v22 = vmul.f32 %v2993_v40, %v1591_v31  ;;  %v3414_v2 = vld [vmem:[#allocation19_spill] sm:$0xff]  ;;  %v1691_v34 = vmul.f32 %v2985_v44, %v1596_v42 }
 0x17d   :  { %1818 = vst [vmem:[%s3365_s6 + $0x168] sm:$0xff] %v1746_v11  ;;  %v1749_v13 = vadd.f32 %v1677_v52, %v1348_v33  ;;  %v1751_v14 = vadd.f32 %v1679_v24, %v1471_v60  ;;  %v1350_v45 = vadd.f32 %v1349_v25, %v3406_v36  ;;  %v1473_v28 = vadd.f32 %v1472_v35, %v3407_v27  ;;  %v3415_v52 = vld [vmem:[#allocation20_spill] sm:$0xff]  ;;  %v1601_v33 = vpop.permute.xlu0 %1600  ;;  %v3416_v25 = vld [vmem:[#allocation21_spill] sm:$0xff]  ;;  %v3417_v35 = vld [vmem:[#allocation22_spill] sm:$0xff] }
 0x17e   :  { %1820 = vst [vmem:[%s3365_s6 + $0x178] sm:$0xff] %v1748_v12  ;;  %v1351_v47 = vpop.f32.mrf.mxu0  ;;  %v1474_v38 = vpop.f32.mrf.mxu1  ;;  %v1689_v11 = vmul.f32 %v2983_v43, %v1596_v42  ;;  %v1692_v36 = vmul.f32 %v2993_v40, %v1596_v42  ;;  %v1694_v31 = vmul.f32 %v2991_v48, %v1601_v33 }
 0x17f   :  { %1821 = vst [vmem:[%s3365_s6 + $0x180] sm:$0xff] %v1749_v13  ;;  %1823 = vst [vmem:[%s3365_s6 + $0x190] sm:$0xff] %v1751_v14  ;;  %v1750_v29 = vadd.f32 %v1678_v26, %v1350_v45  ;;  %v1752_v15 = vadd.f32 %v1680_v3, %v1473_v28  ;;  %v1352_v16 = vadd.f32 %v1351_v47, %v3408_v30  ;;  %v3418_v28 = vld [vmem:[#allocation23_spill] sm:$0xff] }
 0x180   :  { %v1475_v5 = vadd.f32 %v1474_v38, %v3409_v62  ;;  %v1353_v6 = vpop.f32.mrf.mxu0  ;;  %v1476_v50 = vpop.f32.mrf.mxu1  ;;  %v1690_v13 = vmul.f32 %v2991_v48, %v1596_v42 }
 0x181   :  { %1822 = vst [vmem:[%s3365_s6 + $0x188] sm:$0xff] %v1750_v29  ;;  %1824 = vst [vmem:[%s3365_s6 + $0x198] sm:$0xff] %v1752_v15  ;;  %v1753_v53 = vadd.f32 %v1681_v39, %v1352_v16  ;;  %v1354_v32 = vadd.f32 %v1353_v6, %v3410_v18  ;;  %v1477_v7 = vadd.f32 %v1476_v50, %v3411_v56  ;;  %v3419_v39 = vld [vmem:[#allocation24_spill] sm:$0xff]  ;;  %v1606_v16 = vpop.permute.xlu1 %1605  ;;  %v3420_v6 = vld [vmem:[#allocation25_spill] sm:$0xff] }
 0x182   :  { %v1755_v17 = vadd.f32 %v1683_v61, %v1475_v5  ;;  %v1357_v8 = vpop.f32.mrf.mxu0  ;;  %v1480_v63 = vpop.f32.mrf.mxu1  ;;  %v1693_v61 = vmul.f32 %v2983_v43, %v1601_v33  ;;  %v1695_v29 = vmul.f32 %v2985_v44, %v1601_v33  ;;  %v3421_v50 = vld [vmem:[#allocation26_spill] sm:$0xff] }
 0x183   :  { %1825 = vst [vmem:[%s3365_s6 + $0x1a0] sm:$0xff] %v1753_v53  ;;  %v1754_v20 = vadd.f32 %v1682_v49, %v1354_v32  ;;  %v1756_v0 = vadd.f32 %v1684_v55, %v1477_v7  ;;  %v1358_v41 = vadd.f32 %v1357_v8, %v3412_v37  ;;  %v1481_v58 = vadd.f32 %v1480_v63, %v3413_v57  ;;  %v3422_v7 = vld [vmem:[#allocation27_spill] sm:$0xff] }
 0x184   :  { %1827 = vst [vmem:[%s3365_s6 + $0x1b0] sm:$0xff] %v1755_v17  ;;  %v1359_v9 = vpop.f32.mrf.mxu0  ;;  %v1482_v21 = vpop.f32.mrf.mxu1  ;;  %v1696_v53 = vmul.f32 %v2993_v40, %v1601_v33 }
 0x185   :  { %1826 = vst [vmem:[%s3365_s6 + $0x1a8] sm:$0xff] %v1754_v20  ;;  %1828 = vst [vmem:[%s3365_s6 + $0x1b8] sm:$0xff] %v1756_v0  ;;  %v1757_v51 = vadd.f32 %v1685_v46, %v1358_v41  ;;  %v1759_v1 = vadd.f32 %v1687_v19, %v1481_v58  ;;  %v1360_v54 = vadd.f32 %v1359_v9, %v3414_v2  ;;  %v3423_v46 = vld [vmem:[#allocation28_spill] sm:$0xff]  ;;  %v3424_v58 = vld [vmem:[#allocation29_spill] sm:$0xff] }
 0x186   :  { %v1483_v23 = vadd.f32 %v1482_v21, %v3415_v52  ;;  %v1361_v24 = vpop.f32.mrf.mxu0  ;;  %v1484_v12 = vpop.f32.mrf.mxu1  ;;  %v1697_v19 = vmul.f32 %v2983_v43, %v1606_v16  ;;  %v1699_v20 = vmul.f32 %v2985_v44, %v1606_v16  ;;  %v1698_v43 = vmul.f32 %v2991_v48, %v1606_v16  ;;  %v3426_v2 = vld [vmem:[#allocation31_spill] sm:$0xff]  ;;  %v3427_v52 = vld [vmem:[#allocation32_spill] sm:$0xff] }
 0x187   :  { %1829 = vst [vmem:[%s3365_s6 + $0x1c0] sm:$0xff] %v1757_v51  ;;  %1831 = vst [vmem:[%s3365_s6 + $0x1d0] sm:$0xff] %v1759_v1  ;;  %v1758_v59 = vadd.f32 %v1686_v10, %v1360_v54  ;;  %v1362_v26 = vadd.f32 %v1361_v24, %v3416_v25  ;;  %v1485_v3 = vadd.f32 %v1484_v12, %v3417_v35  ;;  %v3425_v10 = vld [vmem:[#allocation30_spill] sm:$0xff] }
 0x188   :  { %v1760_v60 = vadd.f32 %v1688_v22, %v1483_v23  ;;  %v1363_v4 = vpop.f32.mrf.mxu0  ;;  %v1486_v14 = vpop.f32.mrf.mxu1  ;;  %v1700_v44 = vmul.f32 %v2993_v40, %v1606_v16 }
 0x189   :  { %1830 = vst [vmem:[%s3365_s6 + $0x1c8] sm:$0xff] %v1758_v59  ;;  %v1761_v45 = vadd.f32 %v1689_v11, %v1362_v26  ;;  %v1763_v27 = vadd.f32 %v1691_v34, %v1485_v3  ;;  %v1364_v47 = vadd.f32 %v1363_v4, %v3418_v28  ;;  %v1487_v38 = vadd.f32 %v1486_v14, %v3419_v39 }
 0x18a   :  { %1832 = vst [vmem:[%s3365_s6 + $0x1d8] sm:$0xff] %v1760_v60  ;;  %v1367_v15 = vpop.f32.mrf.mxu0  ;;  %v1490_v30 = vpop.f32.mrf.mxu1 }
 0x18b   :  { %1833 = vst [vmem:[%s3365_s6 + $0x1e0] sm:$0xff] %v1761_v45  ;;  %1835 = vst [vmem:[%s3365_s6 + $0x1f0] sm:$0xff] %v1763_v27  ;;  %v1762_v62 = vadd.f32 %v1690_v13, %v1364_v47  ;;  %v1764_v5 = vadd.f32 %v1692_v36, %v1487_v38  ;;  %v1368_v49 = vadd.f32 %v1367_v15, %v3420_v6 }
 0x18c   :  { %v1491_v55 = vadd.f32 %v1490_v30, %v3421_v50  ;;  %v1369_v17 = vpop.f32.mrf.mxu0  ;;  %v1492_v18 = vpop.f32.mrf.mxu1 }
 0x18d   :  { %1834 = vst [vmem:[%s3365_s6 + $0x1e8] sm:$0xff] %v1762_v62  ;;  %1836 = vst [vmem:[%s3365_s6 + $0x1f8] sm:$0xff] %v1764_v5  ;;  %v1765_v32 = vadd.f32 %v1693_v61, %v1368_v49  ;;  %v1370_v8 = vadd.f32 %v1369_v17, %v3422_v7  ;;  %v1493_v63 = vadd.f32 %v1492_v18, %v3423_v46 }
 0x18e   :  { %v1767_v56 = vadd.f32 %v1695_v29, %v1491_v55  ;;  %v1371_v0 = vpop.f32.mrf.mxu0  ;;  %v1494_v37 = vpop.f32.mrf.mxu1 }
 0x18f   :  { %1837 = vst [vmem:[%s3365_s6 + $0x200] sm:$0xff] %v1765_v32  ;;  %v1766_v41 = vadd.f32 %v1694_v31, %v1370_v8  ;;  %v1768_v57 = vadd.f32 %v1696_v53, %v1493_v63  ;;  %v1372_v9 = vadd.f32 %v1371_v0, %v3424_v58  ;;  %v1495_v21 = vadd.f32 %v1494_v37, %v3425_v10 }
 0x190   :  { %1839 = vst [vmem:[%s3365_s6 + $0x210] sm:$0xff] %v1767_v56  ;;  %v1373_v22 = vpop.f32.mrf.mxu0  ;;  %v1496_v42 = vpop.f32.mrf.mxu1 }
 0x191   :  { %1838 = vst [vmem:[%s3365_s6 + $0x208] sm:$0xff] %v1766_v41  ;;  %1840 = vst [vmem:[%s3365_s6 + $0x218] sm:$0xff] %v1768_v57  ;;  %v1769_v51 = vadd.f32 %v1697_v19, %v1372_v9  ;;  %v1771_v1 = vadd.f32 %v1699_v20, %v1495_v21  ;;  %v1374_v54 = vadd.f32 %v1373_v22, %v3426_v2 }
 0x192   :  { %v1497_v23 = vadd.f32 %v1496_v42, %v3427_v52 }
 0x193   :  { %1841 = vst [vmem:[%s3365_s6 + $0x220] sm:$0xff] %v1769_v51  ;;  %1843 = vst [vmem:[%s3365_s6 + $0x230] sm:$0xff] %v1771_v1  ;;  %v1770_v40 = vadd.f32 %v1698_v43, %v1374_v54 }
 0x194   :  { %v1772_v48 = vadd.f32 %v1700_v44, %v1497_v23 }
 0x195   :  { %1842 = vst [vmem:[%s3365_s6 + $0x228] sm:$0xff] %v1770_v40 }
 0x196   :  { %1844 = vst [vmem:[%s3365_s6 + $0x238] sm:$0xff] %v1772_v48 }

// kernel: pitch_shift.7
= control target key start
LH: loop header
LB: loop body
LE: loop exit
PB: predicated region body
PF: predicated region fallthrough
CT: control target
= control target key end

     0   :  { %s1228_s9 = smov 0   ;;  %s1230_s10 = smov 0   ;;  %s1549_s0 = inlined_call_operand.vmem [shape: bf16[16,128], index: 0, kind: input, shape index: {}]   ;;  %s1550_s1 = inlined_call_operand.vmem [shape: bf16[128,9216], index: 1, kind: input, shape index: {}]   ;;  %s1551_s2 = inlined_call_operand.vmem [shape: f32[16,9216], index: 2, kind: output, shape index: {}]  }
   0x1   :  { %s1232_s11 = smov 0   ;;  %s1234_s12 = smov 0  }
   0x2   :  { %s1236_s13 = smov 0  }
   0x3 LB: > { %s21_s14 = sadd.s32 1, %s1206_s12  ;;  %s1047_s15 = sadd.s32 4294967295, %s1210_s13   ;;  %s1210_s13 = sphi %s1236_s13, %s12_s13   ;;  %s1206_s12 = sphi %s1234_s12, %s1556_s12   ;;  %s1202_s11 = sphi %s1232_s11, %s1555_s11   ;;  %s1198_s10 = sphi %s1230_s10, %s1554_s10   ;;  %s1194_s9 = sphi %s1228_s9, %s1553_s9  }
   0x4   : > { %p22_p0 = scmp.ge.s32.totalorder %s21_s14, 9  ;;  %p64_p1 = scmp.ne.s32.totalorder %s1198_s10, %s1194_s9 }
   0x5   : > { %p65_p2 = scmp.eq.s32.totalorder %s1210_s13, 0  ;;  %p96_p4 = scmp.eq.s32.totalorder %s1047_s15, 8 }
   0x6   : > { %s1558_s14 = smov (%p22_p0, %s21_s14), 0  ;;  %s57_s17 = sadd.s32 1, %s1198_s10 }
   0x7   : > { %p66_p3 = por %p65_p2, %p64_p1  ;;  %s54_s16 = ssub.s32 %s1206_s12, %s1558_s14 }
   0x8   : > { %p55_p5 = scmp.eq.s32.totalorder %s54_s16, 0  ;;  %p1263_p6 = por %p96_p4, %p64_p1 }
   0x9   : > { %p1051_p7 = scmp.ge.s32.totalorder %s1210_s13, 9 }
   0xa   : > { %s1268_s19 = scalar_select %p55_p5, %s1198_s10, %s57_s17  }
   0xb   : > { %127 = sbr.rel (%p1051_p7) target bundleno = 52 (0x34), region = 20 }
  0x10   : > { %130 = sbr.rel (!%p66_p3) target bundleno = 52 (0x34), region = 24  ;;  %s132_s20 = sand.u32 (%p66_p3), 1, %s1198_s10  }
  0x11   : > { %s1128_s21 = sshll.u32 (%p66_p3), %s1206_s12, 5  ;;  %s1052_s22 = sshll.u32 (%p66_p3), %s132_s20, 9 }
  0x12   : > { %s1276_s25 = scalar_lea.vmem (%p66_p3), %s1550_s1, %s1128_s21  ;;  %s1281_s26 = scalar_lea.vmem (%p66_p3), [#allocation2], %s1052_s22 }
  0x13   : > { %v150_v0 = vld [vmem:[%s1276_s25] sm:$0xff] (%p66_p3)  ;;  %v152_v1 = vld [vmem:[%s1276_s25 + $0x8] sm:$0xff] (%p66_p3)  ;;  %v154_v2 = vld [vmem:[%s1276_s25 + $0x10] sm:$0xff] (%p66_p3) }
  0x14   : > { %151 = vst [vmem:[%s1281_s26] sm:$0xff] (%p66_p3), %v150_v0  ;;  %153 = vst [vmem:[%s1281_s26 + $0x8] sm:$0xff] (%p66_p3), %v152_v1  ;;  %v156_v3 = vld [vmem:[%s1276_s25 + $0x18] sm:$0xff] (%p66_p3)  ;;  %v158_v4 = vld [vmem:[%s1276_s25 + $0x120] sm:$0xff] (%p66_p3) }
  0x15   : > { %155 = vst [vmem:[%s1281_s26 + $0x10] sm:$0xff] %v154_v2  ;;  %v160_v5 = vld [vmem:[%s1276_s25 + $0x128] sm:$0xff]  ;;  %157 = vst [vmem:[%s1281_s26 + $0x18] sm:$0xff] %v156_v3  ;;  %v162_v6 = vld [vmem:[%s1276_s25 + $0x130] sm:$0xff] }
  0x16   : > { %159 = vst [vmem:[%s1281_s26 + $0x20] sm:$0xff] %v158_v4  ;;  %161 = vst [vmem:[%s1281_s26 + $0x28] sm:$0xff] %v160_v5  ;;  %v164_v7 = vld [vmem:[%s1276_s25 + $0x138] sm:$0xff]  ;;  %v166_v8 = vld [vmem:[%s1276_s25 + $0x240] sm:$0xff] }
  0x17   : > { %163 = vst [vmem:[%s1281_s26 + $0x30] sm:$0xff] %v162_v6  ;;  %165 = vst [vmem:[%s1281_s26 + $0x38] sm:$0xff] %v164_v7  ;;  %v168_v9 = vld [vmem:[%s1276_s25 + $0x248] sm:$0xff]  ;;  %v170_v10 = vld [vmem:[%s1276_s25 + $0x250] sm:$0xff] }
  0x18   : > { %167 = vst [vmem:[%s1281_s26 + $0x40] sm:$0xff] %v166_v8  ;;  %v172_v11 = vld [vmem:[%s1276_s25 + $0x258] sm:$0xff]  ;;  %169 = vst [vmem:[%s1281_s26 + $0x48] sm:$0xff] %v168_v9  ;;  %v174_v12 = vld [vmem:[%s1276_s25 + $0x360] sm:$0xff] }
  0x19   : > { %171 = vst [vmem:[%s1281_s26 + $0x50] sm:$0xff] %v170_v10  ;;  %173 = vst [vmem:[%s1281_s26 + $0x58] sm:$0xff] %v172_v11  ;;  %v176_v13 = vld [vmem:[%s1276_s25 + $0x368] sm:$0xff]  ;;  %v178_v14 = vld [vmem:[%s1276_s25 + $0x370] sm:$0xff] }
  0x1a   : > { %175 = vst [vmem:[%s1281_s26 + $0x60] sm:$0xff] %v174_v12  ;;  %177 = vst [vmem:[%s1281_s26 + $0x68] sm:$0xff] %v176_v13  ;;  %v180_v15 = vld [vmem:[%s1276_s25 + $0x378] sm:$0xff]  ;;  %v182_v16 = vld [vmem:[%s1276_s25 + $0x480] sm:$0xff] }
  0x1b   : > { %179 = vst [vmem:[%s1281_s26 + $0x70] sm:$0xff] %v178_v14  ;;  %v184_v17 = vld [vmem:[%s1276_s25 + $0x488] sm:$0xff]  ;;  %181 = vst [vmem:[%s1281_s26 + $0x78] sm:$0xff] %v180_v15  ;;  %v186_v18 = vld [vmem:[%s1276_s25 + $0x490] sm:$0xff] }
  0x1c   : > { %183 = vst [vmem:[%s1281_s26 + $0x80] sm:$0xff] %v182_v16  ;;  %185 = vst [vmem:[%s1281_s26 + $0x88] sm:$0xff] %v184_v17  ;;  %v188_v19 = vld [vmem:[%s1276_s25 + $0x498] sm:$0xff]  ;;  %v190_v20 = vld [vmem:[%s1276_s25 + $0x5a0] sm:$0xff] }
  0x1d   : > { %187 = vst [vmem:[%s1281_s26 + $0x90] sm:$0xff] %v186_v18  ;;  %189 = vst [vmem:[%s1281_s26 + $0x98] sm:$0xff] %v188_v19  ;;  %v192_v21 = vld [vmem:[%s1276_s25 + $0x5a8] sm:$0xff]  ;;  %v194_v22 = vld [vmem:[%s1276_s25 + $0x5b0] sm:$0xff] }
  0x1e   : > { %191 = vst [vmem:[%s1281_s26 + $0xa0] sm:$0xff] %v190_v20  ;;  %v196_v23 = vld [vmem:[%s1276_s25 + $0x5b8] sm:$0xff]  ;;  %193 = vst [vmem:[%s1281_s26 + $0xa8] sm:$0xff] %v192_v21  ;;  %v198_v24 = vld [vmem:[%s1276_s25 + $0x6c0] sm:$0xff] }
  0x1f   : > { %195 = vst [vmem:[%s1281_s26 + $0xb0] sm:$0xff] %v194_v22  ;;  %197 = vst [vmem:[%s1281_s26 + $0xb8] sm:$0xff] %v196_v23  ;;  %v200_v25 = vld [vmem:[%s1276_s25 + $0x6c8] sm:$0xff]  ;;  %v202_v26 = vld [vmem:[%s1276_s25 + $0x6d0] sm:$0xff] }
  0x20   : > { %199 = vst [vmem:[%s1281_s26 + $0xc0] sm:$0xff] %v198_v24  ;;  %201 = vst [vmem:[%s1281_s26 + $0xc8] sm:$0xff] %v200_v25  ;;  %v204_v27 = vld [vmem:[%s1276_s25 + $0x6d8] sm:$0xff]  ;;  %v206_v28 = vld [vmem:[%s1276_s25 + $0x7e0] sm:$0xff] }
  0x21   : > { %203 = vst [vmem:[%s1281_s26 + $0xd0] sm:$0xff] %v202_v26  ;;  %v208_v29 = vld [vmem:[%s1276_s25 + $0x7e8] sm:$0xff]  ;;  %205 = vst [vmem:[%s1281_s26 + $0xd8] sm:$0xff] %v204_v27  ;;  %v210_v30 = vld [vmem:[%s1276_s25 + $0x7f0] sm:$0xff] }
  0x22   : > { %207 = vst [vmem:[%s1281_s26 + $0xe0] sm:$0xff] %v206_v28  ;;  %209 = vst [vmem:[%s1281_s26 + $0xe8] sm:$0xff] %v208_v29  ;;  %v212_v31 = vld [vmem:[%s1276_s25 + $0x7f8] sm:$0xff]  ;;  %v214_v32 = vld [vmem:[%s1276_s25 + $0x900] sm:$0xff] }
  0x23   : > { %211 = vst [vmem:[%s1281_s26 + $0xf0] sm:$0xff] %v210_v30  ;;  %213 = vst [vmem:[%s1281_s26 + $0xf8] sm:$0xff] %v212_v31  ;;  %v216_v33 = vld [vmem:[%s1276_s25 + $0x908] sm:$0xff]  ;;  %v218_v34 = vld [vmem:[%s1276_s25 + $0x910] sm:$0xff] }
  0x24   : > { %215 = vst [vmem:[%s1281_s26 + $0x100] sm:$0xff] %v214_v32  ;;  %v220_v35 = vld [vmem:[%s1276_s25 + $0x918] sm:$0xff]  ;;  %217 = vst [vmem:[%s1281_s26 + $0x108] sm:$0xff] %v216_v33  ;;  %v222_v36 = vld [vmem:[%s1276_s25 + $0xa20] sm:$0xff] }
  0x25   : > { %219 = vst [vmem:[%s1281_s26 + $0x110] sm:$0xff] %v218_v34  ;;  %221 = vst [vmem:[%s1281_s26 + $0x118] sm:$0xff] %v220_v35  ;;  %v224_v37 = vld [vmem:[%s1276_s25 + $0xa28] sm:$0xff]  ;;  %v226_v38 = vld [vmem:[%s1276_s25 + $0xa30] sm:$0xff] }
  0x26   : > { %223 = vst [vmem:[%s1281_s26 + $0x120] sm:$0xff] %v222_v36  ;;  %225 = vst [vmem:[%s1281_s26 + $0x128] sm:$0xff] %v224_v37  ;;  %v228_v39 = vld [vmem:[%s1276_s25 + $0xa38] sm:$0xff]  ;;  %v230_v40 = vld [vmem:[%s1276_s25 + $0xb40] sm:$0xff] }
  0x27   : > { %227 = vst [vmem:[%s1281_s26 + $0x130] sm:$0xff] %v226_v38  ;;  %v232_v41 = vld [vmem:[%s1276_s25 + $0xb48] sm:$0xff]  ;;  %229 = vst [vmem:[%s1281_s26 + $0x138] sm:$0xff] %v228_v39  ;;  %v234_v42 = vld [vmem:[%s1276_s25 + $0xb50] sm:$0xff] }
  0x28   : > { %231 = vst [vmem:[%s1281_s26 + $0x140] sm:$0xff] %v230_v40  ;;  %233 = vst [vmem:[%s1281_s26 + $0x148] sm:$0xff] %v232_v41  ;;  %v236_v43 = vld [vmem:[%s1276_s25 + $0xb58] sm:$0xff]  ;;  %v238_v44 = vld [vmem:[%s1276_s25 + $0xc60] sm:$0xff] }
  0x29   : > { %235 = vst [vmem:[%s1281_s26 + $0x150] sm:$0xff] %v234_v42  ;;  %237 = vst [vmem:[%s1281_s26 + $0x158] sm:$0xff] %v236_v43  ;;  %v240_v45 = vld [vmem:[%s1276_s25 + $0xc68] sm:$0xff]  ;;  %v242_v46 = vld [vmem:[%s1276_s25 + $0xc70] sm:$0xff] }
  0x2a   : > { %239 = vst [vmem:[%s1281_s26 + $0x160] sm:$0xff] %v238_v44  ;;  %v244_v47 = vld [vmem:[%s1276_s25 + $0xc78] sm:$0xff]  ;;  %241 = vst [vmem:[%s1281_s26 + $0x168] sm:$0xff] %v240_v45  ;;  %v246_v48 = vld [vmem:[%s1276_s25 + $0xd80] sm:$0xff] }
  0x2b   : > { %243 = vst [vmem:[%s1281_s26 + $0x170] sm:$0xff] %v242_v46  ;;  %245 = vst [vmem:[%s1281_s26 + $0x178] sm:$0xff] %v244_v47  ;;  %v248_v49 = vld [vmem:[%s1276_s25 + $0xd88] sm:$0xff]  ;;  %v250_v50 = vld [vmem:[%s1276_s25 + $0xd90] sm:$0xff] }
  0x2c   : > { %247 = vst [vmem:[%s1281_s26 + $0x180] sm:$0xff] %v246_v48  ;;  %249 = vst [vmem:[%s1281_s26 + $0x188] sm:$0xff] %v248_v49  ;;  %v252_v51 = vld [vmem:[%s1276_s25 + $0xd98] sm:$0xff]  ;;  %v254_v52 = vld [vmem:[%s1276_s25 + $0xea0] sm:$0xff] }
  0x2d   : > { %251 = vst [vmem:[%s1281_s26 + $0x190] sm:$0xff] %v250_v50  ;;  %v256_v53 = vld [vmem:[%s1276_s25 + $0xea8] sm:$0xff]  ;;  %253 = vst [vmem:[%s1281_s26 + $0x198] sm:$0xff] %v252_v51  ;;  %v258_v54 = vld [vmem:[%s1276_s25 + $0xeb0] sm:$0xff] }
  0x2e   : > { %255 = vst [vmem:[%s1281_s26 + $0x1a0] sm:$0xff] %v254_v52  ;;  %257 = vst [vmem:[%s1281_s26 + $0x1a8] sm:$0xff] %v256_v53  ;;  %v260_v55 = vld [vmem:[%s1276_s25 + $0xeb8] sm:$0xff]  ;;  %v262_v56 = vld [vmem:[%s1276_s25 + $0xfc0] sm:$0xff] }
  0x2f   : > { %259 = vst [vmem:[%s1281_s26 + $0x1b0] sm:$0xff] %v258_v54  ;;  %261 = vst [vmem:[%s1281_s26 + $0x1b8] sm:$0xff] %v260_v55  ;;  %v264_v57 = vld [vmem:[%s1276_s25 + $0xfc8] sm:$0xff]  ;;  %v266_v58 = vld [vmem:[%s1276_s25 + $0xfd0] sm:$0xff] }
  0x30   : > { %263 = vst [vmem:[%s1281_s26 + $0x1c0] sm:$0xff] %v262_v56  ;;  %v268_v59 = vld [vmem:[%s1276_s25 + $0xfd8] sm:$0xff]  ;;  %265 = vst [vmem:[%s1281_s26 + $0x1c8] sm:$0xff] %v264_v57  ;;  %v270_v60 = vld [vmem:[%s1276_s25 + $0x10e0] sm:$0xff] }
  0x31   : > { %267 = vst [vmem:[%s1281_s26 + $0x1d0] sm:$0xff] %v266_v58  ;;  %269 = vst [vmem:[%s1281_s26 + $0x1d8] sm:$0xff] %v268_v59  ;;  %v272_v61 = vld [vmem:[%s1276_s25 + $0x10e8] sm:$0xff]  ;;  %v274_v62 = vld [vmem:[%s1276_s25 + $0x10f0] sm:$0xff] }
  0x32   : > { %271 = vst [vmem:[%s1281_s26 + $0x1e0] sm:$0xff] %v270_v60  ;;  %273 = vst [vmem:[%s1281_s26 + $0x1e8] sm:$0xff] %v272_v61  ;;  %v276_v63 = vld [vmem:[%s1276_s25 + $0x10f8] sm:$0xff] }
  0x33   : > { %275 = vst [vmem:[%s1281_s26 + $0x1f0] sm:$0xff] %v274_v62  ;;  %277 = vst [vmem:[%s1281_s26 + $0x1f8] sm:$0xff] %v276_v63 }
  0x34 PF: > { %p1055_p8 = scmp.ge.s32.totalorder %s1210_s13, 1  ;;  %p282_p9 = scmp.lt.s32.totalorder %s1210_s13, 10 }
  0x36   : > { %p283_p10 = pnand %p1055_p8, %p282_p9 }
  0x37   : > { %s289_s27 = sand.u32 (!%p283_p10), 1, %s1194_s9  }
  0x38   : > { %286 = sbr.rel (%p283_p10) target bundleno = 337 (0x151), region = 47  ;;  %s1056_s28 = sshll.u32 (!%p283_p10), %s289_s27, 9 }
  0x39   : > { %s1415_s29 = scalar_lea.vmem (!%p283_p10), [#allocation2], %s1056_s28  ;;  %s1057_s4 = sshll.u32 (!%p283_p10), %s289_s27, 7 }
  0x3a   : > { %s1494_s5 = scalar_lea.vmem (!%p283_p10), [#allocation3], %s1057_s4 }
  0x3d   : > { %v1212_v0 = vmov 0   ;;  %v382_v1 = vld [vmem:[%s1415_s29 + $0x1c0] sm:$0xff]  ;;  %v383_v3 = vld [vmem:[%s1415_s29 + $0x1c8] sm:$0xff]  ;;  %v384_v63 = vld [vmem:[%s1415_s29 + $0x1d0] sm:$0xff]  ;;  %s1129_s6 = sshll.u32 (%p1263_p6), %s1202_s11, 6 }
  0x3e   : > { %748 = vmatprep.mubr.bf16.mxu0 %v1212_v0  ;;  %791 = vmatprep.mubr.bf16.mxu1 %v1212_v0  ;;  %v386_v2 = vld [vmem:[%s1415_s29 + $0x1e0] sm:$0xff]  ;;  %v387_v5 = vld [vmem:[%s1415_s29 + $0x1e8] sm:$0xff]  ;;  %s916_s9 = scalar_lea.vmem (%p1263_p6), %s1551_s2, %s1129_s6 }
  0x3f   : > { %v1116_v4 = vcombine.high %v382_v1, %v386_v2  ;;  %v1115_v6 = vcombine.low %v382_v1, %v386_v2  ;;  %v374_v7 = vld [vmem:[%s1415_s29 + $0x180] sm:$0xff]  ;;  %v1118_v9 = vcombine.high %v383_v3, %v387_v5  ;;  %v1117_v10 = vcombine.low %v383_v3, %v387_v5  ;;  %v375_v12 = vld [vmem:[%s1415_s29 + $0x188] sm:$0xff]  ;;  %v388_v1 = vld [vmem:[%s1415_s29 + $0x1f0] sm:$0xff] }
  0x40   : > { %v378_v8 = vld [vmem:[%s1415_s29 + $0x1a0] sm:$0xff]  ;;  %v379_v13 = vld [vmem:[%s1415_s29 + $0x1a8] sm:$0xff]  ;;  %v385_v2 = vld [vmem:[%s1415_s29 + $0x1d8] sm:$0xff] }
  0x41   : > { %v1108_v11 = vcombine.high %v374_v7, %v378_v8  ;;  %v366_v14 = vld [vmem:[%s1415_s29 + $0x140] sm:$0xff]  ;;  %716 = vmatprep.subr.bf16.mxu0 %v1116_v4  ;;  %v1110_v15 = vcombine.high %v375_v12, %v379_v13  ;;  %v367_v17 = vld [vmem:[%s1415_s29 + $0x148] sm:$0xff]  ;;  %759 = vmatprep.subr.bf16.mxu1 %v1118_v9  ;;  %v1107_v19 = vcombine.low %v374_v7, %v378_v8  ;;  %v389_v3 = vld [vmem:[%s1415_s29 + $0x1f8] sm:$0xff] }
  0x42   : > { %v370_v16 = vld [vmem:[%s1415_s29 + $0x160] sm:$0xff]  ;;  %v371_v18 = vld [vmem:[%s1415_s29 + $0x168] sm:$0xff]  ;;  %717 = vmatpush1.bf16.msra.mxu0 %v1115_v6  ;;  %760 = vmatpush1.bf16.msra.mxu1 %v1117_v10  ;;  %v1109_v20 = vcombine.low %v375_v12, %v379_v13  ;;  %v1120_v6 = vcombine.high %v384_v63, %v388_v1  ;;  %v1122_v7 = vcombine.high %v385_v2, %v389_v3  ;;  %v376_v8 = vld [vmem:[%s1415_s29 + $0x190] sm:$0xff] }
  0x43   : > { %718 = vmatprep.subr.bf16.mxu0 %v1108_v11  ;;  %v1100_v21 = vcombine.high %v366_v14, %v370_v16  ;;  %761 = vmatprep.subr.bf16.mxu1 %v1110_v15  ;;  %v1102_v22 = vcombine.high %v367_v17, %v371_v18  ;;  %v358_v23 = vld [vmem:[%s1415_s29 + $0x100] sm:$0xff]  ;;  %v359_v25 = vld [vmem:[%s1415_s29 + $0x108] sm:$0xff]  ;;  %v1099_v27 = vcombine.low %v366_v14, %v370_v16  ;;  %v380_v9 = vld [vmem:[%s1415_s29 + $0x1b0] sm:$0xff] }
  0x44   : > { %v362_v24 = vld [vmem:[%s1415_s29 + $0x120] sm:$0xff]  ;;  %v363_v26 = vld [vmem:[%s1415_s29 + $0x128] sm:$0xff]  ;;  %v1101_v28 = vcombine.low %v367_v17, %v371_v18  ;;  %v377_v11 = vld [vmem:[%s1415_s29 + $0x198] sm:$0xff]  ;;  %v1119_v13 = vcombine.low %v384_v63, %v388_v1  ;;  %v1121_v14 = vcombine.low %v385_v2, %v389_v3  ;;  %v1112_v15 = vcombine.high %v376_v8, %v380_v9 }
  0x45   : > { %v1092_v29 = vcombine.high %v358_v23, %v362_v24  ;;  %v1094_v30 = vcombine.high %v359_v25, %v363_v26  ;;  %v350_v31 = vld [vmem:[%s1415_s29 + $0xc0] sm:$0xff]  ;;  %v351_v33 = vld [vmem:[%s1415_s29 + $0xc8] sm:$0xff]  ;;  %v1091_v35 = vcombine.low %v358_v23, %v362_v24  ;;  %v1093_v36 = vcombine.low %v359_v25, %v363_v26  ;;  %v381_v12 = vld [vmem:[%s1415_s29 + $0x1b8] sm:$0xff] }
  0x46   : > { %719 = vmatpush1.bf16.msra.mxu0 %v1107_v19  ;;  %762 = vmatpush1.bf16.msra.mxu1 %v1109_v20  ;;  %v354_v32 = vld [vmem:[%s1415_s29 + $0xe0] sm:$0xff]  ;;  %v355_v34 = vld [vmem:[%s1415_s29 + $0xe8] sm:$0xff]  ;;  %v1114_v16 = vcombine.high %v377_v11, %v381_v12  ;;  %v368_v17 = vld [vmem:[%s1415_s29 + $0x150] sm:$0xff] }
  0x47   : > { %720 = vmatprep.subr.bf16.mxu0 %v1100_v21  ;;  %763 = vmatprep.subr.bf16.mxu1 %v1102_v22  ;;  %v1084_v37 = vcombine.high %v350_v31, %v354_v32  ;;  %v1086_v38 = vcombine.high %v351_v33, %v355_v34  ;;  %v342_v39 = vld [vmem:[%s1415_s29 + $0x80] sm:$0xff]  ;;  %v343_v41 = vld [vmem:[%s1415_s29 + $0x88] sm:$0xff]  ;;  %v1083_v43 = vcombine.low %v350_v31, %v354_v32  ;;  %v372_v18 = vld [vmem:[%s1415_s29 + $0x170] sm:$0xff] }
  0x48   : > { %v346_v40 = vld [vmem:[%s1415_s29 + $0xa0] sm:$0xff]  ;;  %v347_v42 = vld [vmem:[%s1415_s29 + $0xa8] sm:$0xff]  ;;  %v1085_v44 = vcombine.low %v351_v33, %v355_v34  ;;  %v369_v19 = vld [vmem:[%s1415_s29 + $0x158] sm:$0xff]  ;;  %v1111_v21 = vcombine.low %v376_v8, %v380_v9  ;;  %v1113_v22 = vcombine.low %v377_v11, %v381_v12  ;;  %v1104_v23 = vcombine.high %v368_v17, %v372_v18 }
  0x49   : > { %v1076_v45 = vcombine.high %v342_v39, %v346_v40  ;;  %v1078_v46 = vcombine.high %v343_v41, %v347_v42  ;;  %v334_v47 = vld [vmem:[%s1415_s29 + $0x40] sm:$0xff]  ;;  %v335_v49 = vld [vmem:[%s1415_s29 + $0x48] sm:$0xff]  ;;  %v1075_v51 = vcombine.low %v342_v39, %v346_v40  ;;  %v1077_v52 = vcombine.low %v343_v41, %v347_v42  ;;  %v373_v20 = vld [vmem:[%s1415_s29 + $0x178] sm:$0xff] }
  0x4a   : > { %721 = vmatpush1.bf16.msra.mxu0 %v1099_v27  ;;  %764 = vmatpush1.bf16.msra.mxu1 %v1101_v28  ;;  %v338_v48 = vld [vmem:[%s1415_s29 + $0x60] sm:$0xff]  ;;  %v339_v50 = vld [vmem:[%s1415_s29 + $0x68] sm:$0xff]  ;;  %v1106_v24 = vcombine.high %v369_v19, %v373_v20  ;;  %v360_v25 = vld [vmem:[%s1415_s29 + $0x110] sm:$0xff] }
  0x4b   : > { %722 = vmatprep.subr.bf16.mxu0 %v1092_v29  ;;  %765 = vmatprep.subr.bf16.mxu1 %v1094_v30  ;;  %v1068_v53 = vcombine.high %v334_v47, %v338_v48  ;;  %v1070_v54 = vcombine.high %v335_v49, %v339_v50  ;;  %v326_v55 = vld [vmem:[%s1415_s29] sm:$0xff]  ;;  %v327_v57 = vld [vmem:[%s1415_s29 + $0x8] sm:$0xff]  ;;  %v1067_v59 = vcombine.low %v334_v47, %v338_v48  ;;  %v364_v26 = vld [vmem:[%s1415_s29 + $0x130] sm:$0xff] }
  0x4c   : > { %v330_v56 = vld [vmem:[%s1415_s29 + $0x20] sm:$0xff]  ;;  %v331_v58 = vld [vmem:[%s1415_s29 + $0x28] sm:$0xff]  ;;  %v1069_v60 = vcombine.low %v335_v49, %v339_v50  ;;  %v361_v27 = vld [vmem:[%s1415_s29 + $0x118] sm:$0xff]  ;;  %v1103_v29 = vcombine.low %v368_v17, %v372_v18  ;;  %v1105_v30 = vcombine.low %v369_v19, %v373_v20  ;;  %v1096_v31 = vcombine.high %v360_v25, %v364_v26 }
  0x4d   : > { %v1060_v61 = vcombine.high %v326_v55, %v330_v56  ;;  %v1062_v62 = vcombine.high %v327_v57, %v331_v58  ;;  %v1059_v4 = vcombine.low %v326_v55, %v330_v56  ;;  %v1061_v5 = vcombine.low %v327_v57, %v331_v58  ;;  %v1458_v10 = vld [vmem:[%s1549_s0] sm:$0xff]   ;;  %v365_v28 = vld [vmem:[%s1415_s29 + $0x138] sm:$0xff]  ;;  %v352_v33 = vld [vmem:[%s1415_s29 + $0xd0] sm:$0xff] }
  0x4e   : > { %723 = vmatpush1.bf16.msra.mxu0 %v1091_v35  ;;  %766 = vmatpush1.bf16.msra.mxu1 %v1093_v36  ;;  %v1098_v32 = vcombine.high %v361_v27, %v365_v28  ;;  %v356_v34 = vld [vmem:[%s1415_s29 + $0xf0] sm:$0xff]  ;;  %v353_v35 = vld [vmem:[%s1415_s29 + $0xd8] sm:$0xff] }
  0x4f   : > { %724 = vmatprep.subr.bf16.mxu0 %v1084_v37  ;;  %767 = vmatprep.subr.bf16.mxu1 %v1086_v38  ;;  %v357_v36 = vld [vmem:[%s1415_s29 + $0xf8] sm:$0xff]  ;;  %v1095_v37 = vcombine.low %v360_v25, %v364_v26  ;;  %v1088_v38 = vcombine.high %v352_v33, %v356_v34  ;;  %v344_v40 = vld [vmem:[%s1415_s29 + $0x90] sm:$0xff] }
  0x50   : > { %v1090_v39 = vcombine.high %v353_v35, %v357_v36  ;;  %v348_v41 = vld [vmem:[%s1415_s29 + $0xb0] sm:$0xff]  ;;  %v345_v42 = vld [vmem:[%s1415_s29 + $0x98] sm:$0xff] }
  0x51   : > { %v336_v48 = vld [vmem:[%s1415_s29 + $0x50] sm:$0xff]  ;;  %v337_v50 = vld [vmem:[%s1415_s29 + $0x58] sm:$0xff] }
  0x52   : > { %725 = vmatpush1.bf16.msra.mxu0 %v1083_v43  ;;  %768 = vmatpush1.bf16.msra.mxu1 %v1085_v44  ;;  %v349_v43 = vld [vmem:[%s1415_s29 + $0xb8] sm:$0xff]  ;;  %v1087_v44 = vcombine.low %v352_v33, %v356_v34  ;;  %v340_v49 = vld [vmem:[%s1415_s29 + $0x70] sm:$0xff] }
  0x53   : > { %726 = vmatprep.subr.bf16.mxu0 %v1076_v45  ;;  %769 = vmatprep.subr.bf16.mxu1 %v1078_v46  ;;  %v1089_v45 = vcombine.low %v353_v35, %v357_v36  ;;  %v1080_v46 = vcombine.high %v344_v40, %v348_v41  ;;  %v1082_v47 = vcombine.high %v345_v42, %v349_v43  ;;  %v328_v56 = vld [vmem:[%s1415_s29 + $0x10] sm:$0xff]  ;;  %v329_v58 = vld [vmem:[%s1415_s29 + $0x18] sm:$0xff] }
  0x54   : > { %v332_v57 = vld [vmem:[%s1415_s29 + $0x30] sm:$0xff] }
  0x55   : > { %v1063_v1 = vcombine.low %v328_v56, %v332_v57 }
  0x56   : > { %727 = vmatpush1.bf16.msra.mxu0 %v1075_v51  ;;  %770 = vmatpush1.bf16.msra.mxu1 %v1077_v52  ;;  %v341_v51 = vld [vmem:[%s1415_s29 + $0x78] sm:$0xff]  ;;  %v1079_v52 = vcombine.low %v344_v40, %v348_v41 }
  0x57   : > { %728 = vmatprep.subr.bf16.mxu0 %v1068_v53  ;;  %771 = vmatprep.subr.bf16.mxu1 %v1070_v54  ;;  %v1081_v53 = vcombine.low %v345_v42, %v349_v43  ;;  %v1072_v54 = vcombine.high %v336_v48, %v340_v49  ;;  %v1074_v55 = vcombine.high %v337_v50, %v341_v51 }
  0x5a   : > { %729 = vmatpush1.bf16.msra.mxu0 %v1067_v59  ;;  %772 = vmatpush1.bf16.msra.mxu1 %v1069_v60  ;;  %v333_v59 = vld [vmem:[%s1415_s29 + $0x38] sm:$0xff]  ;;  %v1071_v60 = vcombine.low %v336_v48, %v340_v49 }
  0x5b   : > { %730 = vmatprep.subr.bf16.mxu0 %v1060_v61  ;;  %773 = vmatprep.subr.bf16.mxu1 %v1062_v62  ;;  %v1073_v61 = vcombine.low %v337_v50, %v341_v51  ;;  %v1064_v62 = vcombine.high %v328_v56, %v332_v57  ;;  %v1066_v63 = vcombine.high %v329_v58, %v333_v59 }
  0x5c   : > { %v1065_v2 = vcombine.low %v329_v58, %v333_v59 }
  0x5e   : > { %731 = vmatpush1.bf16.msra.mxu0 %v1059_v4  ;;  %774 = vmatpush1.bf16.msra.mxu1 %v1061_v5 }
  0x5f   : > { %802 = vmatprep.subr.bf16.mxu0 %v1120_v6  ;;  %845 = vmatprep.subr.bf16.mxu1 %v1122_v7 }
  0x61   : > { %749 = vmatmul.mubr.bf16.vlgmr.msra.gmra.mxu0 %v1458_v10  ;;  %792 = vmatmul.mubr.bf16.vlgmr.msra.gmra.mxu1 %v1458_v10 }
  0x62   : > { %803 = vmatpush1.bf16.msra.mxu0 %v1119_v13  ;;  %846 = vmatpush1.bf16.msra.mxu1 %v1121_v14 }
  0x63   : > { %804 = vmatprep.subr.bf16.mxu0 %v1112_v15  ;;  %847 = vmatprep.subr.bf16.mxu1 %v1114_v16 }
  0x64   : > { %834 = vmatprep.mubr.bf16.mxu0 %v1212_v0  ;;  %877 = vmatprep.mubr.bf16.mxu1 %v1212_v0  ;;  %v1097_v0 = vcombine.low %v361_v27, %v365_v28 }
  0x66   : > { %805 = vmatpush1.bf16.msra.mxu0 %v1111_v21  ;;  %848 = vmatpush1.bf16.msra.mxu1 %v1113_v22 }
  0x67   : > { %806 = vmatprep.subr.bf16.mxu0 %v1104_v23  ;;  %849 = vmatprep.subr.bf16.mxu1 %v1106_v24 }
  0x6a   : > { %807 = vmatpush1.bf16.msra.mxu0 %v1103_v29  ;;  %850 = vmatpush1.bf16.msra.mxu1 %v1105_v30 }
  0x6b   : > { %808 = vmatprep.subr.bf16.mxu0 %v1096_v31  ;;  %851 = vmatprep.subr.bf16.mxu1 %v1098_v32 }
  0x6e   : > { %809 = vmatpush1.bf16.msra.mxu0 %v1095_v37  ;;  %852 = vmatpush1.bf16.msra.mxu1 %v1097_v0 }
  0x6f   : > { %810 = vmatprep.subr.bf16.mxu0 %v1088_v38  ;;  %853 = vmatprep.subr.bf16.mxu1 %v1090_v39 }
  0x72   : > { %811 = vmatpush1.bf16.msra.mxu0 %v1087_v44  ;;  %854 = vmatpush1.bf16.msra.mxu1 %v1089_v45 }
  0x73   : > { %812 = vmatprep.subr.bf16.mxu0 %v1080_v46  ;;  %855 = vmatprep.subr.bf16.mxu1 %v1082_v47 }
  0x76   : > { %813 = vmatpush1.bf16.msra.mxu0 %v1079_v52  ;;  %856 = vmatpush1.bf16.msra.mxu1 %v1081_v53 }
  0x77   : > { %814 = vmatprep.subr.bf16.mxu0 %v1072_v54  ;;  %857 = vmatprep.subr.bf16.mxu1 %v1074_v55 }
  0x7a   : > { %815 = vmatpush1.bf16.msra.mxu0 %v1071_v60  ;;  %858 = vmatpush1.bf16.msra.mxu1 %v1073_v61 }
  0x7b   : > { %816 = vmatprep.subr.bf16.mxu0 %v1064_v62  ;;  %859 = vmatprep.subr.bf16.mxu1 %v1066_v63 }
  0x7e   : > { %817 = vmatpush1.bf16.msra.mxu0 %v1063_v1  ;;  %860 = vmatpush1.bf16.msra.mxu1 %v1065_v2 }
  0x81   : > { %835 = vmatmul.mubr.bf16.vlgmr.msra.gmra.mxu0 %v1458_v10  ;;  %878 = vmatmul.mubr.bf16.vlgmr.msra.gmra.mxu1 %v1458_v10 }
 0x121   : > { %v750_v3 = vpop.f32.mrf.mxu0  ;;  %v793_v4 = vpop.f32.mrf.mxu1 }
 0x122   : > { %888 = vst [vmem:[%s1494_s5] sm:$0xff] %v750_v3  ;;  %890 = vst [vmem:[%s1494_s5 + $0x10] sm:$0xff] %v793_v4 }
 0x123   : > { %v752_v5 = vpop.f32.mrf.mxu0  ;;  %v795_v6 = vpop.f32.mrf.mxu1 }
 0x124   : > { %889 = vst [vmem:[%s1494_s5 + $0x8] sm:$0xff] %v752_v5  ;;  %891 = vst [vmem:[%s1494_s5 + $0x18] sm:$0xff] %v795_v6 }
 0x125   : > { %v754_v7 = vpop.f32.mrf.mxu0  ;;  %v797_v8 = vpop.f32.mrf.mxu1 }
 0x126   : > { %896 = vst [vmem:[%s1494_s5 + $0x40] sm:$0xff] %v754_v7  ;;  %898 = vst [vmem:[%s1494_s5 + $0x50] sm:$0xff] %v797_v8 }
 0x127   : > { %v756_v9 = vpop.f32.mrf.mxu0  ;;  %v799_v10 = vpop.f32.mrf.mxu1 }
 0x128   : > { %897 = vst [vmem:[%s1494_s5 + $0x48] sm:$0xff] %v756_v9  ;;  %899 = vst [vmem:[%s1494_s5 + $0x58] sm:$0xff] %v799_v10 }
 0x129   : > { %v929_v19 = vld [vmem:[%s1494_s5] sm:$0xff] (%p1263_p6)  ;;  %v933_v21 = vld [vmem:[%s1494_s5 + $0x10] sm:$0xff] (%p1263_p6) }
 0x12a   : > { %930 = vst [vmem:[%s916_s9] sm:$0xff] (%p1263_p6), %v929_v19  ;;  %934 = vst [vmem:[%s916_s9 + $0x10] sm:$0xff] (%p1263_p6), %v933_v21 }
 0x12b   : > { %v931_v20 = vld [vmem:[%s1494_s5 + $0x8] sm:$0xff] (%p1263_p6)  ;;  %v935_v22 = vld [vmem:[%s1494_s5 + $0x18] sm:$0xff] (%p1263_p6) }
 0x12c   : > { %932 = vst [vmem:[%s916_s9 + $0x8] sm:$0xff] (%p1263_p6), %v931_v20  ;;  %936 = vst [vmem:[%s916_s9 + $0x18] sm:$0xff] (%p1263_p6), %v935_v22 }
 0x12d   : > { %v945_v27 = vld [vmem:[%s1494_s5 + $0x40] sm:$0xff] (%p1263_p6)  ;;  %v949_v29 = vld [vmem:[%s1494_s5 + $0x50] sm:$0xff] (%p1263_p6) }
 0x12e   : > { %946 = vst [vmem:[%s916_s9 + $0x240] sm:$0xff] (%p1263_p6), %v945_v27  ;;  %950 = vst [vmem:[%s916_s9 + $0x250] sm:$0xff] (%p1263_p6), %v949_v29 }
 0x12f   : > { %v947_v28 = vld [vmem:[%s1494_s5 + $0x48] sm:$0xff] (%p1263_p6)  ;;  %v951_v30 = vld [vmem:[%s1494_s5 + $0x58] sm:$0xff] (%p1263_p6) }
 0x130   : > { %948 = vst [vmem:[%s916_s9 + $0x248] sm:$0xff] (%p1263_p6), %v947_v28  ;;  %952 = vst [vmem:[%s916_s9 + $0x258] sm:$0xff] (%p1263_p6), %v951_v30 }
 0x141   : > { %v836_v11 = vpop.f32.mrf.mxu0  ;;  %v879_v12 = vpop.f32.mrf.mxu1 }
 0x142   : > { %892 = vst [vmem:[%s1494_s5 + $0x20] sm:$0xff] %v836_v11  ;;  %894 = vst [vmem:[%s1494_s5 + $0x30] sm:$0xff] %v879_v12 }
 0x143   : > { %v838_v13 = vpop.f32.mrf.mxu0  ;;  %v881_v14 = vpop.f32.mrf.mxu1 }
 0x144   : > { %893 = vst [vmem:[%s1494_s5 + $0x28] sm:$0xff] %v838_v13  ;;  %895 = vst [vmem:[%s1494_s5 + $0x38] sm:$0xff] %v881_v14  ;;  %910 = sbr.rel (!%p1263_p6) target bundleno = 337 (0x151), region = 55 }
 0x145   : > { %v840_v15 = vpop.f32.mrf.mxu0  ;;  %v883_v16 = vpop.f32.mrf.mxu1 }
 0x146   : > { %900 = vst [vmem:[%s1494_s5 + $0x60] sm:$0xff] %v840_v15  ;;  %902 = vst [vmem:[%s1494_s5 + $0x70] sm:$0xff] %v883_v16 }
 0x147   : > { %v842_v17 = vpop.f32.mrf.mxu0  ;;  %v885_v18 = vpop.f32.mrf.mxu1 }
 0x148   : > { %901 = vst [vmem:[%s1494_s5 + $0x68] sm:$0xff] %v842_v17  ;;  %903 = vst [vmem:[%s1494_s5 + $0x78] sm:$0xff] %v885_v18 }
 0x149   : > { %v937_v23 = vld [vmem:[%s1494_s5 + $0x20] sm:$0xff]  ;;  %v941_v25 = vld [vmem:[%s1494_s5 + $0x30] sm:$0xff] }
 0x14a   : > { %938 = vst [vmem:[%s916_s9 + $0x20] sm:$0xff] %v937_v23  ;;  %942 = vst [vmem:[%s916_s9 + $0x30] sm:$0xff] %v941_v25 }
 0x14b   : > { %v939_v24 = vld [vmem:[%s1494_s5 + $0x28] sm:$0xff]  ;;  %v943_v26 = vld [vmem:[%s1494_s5 + $0x38] sm:$0xff] }
 0x14c   : > { %940 = vst [vmem:[%s916_s9 + $0x28] sm:$0xff] %v939_v24  ;;  %944 = vst [vmem:[%s916_s9 + $0x38] sm:$0xff] %v943_v26 }
 0x14d   : > { %v953_v31 = vld [vmem:[%s1494_s5 + $0x60] sm:$0xff]  ;;  %v957_v33 = vld [vmem:[%s1494_s5 + $0x70] sm:$0xff] }
 0x14e   : > { %954 = vst [vmem:[%s916_s9 + $0x260] sm:$0xff] %v953_v31  ;;  %958 = vst [vmem:[%s916_s9 + $0x270] sm:$0xff] %v957_v33 }
 0x14f   : > { %v955_v32 = vld [vmem:[%s1494_s5 + $0x68] sm:$0xff]  ;;  %v959_v34 = vld [vmem:[%s1494_s5 + $0x78] sm:$0xff] }
 0x150   : > { %956 = vst [vmem:[%s916_s9 + $0x268] sm:$0xff] %v955_v32  ;;  %960 = vst [vmem:[%s916_s9 + $0x278] sm:$0xff] %v959_v34 }
 0x151 PF: > { %s12_s13 = sadd.s32 1, %s1210_s13   ;;  %s1553_s9 = smov %s1198_s10 }
 0x152   : > { %p9_p11 = scmp.ge.s32.totalorder %s12_s13, 11   ;;  %s1554_s10 = smov %s1268_s19 }
 0x153   : > { %s1555_s11 = smov %s1206_s12  ;;  %s1556_s12 = smov %s1558_s14 }
 0x154   :  { %11 = sbr.rel (!%p9_p11) target bundleno = 3 (0x3), region = 112 }

</bundles_post_ra>
